<compile_context>
chip_gen: v6e
topology: v6e:2x2x1
jax: 0.10.0
libtpu: 0.0.40
codegen_flags: <defaults>
</compile_context>

<pallas_src>
import functools

import jax
import jax.numpy as jnp
from jax.experimental import pallas as pl
from jax.experimental.pallas import tpu as pltpu


# ------------------------------ Pallas kernels ------------------------------

def _matmul_act_kernel(a_ref, b_ref, o_ref, *, activation):
    # Full-K tile => single reduction step: dot straight to the output tile.
    acc = jnp.dot(a_ref[...], b_ref[...], preferred_element_type=jnp.float32)
    if activation == "leaky_relu":
        acc = jnp.where(acc >= 0, acc, 0.2 * acc)
    o_ref[...] = acc.astype(o_ref.dtype)


def matmul_act(a, b, activation="none", out_dtype=jnp.bfloat16, tm=128, tn=128):
    M, K = a.shape
    K2, N = b.shape
    assert K == K2
    tm = min(tm, M)
    tn = min(tn, N)
    assert M % tm == 0 and N % tn == 0 and tm % 8 == 0 and tn % 128 == 0

    kernel = functools.partial(_matmul_act_kernel, activation=activation)
    return pl.pallas_call(
        kernel,
        out_shape=jax.ShapeDtypeStruct((M, N), out_dtype),
        grid_spec=pltpu.PrefetchScalarGridSpec(
            num_scalar_prefetch=0,
            grid=(M // tm, N // tn),
            in_specs=[pl.BlockSpec((tm, K), lambda i, j: (i, 0)),
                      pl.BlockSpec((K, tn), lambda i, j: (0, j))],
            out_specs=pl.BlockSpec((tm, tn), lambda i, j: (i, j))),
        compiler_params=pltpu.CompilerParams(
            dimension_semantics=("parallel", "parallel")),
    )(a, b)


def _matmul_stats_kernel(a_ref, b_ref, o_ref, sum_ref, sq_ref):
    # grid = (N-tiles, M-tiles); M-tile axis is last ("arbitrary") because the
    # per-channel sum / sumsq outputs are resident (same block) across it.
    i = pl.program_id(1)

    acc = jnp.dot(a_ref[...], b_ref[...], preferred_element_type=jnp.float32)
    o_ref[...] = acc

    @pl.when(i == 0)
    def _():
        sum_ref[...] = jnp.zeros_like(sum_ref)
        sq_ref[...] = jnp.zeros_like(sq_ref)

    sum_ref[...] += jnp.sum(acc, axis=0, keepdims=True)
    sq_ref[...] += jnp.sum(acc * acc, axis=0, keepdims=True)


def matmul_stats(a, b, tm=128, tn=128):
    """Conv GEMM with fused BatchNorm column statistics (sum, sum of squares)."""
    M, K = a.shape
    K2, N = b.shape
    assert K == K2
    tm = min(tm, M)
    tn = min(tn, N)
    assert M % tm == 0 and N % tn == 0 and tm % 8 == 0 and tn % 128 == 0

    return pl.pallas_call(
        _matmul_stats_kernel,
        out_shape=(jax.ShapeDtypeStruct((M, N), jnp.float32),
                   jax.ShapeDtypeStruct((1, N), jnp.float32),
                   jax.ShapeDtypeStruct((1, N), jnp.float32)),
        grid_spec=pltpu.PrefetchScalarGridSpec(
            num_scalar_prefetch=0,
            grid=(N // tn, M // tm),
            in_specs=[pl.BlockSpec((tm, K), lambda j, i: (i, 0)),
                      pl.BlockSpec((K, tn), lambda j, i: (0, j))],
            out_specs=(pl.BlockSpec((tm, tn), lambda j, i: (i, j)),
                       pl.BlockSpec((1, tn), lambda j, i: (0, j)),
                       pl.BlockSpec((1, tn), lambda j, i: (0, j)))),
        compiler_params=pltpu.CompilerParams(
            dimension_semantics=("parallel", "arbitrary")),
    )(a, b)


def _bn_lrelu_kernel(x_ref, scale_ref, shift_ref, o_ref):
    y = x_ref[...] * scale_ref[...] + shift_ref[...]
    o_ref[...] = jnp.where(y >= 0, y, 0.2 * y).astype(o_ref.dtype)


def bn_leaky_relu(x, scale, shift, out_dtype=jnp.bfloat16, tm=128, tn=128):
    M, N = x.shape
    tm = min(tm, M)
    tn = min(tn, N)
    assert M % tm == 0 and N % tn == 0 and tm % 8 == 0 and tn % 128 == 0
    cvec = pl.BlockSpec((1, tn), lambda i, j: (0, j))
    return pl.pallas_call(
        _bn_lrelu_kernel,
        out_shape=jax.ShapeDtypeStruct((M, N), out_dtype),
        grid_spec=pltpu.PrefetchScalarGridSpec(
            num_scalar_prefetch=0,
            grid=(M // tm, N // tn),
            in_specs=[pl.BlockSpec((tm, tn), lambda i, j: (i, j)), cvec, cvec],
            out_specs=pl.BlockSpec((tm, tn), lambda i, j: (i, j))),
        compiler_params=pltpu.CompilerParams(
            dimension_semantics=("parallel", "parallel")),
    )(x, scale, shift)


# ------------------------------- glue (JAX) ---------------------------------

def im2col(x_nhwc, kh, kw, stride, pad, c_pad=0):
    # TODO(synk): patch gather stays in XLA (could be fused via Element index_map).
    N, H, W, C = x_nhwc.shape
    xp = jnp.pad(x_nhwc, ((0, 0), (pad, pad), (pad, pad), (0, c_pad)))
    C += c_pad
    OH = (H + 2 * pad - kh) // stride + 1
    OW = (W + 2 * pad - kw) // stride + 1
    cols = []
    for i in range(kh):
        for j in range(kw):
            cols.append(xp[:, i:i + stride * OH:stride,
                           j:j + stride * OW:stride, :])
    patches = jnp.stack(cols, axis=3)                  # [N, OH, OW, KH*KW, C]
    return patches.reshape(N * OH * OW, kh * kw * C), N, OH, OW


def conv_lrelu(x_nhwc, w_mat, stride, pad, c_pad=0, kh=4, kw=4):
    patches, N, OH, OW = im2col(x_nhwc, kh, kw, stride, pad, c_pad=c_pad)
    out = matmul_act(patches, w_mat, activation="leaky_relu")
    return out.reshape(N, OH, OW, w_mat.shape[1])


def conv_bn_lrelu(x_nhwc, w_mat, gamma, beta, stride, pad, kh=4, kw=4):
    patches, N, OH, OW = im2col(x_nhwc, kh, kw, stride, pad)
    M = patches.shape[0]                               # rows == N*OH*OW exactly
    y, s, sq = matmul_stats(patches, w_mat)            # conv + fused batch stats
    mean = s / M
    var = jnp.maximum(sq / M - mean * mean, 0.0)       # clamp: cancellation guard
    scale = gamma * jax.lax.rsqrt(var + 1e-5)
    shift = beta - mean * scale
    out = bn_leaky_relu(y, scale, shift)
    return out.reshape(N, OH, OW, w_mat.shape[1])


def discriminator_forward(x_nchw, params):
    # NCHW -> NHWC, bf16 GEMM operands (f32 accumulation inside the kernels).
    x = jnp.transpose(x_nchw, (0, 2, 3, 1)).astype(jnp.bfloat16)
    # layer 1: Conv(3->64, 4, s2, p1) + LeakyReLU fused. Input channels padded
    # 3->8 inside im2col's existing pad (K = 4*4*8 = 128); output channels are
    # padded 64->128 via the weight so activations stay 128-lane downstream.
    x = conv_lrelu(x, params["w1"], 2, 1, c_pad=5)                     # (N,32,32,128)
    # layers 2-4: Conv + BatchNorm(batch stats) + LeakyReLU(0.2)
    x = conv_bn_lrelu(x, params["w2"], params["gamma2"], params["beta2"], 2, 1)
    x = conv_bn_lrelu(x, params["w3"], params["gamma3"], params["beta3"], 2, 1)
    x = conv_bn_lrelu(x, params["w4"], params["gamma4"], params["beta4"], 2, 1)
    # layer 5: Conv(512->1, 4, s1, p0) on a 4x4 map == full contraction with
    # M=2, N=1 -> plain XLA dot + sigmoid (padded Pallas GEMM would be ~8000x
    # wasted MACs, per perf review).
    n = x.shape[0]
    logits = jnp.dot(x.reshape(n, -1), params["w5"],
                     preferred_element_type=jnp.float32)
    out = jax.nn.sigmoid(logits)
    return out.reshape(n, 1, 1, 1)                     # NCHW [N,1,1,1]


# ------------------------------ params --------------------------------------

def init_raw_params(key):
    ks = jax.random.split(key, 8)

    def conv_w(k, cout, cin):
        return 0.02 * jax.random.normal(k, (cout, cin, 4, 4), jnp.float32)

    return {
        "w1": conv_w(ks[0], 64, 3),
        "w2": conv_w(ks[1], 128, 64),
        "w3": conv_w(ks[2], 256, 128),
        "w4": conv_w(ks[3], 512, 256),
        "w5": conv_w(ks[4], 1, 512),
        "gamma2": 1.0 + 0.02 * jax.random.normal(ks[5], (128,), jnp.float32),
        "beta2": jnp.zeros((128,), jnp.float32),
        "gamma3": 1.0 + 0.02 * jax.random.normal(ks[6], (256,), jnp.float32),
        "beta3": jnp.zeros((256,), jnp.float32),
        "gamma4": 1.0 + 0.02 * jax.random.normal(ks[7], (512,), jnp.float32),
        "beta4": jnp.zeros((512,), jnp.float32),
    }


def _gemm_weight(w_oihw, cin_pad=None, cout_pad=None):
    # OIHW -> (KH*KW*Cin_pad, Cout_pad), bf16, zero-padded ONCE at init so the
    # forward pass never pads/slices activations for channel alignment.
    cout, cin, kh, kw = w_oihw.shape
    cin_pad = cin if cin_pad is None else cin_pad
    cout_pad = cout if cout_pad is None else cout_pad
    w = jnp.transpose(w_oihw, (2, 3, 1, 0))            # (KH, KW, Cin, Cout)
    w = jnp.pad(w, ((0, 0), (0, 0), (0, cin_pad - cin), (0, cout_pad - cout)))
    return w.reshape(kh * kw * cin_pad, cout_pad).astype(jnp.bfloat16)


def prepare_params(raw):
    return {
        "w1": _gemm_weight(raw["w1"], cin_pad=8, cout_pad=128),   # K=128, N=128
        "w2": _gemm_weight(raw["w2"], cin_pad=128),               # consumes padded acts
        "w3": _gemm_weight(raw["w3"]),
        "w4": _gemm_weight(raw["w4"]),
        "w5": _gemm_weight(raw["w5"]),                            # (8192, 1) for XLA dot
        "gamma2": raw["gamma2"].reshape(1, -1),
        "beta2": raw["beta2"].reshape(1, -1),
        "gamma3": raw["gamma3"].reshape(1, -1),
        "beta3": raw["beta3"].reshape(1, -1),
        "gamma4": raw["gamma4"].reshape(1, -1),
        "beta4": raw["beta4"].reshape(1, -1),
    }


if __name__ == "__main__":
    key = jax.random.PRNGKey(0)
    pkey, xkey = jax.random.split(key)
    params = prepare_params(init_raw_params(pkey))
    # DCGAN discriminator needs 64x64 spatial input so the final 4x4 valid conv
    # produces a 1x1 map; batch kept small (2).
    x = jax.random.normal(xkey, (2, 3, 64, 64), jnp.float32)

    out = jax.jit(discriminator_forward)(x, params)
    out = jax.block_until_ready(out)
    assert out.shape == (2, 1, 1, 1)
    assert bool(jnp.all((out >= 0.0) & (out <= 1.0)))
    print("KERNEL_OK")
</pallas_src>

<mosaic_0001>
module attributes {stable_mosaic.version = 11 : i64} {
  func.func @_matmul_act_kernel(%arg0: i32, %arg1: i32, %arg2: memref<128x128xbf16, #tpu.memory_space<vmem>>, %arg3: memref<128x128xbf16, #tpu.memory_space<vmem>>, %arg4: memref<128x128xbf16, #tpu.memory_space<vmem>>) attributes {dimension_semantics = [#tpu.dimension_semantics<parallel>, #tpu.dimension_semantics<parallel>], iteration_bounds = array<i64: 16, 1>, scalar_prefetch = 0 : i64, scratch_operands = 0 : i64, tpu.core_type = #tpu.core_type<tc>, window_params = [{transform_indices = @transform_0, window_bounds = array<i64: 128, 128>}, {transform_indices = @transform_1, window_bounds = array<i64: 128, 128>}, {transform_indices = @transform_2, window_bounds = array<i64: 128, 128>}]} {
    %c0 = arith.constant 0 : index
    %c0_0 = arith.constant 0 : index
    %0 = vector.load %arg2[%c0, %c0_0] : memref<128x128xbf16, #tpu.memory_space<vmem>>, vector<128x128xbf16>
    %c0_1 = arith.constant 0 : index
    %c0_2 = arith.constant 0 : index
    %1 = vector.load %arg3[%c0_1, %c0_2] : memref<128x128xbf16, #tpu.memory_space<vmem>>, vector<128x128xbf16>
    %cst = arith.constant dense<0.000000e+00> : vector<128x128xf32>
    %2 = tpu.matmul %0, %1, %cst {dimension_numbers = #tpu.dot_dimension_numbers<[1], [0], [0], [1], [0, 0, 1, 1], [], []>} : vector<128x128xbf16>, vector<128x128xbf16>, vector<128x128xf32> -> vector<128x128xf32>
    %cst_3 = arith.constant 0.000000e+00 : f32
    %3 = vector.broadcast %cst_3 : f32 to vector<128x128xf32>
    %4 = arith.cmpf oge, %2, %3 : vector<128x128xf32>
    %cst_4 = arith.constant 2.000000e-01 : f32
    %5 = vector.broadcast %cst_4 : f32 to vector<128x128xf32>
    %6 = arith.mulf %5, %2 : vector<128x128xf32>
    %7 = arith.select %4, %2, %6 : vector<128x128xi1>, vector<128x128xf32>
    %8 = arith.truncf %7 : vector<128x128xf32> to vector<128x128xbf16>
    %c0_5 = arith.constant 0 : index
    %c0_6 = arith.constant 0 : index
    %9 = vector.load %arg4[%c0_5, %c0_6] : memref<128x128xbf16, #tpu.memory_space<vmem>>, vector<128x128xbf16>
    tpu.vector_store %arg4[%c0_5, %c0_6], %8 {strides = array<i32>} : memref<128x128xbf16, #tpu.memory_space<vmem>>, vector<128x128xbf16>,
    return
  }
  func.func @transform_0(%arg0: i32, %arg1: i32) -> (i32, i32) {
    %c0_i32 = arith.constant 0 : i32
    %c0_i32_0 = arith.constant 0 : i32
    return %arg0, %c0_i32 : i32, i32
  }
  func.func @transform_1(%arg0: i32, %arg1: i32) -> (i32, i32) {
    %c0_i32 = arith.constant 0 : i32
    %c0_i32_0 = arith.constant 0 : i32
    return %c0_i32, %arg1 : i32, i32
  }
  func.func @transform_2(%arg0: i32, %arg1: i32) -> (i32, i32) {
    %c0_i32 = arith.constant 0 : i32
    return %arg0, %arg1 : i32, i32
  }
}

module attributes {stable_mosaic.version = 11 : i64} {
  func.func @_matmul_stats_kernel(%arg0: i32, %arg1: i32, %arg2: memref<128x2048xbf16, #tpu.memory_space<vmem>>, %arg3: memref<2048x128xbf16, #tpu.memory_space<vmem>>, %arg4: memref<128x128xf32, #tpu.memory_space<vmem>>, %arg5: memref<1x128xf32, #tpu.memory_space<vmem>>, %arg6: memref<1x128xf32, #tpu.memory_space<vmem>>) attributes {dimension_semantics = [#tpu.dimension_semantics<parallel>, #tpu.dimension_semantics<arbitrary>], iteration_bounds = array<i64: 1, 4>, scalar_prefetch = 0 : i64, scratch_operands = 0 : i64, tpu.core_type = #tpu.core_type<tc>, window_params = [{transform_indices = @transform_0, window_bounds = array<i64: 128, 2048>}, {transform_indices = @transform_1, window_bounds = array<i64: 2048, 128>}, {transform_indices = @transform_2, window_bounds = array<i64: 128, 128>}, {transform_indices = @transform_3, window_bounds = array<i64: 1, 128>}, {transform_indices = @transform_4, window_bounds = array<i64: 1, 128>}]} {
    %c0 = arith.constant 0 : index
    %c0_0 = arith.constant 0 : index
    %0 = vector.load %arg2[%c0, %c0_0] : memref<128x2048xbf16, #tpu.memory_space<vmem>>, vector<128x2048xbf16>
    %c0_1 = arith.constant 0 : index
    %c0_2 = arith.constant 0 : index
    %1 = vector.load %arg3[%c0_1, %c0_2] : memref<2048x128xbf16, #tpu.memory_space<vmem>>, vector<2048x128xbf16>
    %cst = arith.constant dense<0.000000e+00> : vector<128x128xf32>
    %2 = tpu.matmul %0, %1, %cst {dimension_numbers = #tpu.dot_dimension_numbers<[1], [0], [0], [1], [0, 0, 1, 1], [], []>} : vector<128x2048xbf16>, vector<2048x128xbf16>, vector<128x128xf32> -> vector<128x128xf32>
    %c0_3 = arith.constant 0 : index
    %c0_4 = arith.constant 0 : index
    %3 = vector.load %arg4[%c0_3, %c0_4] : memref<128x128xf32, #tpu.memory_space<vmem>>, vector<128x128xf32>
    tpu.vector_store %arg4[%c0_3, %c0_4], %2 {strides = array<i32>} : memref<128x128xf32, #tpu.memory_space<vmem>>, vector<128x128xf32>,
    %c0_i32 = arith.constant 0 : i32
    %4 = arith.cmpi eq, %arg1, %c0_i32 : i32
    %5 = arith.extui %4 : i1 to i32
    %c0_i32_5 = arith.constant 0 : i32
    %6 = arith.cmpi ne, %5, %c0_i32_5 : i32
    scf.if %6 {
      %cst_16 = arith.constant 0.000000e+00 : f32
      %18 = vector.broadcast %cst_16 : f32 to vector<1x128xf32>
      %c0_17 = arith.constant 0 : index
      %c0_18 = arith.constant 0 : index
      %19 = vector.load %arg5[%c0_17, %c0_18] : memref<1x128xf32, #tpu.memory_space<vmem>>, vector<1x128xf32>
      tpu.vector_store %arg5[%c0_17, %c0_18], %18 {strides = array<i32>} : memref<1x128xf32, #tpu.memory_space<vmem>>, vector<1x128xf32>,
      %cst_19 = arith.constant 0.000000e+00 : f32
      %20 = vector.broadcast %cst_19 : f32 to vector<1x128xf32>
      %c0_20 = arith.constant 0 : index
      %c0_21 = arith.constant 0 : index
      %21 = vector.load %arg6[%c0_20, %c0_21] : memref<1x128xf32, #tpu.memory_space<vmem>>, vector<1x128xf32>
      tpu.vector_store %arg6[%c0_20, %c0_21], %20 {strides = array<i32>} : memref<1x128xf32, #tpu.memory_space<vmem>>, vector<1x128xf32>,
    } else {
    }
    %c0_6 = arith.constant 0 : index
    %c0_7 = arith.constant 0 : index
    %7 = vector.load %arg5[%c0_6, %c0_7] : memref<1x128xf32, #tpu.memory_space<vmem>>, vector<1x128xf32>
    %cst_8 = arith.constant dense<0.000000e+00> : vector<128xf32>
    %8 = vector.multi_reduction <add>, %2, %cst_8 [0] : vector<128x128xf32> to vector<128xf32>
    %9 = vector.shape_cast %8 : vector<128xf32> to vector<1x128xf32>
    %10 = arith.addf %7, %9 : vector<1x128xf32>
    %c0_9 = arith.constant 0 : index
    %c0_10 = arith.constant 0 : index
    %11 = vector.load %arg5[%c0_9, %c0_10] : memref<1x128xf32, #tpu.memory_space<vmem>>, vector<1x128xf32>
    tpu.vector_store %arg5[%c0_9, %c0_10], %10 {strides = array<i32>} : memref<1x128xf32, #tpu.memory_space<vmem>>, vector<1x128xf32>,
    %c0_11 = arith.constant 0 : index
    %c0_12 = arith.constant 0 : index
    %12 = vector.load %arg6[%c0_11, %c0_12] : memref<1x128xf32, #tpu.memory_space<vmem>>, vector<1x128xf32>
    %13 = arith.mulf %2, %2 : vector<128x128xf32>
    %cst_13 = arith.constant dense<0.000000e+00> : vector<128xf32>
    %14 = vector.multi_reduction <add>, %13, %cst_13 [0] : vector<128x128xf32> to vector<128xf32>
    %15 = vector.shape_cast %14 : vector<128xf32> to vector<1x128xf32>
    %16 = arith.addf %12, %15 : vector<1x128xf32>
    %c0_14 = arith.constant 0 : index
    %c0_15 = arith.constant 0 : index
    %17 = vector.load %arg6[%c0_14, %c0_15] : memref<1x128xf32, #tpu.memory_space<vmem>>, vector<1x128xf32>
    tpu.vector_store %arg6[%c0_14, %c0_15], %16 {strides = array<i32>} : memref<1x128xf32, #tpu.memory_space<vmem>>, vector<1x128xf32>,
    return
  }
  func.func @transform_0(%arg0: i32, %arg1: i32) -> (i32, i32) {
    %c0_i32 = arith.constant 0 : i32
    %c0_i32_0 = arith.constant 0 : i32
    return %arg1, %c0_i32 : i32, i32
  }
  func.func @transform_1(%arg0: i32, %arg1: i32) -> (i32, i32) {
    %c0_i32 = arith.constant 0 : i32
    %c0_i32_0 = arith.constant 0 : i32
    return %c0_i32, %arg0 : i32, i32
  }
  func.func @transform_2(%arg0: i32, %arg1: i32) -> (i32, i32) {
    %c0_i32 = arith.constant 0 : i32
    return %arg1, %arg0 : i32, i32
  }
  func.func @transform_3(%arg0: i32, %arg1: i32) -> (i32, i32) {
    %c0_i32 = arith.constant 0 : i32
    %c0_i32_0 = arith.constant 0 : i32
    return %c0_i32, %arg0 : i32, i32
  }
  func.func @transform_4(%arg0: i32, %arg1: i32) -> (i32, i32) {
    %c0_i32 = arith.constant 0 : i32
    %c0_i32_0 = arith.constant 0 : i32
    return %c0_i32, %arg0 : i32, i32
  }
}

module attributes {stable_mosaic.version = 11 : i64} {
  func.func @_bn_lrelu_kernel(%arg0: i32, %arg1: i32, %arg2: memref<128x128xf32, #tpu.memory_space<vmem>>, %arg3: memref<1x128xf32, #tpu.memory_space<vmem>>, %arg4: memref<1x128xf32, #tpu.memory_space<vmem>>, %arg5: memref<128x128xbf16, #tpu.memory_space<vmem>>) attributes {dimension_semantics = [#tpu.dimension_semantics<parallel>, #tpu.dimension_semantics<parallel>], iteration_bounds = array<i64: 4, 1>, scalar_prefetch = 0 : i64, scratch_operands = 0 : i64, tpu.core_type = #tpu.core_type<tc>, window_params = [{transform_indices = @transform_0, window_bounds = array<i64: 128, 128>}, {transform_indices = @transform_1, window_bounds = array<i64: 1, 128>}, {transform_indices = @transform_2, window_bounds = array<i64: 1, 128>}, {transform_indices = @transform_3, window_bounds = array<i64: 128, 128>}]} {
    %c0 = arith.constant 0 : index
    %c0_0 = arith.constant 0 : index
    %0 = vector.load %arg2[%c0, %c0_0] : memref<128x128xf32, #tpu.memory_space<vmem>>, vector<128x128xf32>
    %c0_1 = arith.constant 0 : index
    %c0_2 = arith.constant 0 : index
    %1 = vector.load %arg3[%c0_1, %c0_2] : memref<1x128xf32, #tpu.memory_space<vmem>>, vector<1x128xf32>
    %2 = vector.broadcast %1 : vector<1x128xf32> to vector<128x128xf32>
    %3 = arith.mulf %0, %2 : vector<128x128xf32>
    %c0_3 = arith.constant 0 : index
    %c0_4 = arith.constant 0 : index
    %4 = vector.load %arg4[%c0_3, %c0_4] : memref<1x128xf32, #tpu.memory_space<vmem>>, vector<1x128xf32>
    %5 = vector.broadcast %4 : vector<1x128xf32> to vector<128x128xf32>
    %6 = arith.addf %3, %5 : vector<128x128xf32>
    %cst = arith.constant 0.000000e+00 : f32
    %7 = vector.broadcast %cst : f32 to vector<128x128xf32>
    %8 = arith.cmpf oge, %6, %7 : vector<128x128xf32>
    %cst_5 = arith.constant 2.000000e-01 : f32
    %9 = vector.broadcast %cst_5 : f32 to vector<128x128xf32>
    %10 = arith.mulf %9, %6 : vector<128x128xf32>
    %11 = arith.select %8, %6, %10 : vector<128x128xi1>, vector<128x128xf32>
    %12 = arith.truncf %11 : vector<128x128xf32> to vector<128x128xbf16>
    %c0_6 = arith.constant 0 : index
    %c0_7 = arith.constant 0 : index
    %13 = vector.load %arg5[%c0_6, %c0_7] : memref<128x128xbf16, #tpu.memory_space<vmem>>, vector<128x128xbf16>
    tpu.vector_store %arg5[%c0_6, %c0_7], %12 {strides = array<i32>} : memref<128x128xbf16, #tpu.memory_space<vmem>>, vector<128x128xbf16>,
    return
  }
  func.func @transform_0(%arg0: i32, %arg1: i32) -> (i32, i32) {
    %c0_i32 = arith.constant 0 : i32
    return %arg0, %arg1 : i32, i32
  }
  func.func @transform_1(%arg0: i32, %arg1: i32) -> (i32, i32) {
    %c0_i32 = arith.constant 0 : i32
    %c0_i32_0 = arith.constant 0 : i32
    return %c0_i32, %arg1 : i32, i32
  }
  func.func @transform_2(%arg0: i32, %arg1: i32) -> (i32, i32) {
    %c0_i32 = arith.constant 0 : i32
    %c0_i32_0 = arith.constant 0 : i32
    return %c0_i32, %arg1 : i32, i32
  }
  func.func @transform_3(%arg0: i32, %arg1: i32) -> (i32, i32) {
    %c0_i32 = arith.constant 0 : i32
    return %arg0, %arg1 : i32, i32
  }
}

module attributes {stable_mosaic.version = 11 : i64} {
  func.func @_matmul_stats_kernel(%arg0: i32, %arg1: i32, %arg2: memref<128x2048xbf16, #tpu.memory_space<vmem>>, %arg3: memref<2048x128xbf16, #tpu.memory_space<vmem>>, %arg4: memref<128x128xf32, #tpu.memory_space<vmem>>, %arg5: memref<1x128xf32, #tpu.memory_space<vmem>>, %arg6: memref<1x128xf32, #tpu.memory_space<vmem>>) attributes {dimension_semantics = [#tpu.dimension_semantics<parallel>, #tpu.dimension_semantics<arbitrary>], iteration_bounds = array<i64: 2, 1>, scalar_prefetch = 0 : i64, scratch_operands = 0 : i64, tpu.core_type = #tpu.core_type<tc>, window_params = [{transform_indices = @transform_0, window_bounds = array<i64: 128, 2048>}, {transform_indices = @transform_1, window_bounds = array<i64: 2048, 128>}, {transform_indices = @transform_2, window_bounds = array<i64: 128, 128>}, {transform_indices = @transform_3, window_bounds = array<i64: 1, 128>}, {transform_indices = @transform_4, window_bounds = array<i64: 1, 128>}]} {
    %c0 = arith.constant 0 : index
    %c0_0 = arith.constant 0 : index
    %0 = vector.load %arg2[%c0, %c0_0] : memref<128x2048xbf16, #tpu.memory_space<vmem>>, vector<128x2048xbf16>
    %c0_1 = arith.constant 0 : index
    %c0_2 = arith.constant 0 : index
    %1 = vector.load %arg3[%c0_1, %c0_2] : memref<2048x128xbf16, #tpu.memory_space<vmem>>, vector<2048x128xbf16>
    %cst = arith.constant dense<0.000000e+00> : vector<128x128xf32>
    %2 = tpu.matmul %0, %1, %cst {dimension_numbers = #tpu.dot_dimension_numbers<[1], [0], [0], [1], [0, 0, 1, 1], [], []>} : vector<128x2048xbf16>, vector<2048x128xbf16>, vector<128x128xf32> -> vector<128x128xf32>
    %c0_3 = arith.constant 0 : index
    %c0_4 = arith.constant 0 : index
    %3 = vector.load %arg4[%c0_3, %c0_4] : memref<128x128xf32, #tpu.memory_space<vmem>>, vector<128x128xf32>
    tpu.vector_store %arg4[%c0_3, %c0_4], %2 {strides = array<i32>} : memref<128x128xf32, #tpu.memory_space<vmem>>, vector<128x128xf32>,
    %c0_i32 = arith.constant 0 : i32
    %4 = arith.cmpi eq, %arg1, %c0_i32 : i32
    %5 = arith.extui %4 : i1 to i32
    %c0_i32_5 = arith.constant 0 : i32
    %6 = arith.cmpi ne, %5, %c0_i32_5 : i32
    scf.if %6 {
      %cst_16 = arith.constant 0.000000e+00 : f32
      %18 = vector.broadcast %cst_16 : f32 to vector<1x128xf32>
      %c0_17 = arith.constant 0 : index
      %c0_18 = arith.constant 0 : index
      %19 = vector.load %arg5[%c0_17, %c0_18] : memref<1x128xf32, #tpu.memory_space<vmem>>, vector<1x128xf32>
      tpu.vector_store %arg5[%c0_17, %c0_18], %18 {strides = array<i32>} : memref<1x128xf32, #tpu.memory_space<vmem>>, vector<1x128xf32>,
      %cst_19 = arith.constant 0.000000e+00 : f32
      %20 = vector.broadcast %cst_19 : f32 to vector<1x128xf32>
      %c0_20 = arith.constant 0 : index
      %c0_21 = arith.constant 0 : index
      %21 = vector.load %arg6[%c0_20, %c0_21] : memref<1x128xf32, #tpu.memory_space<vmem>>, vector<1x128xf32>
      tpu.vector_store %arg6[%c0_20, %c0_21], %20 {strides = array<i32>} : memref<1x128xf32, #tpu.memory_space<vmem>>, vector<1x128xf32>,
    } else {
    }
    %c0_6 = arith.constant 0 : index
    %c0_7 = arith.constant 0 : index
    %7 = vector.load %arg5[%c0_6, %c0_7] : memref<1x128xf32, #tpu.memory_space<vmem>>, vector<1x128xf32>
    %cst_8 = arith.constant dense<0.000000e+00> : vector<128xf32>
    %8 = vector.multi_reduction <add>, %2, %cst_8 [0] : vector<128x128xf32> to vector<128xf32>
    %9 = vector.shape_cast %8 : vector<128xf32> to vector<1x128xf32>
    %10 = arith.addf %7, %9 : vector<1x128xf32>
    %c0_9 = arith.constant 0 : index
    %c0_10 = arith.constant 0 : index
    %11 = vector.load %arg5[%c0_9, %c0_10] : memref<1x128xf32, #tpu.memory_space<vmem>>, vector<1x128xf32>
    tpu.vector_store %arg5[%c0_9, %c0_10], %10 {strides = array<i32>} : memref<1x128xf32, #tpu.memory_space<vmem>>, vector<1x128xf32>,
    %c0_11 = arith.constant 0 : index
    %c0_12 = arith.constant 0 : index
    %12 = vector.load %arg6[%c0_11, %c0_12] : memref<1x128xf32, #tpu.memory_space<vmem>>, vector<1x128xf32>
    %13 = arith.mulf %2, %2 : vector<128x128xf32>
    %cst_13 = arith.constant dense<0.000000e+00> : vector<128xf32>
    %14 = vector.multi_reduction <add>, %13, %cst_13 [0] : vector<128x128xf32> to vector<128xf32>
    %15 = vector.shape_cast %14 : vector<128xf32> to vector<1x128xf32>
    %16 = arith.addf %12, %15 : vector<1x128xf32>
    %c0_14 = arith.constant 0 : index
    %c0_15 = arith.constant 0 : index
    %17 = vector.load %arg6[%c0_14, %c0_15] : memref<1x128xf32, #tpu.memory_space<vmem>>, vector<1x128xf32>
    tpu.vector_store %arg6[%c0_14, %c0_15], %16 {strides = array<i32>} : memref<1x128xf32, #tpu.memory_space<vmem>>, vector<1x128xf32>,
    return
  }
  func.func @transform_0(%arg0: i32, %arg1: i32) -> (i32, i32) {
    %c0_i32 = arith.constant 0 : i32
    %c0_i32_0 = arith.constant 0 : i32
    return %arg1, %c0_i32 : i32, i32
  }
  func.func @transform_1(%arg0: i32, %arg1: i32) -> (i32, i32) {
    %c0_i32 = arith.constant 0 : i32
    %c0_i32_0 = arith.constant 0 : i32
    return %c0_i32, %arg0 : i32, i32
  }
  func.func @transform_2(%arg0: i32, %arg1: i32) -> (i32, i32) {
    %c0_i32 = arith.constant 0 : i32
    return %arg1, %arg0 : i32, i32
  }
  func.func @transform_3(%arg0: i32, %arg1: i32) -> (i32, i32) {
    %c0_i32 = arith.constant 0 : i32
    %c0_i32_0 = arith.constant 0 : i32
    return %c0_i32, %arg0 : i32, i32
  }
  func.func @transform_4(%arg0: i32, %arg1: i32) -> (i32, i32) {
    %c0_i32 = arith.constant 0 : i32
    %c0_i32_0 = arith.constant 0 : i32
    return %c0_i32, %arg0 : i32, i32
  }
}

module attributes {stable_mosaic.version = 11 : i64} {
  func.func @_bn_lrelu_kernel(%arg0: i32, %arg1: i32, %arg2: memref<128x128xf32, #tpu.memory_space<vmem>>, %arg3: memref<1x128xf32, #tpu.memory_space<vmem>>, %arg4: memref<1x128xf32, #tpu.memory_space<vmem>>, %arg5: memref<128x128xbf16, #tpu.memory_space<vmem>>) attributes {dimension_semantics = [#tpu.dimension_semantics<parallel>, #tpu.dimension_semantics<parallel>], iteration_bounds = array<i64: 1, 2>, scalar_prefetch = 0 : i64, scratch_operands = 0 : i64, tpu.core_type = #tpu.core_type<tc>, window_params = [{transform_indices = @transform_0, window_bounds = array<i64: 128, 128>}, {transform_indices = @transform_1, window_bounds = array<i64: 1, 128>}, {transform_indices = @transform_2, window_bounds = array<i64: 1, 128>}, {transform_indices = @transform_3, window_bounds = array<i64: 128, 128>}]} {
    %c0 = arith.constant 0 : index
    %c0_0 = arith.constant 0 : index
    %0 = vector.load %arg2[%c0, %c0_0] : memref<128x128xf32, #tpu.memory_space<vmem>>, vector<128x128xf32>
    %c0_1 = arith.constant 0 : index
    %c0_2 = arith.constant 0 : index
    %1 = vector.load %arg3[%c0_1, %c0_2] : memref<1x128xf32, #tpu.memory_space<vmem>>, vector<1x128xf32>
    %2 = vector.broadcast %1 : vector<1x128xf32> to vector<128x128xf32>
    %3 = arith.mulf %0, %2 : vector<128x128xf32>
    %c0_3 = arith.constant 0 : index
    %c0_4 = arith.constant 0 : index
    %4 = vector.load %arg4[%c0_3, %c0_4] : memref<1x128xf32, #tpu.memory_space<vmem>>, vector<1x128xf32>
    %5 = vector.broadcast %4 : vector<1x128xf32> to vector<128x128xf32>
    %6 = arith.addf %3, %5 : vector<128x128xf32>
    %cst = arith.constant 0.000000e+00 : f32
    %7 = vector.broadcast %cst : f32 to vector<128x128xf32>
    %8 = arith.cmpf oge, %6, %7 : vector<128x128xf32>
    %cst_5 = arith.constant 2.000000e-01 : f32
    %9 = vector.broadcast %cst_5 : f32 to vector<128x128xf32>
    %10 = arith.mulf %9, %6 : vector<128x128xf32>
    %11 = arith.select %8, %6, %10 : vector<128x128xi1>, vector<128x128xf32>
    %12 = arith.truncf %11 : vector<128x128xf32> to vector<128x128xbf16>
    %c0_6 = arith.constant 0 : index
    %c0_7 = arith.constant 0 : index
    %13 = vector.load %arg5[%c0_6, %c0_7] : memref<128x128xbf16, #tpu.memory_space<vmem>>, vector<128x128xbf16>
    tpu.vector_store %arg5[%c0_6, %c0_7], %12 {strides = array<i32>} : memref<128x128xbf16, #tpu.memory_space<vmem>>, vector<128x128xbf16>,
    return
  }
  func.func @transform_0(%arg0: i32, %arg1: i32) -> (i32, i32) {
    %c0_i32 = arith.constant 0 : i32
    return %arg0, %arg1 : i32, i32
  }
  func.func @transform_1(%arg0: i32, %arg1: i32) -> (i32, i32) {
    %c0_i32 = arith.constant 0 : i32
    %c0_i32_0 = arith.constant 0 : i32
    return %c0_i32, %arg1 : i32, i32
  }
  func.func @transform_2(%arg0: i32, %arg1: i32) -> (i32, i32) {
    %c0_i32 = arith.constant 0 : i32
    %c0_i32_0 = arith.constant 0 : i32
    return %c0_i32, %arg1 : i32, i32
  }
  func.func @transform_3(%arg0: i32, %arg1: i32) -> (i32, i32) {
    %c0_i32 = arith.constant 0 : i32
    return %arg0, %arg1 : i32, i32
  }
}

module attributes {stable_mosaic.version = 11 : i64} {
  func.func @_matmul_stats_kernel(%arg0: i32, %arg1: i32, %arg2: memref<32x4096xbf16, #tpu.memory_space<vmem>>, %arg3: memref<4096x128xbf16, #tpu.memory_space<vmem>>, %arg4: memref<32x128xf32, #tpu.memory_space<vmem>>, %arg5: memref<1x128xf32, #tpu.memory_space<vmem>>, %arg6: memref<1x128xf32, #tpu.memory_space<vmem>>) attributes {dimension_semantics = [#tpu.dimension_semantics<parallel>, #tpu.dimension_semantics<arbitrary>], iteration_bounds = array<i64: 4, 1>, scalar_prefetch = 0 : i64, scratch_operands = 0 : i64, tpu.core_type = #tpu.core_type<tc>, window_params = [{transform_indices = @transform_0, window_bounds = array<i64: 32, 4096>}, {transform_indices = @transform_1, window_bounds = array<i64: 4096, 128>}, {transform_indices = @transform_2, window_bounds = array<i64: 32, 128>}, {transform_indices = @transform_3, window_bounds = array<i64: 1, 128>}, {transform_indices = @transform_4, window_bounds = array<i64: 1, 128>}]} {
    %c0 = arith.constant 0 : index
    %c0_0 = arith.constant 0 : index
    %0 = vector.load %arg2[%c0, %c0_0] : memref<32x4096xbf16, #tpu.memory_space<vmem>>, vector<32x4096xbf16>
    %c0_1 = arith.constant 0 : index
    %c0_2 = arith.constant 0 : index
    %1 = vector.load %arg3[%c0_1, %c0_2] : memref<4096x128xbf16, #tpu.memory_space<vmem>>, vector<4096x128xbf16>
    %cst = arith.constant dense<0.000000e+00> : vector<32x128xf32>
    %2 = tpu.matmul %0, %1, %cst {dimension_numbers = #tpu.dot_dimension_numbers<[1], [0], [0], [1], [0, 0, 1, 1], [], []>} : vector<32x4096xbf16>, vector<4096x128xbf16>, vector<32x128xf32> -> vector<32x128xf32>
    %c0_3 = arith.constant 0 : index
    %c0_4 = arith.constant 0 : index
    %3 = vector.load %arg4[%c0_3, %c0_4] : memref<32x128xf32, #tpu.memory_space<vmem>>, vector<32x128xf32>
    tpu.vector_store %arg4[%c0_3, %c0_4], %2 {strides = array<i32>} : memref<32x128xf32, #tpu.memory_space<vmem>>, vector<32x128xf32>,
    %c0_i32 = arith.constant 0 : i32
    %4 = arith.cmpi eq, %arg1, %c0_i32 : i32
    %5 = arith.extui %4 : i1 to i32
    %c0_i32_5 = arith.constant 0 : i32
    %6 = arith.cmpi ne, %5, %c0_i32_5 : i32
    scf.if %6 {
      %cst_16 = arith.constant 0.000000e+00 : f32
      %18 = vector.broadcast %cst_16 : f32 to vector<1x128xf32>
      %c0_17 = arith.constant 0 : index
      %c0_18 = arith.constant 0 : index
      %19 = vector.load %arg5[%c0_17, %c0_18] : memref<1x128xf32, #tpu.memory_space<vmem>>, vector<1x128xf32>
      tpu.vector_store %arg5[%c0_17, %c0_18], %18 {strides = array<i32>} : memref<1x128xf32, #tpu.memory_space<vmem>>, vector<1x128xf32>,
      %cst_19 = arith.constant 0.000000e+00 : f32
      %20 = vector.broadcast %cst_19 : f32 to vector<1x128xf32>
      %c0_20 = arith.constant 0 : index
      %c0_21 = arith.constant 0 : index
      %21 = vector.load %arg6[%c0_20, %c0_21] : memref<1x128xf32, #tpu.memory_space<vmem>>, vector<1x128xf32>
      tpu.vector_store %arg6[%c0_20, %c0_21], %20 {strides = array<i32>} : memref<1x128xf32, #tpu.memory_space<vmem>>, vector<1x128xf32>,
    } else {
    }
    %c0_6 = arith.constant 0 : index
    %c0_7 = arith.constant 0 : index
    %7 = vector.load %arg5[%c0_6, %c0_7] : memref<1x128xf32, #tpu.memory_space<vmem>>, vector<1x128xf32>
    %cst_8 = arith.constant dense<0.000000e+00> : vector<128xf32>
    %8 = vector.multi_reduction <add>, %2, %cst_8 [0] : vector<32x128xf32> to vector<128xf32>
    %9 = vector.shape_cast %8 : vector<128xf32> to vector<1x128xf32>
    %10 = arith.addf %7, %9 : vector<1x128xf32>
    %c0_9 = arith.constant 0 : index
    %c0_10 = arith.constant 0 : index
    %11 = vector.load %arg5[%c0_9, %c0_10] : memref<1x128xf32, #tpu.memory_space<vmem>>, vector<1x128xf32>
    tpu.vector_store %arg5[%c0_9, %c0_10], %10 {strides = array<i32>} : memref<1x128xf32, #tpu.memory_space<vmem>>, vector<1x128xf32>,
    %c0_11 = arith.constant 0 : index
    %c0_12 = arith.constant 0 : index
    %12 = vector.load %arg6[%c0_11, %c0_12] : memref<1x128xf32, #tpu.memory_space<vmem>>, vector<1x128xf32>
    %13 = arith.mulf %2, %2 : vector<32x128xf32>
    %cst_13 = arith.constant dense<0.000000e+00> : vector<128xf32>
    %14 = vector.multi_reduction <add>, %13, %cst_13 [0] : vector<32x128xf32> to vector<128xf32>
    %15 = vector.shape_cast %14 : vector<128xf32> to vector<1x128xf32>
    %16 = arith.addf %12, %15 : vector<1x128xf32>
    %c0_14 = arith.constant 0 : index
    %c0_15 = arith.constant 0 : index
    %17 = vector.load %arg6[%c0_14, %c0_15] : memref<1x128xf32, #tpu.memory_space<vmem>>, vector<1x128xf32>
    tpu.vector_store %arg6[%c0_14, %c0_15], %16 {strides = array<i32>} : memref<1x128xf32, #tpu.memory_space<vmem>>, vector<1x128xf32>,
    return
  }
  func.func @transform_0(%arg0: i32, %arg1: i32) -> (i32, i32) {
    %c0_i32 = arith.constant 0 : i32
    %c0_i32_0 = arith.constant 0 : i32
    return %arg1, %c0_i32 : i32, i32
  }
  func.func @transform_1(%arg0: i32, %arg1: i32) -> (i32, i32) {
    %c0_i32 = arith.constant 0 : i32
    %c0_i32_0 = arith.constant 0 : i32
    return %c0_i32, %arg0 : i32, i32
  }
  func.func @transform_2(%arg0: i32, %arg1: i32) -> (i32, i32) {
    %c0_i32 = arith.constant 0 : i32
    return %arg1, %arg0 : i32, i32
  }
  func.func @transform_3(%arg0: i32, %arg1: i32) -> (i32, i32) {
    %c0_i32 = arith.constant 0 : i32
    %c0_i32_0 = arith.constant 0 : i32
    return %c0_i32, %arg0 : i32, i32
  }
  func.func @transform_4(%arg0: i32, %arg1: i32) -> (i32, i32) {
    %c0_i32 = arith.constant 0 : i32
    %c0_i32_0 = arith.constant 0 : i32
    return %c0_i32, %arg0 : i32, i32
  }
}

module attributes {stable_mosaic.version = 11 : i64} {
  func.func @_bn_lrelu_kernel(%arg0: i32, %arg1: i32, %arg2: memref<32x128xf32, #tpu.memory_space<vmem>>, %arg3: memref<1x128xf32, #tpu.memory_space<vmem>>, %arg4: memref<1x128xf32, #tpu.memory_space<vmem>>, %arg5: memref<32x128xbf16, #tpu.memory_space<vmem>>) attributes {dimension_semantics = [#tpu.dimension_semantics<parallel>, #tpu.dimension_semantics<parallel>], iteration_bounds = array<i64: 1, 4>, scalar_prefetch = 0 : i64, scratch_operands = 0 : i64, tpu.core_type = #tpu.core_type<tc>, window_params = [{transform_indices = @transform_0, window_bounds = array<i64: 32, 128>}, {transform_indices = @transform_1, window_bounds = array<i64: 1, 128>}, {transform_indices = @transform_2, window_bounds = array<i64: 1, 128>}, {transform_indices = @transform_3, window_bounds = array<i64: 32, 128>}]} {
    %c0 = arith.constant 0 : index
    %c0_0 = arith.constant 0 : index
    %0 = vector.load %arg2[%c0, %c0_0] : memref<32x128xf32, #tpu.memory_space<vmem>>, vector<32x128xf32>
    %c0_1 = arith.constant 0 : index
    %c0_2 = arith.constant 0 : index
    %1 = vector.load %arg3[%c0_1, %c0_2] : memref<1x128xf32, #tpu.memory_space<vmem>>, vector<1x128xf32>
    %2 = vector.broadcast %1 : vector<1x128xf32> to vector<32x128xf32>
    %3 = arith.mulf %0, %2 : vector<32x128xf32>
    %c0_3 = arith.constant 0 : index
    %c0_4 = arith.constant 0 : index
    %4 = vector.load %arg4[%c0_3, %c0_4] : memref<1x128xf32, #tpu.memory_space<vmem>>, vector<1x128xf32>
    %5 = vector.broadcast %4 : vector<1x128xf32> to vector<32x128xf32>
    %6 = arith.addf %3, %5 : vector<32x128xf32>
    %cst = arith.constant 0.000000e+00 : f32
    %7 = vector.broadcast %cst : f32 to vector<32x128xf32>
    %8 = arith.cmpf oge, %6, %7 : vector<32x128xf32>
    %cst_5 = arith.constant 2.000000e-01 : f32
    %9 = vector.broadcast %cst_5 : f32 to vector<32x128xf32>
    %10 = arith.mulf %9, %6 : vector<32x128xf32>
    %11 = arith.select %8, %6, %10 : vector<32x128xi1>, vector<32x128xf32>
    %12 = arith.truncf %11 : vector<32x128xf32> to vector<32x128xbf16>
    %c0_6 = arith.constant 0 : index
    %c0_7 = arith.constant 0 : index
    %13 = vector.load %arg5[%c0_6, %c0_7] : memref<32x128xbf16, #tpu.memory_space<vmem>>, vector<32x128xbf16>
    tpu.vector_store %arg5[%c0_6, %c0_7], %12 {strides = array<i32>} : memref<32x128xbf16, #tpu.memory_space<vmem>>, vector<32x128xbf16>,
    return
  }
  func.func @transform_0(%arg0: i32, %arg1: i32) -> (i32, i32) {
    %c0_i32 = arith.constant 0 : i32
    return %arg0, %arg1 : i32, i32
  }
  func.func @transform_1(%arg0: i32, %arg1: i32) -> (i32, i32) {
    %c0_i32 = arith.constant 0 : i32
    %c0_i32_0 = arith.constant 0 : i32
    return %c0_i32, %arg1 : i32, i32
  }
  func.func @transform_2(%arg0: i32, %arg1: i32) -> (i32, i32) {
    %c0_i32 = arith.constant 0 : i32
    %c0_i32_0 = arith.constant 0 : i32
    return %c0_i32, %arg1 : i32, i32
  }
  func.func @transform_3(%arg0: i32, %arg1: i32) -> (i32, i32) {
    %c0_i32 = arith.constant 0 : i32
    return %arg0, %arg1 : i32, i32
  }
}

</mosaic_0001>

<bundles_post_ra>
// kernel: discriminator_forward.7
= control target key start
LH: loop header
LB: loop body
LE: loop exit
PB: predicated region body
PF: predicated region fallthrough
CT: control target
= control target key end

     0   :  { %s878_s9 = smov 0   ;;  %s880_s10 = smov 0   ;;  %s965_s0 = inlined_call_operand.vmem [shape: bf16[2048,128], index: 0, kind: input, shape index: {}]   ;;  %s966_s1 = inlined_call_operand.vmem [shape: bf16[128,128], index: 1, kind: input, shape index: {}]   ;;  %s967_s2 = inlined_call_operand.vmem [shape: bf16[2048,128], index: 2, kind: output, shape index: {}]  }
   0x1   :  { %s882_s11 = smov 0  }
   0x2 LB: > { %s24_s12 = sadd.s32 1, %s857_s10  ;;  %p633_p0 = scmp.ge.s32.totalorder %s861_s11, 1  ;;  %s861_s11 = sphi %s882_s11, %s12_s11   ;;  %s857_s10 = sphi %s880_s10, %s969_s10   ;;  %s853_s9 = sphi %s878_s9, %s968_s9  }
   0x3   : > { %p26_p1 = scmp.ge.s32.totalorder %s24_s12, 16  ;;  %p136_p2 = scmp.lt.s32.totalorder %s861_s11, 17 }
   0x5   : > { %s971_s12 = smov (%p26_p1, %s24_s12), 0  ;;  %p137_p3 = pnand %p633_p0, %p136_p2 }
   0x6   : > { %s634_s15 = sshll.u32 (!%p137_p3), %s853_s9, 4 }
   0x7   : > { %140 = sbr.rel (%p137_p3) target bundleno = 259 (0x103), region = 28  ;;  %p166_p4 = scmp.lt.s32.totalorder (!%p137_p3), %s634_s15, 255 }
   0xc   : > { %v823_v0 = vld [vmem:[%s966_s1 + $0x38] sm:$0xff]   ;;  %v824_v1 = vld [vmem:[%s966_s1 + $0x30] sm:$0xff]   ;;  %s973_s15 = smov (!%p166_p4, %s634_s15), 255  ;;  %v825_v2 = vld [vmem:[%s966_s1 + $0x28] sm:$0xff]  }
   0xd   : > { %751 = vmatprep.subr.bf16.mxu0 %v823_v0  ;;  %783 = vmatprep.subr.bf16.mxu1 %v823_v0  ;;  %s635_s20 = sshll.u32 %s973_s15, 2  ;;  %v826_v3 = vld [vmem:[%s966_s1 + $0x20] sm:$0xff]   ;;  %v827_v6 = vld [vmem:[%s966_s1 + $0x18] sm:$0xff]   ;;  %v828_v7 = vld [vmem:[%s966_s1 + $0x10] sm:$0xff]  }
   0xe   : > { %752 = vmatpush3.bf16.msra.mxu0 %v823_v0  ;;  %791 = vmatpush3.bf16.msra.mxu1 %v823_v0  ;;  %s913_s23 = scalar_lea.vmem %s965_s0, %s635_s20  ;;  %v829_v8 = vld [vmem:[%s966_s1 + $0x8] sm:$0xff]   ;;  %v830_v9 = vld [vmem:[%s966_s1] sm:$0xff]   ;;  %s943_s8 = scalar_lea.vmem %s967_s2, %s635_s20 }
   0xf   : > { %753 = vmatprep.subr.bf16.mxu0 %v824_v1  ;;  %784 = vmatprep.subr.bf16.mxu1 %v824_v1  ;;  %v831_v4 = vld [vmem:[%s913_s23] sm:$0xff]   ;;  %v833_v10 = vld [vmem:[%s913_s23 + $0x8] sm:$0xff]   ;;  %v835_v12 = vld [vmem:[%s913_s23 + $0x10] sm:$0xff]  }
  0x10   : > { %v832_v5 = vld [vmem:[%s913_s23 + $0x20] sm:$0xff]   ;;  %767 = vmatprep.mubr.bf16.mxu0 %v831_v4  ;;  %v834_v11 = vld [vmem:[%s913_s23 + $0x28] sm:$0xff]   ;;  %v836_v13 = vld [vmem:[%s913_s23 + $0x30] sm:$0xff]  }
  0x11   : > { %775 = vmatprep.mubr.bf16.mxu1 %v832_v5  ;;  %v837_v14 = vld [vmem:[%s913_s23 + $0x18] sm:$0xff]  }
  0x12   : > { %754 = vmatpush3.bf16.msra.mxu0 %v824_v1  ;;  %792 = vmatpush3.bf16.msra.mxu1 %v824_v1  ;;  %v838_v15 = vld [vmem:[%s913_s23 + $0x38] sm:$0xff]  }
  0x13   : > { %755 = vmatprep.subr.bf16.mxu0 %v825_v2  ;;  %785 = vmatprep.subr.bf16.mxu1 %v825_v2 }
  0x16   : > { %756 = vmatpush3.bf16.msra.mxu0 %v825_v2  ;;  %793 = vmatpush3.bf16.msra.mxu1 %v825_v2 }
  0x17   : > { %757 = vmatprep.subr.bf16.mxu0 %v826_v3  ;;  %786 = vmatprep.subr.bf16.mxu1 %v826_v3 }
  0x1a   : > { %758 = vmatpush3.bf16.msra.mxu0 %v826_v3  ;;  %794 = vmatpush3.bf16.msra.mxu1 %v826_v3 }
  0x1b   : > { %759 = vmatprep.subr.bf16.mxu0 %v827_v6  ;;  %787 = vmatprep.subr.bf16.mxu1 %v827_v6 }
  0x1e   : > { %760 = vmatpush3.bf16.msra.mxu0 %v827_v6  ;;  %795 = vmatpush3.bf16.msra.mxu1 %v827_v6 }
  0x1f   : > { %761 = vmatprep.subr.bf16.mxu0 %v828_v7  ;;  %788 = vmatprep.subr.bf16.mxu1 %v828_v7 }
  0x22   : > { %762 = vmatpush3.bf16.msra.mxu0 %v828_v7  ;;  %796 = vmatpush3.bf16.msra.mxu1 %v828_v7 }
  0x23   : > { %763 = vmatprep.subr.bf16.mxu0 %v829_v8  ;;  %789 = vmatprep.subr.bf16.mxu1 %v829_v8 }
  0x26   : > { %764 = vmatpush3.bf16.msra.mxu0 %v829_v8  ;;  %797 = vmatpush3.bf16.msra.mxu1 %v829_v8 }
  0x27   : > { %765 = vmatprep.subr.bf16.mxu0 %v830_v9  ;;  %790 = vmatprep.subr.bf16.mxu1 %v830_v9 }
  0x2a   : > { %766 = vmatpush3.bf16.msra.mxu0 %v830_v9  ;;  %798 = vmatpush3.bf16.msra.mxu1 %v830_v9 }
  0x2d   : > { %768 = vmatmul.mubr.bf16.vlgmr.msra.gmra.mxu0 %v833_v10  ;;  %776 = vmatmul.mubr.bf16.vlgmr.msra.gmra.mxu1 %v834_v11 }
  0x2e   : > { %771 = vmatprep.mubr.bf16.mxu0 %v835_v12  ;;  %779 = vmatprep.mubr.bf16.mxu1 %v836_v13 }
  0x35   : > { %772 = vmatmul.mubr.bf16.gmra.mxu0 %v837_v14  ;;  %780 = vmatmul.mubr.bf16.gmra.mxu1 %v838_v15 }
  0xed   : > { %v769_v16 = vpop.f32.mrf.mxu0  ;;  %v777_v17 = vpop.f32.mrf.mxu1 }
  0xee   : > { %vm412_vm0 = vcmp.ge.f32.partialorder %v769_v16, 0.0  ;;  %v428_v18 = vmul.f32 0.2, %v769_v16  ;;  %v436_v19 = vmul.f32 0.2, %v777_v17  ;;  %vm420_vm1 = vcmp.ge.f32.partialorder %v777_v17, 0.0 }
  0xef   : > { %v347_v20 = vpop.f32.mrf.mxu0  ;;  %v379_v21 = vpop.f32.mrf.mxu1 }
  0xf0   : > { %v444_v22 = vsel %vm412_vm0, %v769_v16, %v428_v18  ;;  %v426_v23 = vmul.f32 0.2, %v347_v20  ;;  %vm410_vm2 = vcmp.ge.f32.partialorder %v347_v20, 0.0  ;;  %v452_v27 = vsel %vm420_vm1, %v777_v17, %v436_v19 }
  0xf1   : > { %v770_v24 = vpop.f32.mrf.mxu0  ;;  %v778_v25 = vpop.f32.mrf.mxu1  ;;  %vm418_vm5 = vcmp.ge.f32.partialorder %v379_v21, 0.0  ;;  %v434_v28 = vmul.f32 0.2, %v379_v21 }
  0xf2   : > { %vm413_vm3 = vcmp.ge.f32.partialorder %v770_v24, 0.0  ;;  %v429_v26 = vmul.f32 0.2, %v770_v24  ;;  %vm421_vm4 = vcmp.ge.f32.partialorder %v778_v25, 0.0  ;;  %v437_v29 = vmul.f32 0.2, %v778_v25 }
  0xf3   : > { %v350_v30 = vpop.f32.mrf.mxu0  ;;  %v382_v31 = vpop.f32.mrf.mxu1  ;;  %v442_v34 = vsel %vm410_vm2, %v347_v20, %v426_v23  ;;  %v450_v43 = vsel %vm418_vm5, %v379_v21, %v434_v28 }
  0xf4   : > { %v445_v32 = vsel %vm413_vm3, %v770_v24, %v429_v26  ;;  %vm411_vm6 = vcmp.ge.f32.partialorder %v350_v30, 0.0  ;;  %v427_v33 = vmul.f32 0.2, %v350_v30  ;;  %vm419_vm7 = vcmp.ge.f32.partialorder %v382_v31, 0.0 }
  0xf5   : > { %v696_v35 = vpack.c.bf16 %v445_v32, %v444_v22  ;;  %v453_v36 = vsel %vm421_vm4, %v778_v25, %v437_v29  ;;  %v435_v37 = vmul.f32 0.2, %v382_v31  ;;  %v773_v38 = vpop.f32.mrf.mxu0  ;;  %v781_v39 = vpop.f32.mrf.mxu1 }
  0xf6   : > { %v716_v40 = vpack.c.bf16 %v453_v36, %v452_v27  ;;  %v443_v41 = vsel %vm411_vm6, %v350_v30, %v427_v33  ;;  %vm416_vm8 = vcmp.ge.f32.partialorder %v773_v38, 0.0  ;;  %v432_v42 = vmul.f32 0.2, %v773_v38 }
  0xf7   : > { %728 = vst [vmem:[%s943_s8 + $0x8] sm:$0xff] %v696_v35   ;;  %v691_v44 = vpack.c.bf16 %v443_v41, %v442_v34  ;;  %v451_v45 = vsel %vm419_vm7, %v382_v31, %v435_v37  ;;  %v363_v46 = vpop.f32.mrf.mxu0  ;;  %v395_v47 = vpop.f32.mrf.mxu1  ;;  %vm424_vm9 = vcmp.ge.f32.partialorder %v781_v39, 0.0  ;;  %v440_v50 = vmul.f32 0.2, %v781_v39 }
  0xf8   : > { %732 = vst [vmem:[%s943_s8 + $0x28] sm:$0xff] %v716_v40   ;;  %v711_v48 = vpack.c.bf16 %v451_v45, %v450_v43  ;;  %v448_v49 = vsel %vm416_vm8, %v773_v38, %v432_v42  ;;  %v430_v53 = vmul.f32 0.2, %v363_v46  ;;  %vm414_vm12 = vcmp.ge.f32.partialorder %v363_v46, 0.0 }
  0xf9   : > { %692 = vst [vmem:[%s943_s8] sm:$0xff] %v691_v44   ;;  %v774_v51 = vpop.f32.mrf.mxu0  ;;  %v782_v52 = vpop.f32.mrf.mxu1  ;;  %vm422_vm13 = vcmp.ge.f32.partialorder %v395_v47, 0.0  ;;  %v438_v55 = vmul.f32 0.2, %v395_v47  ;;  %v456_v61 = vsel %vm424_vm9, %v781_v39, %v440_v50 }
  0xfa   : > { %731 = vst [vmem:[%s943_s8 + $0x20] sm:$0xff] %v711_v48   ;;  %vm417_vm10 = vcmp.ge.f32.partialorder %v774_v51, 0.0  ;;  %v433_v54 = vmul.f32 0.2, %v774_v51  ;;  %vm425_vm11 = vcmp.ge.f32.partialorder %v782_v52, 0.0  ;;  %v446_v1 = vsel %vm414_vm12, %v363_v46, %v430_v53 }
  0xfb   : > { %v441_v56 = vmul.f32 0.2, %v782_v52  ;;  %v366_v57 = vpop.f32.mrf.mxu0  ;;  %v398_v58 = vpop.f32.mrf.mxu1  ;;  %v454_v4 = vsel %vm422_vm13, %v395_v47, %v438_v55 }
  0xfc   : > { %v449_v59 = vsel %vm417_vm10, %v774_v51, %v433_v54  ;;  %vm415_vm14 = vcmp.ge.f32.partialorder %v366_v57, 0.0  ;;  %v431_v60 = vmul.f32 0.2, %v366_v57  ;;  %vm423_vm15 = vcmp.ge.f32.partialorder %v398_v58, 0.0 }
  0xfd   : > { %v706_v62 = vpack.c.bf16 %v449_v59, %v448_v49  ;;  %v457_v63 = vsel %vm425_vm11, %v782_v52, %v441_v56  ;;  %v439_v0 = vmul.f32 0.2, %v398_v58 }
  0xfe   : > { %v726_v2 = vpack.c.bf16 %v457_v63, %v456_v61  ;;  %v447_v3 = vsel %vm415_vm14, %v366_v57, %v431_v60 }
  0xff   : > { %730 = vst [vmem:[%s943_s8 + $0x18] sm:$0xff] %v706_v62   ;;  %v701_v5 = vpack.c.bf16 %v447_v3, %v446_v1  ;;  %v455_v6 = vsel %vm423_vm15, %v398_v58, %v439_v0 }
 0x100   : > { %734 = vst [vmem:[%s943_s8 + $0x38] sm:$0xff] %v726_v2   ;;  %v721_v7 = vpack.c.bf16 %v455_v6, %v454_v4 }
 0x101   : > { %729 = vst [vmem:[%s943_s8 + $0x10] sm:$0xff] %v701_v5  }
 0x102   : > { %733 = vst [vmem:[%s943_s8 + $0x30] sm:$0xff] %v721_v7  }
 0x103 PF: > { %s12_s11 = sadd.s32 1, %s861_s11   ;;  %s968_s9 = smov %s857_s10 }
 0x104   : > { %p9_p5 = scmp.ge.s32.totalorder %s12_s11, 18   ;;  %s969_s10 = smov %s971_s12 }
 0x106   :  { %11 = sbr.rel (!%p9_p5) target bundleno = 2 (0x2), region = 61 }

// kernel: discriminator_forward.8
= control target key start
LH: loop header
LB: loop body
LE: loop exit
PB: predicated region body
PF: predicated region fallthrough
CT: control target
= control target key end

     0   :  { %s4035_s15 = smov 0   ;;  %s4037_s16 = smov 0   ;;  %s4980_s0 = inlined_call_operand.vmem [shape: bf16[512,2048], index: 0, kind: input, shape index: {}]   ;;  %s4981_s1 = inlined_call_operand.vmem [shape: bf16[2048,128], index: 1, kind: input, shape index: {}]   ;;  %s4982_s2 = inlined_call_operand.vmem [shape: f32[512,128], index: 2, kind: output, shape index: {0}]   ;;  %s4983_s3 = inlined_call_operand.vmem [shape: f32[1,128], index: 3, kind: output, shape index: {1}]   ;;  %s4984_s4 = inlined_call_operand.vmem [shape: f32[1,128], index: 4, kind: output, shape index: {2}]  }
   0x1   :  { %s4039_s17 = smov 0  }
   0x2 LB: > { %s24_s18 = sadd.s32 1, %s4003_s16  ;;  %p3052_p0 = scmp.ge.s32.totalorder %s4007_s17, 1  ;;  %s4007_s17 = sphi %s4039_s17, %s15_s17   ;;  %s4003_s16 = sphi %s4037_s16, %s5042_s16   ;;  %s3999_s15 = sphi %s4035_s15, %s5041_s15  }
   0x3   : > { %p25_p1 = scmp.ge.s32.totalorder %s24_s18, 4  ;;  %p192_p2 = scmp.lt.s32.totalorder %s4007_s17, 5 }
   0x5   : > { %s5044_s18 = smov (%p25_p1, %s24_s18), 0  ;;  %p193_p3 = pnand %p3052_p0, %p192_p2 }
   0x7   : > { %196 = sbr.rel (%p193_p3) target bundleno = 549 (0x225), region = 28 }
   0xc   : > { %v3857_v0 = vld [vmem:[%s4981_s1 + $0x78] sm:$0xff]   ;;  %v3861_v4 = vld [vmem:[%s4981_s1 + $0x70] sm:$0xff]   ;;  %v3865_v8 = vld [vmem:[%s4981_s1 + $0x68] sm:$0xff]   ;;  %s3053_s29 = sshll.u32 %s3999_s15, 4  ;;  %p3314_p5 = scmp.ne.s32.totalorder %s3999_s15, 0 }
   0xd   : > { %v3858_v1 = vld [vmem:[%s4981_s1 + $0xf8] sm:$0xff]   ;;  %3320 = vmatprep.subr.bf16.mxu0 %v3857_v0  ;;  %v3862_v5 = vld [vmem:[%s4981_s1 + $0xf0] sm:$0xff]   ;;  %v3866_v9 = vld [vmem:[%s4981_s1 + $0xe8] sm:$0xff]   ;;  %p233_p4 = scmp.lt.s32.totalorder %s3053_s29, 63 }
   0xe   : > { %v3859_v2 = vld [vmem:[%s4981_s1 + $0x38] sm:$0xff]   ;;  %3384 = vmatprep.subr.bf16.mxu1 %v3858_v1  ;;  %v3863_v6 = vld [vmem:[%s4981_s1 + $0x30] sm:$0xff]   ;;  %v3867_v10 = vld [vmem:[%s4981_s1 + $0x28] sm:$0xff]  }
   0xf   : > { %v3860_v3 = vld [vmem:[%s4981_s1 + $0xb8] sm:$0xff]   ;;  %3321 = vmatpush3.bf16.msra.mxu0 %v3859_v2  ;;  %v3864_v7 = vld [vmem:[%s4981_s1 + $0xb0] sm:$0xff]   ;;  %v3868_v11 = vld [vmem:[%s4981_s1 + $0xa8] sm:$0xff]   ;;  %s5046_s29 = smov (!%p233_p4, %s3053_s29), 63 }
  0x10   : > { %3385 = vmatpush3.bf16.msra.mxu1 %v3860_v3  ;;  %3322 = vmatprep.subr.bf16.mxu0 %v3861_v4  ;;  %v3869_v12 = vld [vmem:[%s4981_s1 + $0x60] sm:$0xff]   ;;  %v3873_v16 = vld [vmem:[%s4981_s1 + $0x58] sm:$0xff]   ;;  %v3877_v20 = vld [vmem:[%s4981_s1 + $0x50] sm:$0xff]   ;;  %s3319_s5 = sshll.u32 %s5046_s29, 6 }
  0x11   : > { %3386 = vmatprep.subr.bf16.mxu1 %v3862_v5  ;;  %v3870_v13 = vld [vmem:[%s4981_s1 + $0xe0] sm:$0xff]   ;;  %v3874_v17 = vld [vmem:[%s4981_s1 + $0xd8] sm:$0xff]   ;;  %v3878_v21 = vld [vmem:[%s4981_s1 + $0xd0] sm:$0xff]   ;;  %s4152_s14 = scalar_lea.vmem %s4980_s0, %s3319_s5 }
  0x12   : > { %v3871_v14 = vld [vmem:[%s4981_s1 + $0x20] sm:$0xff]   ;;  %v3875_v18 = vld [vmem:[%s4981_s1 + $0x18] sm:$0xff]   ;;  %v3879_v22 = vld [vmem:[%s4981_s1 + $0x10] sm:$0xff]  }
  0x13   : > { %3323 = vmatpush3.bf16.msra.mxu0 %v3863_v6  ;;  %v3872_v15 = vld [vmem:[%s4981_s1 + $0xa0] sm:$0xff]   ;;  %v3876_v19 = vld [vmem:[%s4981_s1 + $0x98] sm:$0xff]   ;;  %v3880_v23 = vld [vmem:[%s4981_s1 + $0x90] sm:$0xff]  }
  0x14   : > { %3387 = vmatpush3.bf16.msra.mxu1 %v3864_v7  ;;  %3324 = vmatprep.subr.bf16.mxu0 %v3865_v8  ;;  %v3881_v24 = vld [vmem:[%s4981_s1 + $0x48] sm:$0xff]   ;;  %v3885_v28 = vld [vmem:[%s4981_s1 + $0x40] sm:$0xff]   ;;  %v3889_v40 = vld [vmem:[%s4981_s1 + $0x178] sm:$0xff]  }
  0x15   : > { %3388 = vmatprep.subr.bf16.mxu1 %v3866_v9  ;;  %v3882_v25 = vld [vmem:[%s4981_s1 + $0xc8] sm:$0xff]   ;;  %v3886_v29 = vld [vmem:[%s4981_s1 + $0xc0] sm:$0xff]   ;;  %v3890_v41 = vld [vmem:[%s4981_s1 + $0x138] sm:$0xff]  }
  0x16   : > { %v3883_v26 = vld [vmem:[%s4981_s1 + $0x8] sm:$0xff]   ;;  %v3887_v30 = vld [vmem:[%s4981_s1] sm:$0xff]   ;;  %v3891_v42 = vld [vmem:[%s4981_s1 + $0x1f8] sm:$0xff]  }
  0x17   : > { %3325 = vmatpush3.bf16.msra.mxu0 %v3867_v10  ;;  %v3884_v27 = vld [vmem:[%s4981_s1 + $0x88] sm:$0xff]   ;;  %v3888_v31 = vld [vmem:[%s4981_s1 + $0x80] sm:$0xff]   ;;  %v3892_v43 = vld [vmem:[%s4981_s1 + $0x1b8] sm:$0xff]  }
  0x18   : > { %3389 = vmatpush3.bf16.msra.mxu1 %v3868_v11  ;;  %3326 = vmatprep.subr.bf16.mxu0 %v3869_v12  ;;  %v259_v32 = vld [vmem:[%s4152_s14] sm:$0xff]  ;;  %v260_v34 = vld [vmem:[%s4152_s14 + $0x8] sm:$0xff]  ;;  %v3893_v50 = vld [vmem:[%s4981_s1 + $0x170] sm:$0xff]  }
  0x19   : > { %3390 = vmatprep.subr.bf16.mxu1 %v3870_v13  ;;  %v267_v33 = vld [vmem:[%s4152_s14 + $0x40] sm:$0xff]  ;;  %v268_v37 = vld [vmem:[%s4152_s14 + $0x48] sm:$0xff]  ;;  %v3894_v52 = vld [vmem:[%s4981_s1 + $0x130] sm:$0xff]  }
  0x1a   : > { %v3058_v35 = vcombine.low %v259_v32, %v267_v33  ;;  %v3059_v36 = vcombine.high %v259_v32, %v267_v33  ;;  %v3060_v38 = vcombine.low %v260_v34, %v268_v37  ;;  %v3061_v39 = vcombine.high %v260_v34, %v268_v37  ;;  %v275_v44 = vld [vmem:[%s4152_s14 + $0x80] sm:$0xff]  ;;  %v276_v47 = vld [vmem:[%s4152_s14 + $0x88] sm:$0xff]  ;;  %v3895_v54 = vld [vmem:[%s4981_s1 + $0x1f0] sm:$0xff]  }
  0x1b   : > { %3327 = vmatpush3.bf16.msra.mxu0 %v3871_v14  ;;  %v283_v45 = vld [vmem:[%s4152_s14 + $0xc0] sm:$0xff]  ;;  %v284_v48 = vld [vmem:[%s4152_s14 + $0xc8] sm:$0xff]  ;;  %v3896_v55 = vld [vmem:[%s4981_s1 + $0x1b0] sm:$0xff]  }
  0x1c   : > { %3391 = vmatpush3.bf16.msra.mxu1 %v3872_v15  ;;  %3328 = vmatprep.subr.bf16.mxu0 %v3873_v16  ;;  %v3075_v46 = vcombine.high %v275_v44, %v283_v45  ;;  %v3077_v49 = vcombine.high %v276_v47, %v284_v48  ;;  %v3074_v51 = vcombine.low %v275_v44, %v283_v45  ;;  %v291_v56 = vld [vmem:[%s4152_s14 + $0x100] sm:$0xff]  ;;  %v292_v58 = vld [vmem:[%s4152_s14 + $0x108] sm:$0xff]  ;;  %v3911_v32 = vld [vmem:[%s4981_s1 + $0x1d0] sm:$0xff]  }
  0x1d   : > { %3392 = vmatprep.subr.bf16.mxu1 %v3874_v17  ;;  %2083 = vmatprep.mubr.bf16.mxu0 %v3059_v36  ;;  %v3076_v53 = vcombine.low %v276_v47, %v284_v48  ;;  %v299_v57 = vld [vmem:[%s4152_s14 + $0x140] sm:$0xff]  ;;  %v300_v59 = vld [vmem:[%s4152_s14 + $0x148] sm:$0xff]  ;;  %v3912_v33 = vld [vmem:[%s4981_s1 + $0x190] sm:$0xff]  }
  0x1e   : > { %2180 = vmatprep.mubr.bf16.mxu1 %v3061_v39  ;;  %v3091_v60 = vcombine.high %v291_v56, %v299_v57  ;;  %v3093_v61 = vcombine.high %v292_v58, %v300_v59  ;;  %v3897_v62 = vld [vmem:[%s4981_s1 + $0x168] sm:$0xff]   ;;  %v3090_v2 = vcombine.low %v291_v56, %v299_v57  ;;  %v307_v3 = vld [vmem:[%s4152_s14 + $0x180] sm:$0xff]  ;;  %v3092_v6 = vcombine.low %v292_v58, %v300_v59  ;;  %v3921_v56 = vld [vmem:[%s4981_s1 + $0x278] sm:$0xff]  }
  0x1f   : > { %3329 = vmatpush3.bf16.msra.mxu0 %v3875_v18  ;;  %v3898_v63 = vld [vmem:[%s4981_s1 + $0x128] sm:$0xff]   ;;  %v315_v4 = vld [vmem:[%s4152_s14 + $0x1c0] sm:$0xff]  ;;  %v3905_v18 = vld [vmem:[%s4981_s1 + $0x158] sm:$0xff]  }
  0x20   : > { %3393 = vmatpush3.bf16.msra.mxu1 %v3876_v19  ;;  %3330 = vmatprep.subr.bf16.mxu0 %v3877_v20  ;;  %v3899_v0 = vld [vmem:[%s4981_s1 + $0x1e8] sm:$0xff]   ;;  %v3107_v7 = vcombine.high %v307_v3, %v315_v4  ;;  %v3901_v10 = vld [vmem:[%s4981_s1 + $0x160] sm:$0xff]   ;;  %v3106_v19 = vcombine.low %v307_v3, %v315_v4  ;;  %v3906_v20 = vld [vmem:[%s4981_s1 + $0x118] sm:$0xff]  }
  0x21   : > { %3394 = vmatprep.subr.bf16.mxu1 %v3878_v21  ;;  %v3900_v1 = vld [vmem:[%s4981_s1 + $0x1a8] sm:$0xff]   ;;  %v3902_v11 = vld [vmem:[%s4981_s1 + $0x120] sm:$0xff]   ;;  %v3923_v58 = vld [vmem:[%s4981_s1 + $0x2f8] sm:$0xff]  }
  0x22   : > { %v308_v5 = vld [vmem:[%s4152_s14 + $0x188] sm:$0xff]  ;;  %v3903_v12 = vld [vmem:[%s4981_s1 + $0x1e0] sm:$0xff]   ;;  %v270_v3 = vld [vmem:[%s4152_s14 + $0x58] sm:$0xff] }
  0x23   : > { %3331 = vmatpush3.bf16.msra.mxu0 %v3879_v22  ;;  %v316_v8 = vld [vmem:[%s4152_s14 + $0x1c8] sm:$0xff]  ;;  %v3904_v13 = vld [vmem:[%s4981_s1 + $0x1a0] sm:$0xff]  }
  0x24   : > { %3395 = vmatpush3.bf16.msra.mxu1 %v3880_v23  ;;  %3332 = vmatprep.subr.bf16.mxu0 %v3881_v24  ;;  %v3109_v9 = vcombine.high %v308_v5, %v316_v8  ;;  %v323_v14 = vld [vmem:[%s4152_s14 + $0x200] sm:$0xff]  ;;  %v324_v16 = vld [vmem:[%s4152_s14 + $0x208] sm:$0xff]  ;;  %v3108_v21 = vcombine.low %v308_v5, %v316_v8  ;;  %v3907_v23 = vld [vmem:[%s4981_s1 + $0x1d8] sm:$0xff]  }
  0x25   : > { %3396 = vmatprep.subr.bf16.mxu1 %v3882_v25  ;;  %v331_v15 = vld [vmem:[%s4152_s14 + $0x240] sm:$0xff]  ;;  %v332_v17 = vld [vmem:[%s4152_s14 + $0x248] sm:$0xff]  ;;  %v3908_v25 = vld [vmem:[%s4981_s1 + $0x198] sm:$0xff]  }
  0x26   : > { %v3123_v22 = vcombine.high %v323_v14, %v331_v15  ;;  %v3125_v24 = vcombine.high %v324_v16, %v332_v17  ;;  %v3122_v34 = vcombine.low %v323_v14, %v331_v15  ;;  %v3914_v39 = vld [vmem:[%s4981_s1 + $0x108] sm:$0xff]   ;;  %v3918_v48 = vld [vmem:[%s4981_s1 + $0x100] sm:$0xff]   ;;  %v277_v8 = vld [vmem:[%s4152_s14 + $0x90] sm:$0xff] }
  0x27   : > { %3333 = vmatpush3.bf16.msra.mxu0 %v3883_v26  ;;  %v339_v26 = vld [vmem:[%s4152_s14 + $0x280] sm:$0xff]  ;;  %v356_v44 = vld [vmem:[%s4152_s14 + $0x308] sm:$0xff]  ;;  %v3924_v15 = vld [vmem:[%s4981_s1 + $0x2b8] sm:$0xff]  }
  0x28   : > { %3397 = vmatpush3.bf16.msra.mxu1 %v3884_v27  ;;  %3334 = vmatprep.subr.bf16.mxu0 %v3885_v28  ;;  %v347_v27 = vld [vmem:[%s4152_s14 + $0x2c0] sm:$0xff]  ;;  %v3909_v28 = vld [vmem:[%s4981_s1 + $0x150] sm:$0xff]   ;;  %v364_v45 = vld [vmem:[%s4152_s14 + $0x348] sm:$0xff] }
  0x29   : > { %3398 = vmatprep.subr.bf16.mxu1 %v3886_v29  ;;  %v340_v29 = vld [vmem:[%s4152_s14 + $0x288] sm:$0xff]  ;;  %v3139_v36 = vcombine.high %v339_v26, %v347_v27  ;;  %v3138_v47 = vcombine.low %v339_v26, %v347_v27 }
  0x2a   : > { %v372_v57 = vld [vmem:[%s4152_s14 + $0x388] sm:$0xff] }
  0x2b   : > { %3335 = vmatpush3.bf16.msra.mxu0 %v3887_v30  ;;  %v348_v30 = vld [vmem:[%s4152_s14 + $0x2c8] sm:$0xff] }
  0x2c   : > { %3399 = vmatpush3.bf16.msra.mxu1 %v3888_v31  ;;  %3448 = vmatprep.subr.bf16.mxu0 %v3889_v40  ;;  %v3910_v31 = vld [vmem:[%s4981_s1 + $0x110] sm:$0xff]   ;;  %v3141_v37 = vcombine.high %v340_v29, %v348_v30  ;;  %v3915_v40 = vld [vmem:[%s4981_s1 + $0x1c8] sm:$0xff]  }
  0x2d   : > { %3512 = vmatprep.subr.bf16.mxu1 %v3891_v42  ;;  %v363_v42 = vld [vmem:[%s4152_s14 + $0x340] sm:$0xff]  ;;  %v380_v59 = vld [vmem:[%s4152_s14 + $0x3c8] sm:$0xff] }
  0x2e   : > { %2084 = vmatmul.mubr.bf16.vlgmr.msra.gmra.mxu0 %v3058_v35  ;;  %v3124_v35 = vcombine.low %v324_v16, %v332_v17  ;;  %v3172_v5 = vcombine.low %v372_v57, %v380_v59  ;;  %v3925_v17 = vld [vmem:[%s4981_s1 + $0x270] sm:$0xff]   ;;  %v3929_v26 = vld [vmem:[%s4981_s1 + $0x268] sm:$0xff]  }
  0x2f   : > { %2181 = vmatmul.mubr.bf16.vlgmr.msra.gmra.mxu1 %v3060_v38  ;;  %3449 = vmatpush3.bf16.msra.mxu0 %v3890_v41  ;;  %v3913_v38 = vld [vmem:[%s4981_s1 + $0x148] sm:$0xff]   ;;  %v355_v41 = vld [vmem:[%s4152_s14 + $0x300] sm:$0xff] }
  0x30   : > { %3513 = vmatpush3.bf16.msra.mxu1 %v3892_v43  ;;  %2091 = vmatprep.mubr.bf16.mxu0 %v3075_v46  ;;  %v3916_v43 = vld [vmem:[%s4981_s1 + $0x188] sm:$0xff]   ;;  %v3917_v46 = vld [vmem:[%s4981_s1 + $0x140] sm:$0xff]  }
  0x31   : > { %2188 = vmatprep.mubr.bf16.mxu1 %v3077_v49  ;;  %3450 = vmatprep.subr.bf16.mxu0 %v3893_v50  ;;  %v3140_v49 = vcombine.low %v340_v29, %v348_v30  ;;  %v3155_v50 = vcombine.high %v355_v41, %v363_v42  ;;  %v3931_v27 = vld [vmem:[%s4981_s1 + $0x2e8] sm:$0xff]  }
  0x32   : > { %3514 = vmatprep.subr.bf16.mxu1 %v3895_v54  ;;  %v371_v54 = vld [vmem:[%s4152_s14 + $0x380] sm:$0xff] }
  0x33   : > { %3451 = vmatpush3.bf16.msra.mxu0 %v3894_v52  ;;  %v3157_v52 = vcombine.high %v356_v44, %v364_v45 }
  0x34   : > { %3515 = vmatpush3.bf16.msra.mxu1 %v3896_v55  ;;  %3452 = vmatprep.subr.bf16.mxu0 %v3897_v62  ;;  %v379_v55 = vld [vmem:[%s4152_s14 + $0x3c0] sm:$0xff] }
  0x35   : > { %3516 = vmatprep.subr.bf16.mxu1 %v3899_v0  ;;  %v3171_v62 = vcombine.high %v371_v54, %v379_v55  ;;  %v261_v0 = vld [vmem:[%s4152_s14 + $0x10] sm:$0xff]  ;;  %v3170_v4 = vcombine.low %v371_v54, %v379_v55  ;;  %v326_v54 = vld [vmem:[%s4152_s14 + $0x218] sm:$0xff] }
  0x36   : > { %2092 = vmatmul.mubr.bf16.gmra.mxu0 %v3074_v51  ;;  %v3919_v51 = vld [vmem:[%s4981_s1 + $0x1c0] sm:$0xff]   ;;  %v334_v55 = vld [vmem:[%s4152_s14 + $0x258] sm:$0xff] }
  0x37   : > { %2189 = vmatmul.mubr.bf16.gmra.mxu1 %v3076_v53  ;;  %2099 = vmatprep.mubr.bf16.mxu0 %v3091_v60  ;;  %v3920_v53 = vld [vmem:[%s4981_s1 + $0x180] sm:$0xff]   ;;  %v3154_v60 = vcombine.low %v355_v41, %v363_v42  ;;  %v3937_v42 = vld [vmem:[%s4981_s1 + $0x258] sm:$0xff]  }
  0x38   : > { %2196 = vmatprep.mubr.bf16.mxu1 %v3093_v61  ;;  %3453 = vmatpush3.bf16.msra.mxu0 %v3898_v63  ;;  %v3156_v61 = vcombine.low %v356_v44, %v364_v45  ;;  %v3173_v63 = vcombine.high %v372_v57, %v380_v59  ;;  %v3936_v41 = vld [vmem:[%s4981_s1 + $0x2a0] sm:$0xff]   ;;  %v3939_v44 = vld [vmem:[%s4981_s1 + $0x2d8] sm:$0xff]   ;;  %v3944_v57 = vld [vmem:[%s4981_s1 + $0x290] sm:$0xff]  }
  0x39   : > { %3517 = vmatpush3.bf16.msra.mxu1 %v3900_v1  ;;  %3454 = vmatprep.subr.bf16.mxu0 %v3901_v10  ;;  %v269_v1 = vld [vmem:[%s4152_s14 + $0x50] sm:$0xff] }
  0x3a   : > { %3518 = vmatprep.subr.bf16.mxu1 %v3903_v12  ;;  %v3062_v10 = vcombine.low %v261_v0, %v269_v1  ;;  %v278_v12 = vld [vmem:[%s4152_s14 + $0x98] sm:$0xff] }
  0x3c   : > { %3455 = vmatpush3.bf16.msra.mxu0 %v3902_v11  ;;  %v3922_v11 = vld [vmem:[%s4981_s1 + $0x238] sm:$0xff]  }
  0x3d   : > { %3519 = vmatpush3.bf16.msra.mxu1 %v3904_v13  ;;  %3456 = vmatprep.subr.bf16.mxu0 %v3905_v18  ;;  %v286_v13 = vld [vmem:[%s4152_s14 + $0xd8] sm:$0xff] }
  0x3e   : > { %2100 = vmatmul.mubr.bf16.gmra.mxu0 %v3090_v2  ;;  %3520 = vmatprep.subr.bf16.mxu1 %v3907_v23  ;;  %v262_v2 = vld [vmem:[%s4152_s14 + $0x18] sm:$0xff]  ;;  %v3081_v18 = vcombine.high %v278_v12, %v286_v13  ;;  %v301_v23 = vld [vmem:[%s4152_s14 + $0x150] sm:$0xff]  ;;  %v3080_v29 = vcombine.low %v278_v12, %v286_v13  ;;  %v3128_v13 = vcombine.low %v326_v54, %v334_v55 }
  0x3f   : > { %2197 = vmatmul.mubr.bf16.gmra.mxu1 %v3092_v6  ;;  %2107 = vmatprep.mubr.bf16.mxu0 %v3107_v7  ;;  %v3063_v6 = vcombine.high %v261_v0, %v269_v1  ;;  %v3065_v7 = vcombine.high %v262_v2, %v270_v3  ;;  %v3064_v14 = vcombine.low %v262_v2, %v270_v3  ;;  %v3946_v0 = vld [vmem:[%s4981_s1 + $0x208] sm:$0xff]   ;;  %v3949_v2 = vld [vmem:[%s4981_s1 + $0x240] sm:$0xff]   ;;  %v341_v3 = vld [vmem:[%s4152_s14 + $0x290] sm:$0xff] }
  0x40   : > { %2204 = vmatprep.mubr.bf16.mxu1 %v3109_v9  ;;  %3457 = vmatpush3.bf16.msra.mxu0 %v3906_v20  ;;  %v285_v9 = vld [vmem:[%s4152_s14 + $0xd0] sm:$0xff]  ;;  %v3948_v1 = vld [vmem:[%s4981_s1 + $0x288] sm:$0xff]   ;;  %v3955_v12 = vld [vmem:[%s4981_s1 + $0x3f8] sm:$0xff]  }
  0x41   : > { %3521 = vmatpush3.bf16.msra.mxu1 %v3908_v25  ;;  %3458 = vmatprep.subr.bf16.mxu0 %v3909_v28  ;;  %v3079_v16 = vcombine.high %v277_v8, %v285_v9  ;;  %v3927_v20 = vld [vmem:[%s4981_s1 + $0x2f0] sm:$0xff]   ;;  %v302_v25 = vld [vmem:[%s4152_s14 + $0x158] sm:$0xff]  ;;  %v3078_v28 = vcombine.low %v277_v8, %v285_v9  ;;  %v3950_v8 = vld [vmem:[%s4981_s1 + $0x200] sm:$0xff]  }
  0x42   : > { %3522 = vmatprep.subr.bf16.mxu1 %v3911_v32  ;;  %v3930_v32 = vld [vmem:[%s4981_s1 + $0x228] sm:$0xff]   ;;  %v3952_v9 = vld [vmem:[%s4981_s1 + $0x280] sm:$0xff]  }
  0x44   : > { %3459 = vmatpush3.bf16.msra.mxu0 %v3910_v31 }
  0x45   : > { %3523 = vmatpush3.bf16.msra.mxu1 %v3912_v33  ;;  %3460 = vmatprep.subr.bf16.mxu0 %v3913_v38  ;;  %v3932_v33 = vld [vmem:[%s4981_s1 + $0x2a8] sm:$0xff]   ;;  %v310_v38 = vld [vmem:[%s4152_s14 + $0x198] sm:$0xff] }
  0x46   : > { %2108 = vmatmul.mubr.bf16.gmra.mxu0 %v3106_v19  ;;  %3524 = vmatprep.subr.bf16.mxu1 %v3915_v40  ;;  %v3926_v19 = vld [vmem:[%s4981_s1 + $0x230] sm:$0xff]   ;;  %v3934_v40 = vld [vmem:[%s4981_s1 + $0x220] sm:$0xff]  }
  0x47   : > { %2205 = vmatmul.mubr.bf16.gmra.mxu1 %v3108_v21  ;;  %2115 = vmatprep.mubr.bf16.mxu0 %v3123_v22  ;;  %v3928_v21 = vld [vmem:[%s4981_s1 + $0x2b0] sm:$0xff]  }
  0x48   : > { %2212 = vmatprep.mubr.bf16.mxu1 %v3125_v24  ;;  %3461 = vmatpush3.bf16.msra.mxu0 %v3914_v39  ;;  %v293_v22 = vld [vmem:[%s4152_s14 + $0x110] sm:$0xff]  ;;  %v294_v24 = vld [vmem:[%s4152_s14 + $0x118] sm:$0xff] }
  0x49   : > { %3525 = vmatpush3.bf16.msra.mxu1 %v3916_v43  ;;  %3462 = vmatprep.subr.bf16.mxu0 %v3917_v46  ;;  %v3095_v30 = vcombine.high %v293_v22, %v301_v23  ;;  %v3097_v31 = vcombine.high %v294_v24, %v302_v25  ;;  %v318_v39 = vld [vmem:[%s4152_s14 + $0x1d8] sm:$0xff]  ;;  %v3094_v43 = vcombine.low %v293_v22, %v301_v23 }
  0x4a   : > { %3526 = vmatprep.subr.bf16.mxu1 %v3919_v51  ;;  %v3096_v45 = vcombine.low %v294_v24, %v302_v25  ;;  %v325_v51 = vld [vmem:[%s4152_s14 + $0x210] sm:$0xff] }
  0x4b   : > { %v373_v24 = vld [vmem:[%s4152_s14 + $0x390] sm:$0xff] }
  0x4c   : > { %3463 = vmatpush3.bf16.msra.mxu0 %v3918_v48  ;;  %v3113_v48 = vcombine.high %v310_v38, %v318_v39  ;;  %v381_v25 = vld [vmem:[%s4152_s14 + $0x3d0] sm:$0xff] }
  0x4d   : > { %3527 = vmatpush3.bf16.msra.mxu1 %v3920_v53  ;;  %3576 = vmatprep.subr.bf16.mxu0 %v3921_v56  ;;  %v333_v53 = vld [vmem:[%s4152_s14 + $0x250] sm:$0xff] }
  0x4e   : > { %2116 = vmatmul.mubr.bf16.gmra.mxu0 %v3122_v34  ;;  %3640 = vmatprep.subr.bf16.mxu1 %v3923_v58  ;;  %v3933_v34 = vld [vmem:[%s4981_s1 + $0x260] sm:$0xff]   ;;  %v3942_v56 = vld [vmem:[%s4981_s1 + $0x210] sm:$0xff]   ;;  %v3945_v58 = vld [vmem:[%s4981_s1 + $0x248] sm:$0xff]  }
  0x4f   : > { %2213 = vmatmul.mubr.bf16.gmra.mxu1 %v3124_v35  ;;  %2123 = vmatprep.mubr.bf16.mxu0 %v3139_v36  ;;  %v309_v35 = vld [vmem:[%s4152_s14 + $0x190] sm:$0xff] }
  0x50   : > { %2220 = vmatprep.mubr.bf16.mxu1 %v3141_v37  ;;  %v317_v36 = vld [vmem:[%s4152_s14 + $0x1d0] sm:$0xff]  ;;  %v3935_v37 = vld [vmem:[%s4981_s1 + $0x2e0] sm:$0xff]  }
  0x51   : > { %v3111_v46 = vcombine.high %v309_v35, %v317_v36  ;;  %v3110_v59 = vcombine.low %v309_v35, %v317_v36  ;;  %v272_v35 = vld [vmem:[%s4152_s14 + $0x68] sm:$0xff]  ;;  %v3174_v36 = vcombine.low %v373_v24, %v381_v25 }
  0x56   : > { %2124 = vmatmul.mubr.bf16.gmra.mxu0 %v3138_v47  ;;  %v3938_v47 = vld [vmem:[%s4981_s1 + $0x218] sm:$0xff]  }
  0x57   : > { %2221 = vmatmul.mubr.bf16.gmra.mxu1 %v3140_v49  ;;  %2131 = vmatprep.mubr.bf16.mxu0 %v3155_v50  ;;  %v3940_v49 = vld [vmem:[%s4981_s1 + $0x298] sm:$0xff]   ;;  %v3941_v50 = vld [vmem:[%s4981_s1 + $0x250] sm:$0xff]  }
  0x58   : > { %2228 = vmatprep.mubr.bf16.mxu1 %v3157_v52  ;;  %v3943_v52 = vld [vmem:[%s4981_s1 + $0x2d0] sm:$0xff]  }
  0x5e   : > { %2132 = vmatmul.mubr.bf16.gmra.mxu0 %v3154_v60  ;;  %v3947_v60 = vld [vmem:[%s4981_s1 + $0x2c8] sm:$0xff]  }
  0x5f   : > { %2229 = vmatmul.mubr.bf16.gmra.mxu1 %v3156_v61  ;;  %2139 = vmatprep.mubr.bf16.mxu0 %v3171_v62  ;;  %v3112_v61 = vcombine.low %v310_v38, %v318_v39  ;;  %v3127_v62 = vcombine.high %v325_v51, %v333_v53 }
  0x60   : > { %2236 = vmatprep.mubr.bf16.mxu1 %v3173_v63  ;;  %v3129_v63 = vcombine.high %v326_v54, %v334_v55  ;;  %v295_v54 = vld [vmem:[%s4152_s14 + $0x120] sm:$0xff] }
  0x61   : > { %v303_v55 = vld [vmem:[%s4152_s14 + $0x160] sm:$0xff] }
  0x66   : > { %2140 = vmatmul.mubr.bf16.gmra.mxu0 %v3170_v4  ;;  %v349_v4 = vld [vmem:[%s4152_s14 + $0x2d0] sm:$0xff] }
  0x67   : > { %2237 = vmatmul.mubr.bf16.gmra.mxu1 %v3172_v5  ;;  %2277 = vmatprep.mubr.bf16.mxu0 %v3063_v6  ;;  %v3951_v5 = vld [vmem:[%s4981_s1 + $0x2c0] sm:$0xff]   ;;  %v342_v6 = vld [vmem:[%s4152_s14 + $0x298] sm:$0xff] }
  0x68   : > { %2374 = vmatprep.mubr.bf16.mxu1 %v3065_v7  ;;  %v350_v7 = vld [vmem:[%s4152_s14 + $0x2d8] sm:$0xff] }
  0x6e   : > { %2278 = vmatmul.mubr.bf16.vlgmr.msra.gmra.mxu0 %v3062_v10  ;;  %v3953_v10 = vld [vmem:[%s4981_s1 + $0x378] sm:$0xff]  }
  0x6f   : > { %2375 = vmatmul.mubr.bf16.vlgmr.msra.gmra.mxu1 %v3064_v14  ;;  %3577 = vmatpush3.bf16.msra.mxu0 %v3922_v11  ;;  %v3126_v11 = vcombine.low %v325_v51, %v333_v53  ;;  %v3143_v14 = vcombine.high %v341_v3, %v349_v4  ;;  %v3959_v51 = vld [vmem:[%s4981_s1 + $0x3f0] sm:$0xff]  }
  0x70   : > { %3641 = vmatpush3.bf16.msra.mxu1 %v3924_v15  ;;  %2285 = vmatprep.mubr.bf16.mxu0 %v3079_v16  ;;  %v3145_v15 = vcombine.high %v342_v6, %v350_v7  ;;  %v357_v16 = vld [vmem:[%s4152_s14 + $0x310] sm:$0xff] }
  0x71   : > { %2382 = vmatprep.mubr.bf16.mxu1 %v3081_v18  ;;  %3578 = vmatprep.subr.bf16.mxu0 %v3925_v17  ;;  %v365_v17 = vld [vmem:[%s4152_s14 + $0x350] sm:$0xff]  ;;  %v358_v18 = vld [vmem:[%s4152_s14 + $0x318] sm:$0xff] }
  0x72   : > { %3642 = vmatprep.subr.bf16.mxu1 %v3927_v20  ;;  %v3142_v20 = vcombine.low %v341_v3, %v349_v4  ;;  %v3159_v22 = vcombine.high %v357_v16, %v365_v17  ;;  %v3960_v53 = vld [vmem:[%s4981_s1 + $0x3b0] sm:$0xff]   ;;  %v3967_v3 = vld [vmem:[%s4981_s1 + $0x3e0] sm:$0xff]  }
  0x73   : > { %3579 = vmatpush3.bf16.msra.mxu0 %v3926_v19  ;;  %v366_v19 = vld [vmem:[%s4152_s14 + $0x358] sm:$0xff]  ;;  %v311_v4 = vld [vmem:[%s4152_s14 + $0x1a0] sm:$0xff] }
  0x74   : > { %3643 = vmatpush3.bf16.msra.mxu1 %v3928_v21  ;;  %3580 = vmatprep.subr.bf16.mxu0 %v3929_v26  ;;  %v3144_v21 = vcombine.low %v342_v6, %v350_v7  ;;  %v3161_v23 = vcombine.high %v358_v18, %v366_v19  ;;  %v374_v26 = vld [vmem:[%s4152_s14 + $0x398] sm:$0xff]  ;;  %v312_v6 = vld [vmem:[%s4152_s14 + $0x1a8] sm:$0xff]  ;;  %v3966_v7 = vld [vmem:[%s4981_s1 + $0x320] sm:$0xff]  }
  0x75   : > { %3644 = vmatprep.subr.bf16.mxu1 %v3931_v27  ;;  %v382_v27 = vld [vmem:[%s4152_s14 + $0x3d8] sm:$0xff] }
  0x76   : > { %2286 = vmatmul.mubr.bf16.gmra.mxu0 %v3078_v28  ;;  %v3158_v28 = vcombine.low %v357_v16, %v365_v17  ;;  %v3970_v16 = vld [vmem:[%s4981_s1 + $0x318] sm:$0xff]  }
  0x77   : > { %2383 = vmatmul.mubr.bf16.gmra.mxu1 %v3080_v29  ;;  %2293 = vmatprep.mubr.bf16.mxu0 %v3095_v30  ;;  %v3160_v29 = vcombine.low %v358_v18, %v366_v19  ;;  %v3175_v30 = vcombine.high %v373_v24, %v381_v25  ;;  %v3972_v17 = vld [vmem:[%s4981_s1 + $0x398] sm:$0xff]   ;;  %v3973_v18 = vld [vmem:[%s4981_s1 + $0x350] sm:$0xff]   ;;  %v336_v24 = vld [vmem:[%s4152_s14 + $0x268] sm:$0xff] }
  0x78   : > { %2390 = vmatprep.mubr.bf16.mxu1 %v3097_v31  ;;  %3581 = vmatpush3.bf16.msra.mxu0 %v3930_v32  ;;  %v3177_v31 = vcombine.high %v374_v26, %v382_v27  ;;  %v263_v32 = vld [vmem:[%s4152_s14 + $0x20] sm:$0xff]  ;;  %v3975_v19 = vld [vmem:[%s4981_s1 + $0x3d0] sm:$0xff]  }
  0x79   : > { %3645 = vmatpush3.bf16.msra.mxu1 %v3932_v33  ;;  %3582 = vmatprep.subr.bf16.mxu0 %v3933_v34  ;;  %v271_v33 = vld [vmem:[%s4152_s14 + $0x60] sm:$0xff]  ;;  %v264_v34 = vld [vmem:[%s4152_s14 + $0x28] sm:$0xff]  ;;  %v3976_v25 = vld [vmem:[%s4981_s1 + $0x390] sm:$0xff]  }
  0x7a   : > { %3646 = vmatprep.subr.bf16.mxu1 %v3935_v37  ;;  %v3176_v37 = vcombine.low %v374_v26, %v382_v27  ;;  %v3067_v38 = vcombine.high %v263_v32, %v271_v33  ;;  %v3069_v39 = vcombine.high %v264_v34, %v272_v35  ;;  %v3977_v26 = vld [vmem:[%s4981_s1 + $0x348] sm:$0xff]  }
  0x7c   : > { %3583 = vmatpush3.bf16.msra.mxu0 %v3934_v40  ;;  %v279_v40 = vld [vmem:[%s4152_s14 + $0xa0] sm:$0xff] }
  0x7d   : > { %3647 = vmatpush3.bf16.msra.mxu1 %v3936_v41  ;;  %3584 = vmatprep.subr.bf16.mxu0 %v3937_v42  ;;  %v287_v41 = vld [vmem:[%s4152_s14 + $0xe0] sm:$0xff]  ;;  %v3066_v42 = vcombine.low %v263_v32, %v271_v33  ;;  %v3978_v32 = vld [vmem:[%s4981_s1 + $0x308] sm:$0xff]  }
  0x7e   : > { %2294 = vmatmul.mubr.bf16.gmra.mxu0 %v3094_v43  ;;  %3648 = vmatprep.subr.bf16.mxu1 %v3939_v44  ;;  %v280_v43 = vld [vmem:[%s4152_s14 + $0xa8] sm:$0xff] }
  0x7f   : > { %2391 = vmatmul.mubr.bf16.gmra.mxu1 %v3096_v45  ;;  %2301 = vmatprep.mubr.bf16.mxu0 %v3111_v46  ;;  %v288_v44 = vld [vmem:[%s4152_s14 + $0xe8] sm:$0xff]  ;;  %v3068_v45 = vcombine.low %v264_v34, %v272_v35  ;;  %v3954_v46 = vld [vmem:[%s4981_s1 + $0x338] sm:$0xff]   ;;  %v3981_v34 = vld [vmem:[%s4981_s1 + $0x340] sm:$0xff]  }
  0x80   : > { %2398 = vmatprep.mubr.bf16.mxu1 %v3113_v48  ;;  %3585 = vmatpush3.bf16.msra.mxu0 %v3938_v47  ;;  %v3956_v47 = vld [vmem:[%s4981_s1 + $0x3b8] sm:$0xff]   ;;  %v3083_v48 = vcombine.high %v279_v40, %v287_v41  ;;  %v3980_v33 = vld [vmem:[%s4981_s1 + $0x388] sm:$0xff]   ;;  %v3983_v35 = vld [vmem:[%s4981_s1 + $0x3c0] sm:$0xff]  }
  0x81   : > { %3649 = vmatpush3.bf16.msra.mxu1 %v3940_v49  ;;  %3586 = vmatprep.subr.bf16.mxu0 %v3941_v50  ;;  %v3085_v49 = vcombine.high %v280_v43, %v288_v44  ;;  %v3957_v50 = vld [vmem:[%s4981_s1 + $0x370] sm:$0xff]  }
  0x82   : > { %3650 = vmatprep.subr.bf16.mxu1 %v3943_v52  ;;  %v3958_v52 = vld [vmem:[%s4981_s1 + $0x330] sm:$0xff]  }
  0x84   : > { %3587 = vmatpush3.bf16.msra.mxu0 %v3942_v56  ;;  %v3961_v56 = vld [vmem:[%s4981_s1 + $0x368] sm:$0xff]  }
  0x85   : > { %3651 = vmatpush3.bf16.msra.mxu1 %v3944_v57  ;;  %3588 = vmatprep.subr.bf16.mxu0 %v3945_v58  ;;  %v296_v57 = vld [vmem:[%s4152_s14 + $0x128] sm:$0xff] }
  0x86   : > { %2302 = vmatmul.mubr.bf16.gmra.mxu0 %v3110_v59  ;;  %3652 = vmatprep.subr.bf16.mxu1 %v3947_v60  ;;  %v304_v58 = vld [vmem:[%s4152_s14 + $0x168] sm:$0xff]  ;;  %v3082_v60 = vcombine.low %v279_v40, %v287_v41  ;;  %v3984_v41 = vld [vmem:[%s4981_s1 + $0x380] sm:$0xff]  }
  0x87   : > { %2399 = vmatmul.mubr.bf16.gmra.mxu1 %v3112_v61  ;;  %2309 = vmatprep.mubr.bf16.mxu0 %v3127_v62  ;;  %v3963_v59 = vld [vmem:[%s4981_s1 + $0x3e8] sm:$0xff]   ;;  %v3084_v61 = vcombine.low %v280_v43, %v288_v44  ;;  %v3099_v62 = vcombine.high %v295_v54, %v303_v55 }
  0x88   : > { %2406 = vmatprep.mubr.bf16.mxu1 %v3129_v63  ;;  %3589 = vmatpush3.bf16.msra.mxu0 %v3946_v0  ;;  %v3101_v63 = vcombine.high %v296_v57, %v304_v58  ;;  %v3962_v0 = vld [vmem:[%s4981_s1 + $0x328] sm:$0xff]  }
  0x89   : > { %3653 = vmatpush3.bf16.msra.mxu1 %v3948_v1  ;;  %3590 = vmatprep.subr.bf16.mxu0 %v3949_v2  ;;  %v3964_v1 = vld [vmem:[%s4981_s1 + $0x3a8] sm:$0xff]   ;;  %v3965_v2 = vld [vmem:[%s4981_s1 + $0x360] sm:$0xff]  }
  0x8a   : > { %3654 = vmatprep.subr.bf16.mxu1 %v3951_v5  ;;  %v319_v5 = vld [vmem:[%s4152_s14 + $0x1e0] sm:$0xff]  ;;  %v352_v40 = vld [vmem:[%s4152_s14 + $0x2e8] sm:$0xff] }
  0x8b   : > { %v3114_v27 = vcombine.low %v311_v4, %v319_v5 }
  0x8c   : > { %3591 = vmatpush3.bf16.msra.mxu0 %v3950_v8  ;;  %v320_v8 = vld [vmem:[%s4152_s14 + $0x1e8] sm:$0xff] }
  0x8d   : > { %3655 = vmatpush3.bf16.msra.mxu1 %v3952_v9  ;;  %3704 = vmatprep.subr.bf16.mxu0 %v3953_v10  ;;  %v3968_v9 = vld [vmem:[%s4981_s1 + $0x3a0] sm:$0xff]   ;;  %v3969_v10 = vld [vmem:[%s4981_s1 + $0x358] sm:$0xff]  }
  0x8e   : > { %2310 = vmatmul.mubr.bf16.gmra.mxu0 %v3126_v11  ;;  %3768 = vmatprep.subr.bf16.mxu1 %v3955_v12  ;;  %v3098_v11 = vcombine.low %v295_v54, %v303_v55  ;;  %v3971_v12 = vld [vmem:[%s4981_s1 + $0x3d8] sm:$0xff]   ;;  %v375_v54 = vld [vmem:[%s4152_s14 + $0x3a0] sm:$0xff] }
  0x8f   : > { %2407 = vmatmul.mubr.bf16.gmra.mxu1 %v3128_v13  ;;  %2317 = vmatprep.mubr.bf16.mxu0 %v3143_v14  ;;  %v3100_v13 = vcombine.low %v296_v57, %v304_v58  ;;  %v3115_v14 = vcombine.high %v311_v4, %v319_v5  ;;  %v383_v55 = vld [vmem:[%s4152_s14 + $0x3e0] sm:$0xff]  ;;  %v384_v57 = vld [vmem:[%s4152_s14 + $0x3e8] sm:$0xff] }
  0x90   : > { %2414 = vmatprep.mubr.bf16.mxu1 %v3145_v15  ;;  %v3117_v15 = vcombine.high %v312_v6, %v320_v8 }
  0x96   : > { %2318 = vmatmul.mubr.bf16.gmra.mxu0 %v3142_v20  ;;  %v327_v20 = vld [vmem:[%s4152_s14 + $0x220] sm:$0xff] }
  0x97   : > { %2415 = vmatmul.mubr.bf16.gmra.mxu1 %v3144_v21  ;;  %2325 = vmatprep.mubr.bf16.mxu0 %v3159_v22  ;;  %v335_v21 = vld [vmem:[%s4152_s14 + $0x260] sm:$0xff]  ;;  %v328_v22 = vld [vmem:[%s4152_s14 + $0x228] sm:$0xff] }
  0x98   : > { %2422 = vmatprep.mubr.bf16.mxu1 %v3161_v23  ;;  %v3974_v23 = vld [vmem:[%s4981_s1 + $0x310] sm:$0xff]   ;;  %v3132_v43 = vcombine.low %v328_v22, %v336_v24 }
  0x9e   : > { %2326 = vmatmul.mubr.bf16.gmra.mxu0 %v3158_v28  ;;  %v3979_v28 = vld [vmem:[%s4981_s1 + $0x3c8] sm:$0xff]  }
  0x9f   : > { %2423 = vmatmul.mubr.bf16.gmra.mxu1 %v3160_v29  ;;  %2333 = vmatprep.mubr.bf16.mxu0 %v3175_v30  ;;  %v3116_v29 = vcombine.low %v312_v6, %v320_v8  ;;  %v3131_v30 = vcombine.high %v327_v20, %v335_v21  ;;  %v281_v6 = vld [vmem:[%s4152_s14 + $0xb0] sm:$0xff]  ;;  %v282_v8 = vld [vmem:[%s4152_s14 + $0xb8] sm:$0xff] }
  0xa0   : > { %2430 = vmatprep.mubr.bf16.mxu1 %v3177_v31  ;;  %v3133_v31 = vcombine.high %v328_v22, %v336_v24  ;;  %v306_v22 = vld [vmem:[%s4152_s14 + $0x178] sm:$0xff] }
  0xa6   : > { %2334 = vmatmul.mubr.bf16.gmra.mxu0 %v3174_v36  ;;  %v343_v36 = vld [vmem:[%s4152_s14 + $0x2a0] sm:$0xff] }
  0xa7   : > { %2431 = vmatmul.mubr.bf16.gmra.mxu1 %v3176_v37  ;;  %2471 = vmatprep.mubr.bf16.mxu0 %v3067_v38  ;;  %v351_v37 = vld [vmem:[%s4152_s14 + $0x2e0] sm:$0xff] }
  0xa8   : > { %2568 = vmatprep.mubr.bf16.mxu1 %v3069_v39  ;;  %v3982_v38 = vld [vmem:[%s4981_s1 + $0x300] sm:$0xff]   ;;  %v344_v39 = vld [vmem:[%s4152_s14 + $0x2a8] sm:$0xff]  ;;  %v3147_v44 = vcombine.high %v343_v36, %v351_v37 }
  0xae   : > { %2472 = vmatmul.mubr.bf16.vlgmr.msra.gmra.mxu0 %v3066_v42  ;;  %v3130_v42 = vcombine.low %v327_v20, %v335_v21  ;;  %v298_v21 = vld [vmem:[%s4152_s14 + $0x138] sm:$0xff] }
  0xaf   : > { %2569 = vmatmul.mubr.bf16.vlgmr.msra.gmra.mxu1 %v3068_v45  ;;  %3705 = vmatpush3.bf16.msra.mxu0 %v3954_v46  ;;  %v3149_v45 = vcombine.high %v344_v39, %v352_v40  ;;  %v359_v46 = vld [vmem:[%s4152_s14 + $0x320] sm:$0xff] }
  0xb0   : > { %3769 = vmatpush3.bf16.msra.mxu1 %v3956_v47  ;;  %2479 = vmatprep.mubr.bf16.mxu0 %v3083_v48  ;;  %v367_v47 = vld [vmem:[%s4152_s14 + $0x360] sm:$0xff]  ;;  %v360_v48 = vld [vmem:[%s4152_s14 + $0x328] sm:$0xff] }
  0xb1   : > { %2576 = vmatprep.mubr.bf16.mxu1 %v3085_v49  ;;  %3706 = vmatprep.subr.bf16.mxu0 %v3957_v50  ;;  %v368_v49 = vld [vmem:[%s4152_s14 + $0x368] sm:$0xff]  ;;  %v3146_v50 = vcombine.low %v343_v36, %v351_v37  ;;  %v3162_v58 = vcombine.low %v359_v46, %v367_v47 }
  0xb2   : > { %3770 = vmatprep.subr.bf16.mxu1 %v3959_v51  ;;  %v3148_v51 = vcombine.low %v344_v39, %v352_v40  ;;  %v313_v39 = vld [vmem:[%s4152_s14 + $0x1b0] sm:$0xff] }
  0xb3   : > { %3707 = vmatpush3.bf16.msra.mxu0 %v3958_v52  ;;  %v3163_v52 = vcombine.high %v359_v46, %v367_v47  ;;  %v321_v40 = vld [vmem:[%s4152_s14 + $0x1f0] sm:$0xff] }
  0xb4   : > { %3771 = vmatpush3.bf16.msra.mxu1 %v3960_v53  ;;  %3708 = vmatprep.subr.bf16.mxu0 %v3961_v56  ;;  %v3165_v53 = vcombine.high %v360_v48, %v368_v49  ;;  %v376_v56 = vld [vmem:[%s4152_s14 + $0x3a8] sm:$0xff] }
  0xb5   : > { %3772 = vmatprep.subr.bf16.mxu1 %v3963_v59  ;;  %v3164_v59 = vcombine.low %v360_v48, %v368_v49  ;;  %v3104_v49 = vcombine.low %v298_v21, %v306_v22 }
  0xb6   : > { %2480 = vmatmul.mubr.bf16.gmra.mxu0 %v3082_v60  ;;  %v3179_v60 = vcombine.high %v375_v54, %v383_v55 }
  0xb7   : > { %2577 = vmatmul.mubr.bf16.gmra.mxu1 %v3084_v61  ;;  %2487 = vmatprep.mubr.bf16.mxu0 %v3099_v62  ;;  %v3181_v61 = vcombine.high %v376_v56, %v384_v57  ;;  %v265_v62 = vld [vmem:[%s4152_s14 + $0x30] sm:$0xff] }
  0xb8   : > { %2584 = vmatprep.mubr.bf16.mxu1 %v3101_v63  ;;  %3709 = vmatpush3.bf16.msra.mxu0 %v3962_v0  ;;  %v273_v63 = vld [vmem:[%s4152_s14 + $0x70] sm:$0xff]  ;;  %v266_v0 = vld [vmem:[%s4152_s14 + $0x38] sm:$0xff] }
  0xb9   : > { %3773 = vmatpush3.bf16.msra.mxu1 %v3964_v1  ;;  %3710 = vmatprep.subr.bf16.mxu0 %v3965_v2  ;;  %v274_v1 = vld [vmem:[%s4152_s14 + $0x78] sm:$0xff]  ;;  %v3178_v2 = vcombine.low %v375_v54, %v383_v55  ;;  %v3071_v4 = vcombine.high %v265_v62, %v273_v63 }
  0xba   : > { %3774 = vmatprep.subr.bf16.mxu1 %v3967_v3  ;;  %v3180_v3 = vcombine.low %v376_v56, %v384_v57  ;;  %v3073_v5 = vcombine.high %v266_v0, %v274_v1 }
  0xbc   : > { %3711 = vmatpush3.bf16.msra.mxu0 %v3966_v7  ;;  %v289_v7 = vld [vmem:[%s4152_s14 + $0xf0] sm:$0xff] }
  0xbd   : > { %3775 = vmatpush3.bf16.msra.mxu1 %v3968_v9  ;;  %3712 = vmatprep.subr.bf16.mxu0 %v3969_v10  ;;  %v290_v9 = vld [vmem:[%s4152_s14 + $0xf8] sm:$0xff]  ;;  %v3070_v10 = vcombine.low %v265_v62, %v273_v63  ;;  %v337_v62 = vld [vmem:[%s4152_s14 + $0x270] sm:$0xff] }
  0xbe   : > { %2488 = vmatmul.mubr.bf16.gmra.mxu0 %v3098_v11  ;;  %3776 = vmatprep.subr.bf16.mxu1 %v3971_v12  ;;  %v3072_v11 = vcombine.low %v266_v0, %v274_v1  ;;  %v3087_v12 = vcombine.high %v281_v6, %v289_v7  ;;  %v330_v1 = vld [vmem:[%s4152_s14 + $0x238] sm:$0xff] }
  0xbf   : > { %2585 = vmatmul.mubr.bf16.gmra.mxu1 %v3100_v13  ;;  %2495 = vmatprep.mubr.bf16.mxu0 %v3115_v14  ;;  %v3089_v13 = vcombine.high %v282_v8, %v290_v9 }
  0xc0   : > { %2592 = vmatprep.mubr.bf16.mxu1 %v3117_v15  ;;  %3713 = vmatpush3.bf16.msra.mxu0 %v3970_v16 }
  0xc1   : > { %3777 = vmatpush3.bf16.msra.mxu1 %v3972_v17  ;;  %3714 = vmatprep.subr.bf16.mxu0 %v3973_v18  ;;  %v297_v17 = vld [vmem:[%s4152_s14 + $0x130] sm:$0xff] }
  0xc2   : > { %3778 = vmatprep.subr.bf16.mxu1 %v3975_v19  ;;  %v305_v18 = vld [vmem:[%s4152_s14 + $0x170] sm:$0xff] }
  0xc3   : > { %v3102_v47 = vcombine.low %v297_v17, %v305_v18 }
  0xc4   : > { %3715 = vmatpush3.bf16.msra.mxu0 %v3974_v23 }
  0xc5   : > { %3779 = vmatpush3.bf16.msra.mxu1 %v3976_v25  ;;  %3716 = vmatprep.subr.bf16.mxu0 %v3977_v26  ;;  %v3086_v25 = vcombine.low %v281_v6, %v289_v7 }
  0xc6   : > { %2496 = vmatmul.mubr.bf16.gmra.mxu0 %v3114_v27  ;;  %3780 = vmatprep.subr.bf16.mxu1 %v3979_v28  ;;  %v3088_v27 = vcombine.low %v282_v8, %v290_v9  ;;  %v3103_v28 = vcombine.high %v297_v17, %v305_v18 }
  0xc7   : > { %2593 = vmatmul.mubr.bf16.gmra.mxu1 %v3116_v29  ;;  %2503 = vmatprep.mubr.bf16.mxu0 %v3131_v30 }
  0xc8   : > { %2600 = vmatprep.mubr.bf16.mxu1 %v3133_v31  ;;  %3717 = vmatpush3.bf16.msra.mxu0 %v3978_v32  ;;  %v3105_v31 = vcombine.high %v298_v21, %v306_v22 }
  0xc9   : > { %3781 = vmatpush3.bf16.msra.mxu1 %v3980_v33  ;;  %3718 = vmatprep.subr.bf16.mxu0 %v3981_v34 }
  0xca   : > { %3782 = vmatprep.subr.bf16.mxu1 %v3983_v35 }
  0xcc   : > { %3719 = vmatpush3.bf16.msra.mxu0 %v3982_v38 }
  0xcd   : > { %3783 = vmatpush3.bf16.msra.mxu1 %v3984_v41 }
  0xce   : > { %2504 = vmatmul.mubr.bf16.gmra.mxu0 %v3130_v42 }
  0xcf   : > { %2601 = vmatmul.mubr.bf16.gmra.mxu1 %v3132_v43  ;;  %2511 = vmatprep.mubr.bf16.mxu0 %v3147_v44  ;;  %v314_v43 = vld [vmem:[%s4152_s14 + $0x1b8] sm:$0xff] }
  0xd0   : > { %2608 = vmatprep.mubr.bf16.mxu1 %v3149_v45  ;;  %v322_v44 = vld [vmem:[%s4152_s14 + $0x1f8] sm:$0xff] }
  0xd1   : > { %v3120_v7 = vcombine.low %v314_v43, %v322_v44 }
  0xd6   : > { %2512 = vmatmul.mubr.bf16.gmra.mxu0 %v3146_v50  ;;  %v3119_v50 = vcombine.high %v313_v39, %v321_v40 }
  0xd7   : > { %2609 = vmatmul.mubr.bf16.gmra.mxu1 %v3148_v51  ;;  %2519 = vmatprep.mubr.bf16.mxu0 %v3163_v52 }
  0xd8   : > { %2616 = vmatprep.mubr.bf16.mxu1 %v3165_v53  ;;  %v3121_v53 = vcombine.high %v314_v43, %v322_v44  ;;  %v361_v43 = vld [vmem:[%s4152_s14 + $0x330] sm:$0xff] }
  0xd9   : > { %v369_v44 = vld [vmem:[%s4152_s14 + $0x370] sm:$0xff] }
  0xde   : > { %2520 = vmatmul.mubr.bf16.gmra.mxu0 %v3162_v58 }
  0xdf   : > { %2617 = vmatmul.mubr.bf16.gmra.mxu1 %v3164_v59  ;;  %2527 = vmatprep.mubr.bf16.mxu0 %v3179_v60 }
  0xe0   : > { %2624 = vmatprep.mubr.bf16.mxu1 %v3181_v61  ;;  %v329_v61 = vld [vmem:[%s4152_s14 + $0x230] sm:$0xff] }
  0xe1   : > { %v3135_v8 = vcombine.high %v329_v61, %v337_v62 }
  0xe6   : > { %2528 = vmatmul.mubr.bf16.gmra.mxu0 %v3178_v2  ;;  %v338_v2 = vld [vmem:[%s4152_s14 + $0x278] sm:$0xff] }
  0xe7   : > { %2625 = vmatmul.mubr.bf16.gmra.mxu1 %v3180_v3  ;;  %2665 = vmatprep.mubr.bf16.mxu0 %v3071_v4 }
  0xe8   : > { %2762 = vmatprep.mubr.bf16.mxu1 %v3073_v5  ;;  %v3118_v5 = vcombine.low %v313_v39, %v321_v40 }
  0xee   : > { %v3336_v14 = vpop.f32.mrf.mxu0  ;;  %2666 = vmatmul.mubr.bf16.vlgmr.msra.gmra.mxu0 %v3070_v10 }
  0xef   : > { %v3400_v15 = vpop.f32.mrf.mxu1  ;;  %2763 = vmatmul.mubr.bf16.vlgmr.msra.gmra.mxu1 %v3072_v11  ;;  %2673 = vmatprep.mubr.bf16.mxu0 %v3087_v12  ;;  %v3137_v11 = vcombine.high %v330_v1, %v338_v2 }
  0xf0   : > { %v3337_v16 = vpop.f32.mrf.mxu0  ;;  %2770 = vmatprep.mubr.bf16.mxu1 %v3089_v13 }
  0xf1   : > { %v3338_v19 = vadd.f32 %v3337_v16, %v3336_v14  ;;  %v3401_v20 = vpop.f32.mrf.mxu1 }
  0xf2   : > { %v3402_v23 = vadd.f32 %v3401_v20, %v3400_v15  ;;  %v3339_v24 = vpop.f32.mrf.mxu0  ;;  %v353_v20 = vld [vmem:[%s4152_s14 + $0x2f0] sm:$0xff] }
  0xf3   : > { %v3403_v26 = vpop.f32.mrf.mxu1 }
  0xf4   : > { %v4556_v29 = vadd.f32 %v3402_v23, %v3338_v19  ;;  %v3340_v30 = vpop.f32.mrf.mxu0  ;;  %v345_v19 = vld [vmem:[%s4152_s14 + $0x2b0] sm:$0xff]  ;;  %v346_v23 = vld [vmem:[%s4152_s14 + $0x2b8] sm:$0xff] }
  0xf5   : > { %v3341_v32 = vadd.f32 %v3340_v30, %v3339_v24  ;;  %v3404_v33 = vpop.f32.mrf.mxu1  ;;  %v354_v24 = vld [vmem:[%s4152_s14 + $0x2f8] sm:$0xff]  ;;  %v3136_v30 = vcombine.low %v330_v1, %v338_v2 }
  0xf6   : > { %v3405_v34 = vadd.f32 %v3404_v33, %v3403_v26  ;;  %v3342_v35 = vpop.f32.mrf.mxu0  ;;  %2674 = vmatmul.mubr.bf16.gmra.mxu0 %v3086_v25 }
  0xf7   : > { %v3406_v36 = vpop.f32.mrf.mxu1  ;;  %2771 = vmatmul.mubr.bf16.gmra.mxu1 %v3088_v27  ;;  %2681 = vmatprep.mubr.bf16.mxu0 %v3103_v28  ;;  %v3134_v27 = vcombine.low %v329_v61, %v337_v62 }
  0xf8   : > { %v4558_v37 = vadd.f32 %v3405_v34, %v3341_v32  ;;  %v3343_v38 = vpop.f32.mrf.mxu0  ;;  %2778 = vmatprep.mubr.bf16.mxu1 %v3105_v31  ;;  %v3151_v31 = vcombine.high %v345_v19, %v353_v20  ;;  %v3153_v34 = vcombine.high %v346_v23, %v354_v24 }
  0xf9   : > { %v3344_v41 = vadd.f32 %v3343_v38, %v3342_v35  ;;  %v3407_v42 = vpop.f32.mrf.mxu1 }
  0xfa   : > { %v3408_v45 = vadd.f32 %v3407_v42, %v3406_v36  ;;  %v3345_v46 = vpop.f32.mrf.mxu0 }
  0xfb   : > { %v3409_v48 = vpop.f32.mrf.mxu1 }
  0xfc   : > { %v4564_v51 = vadd.f32 %v3408_v45, %v3344_v41  ;;  %v3346_v52 = vpop.f32.mrf.mxu0 }
  0xfd   : > { %v3347_v54 = vadd.f32 %v3346_v52, %v3345_v46  ;;  %v3410_v55 = vpop.f32.mrf.mxu1  ;;  %v3150_v52 = vcombine.low %v345_v19, %v353_v20 }
  0xfe   : > { %v3411_v56 = vadd.f32 %v3410_v55, %v3409_v48  ;;  %v3348_v57 = vpop.f32.mrf.mxu0  ;;  %2682 = vmatmul.mubr.bf16.gmra.mxu0 %v3102_v47  ;;  %v362_v47 = vld [vmem:[%s4152_s14 + $0x338] sm:$0xff]  ;;  %v3167_v55 = vcombine.high %v361_v43, %v369_v44 }
  0xff   : > { %v3412_v58 = vpop.f32.mrf.mxu1  ;;  %2779 = vmatmul.mubr.bf16.gmra.mxu1 %v3104_v49  ;;  %2689 = vmatprep.mubr.bf16.mxu0 %v3119_v50  ;;  %v370_v48 = vld [vmem:[%s4152_s14 + $0x378] sm:$0xff] }
 0x100   : > { %v4566_v59 = vadd.f32 %v3411_v56, %v3347_v54  ;;  %v3349_v60 = vpop.f32.mrf.mxu0  ;;  %2786 = vmatprep.mubr.bf16.mxu1 %v3121_v53  ;;  %v3152_v54 = vcombine.low %v346_v23, %v354_v24 }
 0x101   : > { %v3350_v63 = vadd.f32 %v3349_v60, %v3348_v57  ;;  %v3413_v0 = vpop.f32.mrf.mxu1 }
 0x102   : > { %v3414_v3 = vadd.f32 %v3413_v0, %v3412_v58  ;;  %v3351_v4 = vpop.f32.mrf.mxu0  ;;  %v3169_v58 = vcombine.high %v362_v47, %v370_v48 }
 0x103   : > { %v3415_v6 = vpop.f32.mrf.mxu1 }
 0x104   : > { %v4572_v9 = vadd.f32 %v3414_v3, %v3350_v63  ;;  %v3352_v10 = vpop.f32.mrf.mxu0  ;;  %v377_v3 = vld [vmem:[%s4152_s14 + $0x3b0] sm:$0xff] }
 0x105   : > { %v3353_v12 = vadd.f32 %v3352_v10, %v3351_v4  ;;  %v3416_v13 = vpop.f32.mrf.mxu1  ;;  %v385_v4 = vld [vmem:[%s4152_s14 + $0x3f0] sm:$0xff] }
 0x106   : > { %v3417_v14 = vadd.f32 %v3416_v13, %v3415_v6  ;;  %v3354_v15 = vpop.f32.mrf.mxu0  ;;  %2690 = vmatmul.mubr.bf16.gmra.mxu0 %v3118_v5 }
 0x107   : > { %v3418_v16 = vpop.f32.mrf.mxu1  ;;  %2787 = vmatmul.mubr.bf16.gmra.mxu1 %v3120_v7  ;;  %2697 = vmatprep.mubr.bf16.mxu0 %v3135_v8  ;;  %v378_v7 = vld [vmem:[%s4152_s14 + $0x3b8] sm:$0xff] }
 0x108   : > { %v4574_v17 = vadd.f32 %v3417_v14, %v3353_v12  ;;  %v3355_v18 = vpop.f32.mrf.mxu0  ;;  %2794 = vmatprep.mubr.bf16.mxu1 %v3137_v11  ;;  %v386_v8 = vld [vmem:[%s4152_s14 + $0x3f8] sm:$0xff]  ;;  %v3166_v12 = vcombine.low %v361_v43, %v369_v44  ;;  %v3168_v14 = vcombine.low %v362_v47, %v370_v48  ;;  %s3057_s14 = sshll.u32 %s5046_s29, 3 }
 0x109   : > { %v3356_v21 = vadd.f32 %v3355_v18, %v3354_v15  ;;  %v3419_v22 = vpop.f32.mrf.mxu1  ;;  %v3183_v15 = vcombine.high %v377_v3, %v385_v4  ;;  %v3185_v19 = vcombine.high %v378_v7, %v386_v8  ;;  %s4788_s12 = scalar_lea.vmem %s4982_s2, %s3057_s14 }
 0x10a   : > { %v3420_v25 = vadd.f32 %v3419_v22, %v3418_v16  ;;  %v3357_v26 = vpop.f32.mrf.mxu0 }
 0x10b   : > { %v3421_v28 = vpop.f32.mrf.mxu1 }
 0x10c   : > { %v4580_v32 = vadd.f32 %v3420_v25, %v3356_v21  ;;  %v3358_v33 = vpop.f32.mrf.mxu0 }
 0x10d   : > { %v3359_v35 = vadd.f32 %v3358_v33, %v3357_v26  ;;  %v3422_v36 = vpop.f32.mrf.mxu1  ;;  %v3182_v33 = vcombine.low %v377_v3, %v385_v4 }
 0x10e   : > { %v3423_v38 = vadd.f32 %v3422_v36, %v3421_v28  ;;  %v3360_v39 = vpop.f32.mrf.mxu0  ;;  %2698 = vmatmul.mubr.bf16.gmra.mxu0 %v3134_v27 }
 0x10f   : > { %v3424_v40 = vpop.f32.mrf.mxu1  ;;  %2795 = vmatmul.mubr.bf16.gmra.mxu1 %v3136_v30  ;;  %2705 = vmatprep.mubr.bf16.mxu0 %v3151_v31 }
 0x110   : > { %v4582_v41 = vadd.f32 %v3423_v38, %v3359_v35  ;;  %v3361_v42 = vpop.f32.mrf.mxu0  ;;  %2802 = vmatprep.mubr.bf16.mxu1 %v3153_v34  ;;  %v3184_v35 = vcombine.low %v378_v7, %v386_v8 }
 0x111   : > { %v3362_v45 = vadd.f32 %v3361_v42, %v3360_v39  ;;  %v3425_v46 = vpop.f32.mrf.mxu1 }
 0x112   : > { %v3426_v49 = vadd.f32 %v3425_v46, %v3424_v40  ;;  %v3363_v50 = vpop.f32.mrf.mxu0 }
 0x113   : > { %v3427_v53 = vpop.f32.mrf.mxu1 }
 0x114   : > { %v4588_v56 = vadd.f32 %v3426_v49, %v3362_v45  ;;  %v3364_v57 = vpop.f32.mrf.mxu0 }
 0x115   : > { %v3365_v60 = vadd.f32 %v3364_v57, %v3363_v50  ;;  %v3428_v61 = vpop.f32.mrf.mxu1 }
 0x116   : > { %v3429_v62 = vadd.f32 %v3428_v61, %v3427_v53  ;;  %v3366_v63 = vpop.f32.mrf.mxu0  ;;  %2706 = vmatmul.mubr.bf16.gmra.mxu0 %v3150_v52 }
 0x117   : > { %v3430_v0 = vpop.f32.mrf.mxu1  ;;  %2803 = vmatmul.mubr.bf16.gmra.mxu1 %v3152_v54  ;;  %2713 = vmatprep.mubr.bf16.mxu0 %v3167_v55 }
 0x118   : > { %v4590_v1 = vadd.f32 %v3429_v62, %v3365_v60  ;;  %v3367_v2 = vpop.f32.mrf.mxu0  ;;  %2810 = vmatprep.mubr.bf16.mxu1 %v3169_v58 }
 0x119   : > { %v3368_v5 = vadd.f32 %v3367_v2, %v3366_v63  ;;  %v3431_v6 = vpop.f32.mrf.mxu1 }
 0x11a   : > { %v3432_v10 = vadd.f32 %v3431_v6, %v3430_v0  ;;  %v3369_v11 = vpop.f32.mrf.mxu0 }
 0x11b   : > { %v3433_v13 = vpop.f32.mrf.mxu1 }
 0x11c   : > { %v4596_v16 = vadd.f32 %v3432_v10, %v3368_v5  ;;  %v3370_v18 = vpop.f32.mrf.mxu0 }
 0x11d   : > { %v3371_v20 = vadd.f32 %v3370_v18, %v3369_v11  ;;  %v3434_v21 = vpop.f32.mrf.mxu1 }
 0x11e   : > { %v3435_v22 = vadd.f32 %v3434_v21, %v3433_v13  ;;  %v3372_v23 = vpop.f32.mrf.mxu0  ;;  %2714 = vmatmul.mubr.bf16.gmra.mxu0 %v3166_v12 }
 0x11f   : > { %v3436_v24 = vpop.f32.mrf.mxu1  ;;  %2811 = vmatmul.mubr.bf16.gmra.mxu1 %v3168_v14  ;;  %2721 = vmatprep.mubr.bf16.mxu0 %v3183_v15 }
 0x120   : > { %v4598_v25 = vadd.f32 %v3435_v22, %v3371_v20  ;;  %v3373_v26 = vpop.f32.mrf.mxu0  ;;  %2818 = vmatprep.mubr.bf16.mxu1 %v3185_v19 }
 0x121   : > { %v3374_v27 = vadd.f32 %v3373_v26, %v3372_v23  ;;  %v3437_v28 = vpop.f32.mrf.mxu1 }
 0x122   : > { %v3438_v30 = vadd.f32 %v3437_v28, %v3436_v24  ;;  %v3375_v31 = vpop.f32.mrf.mxu0 }
 0x123   : > { %v3439_v34 = vpop.f32.mrf.mxu1 }
 0x124   : > { %v4600_v36 = vadd.f32 %v3438_v30, %v3374_v27  ;;  %v3376_v38 = vpop.f32.mrf.mxu0 }
 0x125   : > { %v3377_v39 = vadd.f32 %v3376_v38, %v3375_v31  ;;  %v3440_v40 = vpop.f32.mrf.mxu1 }
 0x126   : > { %v3441_v42 = vadd.f32 %v3440_v40, %v3439_v34  ;;  %v3378_v43 = vpop.f32.mrf.mxu0  ;;  %2722 = vmatmul.mubr.bf16.gmra.mxu0 %v3182_v33 }
 0x127   : > { %v3442_v44 = vpop.f32.mrf.mxu1  ;;  %2819 = vmatmul.mubr.bf16.gmra.mxu1 %v3184_v35 }
 0x128   : > { %v4602_v45 = vadd.f32 %v3441_v42, %v3377_v39  ;;  %v3379_v46 = vpop.f32.mrf.mxu0 }
 0x129   : > { %v3380_v47 = vadd.f32 %v3379_v46, %v3378_v43  ;;  %v3443_v48 = vpop.f32.mrf.mxu1 }
 0x12a   : > { %v3444_v49 = vadd.f32 %v3443_v48, %v3442_v44  ;;  %v3381_v50 = vpop.f32.mrf.mxu0 }
 0x12b   : > { %v3445_v52 = vpop.f32.mrf.mxu1 }
 0x12c   : > { %v4604_v53 = vadd.f32 %v3444_v49, %v3380_v47  ;;  %v3382_v54 = vpop.f32.mrf.mxu0 }
 0x12d   : > { %v3383_v55 = vadd.f32 %v3382_v54, %v3381_v50  ;;  %v3446_v57 = vpop.f32.mrf.mxu1 }
 0x12e   : > { %v3447_v58 = vadd.f32 %v3446_v57, %v3445_v52  ;;  %v3464_v60 = vpop.f32.mrf.mxu0 }
 0x12f   : > { %v3528_v61 = vpop.f32.mrf.mxu1 }
 0x130   : > { %v4606_v62 = vadd.f32 %v3447_v58, %v3383_v55  ;;  %v3465_v63 = vpop.f32.mrf.mxu0 }
 0x131   : > { %v3466_v0 = vadd.f32 %v3465_v63, %v3464_v60  ;;  %v3529_v2 = vpop.f32.mrf.mxu1 }
 0x132   : > { %v3530_v3 = vadd.f32 %v3529_v2, %v3528_v61  ;;  %v3467_v4 = vpop.f32.mrf.mxu0 }
 0x133   : > { %v2280_v5 = vadd.f32 %v3466_v0, %v4556_v29  ;;  %v3531_v6 = vpop.f32.mrf.mxu1 }
 0x134   : > { %v3468_v7 = vpop.f32.mrf.mxu0 }
 0x135   : > { %v4609_v8 = vadd.f32 %v3530_v3, %v2280_v5  ;;  %v3469_v10 = vadd.f32 %v3468_v7, %v3467_v4  ;;  %v3532_v11 = vpop.f32.mrf.mxu1 }
 0x136   : > { %v3533_v12 = vadd.f32 %v3532_v11, %v3531_v6  ;;  %v3470_v13 = vpop.f32.mrf.mxu0 }
 0x137   : > { %v2283_v14 = vadd.f32 %v3469_v10, %v4558_v37  ;;  %v3534_v15 = vpop.f32.mrf.mxu1 }
 0x138   : > { %v3471_v18 = vpop.f32.mrf.mxu0 }
 0x139   : > { %v4612_v19 = vadd.f32 %v3533_v12, %v2283_v14  ;;  %v3472_v20 = vadd.f32 %v3471_v18, %v3470_v13  ;;  %v3535_v21 = vpop.f32.mrf.mxu1 }
 0x13a   : > { %v3536_v22 = vadd.f32 %v3535_v21, %v3534_v15  ;;  %v3473_v23 = vpop.f32.mrf.mxu0 }
 0x13b   : > { %v2288_v29 = vadd.f32 %v3472_v20, %v4564_v51  ;;  %v3537_v24 = vpop.f32.mrf.mxu1 }
 0x13c   : > { %v3474_v26 = vpop.f32.mrf.mxu0 }
 0x13d   : > { %v4615_v27 = vadd.f32 %v3536_v22, %v2288_v29  ;;  %v3475_v28 = vadd.f32 %v3474_v26, %v3473_v23  ;;  %v3538_v30 = vpop.f32.mrf.mxu1 }
 0x13e   : > { %v3539_v31 = vadd.f32 %v3538_v30, %v3537_v24  ;;  %v3476_v33 = vpop.f32.mrf.mxu0 }
 0x13f   : > { %v2291_v37 = vadd.f32 %v3475_v28, %v4566_v59  ;;  %v3540_v34 = vpop.f32.mrf.mxu1 }
 0x140   : > { %v3477_v35 = vpop.f32.mrf.mxu0 }
 0x141   : > { %v4618_v38 = vadd.f32 %v3539_v31, %v2291_v37  ;;  %v3478_v39 = vadd.f32 %v3477_v35, %v3476_v33  ;;  %v3541_v40 = vpop.f32.mrf.mxu1 }
 0x142   : > { %v3542_v42 = vadd.f32 %v3541_v40, %v3540_v34  ;;  %v3479_v43 = vpop.f32.mrf.mxu0 }
 0x143   : > { %v2296_v51 = vadd.f32 %v3478_v39, %v4572_v9  ;;  %v3543_v44 = vpop.f32.mrf.mxu1 }
 0x144   : > { %v3480_v46 = vpop.f32.mrf.mxu0 }
 0x145   : > { %v4621_v47 = vadd.f32 %v3542_v42, %v2296_v51  ;;  %v3481_v48 = vadd.f32 %v3480_v46, %v3479_v43  ;;  %v3544_v49 = vpop.f32.mrf.mxu1 }
 0x146   : > { %v3545_v50 = vadd.f32 %v3544_v49, %v3543_v44  ;;  %v3482_v52 = vpop.f32.mrf.mxu0 }
 0x147   : > { %v2299_v59 = vadd.f32 %v3481_v48, %v4574_v17  ;;  %v3546_v54 = vpop.f32.mrf.mxu1 }
 0x148   : > { %v3483_v55 = vpop.f32.mrf.mxu0 }
 0x149   : > { %v4624_v57 = vadd.f32 %v3545_v50, %v2299_v59  ;;  %v3484_v58 = vadd.f32 %v3483_v55, %v3482_v52  ;;  %v3547_v60 = vpop.f32.mrf.mxu1 }
 0x14a   : > { %v3548_v61 = vadd.f32 %v3547_v60, %v3546_v54  ;;  %v3485_v63 = vpop.f32.mrf.mxu0 }
 0x14b   : > { %v2304_v9 = vadd.f32 %v3484_v58, %v4580_v32  ;;  %v3549_v0 = vpop.f32.mrf.mxu1 }
 0x14c   : > { %v3486_v2 = vpop.f32.mrf.mxu0 }
 0x14d   : > { %v4627_v3 = vadd.f32 %v3548_v61, %v2304_v9  ;;  %v3487_v4 = vadd.f32 %v3486_v2, %v3485_v63  ;;  %v3550_v5 = vpop.f32.mrf.mxu1 }
 0x14e   : > { %v3551_v6 = vadd.f32 %v3550_v5, %v3549_v0  ;;  %v3488_v7 = vpop.f32.mrf.mxu0 }
 0x14f   : > { %v2307_v17 = vadd.f32 %v3487_v4, %v4582_v41  ;;  %v3552_v10 = vpop.f32.mrf.mxu1 }
 0x150   : > { %v3489_v11 = vpop.f32.mrf.mxu0 }
 0x151   : > { %v4630_v12 = vadd.f32 %v3551_v6, %v2307_v17  ;;  %v3490_v13 = vadd.f32 %v3489_v11, %v3488_v7  ;;  %v3553_v14 = vpop.f32.mrf.mxu1 }
 0x152   : > { %v3554_v15 = vadd.f32 %v3553_v14, %v3552_v10  ;;  %v3491_v18 = vpop.f32.mrf.mxu0 }
 0x153   : > { %v2312_v32 = vadd.f32 %v3490_v13, %v4588_v56  ;;  %v3555_v20 = vpop.f32.mrf.mxu1 }
 0x154   : > { %v3492_v21 = vpop.f32.mrf.mxu0 }
 0x155   : > { %v4633_v22 = vadd.f32 %v3554_v15, %v2312_v32  ;;  %v3493_v23 = vadd.f32 %v3492_v21, %v3491_v18  ;;  %v3556_v29 = vpop.f32.mrf.mxu1 }
 0x156   : > { %v3557_v24 = vadd.f32 %v3556_v29, %v3555_v20  ;;  %v3494_v26 = vpop.f32.mrf.mxu0 }
 0x157   : > { %v2315_v41 = vadd.f32 %v3493_v23, %v4590_v1  ;;  %v3558_v28 = vpop.f32.mrf.mxu1 }
 0x158   : > { %v3495_v30 = vpop.f32.mrf.mxu0 }
 0x159   : > { %v4636_v31 = vadd.f32 %v3557_v24, %v2315_v41  ;;  %v3496_v33 = vadd.f32 %v3495_v30, %v3494_v26  ;;  %v3559_v37 = vpop.f32.mrf.mxu1 }
 0x15a   : > { %v3560_v34 = vadd.f32 %v3559_v37, %v3558_v28  ;;  %v3497_v35 = vpop.f32.mrf.mxu0 }
 0x15b   : > { %v2320_v56 = vadd.f32 %v3496_v33, %v4596_v16  ;;  %v3561_v39 = vpop.f32.mrf.mxu1 }
 0x15c   : > { %v3498_v40 = vpop.f32.mrf.mxu0 }
 0x15d   : > { %v4639_v42 = vadd.f32 %v3560_v34, %v2320_v56  ;;  %v3499_v43 = vadd.f32 %v3498_v40, %v3497_v35  ;;  %v3562_v51 = vpop.f32.mrf.mxu1 }
 0x15e   : > { %v3563_v44 = vadd.f32 %v3562_v51, %v3561_v39  ;;  %v3500_v46 = vpop.f32.mrf.mxu0 }
 0x15f   : > { %4985 = vst [vmem:[#allocation2_spill] sm:$0xff] %v4639_v42  ;;  %v2323_v1 = vadd.f32 %v3499_v43, %v4598_v25  ;;  %v3564_v48 = vpop.f32.mrf.mxu1 }
 0x160   : > { %v3501_v49 = vpop.f32.mrf.mxu0 }
 0x161   : > { %v4642_v50 = vadd.f32 %v3563_v44, %v2323_v1  ;;  %v3502_v52 = vadd.f32 %v3501_v49, %v3500_v46  ;;  %v3565_v59 = vpop.f32.mrf.mxu1 }
 0x162   : > { %v3566_v54 = vadd.f32 %v3565_v59, %v3564_v48  ;;  %v3503_v55 = vpop.f32.mrf.mxu0 }
 0x163   : > { %4986 = vst [vmem:[#allocation3_spill] sm:$0xff] %v4642_v50  ;;  %v2328_v16 = vadd.f32 %v3502_v52, %v4600_v36  ;;  %v3567_v58 = vpop.f32.mrf.mxu1 }
 0x164   : > { %v3504_v60 = vpop.f32.mrf.mxu0 }
 0x165   : > { %v4645_v61 = vadd.f32 %v3566_v54, %v2328_v16  ;;  %v3505_v63 = vadd.f32 %v3504_v60, %v3503_v55  ;;  %v3568_v9 = vpop.f32.mrf.mxu1 }
 0x166   : > { %v3569_v0 = vadd.f32 %v3568_v9, %v3567_v58  ;;  %v3506_v2 = vpop.f32.mrf.mxu0 }
 0x167   : > { %4987 = vst [vmem:[#allocation4_spill] sm:$0xff] %v4645_v61  ;;  %v2331_v25 = vadd.f32 %v3505_v63, %v4602_v45  ;;  %v3570_v4 = vpop.f32.mrf.mxu1 }
 0x168   : > { %v3507_v5 = vpop.f32.mrf.mxu0 }
 0x169   : > { %v4648_v6 = vadd.f32 %v3569_v0, %v2331_v25  ;;  %v3508_v7 = vadd.f32 %v3507_v5, %v3506_v2  ;;  %v3571_v17 = vpop.f32.mrf.mxu1 }
 0x16a   : > { %v3572_v10 = vadd.f32 %v3571_v17, %v3570_v4  ;;  %v3509_v11 = vpop.f32.mrf.mxu0 }
 0x16b   : > { %4988 = vst [vmem:[#allocation5_spill] sm:$0xff] %v4648_v6  ;;  %v2336_v36 = vadd.f32 %v3508_v7, %v4604_v53  ;;  %v3573_v13 = vpop.f32.mrf.mxu1 }
 0x16c   : > { %v3510_v14 = vpop.f32.mrf.mxu0 }
 0x16d   : > { %v4651_v15 = vadd.f32 %v3572_v10, %v2336_v36  ;;  %v3511_v18 = vadd.f32 %v3510_v14, %v3509_v11  ;;  %v3574_v32 = vpop.f32.mrf.mxu1 }
 0x16e   : > { %v3575_v20 = vadd.f32 %v3574_v32, %v3573_v13  ;;  %v3592_v21 = vpop.f32.mrf.mxu0 }
 0x16f   : > { %4989 = vst [vmem:[#allocation6_spill] sm:$0xff] %v4651_v15  ;;  %v2339_v45 = vadd.f32 %v3511_v18, %v4606_v62  ;;  %v4654_v23 = vpop.f32.mrf.mxu1 }
 0x170   : > { %v3593_v29 = vpop.f32.mrf.mxu0 }
 0x171   : > { %v4656_v24 = vadd.f32 %v3575_v20, %v2339_v45  ;;  %v4658_v26 = vpop.f32.mrf.mxu1 }
 0x172   : > { %v3595_v41 = vpop.f32.mrf.mxu0 }
 0x173   : > { %4990 = vst [vmem:[#allocation7_spill] sm:$0xff] %v4656_v24  ;;  %v4660_v28 = vpop.f32.mrf.mxu1 }
 0x174   : > { %v3596_v53 = vpop.f32.mrf.mxu0 }
 0x175   : > { %v4662_v30 = vpop.f32.mrf.mxu1 }
 0x176   : > { %v4664_v33 = vpop.f32.mrf.mxu0 }
 0x177   : > { %v4666_v37 = vpop.f32.mrf.mxu1 }
 0x178   : > { %v4668_v34 = vpop.f32.mrf.mxu0 }
 0x179   : > { %v4670_v62 = vpop.f32.mrf.mxu1 }
 0x17a   : > { %v4672_v35 = vpop.f32.mrf.mxu0 }
 0x17b   : > { %v4674_v56 = vpop.f32.mrf.mxu1 }
 0x17c   : > { %v4676_v39 = vpop.f32.mrf.mxu0 }
 0x17d   : > { %v4678_v40 = vpop.f32.mrf.mxu1 }
 0x17e   : > { %v4680_v43 = vpop.f32.mrf.mxu0 }
 0x17f   : > { %v4682_v51 = vpop.f32.mrf.mxu1 }
 0x180   : > { %v4684_v44 = vpop.f32.mrf.mxu0 }
 0x181   : > { %v4686_v46 = vpop.f32.mrf.mxu1 }
 0x182   : > { %v4688_v1 = vpop.f32.mrf.mxu0 }
 0x183   : > { %v4690_v48 = vpop.f32.mrf.mxu1 }
 0x184   : > { %v4692_v49 = vpop.f32.mrf.mxu0 }
 0x185   : > { %v4694_v52 = vpop.f32.mrf.mxu1 }
 0x186   : > { %v4696_v59 = vpop.f32.mrf.mxu0 }
 0x187   : > { %v4698_v54 = vpop.f32.mrf.mxu1 }
 0x188   : > { %v4700_v55 = vpop.f32.mrf.mxu0 }
 0x189   : > { %v4702_v16 = vpop.f32.mrf.mxu1 }
 0x18a   : > { %v4704_v58 = vpop.f32.mrf.mxu0 }
 0x18b   : > { %v4706_v60 = vpop.f32.mrf.mxu1 }
 0x18c   : > { %v4708_v63 = vpop.f32.mrf.mxu0 }
 0x18d   : > { %v4710_v9 = vpop.f32.mrf.mxu1 }
 0x18e   : > { %v4712_v0 = vpop.f32.mrf.mxu0 }
 0x18f   : > { %v4714_v2 = vpop.f32.mrf.mxu1 }
 0x190   : > { %v4716_v25 = vpop.f32.mrf.mxu0 }
 0x191   : > { %v4718_v4 = vpop.f32.mrf.mxu1 }
 0x192   : > { %v4720_v5 = vpop.f32.mrf.mxu0 }
 0x193   : > { %v4722_v7 = vpop.f32.mrf.mxu1 }
 0x194   : > { %v4724_v17 = vpop.f32.mrf.mxu0 }
 0x195   : > { %v4726_v10 = vpop.f32.mrf.mxu1 }
 0x196   : > { %v4728_v11 = vpop.f32.mrf.mxu0 }
 0x197   : > { %v4730_v36 = vpop.f32.mrf.mxu1 }
 0x198   : > { %4991 = vst [vmem:[#allocation8_spill] sm:$0xff] %v4730_v36  ;;  %v4732_v13 = vpop.f32.mrf.mxu0 }
 0x199   : > { %v4734_v14 = vpop.f32.mrf.mxu1 }
 0x19a   : > { %4992 = vst [vmem:[#allocation9_spill] sm:$0xff] %v4734_v14  ;;  %v4736_v18 = vpop.f32.mrf.mxu0 }
 0x19b   : > { %4993 = vst [vmem:[#allocation10_spill] sm:$0xff] %v4736_v18  ;;  %v4738_v32 = vpop.f32.mrf.mxu1 }
 0x19c   : > { %4994 = vst [vmem:[#allocation11_spill] sm:$0xff] %v4738_v32  ;;  %v4740_v20 = vpop.f32.mrf.mxu0 }
 0x19d   : > { %4995 = vst [vmem:[#allocation12_spill] sm:$0xff] %v4740_v20  ;;  %v4742_v45 = vpop.f32.mrf.mxu1 }
 0x19e   : > { %4996 = vst [vmem:[#allocation13_spill] sm:$0xff] %v4742_v45  ;;  %v4744_v24 = vpop.f32.mrf.mxu0 }
 0x19f   : > { %4997 = vst [vmem:[#allocation14_spill] sm:$0xff] %v4744_v24  ;;  %v4746_v15 = vpop.f32.mrf.mxu1  ;;  %v3594_v24 = vadd.f32 %v3593_v29, %v3592_v21 }
 0x1a0   : > { %4998 = vst [vmem:[#allocation15_spill] sm:$0xff] %v4746_v15  ;;  %v4748_v6 = vpop.f32.mrf.mxu0 }
 0x1a1   : > { %4999 = vst [vmem:[#allocation16_spill] sm:$0xff] %v4748_v6  ;;  %v4750_v61 = vpop.f32.mrf.mxu1 }
 0x1a2   : > { %5000 = vst [vmem:[#allocation17_spill] sm:$0xff] %v4750_v61  ;;  %v4752_v50 = vpop.f32.mrf.mxu0 }
 0x1a3   : > { %5001 = vst [vmem:[#allocation18_spill] sm:$0xff] %v4752_v50  ;;  %v4754_v36 = vpop.f32.mrf.mxu1  ;;  %v3597_v50 = vadd.f32 %v3596_v53, %v3595_v41 }
 0x1a4   : > { %5002 = vst [vmem:[#allocation19_spill] sm:$0xff] %v4754_v36  ;;  %v4756_v14 = vpop.f32.mrf.mxu0 }
 0x1a5   : > { %5003 = vst [vmem:[#allocation20_spill] sm:$0xff] %v4756_v14  ;;  %v4758_v18 = vpop.f32.mrf.mxu1  ;;  %v2474_v14 = vadd.f32 %v3594_v24, %v4609_v8  ;;  %v2477_v21 = vadd.f32 %v3597_v50, %v4612_v19  ;;  %v3661_v8 = vadd.f32 %v4662_v30, %v4660_v28 }
 0x1a6   : > { %5004 = vst [vmem:[#allocation21_spill] sm:$0xff] %v4758_v18  ;;  %v4760_v32 = vpop.f32.mrf.mxu0 }
 0x1a7   : > { %5005 = vst [vmem:[#allocation22_spill] sm:$0xff] %v4760_v32  ;;  %v4762_v20 = vpop.f32.mrf.mxu1  ;;  %v2574_v42 = vadd.f32 %v3661_v8, %v2477_v21 }
 0x1a8   : > { %5006 = vst [vmem:[#allocation23_spill] sm:$0xff] %v4762_v20  ;;  %v4764_v45 = vpop.f32.mrf.mxu0  ;;  %v3658_v20 = vadd.f32 %v4658_v26, %v4654_v23  ;;  %v3603_v23 = vadd.f32 %v4676_v39, %v4672_v35 }
 0x1a9   : > { %5007 = vst [vmem:[#allocation24_spill] sm:$0xff] %v4764_v45  ;;  %v4766_v15 = vpop.f32.mrf.mxu1 }
 0x1aa   : > { %5008 = vst [vmem:[#allocation25_spill] sm:$0xff] %v4766_v15  ;;  %v4768_v6 = vpop.f32.mrf.mxu0  ;;  %v2571_v15 = vadd.f32 %v3658_v20, %v2474_v14  ;;  %v2485_v35 = vadd.f32 %v3603_v23, %v4618_v38  ;;  %v3609_v38 = vadd.f32 %v4692_v49, %v4688_v1  ;;  %v3612_v1 = vadd.f32 %v4700_v55, %v4696_v59 }
 0x1ab   : > { %5009 = vst [vmem:[#allocation26_spill] sm:$0xff] %v4768_v6  ;;  %v4770_v61 = vpop.f32.mrf.mxu1  ;;  %v3600_v6 = vadd.f32 %v4668_v34, %v4664_v33 }
 0x1ac   : > { %5010 = vst [vmem:[#allocation27_spill] sm:$0xff] %v4770_v61  ;;  %v4772_v36 = vpop.f32.mrf.mxu0  ;;  %v2493_v23 = vadd.f32 %v3609_v38, %v4624_v57  ;;  %v3615_v57 = vadd.f32 %v4708_v63, %v4704_v58  ;;  %v2498_v59 = vadd.f32 %v3612_v1, %v4627_v3  ;;  %v3618_v3 = vadd.f32 %v4716_v25, %v4712_v0 }
 0x1ad   : > { %5011 = vst [vmem:[#allocation28_spill] sm:$0xff] %v4772_v36  ;;  %v4775_v18 = vpop.f32.mrf.mxu1  ;;  %v2482_v50 = vadd.f32 %v3600_v6, %v4615_v27  ;;  %v3606_v27 = vadd.f32 %v4684_v44, %v4680_v43  ;;  %v3621_v0 = vadd.f32 %v4724_v17, %v4720_v5 }
 0x1ae   : > { %5012 = vst [vmem:[#allocation29_spill] sm:$0xff] %v4775_v18  ;;  %v3720_v32 = vpop.f32.mrf.mxu0  ;;  %v2501_v58 = vadd.f32 %v3615_v57, %v4630_v12  ;;  %v5016_v57 = vld [vmem:[#allocation8_spill] sm:$0xff] }
 0x1af   : > { %v3784_v45 = vpop.f32.mrf.mxu1  ;;  %v2490_v43 = vadd.f32 %v3606_v27, %v4621_v47  ;;  %v2509_v5 = vadd.f32 %v3621_v0, %v4636_v31  ;;  %v5015_v31 = vld [vmem:[#allocation12_spill] sm:$0xff] }
 0x1b0   : > { %v3721_v29 = vpop.f32.mrf.mxu0 }
 0x1b1   : > { %v3722_v61 = vadd.f32 %v3721_v29, %v3720_v32  ;;  %v3785_v41 = vpop.f32.mrf.mxu1 }
 0x1b2   : > { %v3723_v24 = vpop.f32.mrf.mxu0  ;;  %v3786_v18 = vadd.f32 %v3785_v41, %v3784_v45 }
 0x1b3   : > { %v2668_v53 = vadd.f32 %v3722_v61, %v2571_v15  ;;  %v3787_v36 = vpop.f32.mrf.mxu1  ;;  %v3664_v15 = vadd.f32 %v4670_v62, %v4666_v37  ;;  %v3667_v37 = vadd.f32 %v4678_v40, %v4674_v56  ;;  %v3670_v56 = vadd.f32 %v4686_v46, %v4682_v51 }
 0x1b4   : > { %v3724_v19 = vpop.f32.mrf.mxu0  ;;  %v3673_v51 = vadd.f32 %v4694_v52, %v4690_v48  ;;  %v3676_v48 = vadd.f32 %v4702_v16, %v4698_v54  ;;  %v3679_v54 = vadd.f32 %v4710_v9, %v4706_v60  ;;  %v3682_v60 = vadd.f32 %v4718_v4, %v4714_v2 }
 0x1b5   : > { %v4793_v26 = vadd.f32 %v3786_v18, %v2668_v53  ;;  %v3725_v28 = vadd.f32 %v3724_v19, %v3723_v24  ;;  %v3788_v30 = vpop.f32.mrf.mxu1  ;;  %v2579_v32 = vadd.f32 %v3664_v15, %v2482_v50  ;;  %v2582_v21 = vadd.f32 %v3667_v37, %v2485_v35 }
 0x1b6   : > { %v3726_v61 = vpop.f32.mrf.mxu0  ;;  %v3789_v34 = vadd.f32 %v3788_v30, %v3787_v36  ;;  %v2587_v47 = vadd.f32 %v3670_v56, %v2490_v43  ;;  %v2598_v12 = vadd.f32 %v3679_v54, %v2501_v58  ;;  %v3685_v2 = vadd.f32 %v4726_v10, %v4722_v7  ;;  %v5022_v54 = vld [vmem:[#allocation13_spill] sm:$0xff] }
 0x1b7   : > { %2827 = vst [vmem:[%s4788_s12] sm:$0xff] %v4793_v26  ;;  %v2671_v33 = vadd.f32 %v3725_v28, %v2574_v42  ;;  %v3790_v14 = vpop.f32.mrf.mxu1 }
 0x1b8   : > { %v3727_v6 = vpop.f32.mrf.mxu0 }
 0x1b9   : > { %v4802_v39 = vadd.f32 %v3789_v34, %v2671_v33  ;;  %v3728_v18 = vadd.f32 %v3727_v6, %v3726_v61  ;;  %v3791_v20 = vpop.f32.mrf.mxu1 }
 0x1ba   : > { %v3729_v45 = vpop.f32.mrf.mxu0  ;;  %v3792_v62 = vadd.f32 %v3791_v20, %v3790_v14  ;;  %v2590_v14 = vadd.f32 %v3673_v51, %v2493_v23  ;;  %v2595_v20 = vadd.f32 %v3676_v48, %v2498_v59  ;;  %v5018_v48 = vld [vmem:[#allocation3_spill] sm:$0xff] }
 0x1bb   : > { %2828 = vst [vmem:[%s4788_s12 + $0x8] sm:$0xff] %v4802_v39  ;;  %v2676_v42 = vadd.f32 %v3728_v18, %v2579_v32  ;;  %v3793_v36 = vpop.f32.mrf.mxu1 }
 0x1bc   : > { %v3730_v44 = vpop.f32.mrf.mxu0 }
 0x1bd   : > { %v4811_v29 = vadd.f32 %v3792_v62, %v2676_v42  ;;  %v3731_v41 = vadd.f32 %v3730_v44, %v3729_v45  ;;  %v3794_v8 = vpop.f32.mrf.mxu1 }
 0x1be   : > { %v3732_v40 = vpop.f32.mrf.mxu0  ;;  %v3795_v53 = vadd.f32 %v3794_v8, %v3793_v36 }
 0x1bf   : > { %2829 = vst [vmem:[%s4788_s12 + $0x10] sm:$0xff] %v4811_v29  ;;  %v2679_v24 = vadd.f32 %v3731_v41, %v2582_v21  ;;  %v3796_v19 = vpop.f32.mrf.mxu1  ;;  %v2506_v21 = vadd.f32 %v3618_v3, %v4633_v22  ;;  %v3624_v22 = vadd.f32 %v4732_v13, %v4728_v11 }
 0x1c0   : > { %v3733_v50 = vpop.f32.mrf.mxu0 }
 0x1c1   : > { %v4820_v49 = vadd.f32 %v3795_v53, %v2679_v24  ;;  %v3734_v28 = vadd.f32 %v3733_v50, %v3732_v40  ;;  %v3797_v30 = vpop.f32.mrf.mxu1  ;;  %v2603_v53 = vadd.f32 %v3682_v60, %v2506_v21 }
 0x1c2   : > { %v3735_v61 = vpop.f32.mrf.mxu0  ;;  %v3798_v15 = vadd.f32 %v3797_v30, %v3796_v19  ;;  %v2606_v30 = vadd.f32 %v3685_v2, %v2509_v5 }
 0x1c3   : > { %2830 = vst [vmem:[%s4788_s12 + $0x18] sm:$0xff] %v4820_v49  ;;  %v2684_v46 = vadd.f32 %v3734_v28, %v2587_v47  ;;  %v3799_v33 = vpop.f32.mrf.mxu1  ;;  %v5013_v28 = vld [vmem:[#allocation2_spill] sm:$0xff] }
 0x1c4   : > { %v3736_v34 = vpop.f32.mrf.mxu0  ;;  %v2514_v11 = vadd.f32 %v3624_v22, %v5013_v28  ;;  %v5026_v22 = vld [vmem:[#allocation15_spill] sm:$0xff]  ;;  %v5030_v28 = vld [vmem:[#allocation24_spill] sm:$0xff] }
 0x1c5   : > { %v4829_v55 = vadd.f32 %v3798_v15, %v2684_v46  ;;  %v3737_v27 = vadd.f32 %v3736_v34, %v3735_v61  ;;  %v3800_v6 = vpop.f32.mrf.mxu1  ;;  %v5014_v61 = vld [vmem:[#allocation10_spill] sm:$0xff]  ;;  %v5017_v34 = vld [vmem:[#allocation9_spill] sm:$0xff] }
 0x1c6   : > { %v3738_v32 = vpop.f32.mrf.mxu0  ;;  %v3801_v35 = vadd.f32 %v3800_v6, %v3799_v33  ;;  %v3627_v51 = vadd.f32 %v5015_v31, %v5014_v61  ;;  %v3688_v7 = vadd.f32 %v5017_v34, %v5016_v57  ;;  %v5031_v31 = vld [vmem:[#allocation19_spill] sm:$0xff] }
 0x1c7   : > { %2831 = vst [vmem:[%s4788_s12 + $0x20] sm:$0xff] %v4829_v55  ;;  %v2687_v52 = vadd.f32 %v3737_v27, %v2590_v14  ;;  %v3802_v18 = vpop.f32.mrf.mxu1 }
 0x1c8   : > { %v3739_v63 = vpop.f32.mrf.mxu0  ;;  %v2611_v6 = vadd.f32 %v3688_v7, %v2514_v11 }
 0x1c9   : > { %v4838_v45 = vadd.f32 %v3801_v35, %v2687_v52  ;;  %v3740_v37 = vadd.f32 %v3739_v63, %v3738_v32  ;;  %v3803_v42 = vpop.f32.mrf.mxu1  ;;  %v2517_v52 = vadd.f32 %v3627_v51, %v5018_v48  ;;  %v5019_v35 = vld [vmem:[#allocation14_spill] sm:$0xff]  ;;  %v5032_v51 = vld [vmem:[#allocation21_spill] sm:$0xff] }
 0x1ca   : > { %v3741_v16 = vpop.f32.mrf.mxu0  ;;  %v3804_v36 = vadd.f32 %v3803_v42, %v3802_v18  ;;  %v5020_v18 = vld [vmem:[#allocation16_spill] sm:$0xff]  ;;  %v5021_v42 = vld [vmem:[#allocation11_spill] sm:$0xff] }
 0x1cb   : > { %2832 = vst [vmem:[%s4788_s12 + $0x28] sm:$0xff] %v4838_v45  ;;  %v2692_v62 = vadd.f32 %v3740_v37, %v2595_v20  ;;  %v3805_v43 = vpop.f32.mrf.mxu1  ;;  %v3630_v58 = vadd.f32 %v5020_v18, %v5019_v35 }
 0x1cc   : > { %v3742_v44 = vpop.f32.mrf.mxu0 }
 0x1cd   : > { %v4847_v25 = vadd.f32 %v3804_v36, %v2692_v62  ;;  %v3743_v38 = vadd.f32 %v3742_v44, %v3741_v16  ;;  %v3806_v41 = vpop.f32.mrf.mxu1  ;;  %v3691_v16 = vadd.f32 %v5022_v54, %v5021_v42  ;;  %v5024_v44 = vld [vmem:[#allocation20_spill] sm:$0xff] }
 0x1ce   : > { %v3744_v8 = vpop.f32.mrf.mxu0  ;;  %v3807_v56 = vadd.f32 %v3806_v41, %v3805_v43  ;;  %v5025_v41 = vld [vmem:[#allocation4_spill] sm:$0xff] }
 0x1cf   : > { %2833 = vst [vmem:[%s4788_s12 + $0x30] sm:$0xff] %v4847_v25  ;;  %v2695_v9 = vadd.f32 %v3743_v38, %v2598_v12  ;;  %v3808_v40 = vpop.f32.mrf.mxu1  ;;  %v5023_v12 = vld [vmem:[#allocation18_spill] sm:$0xff]  ;;  %v2614_v38 = vadd.f32 %v3691_v16, %v2517_v52 }
 0x1d0   : > { %v3745_v24 = vpop.f32.mrf.mxu0  ;;  %v3633_v21 = vadd.f32 %v5024_v44, %v5023_v12 }
 0x1d1   : > { %v4856_v17 = vadd.f32 %v3807_v56, %v2695_v9  ;;  %v3746_v19 = vadd.f32 %v3745_v24, %v3744_v8  ;;  %v3809_v47 = vpop.f32.mrf.mxu1  ;;  %v2522_v8 = vadd.f32 %v3630_v58, %v5025_v41  ;;  %v5027_v24 = vld [vmem:[#allocation17_spill] sm:$0xff]  ;;  %v5039_v41 = vld [vmem:[#allocation27_spill] sm:$0xff] }
 0x1d2   : > { %v3747_v50 = vpop.f32.mrf.mxu0  ;;  %v3810_v23 = vadd.f32 %v3809_v47, %v3808_v40 }
 0x1d3   : > { %2834 = vst [vmem:[%s4788_s12 + $0x38] sm:$0xff] %v4856_v17  ;;  %v2700_v4 = vadd.f32 %v3746_v19, %v2603_v53  ;;  %v3811_v1 = vpop.f32.mrf.mxu1  ;;  %v3694_v53 = vadd.f32 %v5027_v24, %v5026_v22 }
 0x1d4   : > { %v3748_v13 = vpop.f32.mrf.mxu0 }
 0x1d5   : > { %v4865_v46 = vadd.f32 %v3810_v23, %v2700_v4  ;;  %v3749_v15 = vadd.f32 %v3748_v13, %v3747_v50  ;;  %v3812_v33 = vpop.f32.mrf.mxu1  ;;  %v5028_v50 = vld [vmem:[#allocation5_spill] sm:$0xff]  ;;  %v2619_v23 = vadd.f32 %v3694_v53, %v2522_v8 }
 0x1d6   : > { %v3750_v10 = vpop.f32.mrf.mxu0  ;;  %v3813_v59 = vadd.f32 %v3812_v33, %v3811_v1  ;;  %v2525_v2 = vadd.f32 %v3633_v21, %v5028_v50  ;;  %v5029_v1 = vld [vmem:[#allocation22_spill] sm:$0xff]  ;;  %v5040_v8 = vld [vmem:[#allocation29_spill] sm:$0xff] }
 0x1d7   : > { %2835 = vst [vmem:[%s4788_s12 + $0x40] sm:$0xff] %v4865_v46  ;;  %v2703_v14 = vadd.f32 %v3749_v15, %v2606_v30  ;;  %v3814_v27 = vpop.f32.mrf.mxu1  ;;  %v3636_v11 = vadd.f32 %v5030_v28, %v5029_v1  ;;  %v3697_v15 = vadd.f32 %v5032_v51, %v5031_v31 }
 0x1d8   : > { %v3751_v32 = vpop.f32.mrf.mxu0 }
 0x1d9   : > { %v4874_v63 = vadd.f32 %v3813_v59, %v2703_v14  ;;  %v3752_v20 = vadd.f32 %v3751_v32, %v3750_v10  ;;  %v3815_v3 = vpop.f32.mrf.mxu1  ;;  %v2622_v10 = vadd.f32 %v3697_v15, %v2525_v2  ;;  %v5033_v59 = vld [vmem:[#allocation6_spill] sm:$0xff]  ;;  %v5035_v32 = vld [vmem:[#allocation28_spill] sm:$0xff] }
 0x1da   : > { %v3753_v37 = vpop.f32.mrf.mxu0  ;;  %v3816_v36 = vadd.f32 %v3815_v3, %v3814_v27  ;;  %v2530_v27 = vadd.f32 %v3636_v11, %v5033_v59  ;;  %v5037_v3 = vld [vmem:[#allocation25_spill] sm:$0xff] }
 0x1db   : > { %2836 = vst [vmem:[%s4788_s12 + $0x48] sm:$0xff] %v4874_v63  ;;  %v2708_v62 = vadd.f32 %v3752_v20, %v2611_v6  ;;  %v3817_v43 = vpop.f32.mrf.mxu1  ;;  %v5034_v6 = vld [vmem:[#allocation26_spill] sm:$0xff]  ;;  %v5036_v20 = vld [vmem:[#allocation23_spill] sm:$0xff] }
 0x1dc   : > { %v3754_v0 = vpop.f32.mrf.mxu0  ;;  %v3639_v48 = vadd.f32 %v5035_v32, %v5034_v6 }
 0x1dd   : > { %v4883_v60 = vadd.f32 %v3816_v36, %v2708_v62  ;;  %v3755_v9 = vadd.f32 %v3754_v0, %v3753_v37  ;;  %v3818_v56 = vpop.f32.mrf.mxu1  ;;  %v3700_v37 = vadd.f32 %v5037_v3, %v5036_v20 }
 0x1de   : > { %v3756_v40 = vpop.f32.mrf.mxu0  ;;  %v3819_v19 = vadd.f32 %v3818_v56, %v3817_v43  ;;  %v5038_v43 = vld [vmem:[#allocation7_spill] sm:$0xff] }
 0x1df   : > { %2837 = vst [vmem:[%s4788_s12 + $0x50] sm:$0xff] %v4883_v60  ;;  %v2711_v5 = vadd.f32 %v3755_v9, %v2614_v38  ;;  %v3820_v47 = vpop.f32.mrf.mxu1  ;;  %v2627_v36 = vadd.f32 %v3700_v37, %v2530_v27  ;;  %v2533_v12 = vadd.f32 %v3639_v48, %v5038_v43  ;;  %v3703_v9 = vadd.f32 %v5040_v8, %v5039_v41 }
 0x1e0   : > { %v3757_v4 = vpop.f32.mrf.mxu0 }
 0x1e1   : > { %v4892_v13 = vadd.f32 %v3819_v19, %v2711_v5  ;;  %v3758_v30 = vadd.f32 %v3757_v4, %v3756_v40  ;;  %v3821_v61 = vpop.f32.mrf.mxu1  ;;  %v2630_v53 = vadd.f32 %v3703_v9, %v2533_v12 }
 0x1e2   : > { %v3759_v33 = vpop.f32.mrf.mxu0  ;;  %v3822_v34 = vadd.f32 %v3821_v61, %v3820_v47 }
 0x1e3   : > { %2838 = vst [vmem:[%s4788_s12 + $0x58] sm:$0xff] %v4892_v13  ;;  %v2716_v57 = vadd.f32 %v3758_v30, %v2619_v23  ;;  %v3823_v7 = vpop.f32.mrf.mxu1 }
 0x1e4   : > { %v3760_v14 = vpop.f32.mrf.mxu0 }
 0x1e5   : > { %v4901_v52 = vadd.f32 %v3822_v34, %v2716_v57  ;;  %v3761_v35 = vadd.f32 %v3760_v14, %v3759_v33  ;;  %v3824_v18 = vpop.f32.mrf.mxu1 }
 0x1e6   : > { %v3762_v58 = vpop.f32.mrf.mxu0  ;;  %v3825_v54 = vadd.f32 %v3824_v18, %v3823_v7 }
 0x1e7   : > { %2839 = vst [vmem:[%s4788_s12 + $0x60] sm:$0xff] %v4901_v52  ;;  %v2719_v42 = vadd.f32 %v3761_v35, %v2622_v10  ;;  %v3826_v16 = vpop.f32.mrf.mxu1 }
 0x1e8   : > { %v3763_v62 = vpop.f32.mrf.mxu0 }
 0x1e9   : > { %v2816_v44 = vadd.f32 %v3825_v54, %v2719_v42  ;;  %v3764_v21 = vadd.f32 %v3763_v62, %v3762_v58  ;;  %v3827_v0 = vpop.f32.mrf.mxu1 }
 0x1ea   : > { %v3765_v38 = vpop.f32.mrf.mxu0  ;;  %v3828_v40 = vadd.f32 %v3827_v0, %v3826_v16 }
 0x1eb   : > { %2840 = vst [vmem:[%s4788_s12 + $0x68] sm:$0xff] %v2816_v44  ;;  %v2724_v56 = vadd.f32 %v3764_v21, %v2627_v36  ;;  %v3829_v22 = vpop.f32.mrf.mxu1 }
 0x1ec   : > { %v3766_v24 = vpop.f32.mrf.mxu0 }
 0x1ed   : > { %v2821_v5 = vadd.f32 %v3828_v40, %v2724_v56  ;;  %v3767_v19 = vadd.f32 %v3766_v24, %v3765_v38  ;;  %v3830_v47 = vpop.f32.mrf.mxu1 }
 0x1ee   : > { %v3831_v2 = vadd.f32 %v3830_v47, %v3829_v22 }
 0x1ef   : > { %2841 = vst [vmem:[%s4788_s12 + $0x70] sm:$0xff] %v2821_v5  ;;  %v2727_v50 = vadd.f32 %v3767_v19, %v2630_v53  ;;  %2846 = sbr.rel (%p3314_p5) target bundleno = 502 (0x1f6), region = 32 }
 0x1f1   : > { %v2824_v4 = vadd.f32 %v3831_v2, %v2727_v50 }
 0x1f3   : > { %2842 = vst [vmem:[%s4788_s12 + $0x78] sm:$0xff] %v2824_v4 }
 0x1f4   : > { %v4009_v23 = vmov 0.0  }
 0x1f5   : > { %2847 = vst [vmem:[%s4983_s3] sm:$0x1] %v4009_v23  ;;  %2848 = vst [vmem:[%s4984_s4] sm:$0x1] %v4009_v23 }
 0x1f6 PF: > { %v2850_v1 = vadd.f32 %v4802_v39, %v4793_v26  ;;  %v2874_v28 = vmul.f32 %v4793_v26, %v4793_v26  ;;  %v2875_v11 = vmul.f32 %v4802_v39, %v4802_v39  ;;  %v2876_v61 = vmul.f32 %v4811_v29, %v4811_v29 }
 0x1f7   : > { %v2877_v51 = vmul.f32 %v4820_v49, %v4820_v49  ;;  %v2878_v57 = vmul.f32 %v4829_v55, %v4829_v55  ;;  %v2879_v39 = vmul.f32 %v4838_v45, %v4838_v45  ;;  %v2880_v10 = vmul.f32 %v4847_v25, %v4847_v25 }
 0x1f8   : > { %v2851_v30 = vadd.f32 %v2850_v1, %v4811_v29  ;;  %v2890_v15 = vadd.f32 %v2875_v11, %v2874_v28  ;;  %v2881_v59 = vmul.f32 %v4856_v17, %v4856_v17  ;;  %v2882_v6 = vmul.f32 %v4865_v46, %v4865_v46 }
 0x1f9   : > { %v2883_v48 = vmul.f32 %v4874_v63, %v4874_v63  ;;  %v2884_v18 = vmul.f32 %v4883_v60, %v4883_v60  ;;  %v2885_v20 = vmul.f32 %v4892_v13, %v4892_v13  ;;  %v2886_v37 = vmul.f32 %v4901_v52, %v4901_v52 }
 0x1fa   : > { %v2852_v31 = vadd.f32 %v2851_v30, %v4820_v49  ;;  %v2891_v26 = vadd.f32 %v2890_v15, %v2876_v61  ;;  %v2887_v54 = vmul.f32 %v2816_v44, %v2816_v44  ;;  %v2888_v36 = vmul.f32 %v2821_v5, %v2821_v5 }
 0x1fb   : > { %v2889_v12 = vmul.f32 %v2824_v4, %v2824_v4 }
 0x1fc   : > { %v2853_v33 = vadd.f32 %v2852_v31, %v4829_v55  ;;  %v2892_v7 = vadd.f32 %v2891_v26, %v2877_v51  ;;  %v2873_v47 = vld [vmem:[%s4984_s4] sm:$0x1] }
 0x1fe   : > { %v2854_v34 = vadd.f32 %v2853_v33, %v4838_v45  ;;  %v2893_v14 = vadd.f32 %v2892_v7, %v2878_v57 }
 0x200   : > { %v2855_v29 = vadd.f32 %v2854_v34, %v4847_v25  ;;  %v2894_v27 = vadd.f32 %v2893_v14, %v2879_v39 }
 0x202   : > { %v2856_v49 = vadd.f32 %v2855_v29, %v4856_v17  ;;  %v2895_v32 = vadd.f32 %v2894_v27, %v2880_v10 }
 0x204   : > { %v2857_v55 = vadd.f32 %v2856_v49, %v4865_v46  ;;  %v2896_v35 = vadd.f32 %v2895_v32, %v2881_v59 }
 0x206   : > { %v2858_v45 = vadd.f32 %v2857_v55, %v4874_v63  ;;  %v2897_v58 = vadd.f32 %v2896_v35, %v2882_v6 }
 0x208   : > { %v2859_v25 = vadd.f32 %v2858_v45, %v4883_v60  ;;  %v2898_v3 = vadd.f32 %v2897_v58, %v2883_v48 }
 0x20a   : > { %v2860_v17 = vadd.f32 %v2859_v25, %v4892_v13  ;;  %v2899_v42 = vadd.f32 %v2898_v3, %v2884_v18 }
 0x20c   : > { %v2861_v46 = vadd.f32 %v2860_v17, %v4901_v52  ;;  %v2900_v16 = vadd.f32 %v2899_v42, %v2885_v20 }
 0x20e   : > { %v2862_v63 = vadd.f32 %v2861_v46, %v2816_v44  ;;  %v2901_v43 = vadd.f32 %v2900_v16, %v2886_v37  ;;  %v2849_v44 = vld [vmem:[%s4983_s3] sm:$0x1] }
 0x210   : > { %v2863_v62 = vadd.f32 %v2862_v63, %v2821_v5  ;;  %v2902_v21 = vadd.f32 %v2901_v43, %v2887_v54 }
 0x212   : > { %v2864_v60 = vadd.f32 %v2863_v62, %v2824_v4  ;;  %v2903_v38 = vadd.f32 %v2902_v21, %v2888_v36 }
 0x214   : > { %v2865_v0 = vrot.slane %v2864_v60, 4  ;;  %v2904_v13 = vadd.f32 %v2903_v38, %v2889_v12 }
 0x216   : > { %v2866_v41 = vadd.f32 %v2865_v0, %v2864_v60  ;;  %v2905_v9 = vrot.slane %v2904_v13, 4 }
 0x218   : > { %v2867_v8 = vrot.slane %v2866_v41, 2  ;;  %v2906_v40 = vadd.f32 %v2905_v9, %v2904_v13 }
 0x21a   : > { %v2868_v56 = vadd.f32 %v2867_v8, %v2866_v41  ;;  %v2907_v52 = vrot.slane %v2906_v40, 2 }
 0x21c   : > { %v2869_v22 = vrot.slane %v2868_v56, 1  ;;  %v2908_v53 = vadd.f32 %v2907_v52, %v2906_v40 }
 0x21e   : > { %v2870_v24 = vadd.f32 %v2869_v22, %v2868_v56  ;;  %v2909_v19 = vrot.slane %v2908_v53, 1 }
 0x220   : > { %v2871_v5 = vadd.f32 %v2870_v24, %v2849_v44  ;;  %v2910_v50 = vadd.f32 %v2909_v19, %v2908_v53 }
 0x222   : > { %2872 = vst [vmem:[%s4983_s3] sm:$0x1] %v2871_v5  ;;  %v2911_v2 = vadd.f32 %v2910_v50, %v2873_v47 }
 0x224   : > { %2912 = vst [vmem:[%s4984_s4] sm:$0x1] %v2911_v2 }
 0x225 PF: > { %s15_s17 = sadd.s32 1, %s4007_s17   ;;  %s5041_s15 = smov %s4003_s16 }
 0x226   : > { %p12_p6 = scmp.ge.s32.totalorder %s15_s17, 6   ;;  %s5042_s16 = smov %s5044_s18 }
 0x228   :  { %14 = sbr.rel (!%p12_p6) target bundleno = 2 (0x2), region = 89 }

// kernel: discriminator_forward.9
= control target key start
LH: loop header
LB: loop body
LE: loop exit
PB: predicated region body
PF: predicated region fallthrough
CT: control target
= control target key end

     0   :  { %s687_s12 = smov 0   ;;  %s689_s13 = smov 0   ;;  %s795_s0 = inlined_call_operand.vmem [shape: f32[512,128], index: 0, kind: input, shape index: {}]   ;;  %s796_s1 = inlined_call_operand.vmem [shape: f32[1,128], index: 1, kind: input, shape index: {}]   ;;  %s797_s2 = inlined_call_operand.vmem [shape: f32[1,128], index: 2, kind: input, shape index: {}]   ;;  %s798_s3 = inlined_call_operand.vmem [shape: bf16[512,128], index: 3, kind: output, shape index: {}]  }
   0x1   :  { %s691_s14 = smov 0  }
   0x2 LB: > { %s25_s15 = sadd.s32 1, %s661_s13  ;;  %p531_p0 = scmp.ge.s32.totalorder %s665_s14, 1  ;;  %s665_s14 = sphi %s691_s14, %s13_s14   ;;  %s661_s13 = sphi %s689_s13, %s800_s13   ;;  %s657_s12 = sphi %s687_s12, %s799_s12  }
   0x3   : > { %p27_p1 = scmp.ge.s32.totalorder %s25_s15, 4  ;;  %p173_p2 = scmp.lt.s32.totalorder %s665_s14, 5 }
   0x5   : > { %s802_s15 = smov (%p27_p1, %s25_s15), 0  ;;  %p174_p3 = pnand %p531_p0, %p173_p2 }
   0x6   : > { %s532_s16 = sshll.u32 (!%p174_p3), %s657_s12, 4 }
   0x7   : > { %177 = sbr.rel (%p174_p3) target bundleno = 44 (0x2c), region = 32  ;;  %p210_p4 = scmp.lt.s32.totalorder (!%p174_p3), %s532_s16, 63 }
   0xc   : > { %s804_s16 = smov (!%p210_p4, %s532_s16), 63  ;;  %v711_v0 = vld [vmem:[%s796_s1] ss:$0 sm:$0xff] }
   0xd   : > { %s533_s17 = sshll.u32 %s804_s16, 3  ;;  %v721_v1 = vld [vmem:[%s797_s2] ss:$0 sm:$0xff]  ;;  %s535_s25 = sshll.u32 %s804_s16, 2 }
   0xe   : > { %s716_s22 = scalar_lea.vmem %s795_s0, %s533_s17  ;;  %s749_s28 = scalar_lea.vmem %s798_s3, %s535_s25 }
   0xf   : > { %v233_v2 = vld [vmem:[%s716_s22] sm:$0xff]  ;;  %v234_v3 = vld [vmem:[%s716_s22 + $0x8] sm:$0xff]  ;;  %v235_v4 = vld [vmem:[%s716_s22 + $0x10] sm:$0xff] }
  0x10   : > { %v256_v5 = vmul.f32 %v711_v0, %v233_v2  ;;  %v257_v6 = vmul.f32 %v711_v0, %v234_v3  ;;  %v236_v7 = vld [vmem:[%s716_s22 + $0x18] sm:$0xff]  ;;  %v258_v8 = vmul.f32 %v711_v0, %v235_v4  ;;  %v237_v9 = vld [vmem:[%s716_s22 + $0x20] sm:$0xff]  ;;  %v238_v10 = vld [vmem:[%s716_s22 + $0x28] sm:$0xff] }
  0x11   : > { %v259_v11 = vmul.f32 %v711_v0, %v236_v7  ;;  %v260_v12 = vmul.f32 %v711_v0, %v237_v9  ;;  %v261_v13 = vmul.f32 %v711_v0, %v238_v10  ;;  %v239_v14 = vld [vmem:[%s716_s22 + $0x30] sm:$0xff]  ;;  %v240_v15 = vld [vmem:[%s716_s22 + $0x38] sm:$0xff]  ;;  %v241_v30 = vld [vmem:[%s716_s22 + $0x40] sm:$0xff] }
  0x12   : > { %v279_v16 = vadd.f32 %v721_v1, %v256_v5  ;;  %v280_v17 = vadd.f32 %v721_v1, %v257_v6  ;;  %v281_v18 = vadd.f32 %v721_v1, %v258_v8  ;;  %v262_v19 = vmul.f32 %v711_v0, %v239_v14  ;;  %v242_v31 = vld [vmem:[%s716_s22 + $0x48] sm:$0xff]  ;;  %v243_v32 = vld [vmem:[%s716_s22 + $0x50] sm:$0xff]  ;;  %v244_v44 = vld [vmem:[%s716_s22 + $0x58] sm:$0xff] }
  0x13   : > { %v282_v20 = vadd.f32 %v721_v1, %v259_v11  ;;  %v283_v21 = vadd.f32 %v721_v1, %v260_v12  ;;  %v284_v22 = vadd.f32 %v721_v1, %v261_v13  ;;  %v263_v23 = vmul.f32 %v711_v0, %v240_v15  ;;  %v245_v46 = vld [vmem:[%s716_s22 + $0x60] sm:$0xff]  ;;  %v246_v56 = vld [vmem:[%s716_s22 + $0x68] sm:$0xff]  ;;  %v247_v60 = vld [vmem:[%s716_s22 + $0x70] sm:$0xff] }
  0x14   : > { %vm295_vm0 = vcmp.ge.f32.partialorder %v279_v16, 0.0  ;;  %vm296_vm1 = vcmp.ge.f32.partialorder %v280_v17, 0.0  ;;  %v311_v24 = vmul.f32 0.2, %v279_v16  ;;  %v312_v25 = vmul.f32 0.2, %v280_v17 }
  0x15   : > { %vm297_vm2 = vcmp.ge.f32.partialorder %v281_v18, 0.0  ;;  %vm298_vm3 = vcmp.ge.f32.partialorder %v282_v20, 0.0  ;;  %v313_v26 = vmul.f32 0.2, %v281_v18  ;;  %v314_v27 = vmul.f32 0.2, %v282_v20 }
  0x16   : > { %v327_v28 = vsel %vm295_vm0, %v279_v16, %v311_v24  ;;  %v328_v29 = vsel %vm296_vm1, %v280_v17, %v312_v25  ;;  %vm299_vm4 = vcmp.ge.f32.partialorder %v283_v21, 0.0  ;;  %vm300_vm5 = vcmp.ge.f32.partialorder %v284_v22, 0.0  ;;  %v248_v6 = vld [vmem:[%s716_s22 + $0x78] sm:$0xff] }
  0x17   : > { %v575_v33 = vpack.c.bf16 %v328_v29, %v327_v28  ;;  %v329_v34 = vsel %vm297_vm2, %v281_v18, %v313_v26  ;;  %v330_v35 = vsel %vm298_vm3, %v282_v20, %v314_v27  ;;  %v315_v36 = vmul.f32 0.2, %v283_v21 }
  0x18   : > { %v580_v37 = vpack.c.bf16 %v330_v35, %v329_v34  ;;  %v316_v38 = vmul.f32 0.2, %v284_v22  ;;  %v285_v39 = vadd.f32 %v721_v1, %v262_v19  ;;  %v286_v40 = vadd.f32 %v721_v1, %v263_v23 }
  0x19   : > { %576 = vst [vmem:[%s749_s28] sm:$0xff] %v575_v33   ;;  %v331_v41 = vsel %vm299_vm4, %v283_v21, %v315_v36  ;;  %v264_v42 = vmul.f32 %v711_v0, %v241_v30  ;;  %v265_v43 = vmul.f32 %v711_v0, %v242_v31  ;;  %v266_v45 = vmul.f32 %v711_v0, %v243_v32 }
  0x1a   : > { %612 = vst [vmem:[%s749_s28 + $0x8] sm:$0xff] %v580_v37   ;;  %v332_v47 = vsel %vm300_vm5, %v284_v22, %v316_v38  ;;  %vm301_vm6 = vcmp.ge.f32.partialorder %v285_v39, 0.0  ;;  %vm302_vm7 = vcmp.ge.f32.partialorder %v286_v40, 0.0  ;;  %v317_v48 = vmul.f32 0.2, %v285_v39 }
  0x1b   : > { %v585_v49 = vpack.c.bf16 %v332_v47, %v331_v41  ;;  %v318_v50 = vmul.f32 0.2, %v286_v40  ;;  %v287_v51 = vadd.f32 %v721_v1, %v264_v42  ;;  %v288_v52 = vadd.f32 %v721_v1, %v265_v43 }
  0x1c   : > { %v333_v53 = vsel %vm301_vm6, %v285_v39, %v317_v48  ;;  %v267_v54 = vmul.f32 %v711_v0, %v244_v44  ;;  %v289_v55 = vadd.f32 %v721_v1, %v266_v45  ;;  %v268_v57 = vmul.f32 %v711_v0, %v245_v46 }
  0x1d   : > { %613 = vst [vmem:[%s749_s28 + $0x10] sm:$0xff] %v585_v49   ;;  %v334_v58 = vsel %vm302_vm7, %v286_v40, %v318_v50  ;;  %vm303_vm8 = vcmp.ge.f32.partialorder %v287_v51, 0.0  ;;  %vm304_vm9 = vcmp.ge.f32.partialorder %v288_v52, 0.0  ;;  %v319_v59 = vmul.f32 0.2, %v287_v51 }
  0x1e   : > { %v590_v61 = vpack.c.bf16 %v334_v58, %v333_v53  ;;  %v320_v62 = vmul.f32 0.2, %v288_v52  ;;  %v290_v63 = vadd.f32 %v721_v1, %v267_v54  ;;  %vm305_vm10 = vcmp.ge.f32.partialorder %v289_v55, 0.0 }
  0x1f   : > { %v335_v2 = vsel %vm303_vm8, %v287_v51, %v319_v59  ;;  %v321_v3 = vmul.f32 0.2, %v289_v55  ;;  %v269_v4 = vmul.f32 %v711_v0, %v246_v56  ;;  %v291_v5 = vadd.f32 %v721_v1, %v268_v57 }
  0x20   : > { %614 = vst [vmem:[%s749_s28 + $0x18] sm:$0xff] %v590_v61   ;;  %v336_v7 = vsel %vm304_vm9, %v288_v52, %v320_v62  ;;  %vm306_vm11 = vcmp.ge.f32.partialorder %v290_v63, 0.0  ;;  %v322_v8 = vmul.f32 0.2, %v290_v63  ;;  %v270_v9 = vmul.f32 %v711_v0, %v247_v60 }
  0x21   : > { %v595_v10 = vpack.c.bf16 %v336_v7, %v335_v2  ;;  %v337_v11 = vsel %vm305_vm10, %v289_v55, %v321_v3  ;;  %v292_v12 = vadd.f32 %v721_v1, %v269_v4  ;;  %vm307_vm12 = vcmp.ge.f32.partialorder %v291_v5, 0.0 }
  0x22   : > { %v338_v13 = vsel %vm306_vm11, %v290_v63, %v322_v8  ;;  %v323_v14 = vmul.f32 0.2, %v291_v5  ;;  %v271_v15 = vmul.f32 %v711_v0, %v248_v6  ;;  %v293_v16 = vadd.f32 %v721_v1, %v270_v9 }
  0x23   : > { %615 = vst [vmem:[%s749_s28 + $0x20] sm:$0xff] %v595_v10   ;;  %v600_v17 = vpack.c.bf16 %v338_v13, %v337_v11  ;;  %vm308_vm13 = vcmp.ge.f32.partialorder %v292_v12, 0.0  ;;  %v324_v18 = vmul.f32 0.2, %v292_v12 }
  0x24   : > { %v339_v19 = vsel %vm307_vm12, %v291_v5, %v323_v14  ;;  %v294_v20 = vadd.f32 %v721_v1, %v271_v15  ;;  %vm309_vm14 = vcmp.ge.f32.partialorder %v293_v16, 0.0  ;;  %v325_v21 = vmul.f32 0.2, %v293_v16 }
  0x25   : > { %616 = vst [vmem:[%s749_s28 + $0x28] sm:$0xff] %v600_v17   ;;  %v340_v22 = vsel %vm308_vm13, %v292_v12, %v324_v18 }
  0x26   : > { %v605_v23 = vpack.c.bf16 %v340_v22, %v339_v19  ;;  %vm310_vm15 = vcmp.ge.f32.partialorder %v294_v20, 0.0  ;;  %v326_v24 = vmul.f32 0.2, %v294_v20  ;;  %v341_v25 = vsel %vm309_vm14, %v293_v16, %v325_v21 }
  0x28   : > { %617 = vst [vmem:[%s749_s28 + $0x30] sm:$0xff] %v605_v23   ;;  %v342_v0 = vsel %vm310_vm15, %v294_v20, %v326_v24 }
  0x29   : > { %v610_v26 = vpack.c.bf16 %v342_v0, %v341_v25 }
  0x2b   : > { %618 = vst [vmem:[%s749_s28 + $0x38] sm:$0xff] %v610_v26  }
  0x2c PF: > { %s13_s14 = sadd.s32 1, %s665_s14   ;;  %s799_s12 = smov %s661_s13 }
  0x2d   : > { %p10_p5 = scmp.ge.s32.totalorder %s13_s14, 6   ;;  %s800_s13 = smov %s802_s15 }
  0x2f   :  { %12 = sbr.rel (!%p10_p5) target bundleno = 2 (0x2), region = 68 }

// kernel: discriminator_forward.11
= control target key start
LH: loop header
LB: loop body
LE: loop exit
PB: predicated region body
PF: predicated region fallthrough
CT: control target
= control target key end

     0   :  { %s893_s12 = smov 0   ;;  %s895_s13 = smov 0   ;;  %s1075_s0 = inlined_call_operand.vmem [shape: f32[128,256], index: 0, kind: input, shape index: {}]   ;;  %s1076_s1 = inlined_call_operand.vmem [shape: f32[1,256], index: 1, kind: input, shape index: {}]   ;;  %s1077_s2 = inlined_call_operand.vmem [shape: f32[1,256], index: 2, kind: input, shape index: {}]   ;;  %s1078_s3 = inlined_call_operand.vmem [shape: bf16[128,256], index: 3, kind: output, shape index: {}]  }
   0x1   :  { %s897_s14 = smov 0   ;;  %s899_s15 = smov 0  }
   0x2   :  { %s901_s16 = smov 0  }
   0x3 LB: > { %s22_s17 = sadd.s32 1, %s867_s15  ;;  %s699_s18 = sadd.s32 4294967295, %s871_s16   ;;  %s871_s16 = sphi %s901_s16, %s13_s16   ;;  %s867_s15 = sphi %s899_s15, %s1083_s15   ;;  %s863_s14 = sphi %s897_s14, %s1082_s14   ;;  %s859_s13 = sphi %s895_s13, %s1081_s13   ;;  %s855_s12 = sphi %s893_s12, %s1080_s12  }
   0x4   : > { %p23_p0 = scmp.ge.s32.totalorder %s22_s17, 2  ;;  %p41_p1 = scmp.ne.s32.totalorder %s859_s13, %s855_s12 }
   0x5   : > { %p42_p2 = scmp.eq.s32.totalorder %s871_s16, 0  ;;  %p125_p4 = scmp.eq.s32.totalorder %s699_s18, 1 }
   0x6   : > { %s1085_s17 = smov (%p23_p0, %s22_s17), 0  ;;  %s34_s20 = sadd.s32 1, %s859_s13 }
   0x7   : > { %p43_p3 = por %p42_p2, %p41_p1  ;;  %s30_s19 = ssub.s32 %s867_s15, %s1085_s17 }
   0x8   : > { %p32_p5 = scmp.eq.s32.totalorder %s30_s19, 0  ;;  %p928_p6 = por %p125_p4, %p41_p1 }
   0x9   : > { %p702_p7 = scmp.ge.s32.totalorder %s871_s16, 2 }
   0xa   : > { %s933_s22 = scalar_select %p32_p5, %s859_s13, %s34_s20  }
   0xb   : > { %147 = sbr.rel (%p702_p7) target bundleno = 28 (0x1c), region = 16 }
  0x10   : > { %150 = sbr.rel (!%p43_p3) target bundleno = 28 (0x1c), region = 20  ;;  %s152_s23 = sand.u32 (%p43_p3), 1, %s859_s13  }
  0x11   : > { %s704_s24 = sshll.u32 (%p43_p3), %s867_s15, 3  ;;  %s703_s25 = sshll.u32 (%p43_p3), %s152_s23, 7 }
  0x12   : > { %s941_s28 = scalar_lea.vmem (%p43_p3), %s1075_s0, %s704_s24  ;;  %s154_s29 = scalar_lea.vmem (%p43_p3), [#allocation2], %s703_s25 }
  0x13   : > { %v218_v0 = vld [vmem:[%s941_s28] sm:$0xff] (%p43_p3)  ;;  %v220_v1 = vld [vmem:[%s941_s28 + $0x10] sm:$0xff] (%p43_p3) }
  0x14   : > { %v222_v2 = vld [vmem:[%s941_s28 + $0x20] sm:$0xff] (%p43_p3)  ;;  %219 = vst [vmem:[%s154_s29] sm:$0xff] (%p43_p3), %v218_v0  ;;  %221 = vst [vmem:[%s154_s29 + $0x8] sm:$0xff] (%p43_p3), %v220_v1  ;;  %v224_v3 = vld [vmem:[%s941_s28 + $0x30] sm:$0xff] (%p43_p3) }
  0x15   : > { %223 = vst [vmem:[%s154_s29 + $0x10] sm:$0xff] %v222_v2  ;;  %v226_v4 = vld [vmem:[%s941_s28 + $0x40] sm:$0xff]  ;;  %v228_v5 = vld [vmem:[%s941_s28 + $0x50] sm:$0xff]  ;;  %225 = vst [vmem:[%s154_s29 + $0x18] sm:$0xff] %v224_v3 }
  0x16   : > { %227 = vst [vmem:[%s154_s29 + $0x20] sm:$0xff] %v226_v4  ;;  %229 = vst [vmem:[%s154_s29 + $0x28] sm:$0xff] %v228_v5  ;;  %v230_v6 = vld [vmem:[%s941_s28 + $0x60] sm:$0xff]  ;;  %v232_v7 = vld [vmem:[%s941_s28 + $0x70] sm:$0xff] }
  0x17   : > { %v234_v8 = vld [vmem:[%s941_s28 + $0x80] sm:$0xff]  ;;  %231 = vst [vmem:[%s154_s29 + $0x30] sm:$0xff] %v230_v6  ;;  %233 = vst [vmem:[%s154_s29 + $0x38] sm:$0xff] %v232_v7  ;;  %v236_v9 = vld [vmem:[%s941_s28 + $0x90] sm:$0xff] }
  0x18   : > { %235 = vst [vmem:[%s154_s29 + $0x40] sm:$0xff] %v234_v8  ;;  %v238_v10 = vld [vmem:[%s941_s28 + $0xa0] sm:$0xff]  ;;  %v240_v11 = vld [vmem:[%s941_s28 + $0xb0] sm:$0xff]  ;;  %237 = vst [vmem:[%s154_s29 + $0x48] sm:$0xff] %v236_v9 }
  0x19   : > { %239 = vst [vmem:[%s154_s29 + $0x50] sm:$0xff] %v238_v10  ;;  %241 = vst [vmem:[%s154_s29 + $0x58] sm:$0xff] %v240_v11  ;;  %v242_v12 = vld [vmem:[%s941_s28 + $0xc0] sm:$0xff]  ;;  %v244_v13 = vld [vmem:[%s941_s28 + $0xd0] sm:$0xff] }
  0x1a   : > { %v246_v14 = vld [vmem:[%s941_s28 + $0xe0] sm:$0xff]  ;;  %243 = vst [vmem:[%s154_s29 + $0x60] sm:$0xff] %v242_v12  ;;  %245 = vst [vmem:[%s154_s29 + $0x68] sm:$0xff] %v244_v13  ;;  %v248_v15 = vld [vmem:[%s941_s28 + $0xf0] sm:$0xff] }
  0x1b   : > { %247 = vst [vmem:[%s154_s29 + $0x70] sm:$0xff] %v246_v14  ;;  %249 = vst [vmem:[%s154_s29 + $0x78] sm:$0xff] %v248_v15 }
  0x1c PF: > { %p705_p8 = scmp.ge.s32.totalorder %s871_s16, 1  ;;  %p266_p9 = scmp.lt.s32.totalorder %s871_s16, 3 }
  0x1e   : > { %p267_p10 = pnand %p705_p8, %p266_p9 }
  0x1f   : > { %s273_s30 = sand.u32 (!%p267_p10), 1, %s855_s12   ;;  %p302_p11 = scmp.lt.s32.totalorder (!%p267_p10), %s863_s14, 1 }
  0x20   : > { %270 = sbr.rel (%p267_p10) target bundleno = 77 (0x4d), region = 66  ;;  %s706_s4 = sshll.u32 (!%p267_p10), %s273_s30, 7 }
  0x21   : > { %s964_s6 = scalar_lea.vmem (!%p267_p10), [#allocation2], %s706_s4  ;;  %s707_s18 = sshll.u32 (!%p267_p10), %s273_s30, 6 }
  0x22   : > { %s1004_s19 = scalar_lea.vmem (!%p267_p10), [#allocation3], %s707_s18 }
  0x25   : > { %s303_s5 = scalar_select %p302_p11, %s863_s14, 1  ;;  %v309_v16 = vld [vmem:[%s964_s6] sm:$0xff]  ;;  %v310_v17 = vld [vmem:[%s964_s6 + $0x8] sm:$0xff]  ;;  %v311_v18 = vld [vmem:[%s964_s6 + $0x10] sm:$0xff] }
  0x26   : > { %v312_v19 = vld [vmem:[%s964_s6 + $0x18] sm:$0xff]  ;;  %v313_v20 = vld [vmem:[%s964_s6 + $0x20] sm:$0xff]  ;;  %v314_v21 = vld [vmem:[%s964_s6 + $0x28] sm:$0xff]  ;;  %s727_s20 = sshll.u32 (%p928_p6), %s863_s14, 2 }
  0x27   : > { %s304_s9 = scalar_lea.vmem %s1076_s1, %s303_s5  ;;  %s307_s12 = scalar_lea.vmem %s1077_s2, %s303_s5  ;;  %v315_v22 = vld [vmem:[%s964_s6 + $0x30] sm:$0xff]  ;;  %v316_v23 = vld [vmem:[%s964_s6 + $0x38] sm:$0xff]  ;;  %v317_v48 = vld [vmem:[%s964_s6 + $0x40] sm:$0xff] }
  0x28   : > { %v980_v24 = vld [vmem:[%s304_s9] ss:$0 sm:$0xff]  ;;  %v318_v53 = vld [vmem:[%s964_s6 + $0x48] sm:$0xff]  ;;  %v319_v54 = vld [vmem:[%s964_s6 + $0x50] sm:$0xff]  ;;  %s510_s25 = scalar_lea.vmem (%p928_p6), %s1078_s3, %s727_s20 }
  0x29   : > { %v982_v25 = vld [vmem:[%s307_s12] ss:$0 sm:$0xff]  ;;  %v332_v26 = vmul.f32 %v980_v24, %v309_v16  ;;  %v333_v27 = vmul.f32 %v980_v24, %v310_v17  ;;  %v334_v28 = vmul.f32 %v980_v24, %v311_v18  ;;  %v335_v29 = vmul.f32 %v980_v24, %v312_v19  ;;  %v320_v55 = vld [vmem:[%s964_s6 + $0x58] sm:$0xff]  ;;  %v322_v3 = vld [vmem:[%s964_s6 + $0x68] sm:$0xff] }
  0x2a   : > { %v336_v30 = vmul.f32 %v980_v24, %v313_v20  ;;  %v337_v31 = vmul.f32 %v980_v24, %v314_v21  ;;  %v338_v32 = vmul.f32 %v980_v24, %v315_v22  ;;  %v339_v33 = vmul.f32 %v980_v24, %v316_v23  ;;  %v321_v2 = vld [vmem:[%s964_s6 + $0x60] sm:$0xff]  ;;  %v323_v15 = vld [vmem:[%s964_s6 + $0x70] sm:$0xff]  ;;  %v324_v16 = vld [vmem:[%s964_s6 + $0x78] sm:$0xff] }
  0x2b   : > { %v355_v34 = vadd.f32 %v982_v25, %v332_v26  ;;  %v356_v35 = vadd.f32 %v982_v25, %v333_v27  ;;  %v357_v36 = vadd.f32 %v982_v25, %v334_v28  ;;  %v358_v37 = vadd.f32 %v982_v25, %v335_v29 }
  0x2c   : > { %v359_v38 = vadd.f32 %v982_v25, %v336_v30  ;;  %v360_v39 = vadd.f32 %v982_v25, %v337_v31  ;;  %v361_v40 = vadd.f32 %v982_v25, %v338_v32  ;;  %v362_v41 = vadd.f32 %v982_v25, %v339_v33 }
  0x2d   : > { %vm371_vm0 = vcmp.ge.f32.partialorder %v355_v34, 0.0  ;;  %vm372_vm1 = vcmp.ge.f32.partialorder %v356_v35, 0.0  ;;  %v387_v42 = vmul.f32 0.2, %v355_v34  ;;  %v388_v43 = vmul.f32 0.2, %v356_v35 }
  0x2e   : > { %vm373_vm2 = vcmp.ge.f32.partialorder %v357_v36, 0.0  ;;  %vm374_vm3 = vcmp.ge.f32.partialorder %v358_v37, 0.0  ;;  %v389_v44 = vmul.f32 0.2, %v357_v36  ;;  %v390_v45 = vmul.f32 0.2, %v358_v37 }
  0x2f   : > { %v403_v46 = vsel %vm371_vm0, %v355_v34, %v387_v42  ;;  %v404_v47 = vsel %vm372_vm1, %v356_v35, %v388_v43  ;;  %vm375_vm4 = vcmp.ge.f32.partialorder %v359_v38, 0.0  ;;  %vm376_vm5 = vcmp.ge.f32.partialorder %v360_v39, 0.0 }
  0x30   : > { %v749_v49 = vpack.c.bf16 %v404_v47, %v403_v46  ;;  %v405_v50 = vsel %vm373_vm2, %v357_v36, %v389_v44  ;;  %v406_v51 = vsel %vm374_vm3, %v358_v37, %v390_v45  ;;  %v391_v52 = vmul.f32 0.2, %v359_v38 }
  0x31   : > { %v754_v56 = vpack.c.bf16 %v406_v51, %v405_v50  ;;  %v392_v57 = vmul.f32 0.2, %v360_v39  ;;  %vm377_vm6 = vcmp.ge.f32.partialorder %v361_v40, 0.0  ;;  %vm378_vm7 = vcmp.ge.f32.partialorder %v362_v41, 0.0 }
  0x32   : > { %750 = vst [vmem:[%s1004_s19] sm:$0xff] %v749_v49   ;;  %v407_v58 = vsel %vm375_vm4, %v359_v38, %v391_v52  ;;  %v393_v59 = vmul.f32 0.2, %v361_v40  ;;  %v394_v60 = vmul.f32 0.2, %v362_v41  ;;  %v340_v61 = vmul.f32 %v980_v24, %v317_v48 }
  0x33   : > { %786 = vst [vmem:[%s1004_s19 + $0x8] sm:$0xff] %v754_v56   ;;  %v408_v62 = vsel %vm376_vm5, %v360_v39, %v392_v57  ;;  %v341_v63 = vmul.f32 %v980_v24, %v318_v53  ;;  %v342_v0 = vmul.f32 %v980_v24, %v319_v54  ;;  %v343_v1 = vmul.f32 %v980_v24, %v320_v55 }
  0x34   : > { %v759_v4 = vpack.c.bf16 %v408_v62, %v407_v58  ;;  %v409_v5 = vsel %vm377_vm6, %v361_v40, %v393_v59  ;;  %v410_v6 = vsel %vm378_vm7, %v362_v41, %v394_v60  ;;  %v363_v7 = vadd.f32 %v982_v25, %v340_v61 }
  0x35   : > { %v764_v8 = vpack.c.bf16 %v410_v6, %v409_v5  ;;  %v364_v9 = vadd.f32 %v982_v25, %v341_v63  ;;  %v365_v10 = vadd.f32 %v982_v25, %v342_v0  ;;  %v366_v11 = vadd.f32 %v982_v25, %v343_v1 }
  0x36   : > { %787 = vst [vmem:[%s1004_s19 + $0x10] sm:$0xff] %v759_v4   ;;  %vm379_vm8 = vcmp.ge.f32.partialorder %v363_v7, 0.0  ;;  %v395_v12 = vmul.f32 0.2, %v363_v7  ;;  %v344_v13 = vmul.f32 %v980_v24, %v321_v2  ;;  %v345_v14 = vmul.f32 %v980_v24, %v322_v3 }
  0x37   : > { %788 = vst [vmem:[%s1004_s19 + $0x18] sm:$0xff] %v764_v8   ;;  %vm380_vm9 = vcmp.ge.f32.partialorder %v364_v9, 0.0  ;;  %v396_v17 = vmul.f32 0.2, %v364_v9  ;;  %vm381_vm10 = vcmp.ge.f32.partialorder %v365_v10, 0.0  ;;  %vm382_vm11 = vcmp.ge.f32.partialorder %v366_v11, 0.0 }
  0x38   : > { %v411_v18 = vsel %vm379_vm8, %v363_v7, %v395_v12  ;;  %v397_v19 = vmul.f32 0.2, %v365_v10  ;;  %v398_v20 = vmul.f32 0.2, %v366_v11  ;;  %v367_v21 = vadd.f32 %v982_v25, %v344_v13 }
  0x39   : > { %v412_v22 = vsel %vm380_vm9, %v364_v9, %v396_v17  ;;  %v368_v23 = vadd.f32 %v982_v25, %v345_v14  ;;  %v346_v26 = vmul.f32 %v980_v24, %v323_v15  ;;  %v347_v27 = vmul.f32 %v980_v24, %v324_v16  ;;  %v529_v43 = vld [vmem:[%s1004_s19 + $0x4] sm:$0xf] (%p928_p6) }
  0x3a   : > { %v769_v28 = vpack.c.bf16 %v412_v22, %v411_v18  ;;  %v413_v29 = vsel %vm381_vm10, %v365_v10, %v397_v19  ;;  %v414_v30 = vsel %vm382_vm11, %v366_v11, %v398_v20  ;;  %vm383_vm12 = vcmp.ge.f32.partialorder %v367_v21, 0.0  ;;  %v531_v44 = vld [vmem:[%s1004_s19 + $0x8] sm:$0xf] (%p928_p6)  ;;  %v533_v45 = vld [vmem:[%s1004_s19 + $0xc] sm:$0xf] (%p928_p6) }
  0x3b   : > { %v774_v31 = vpack.c.bf16 %v414_v30, %v413_v29  ;;  %vm384_vm13 = vcmp.ge.f32.partialorder %v368_v23, 0.0  ;;  %v399_v32 = vmul.f32 0.2, %v367_v21  ;;  %v400_v33 = vmul.f32 0.2, %v368_v23 }
  0x3c   : > { %789 = vst [vmem:[%s1004_s19 + $0x20] sm:$0xff] %v769_v28   ;;  %v369_v34 = vadd.f32 %v982_v25, %v346_v26  ;;  %v370_v35 = vadd.f32 %v982_v25, %v347_v27  ;;  %v527_v25 = vld [vmem:[%s1004_s19] sm:$0xf] (%p928_p6)  ;;  %530 = vst [vmem:[%s510_s25 + $0x8] sm:$0xf] (%p928_p6), %v529_v43 }
  0x3d   : > { %790 = vst [vmem:[%s1004_s19 + $0x28] sm:$0xff] %v774_v31   ;;  %v415_v36 = vsel %vm383_vm12, %v367_v21, %v399_v32  ;;  %v416_v37 = vsel %vm384_vm13, %v368_v23, %v400_v33  ;;  %v535_v46 = vld [vmem:[%s1004_s19 + $0x10] sm:$0xf] (%p928_p6)  ;;  %528 = vst [vmem:[%s510_s25] sm:$0xf] (%p928_p6), %v527_v25  ;;  %v537_v47 = vld [vmem:[%s1004_s19 + $0x14] sm:$0xf] (%p928_p6) }
  0x3e   : > { %v779_v38 = vpack.c.bf16 %v416_v37, %v415_v36  ;;  %vm385_vm14 = vcmp.ge.f32.partialorder %v369_v34, 0.0  ;;  %vm386_vm15 = vcmp.ge.f32.partialorder %v370_v35, 0.0  ;;  %v401_v24 = vmul.f32 0.2, %v369_v34  ;;  %532 = vst [vmem:[%s510_s25 + $0x10] sm:$0xf] (%p928_p6), %v531_v44 }
  0x3f   : > { %v402_v39 = vmul.f32 0.2, %v370_v35  ;;  %534 = vst [vmem:[%s510_s25 + $0x18] sm:$0xf] (%p928_p6), %v533_v45  ;;  %536 = vst [vmem:[%s510_s25 + $0x20] sm:$0xf] (%p928_p6), %v535_v46 }
  0x40   : > { %791 = vst [vmem:[%s1004_s19 + $0x30] sm:$0xff] %v779_v38   ;;  %v417_v40 = vsel %vm385_vm14, %v369_v34, %v401_v24  ;;  %505 = sbr.rel (!%p928_p6) target bundleno = 77 (0x4d), region = 74  ;;  %v539_v48 = vld [vmem:[%s1004_s19 + $0x18] sm:$0xf] (%p928_p6)  ;;  %v541_v49 = vld [vmem:[%s1004_s19 + $0x1c] sm:$0xf] (%p928_p6) }
  0x41   : > { %v418_v41 = vsel %vm386_vm15, %v370_v35, %v402_v39  ;;  %538 = vst [vmem:[%s510_s25 + $0x28] sm:$0xf] (%p928_p6), %v537_v47  ;;  %540 = vst [vmem:[%s510_s25 + $0x30] sm:$0xf] (%p928_p6), %v539_v48 }
  0x42   : > { %v784_v42 = vpack.c.bf16 %v418_v41, %v417_v40  ;;  %542 = vst [vmem:[%s510_s25 + $0x38] sm:$0xf] (%p928_p6), %v541_v49 }
  0x43   : > { %v543_v50 = vld [vmem:[%s1004_s19 + $0x20] sm:$0xf] (%p928_p6)  ;;  %v545_v51 = vld [vmem:[%s1004_s19 + $0x24] sm:$0xf] (%p928_p6) }
  0x44   : > { %792 = vst [vmem:[%s1004_s19 + $0x38] sm:$0xff] %v784_v42   ;;  %v547_v52 = vld [vmem:[%s1004_s19 + $0x28] sm:$0xf] (%p928_p6)  ;;  %544 = vst [vmem:[%s510_s25 + $0x40] sm:$0xf] (%p928_p6), %v543_v50 }
  0x45   : > { %546 = vst [vmem:[%s510_s25 + $0x48] sm:$0xf] %v545_v51  ;;  %548 = vst [vmem:[%s510_s25 + $0x50] sm:$0xf] %v547_v52  ;;  %v549_v53 = vld [vmem:[%s1004_s19 + $0x2c] sm:$0xf] }
  0x46   : > { %550 = vst [vmem:[%s510_s25 + $0x58] sm:$0xf] %v549_v53 }
  0x47   : > { %v551_v54 = vld [vmem:[%s1004_s19 + $0x30] sm:$0xf]  ;;  %v553_v55 = vld [vmem:[%s1004_s19 + $0x34] sm:$0xf] }
  0x48   : > { %552 = vst [vmem:[%s510_s25 + $0x60] sm:$0xf] %v551_v54  ;;  %554 = vst [vmem:[%s510_s25 + $0x68] sm:$0xf] %v553_v55 }
  0x4b   : > { %v555_v56 = vld [vmem:[%s1004_s19 + $0x38] sm:$0xf]  ;;  %v557_v57 = vld [vmem:[%s1004_s19 + $0x3c] sm:$0xf] }
  0x4c   : > { %556 = vst [vmem:[%s510_s25 + $0x70] sm:$0xf] %v555_v56  ;;  %558 = vst [vmem:[%s510_s25 + $0x78] sm:$0xf] %v557_v57 }
  0x4d PF: > { %s13_s16 = sadd.s32 1, %s871_s16   ;;  %s1080_s12 = smov %s859_s13 }
  0x4e   : > { %p10_p12 = scmp.ge.s32.totalorder %s13_s16, 4   ;;  %s1081_s13 = smov %s933_s22 }
  0x4f   : > { %s1082_s14 = smov %s867_s15  ;;  %s1083_s15 = smov %s1085_s17 }
  0x50   :  { %12 = sbr.rel (!%p10_p12) target bundleno = 3 (0x3), region = 152 }

// kernel: discriminator_forward.10
= control target key start
LH: loop header
LB: loop body
LE: loop exit
PB: predicated region body
PF: predicated region fallthrough
CT: control target
= control target key end

     0   :  { %s5221_s15 = smov 0   ;;  %s5223_s16 = smov 0   ;;  %s6680_s0 = inlined_call_operand.vmem [shape: bf16[128,2048], index: 0, kind: input, shape index: {}]   ;;  %s6681_s1 = inlined_call_operand.vmem [shape: bf16[2048,256], index: 1, kind: input, shape index: {}]   ;;  %s6682_s2 = inlined_call_operand.vmem [shape: f32[128,256], index: 2, kind: output, shape index: {0}]   ;;  %s6683_s3 = inlined_call_operand.vmem [shape: f32[1,256], index: 3, kind: output, shape index: {1}]   ;;  %s6684_s4 = inlined_call_operand.vmem [shape: f32[1,256], index: 4, kind: output, shape index: {2}]  }
   0x1   :  { %s5225_s17 = smov 0   ;;  %s5227_s18 = smov 0  }
   0x2   :  { %s5229_s19 = smov 0  }
   0x3 LB: > { %s27_s20 = sadd.s32 1, %s5189_s18  ;;  %s4204_s21 = sadd.s32 4294967295, %s5193_s19   ;;  %s5193_s19 = sphi %s5229_s19, %s15_s19   ;;  %s5189_s18 = sphi %s5227_s18, %s6743_s18   ;;  %s5185_s17 = sphi %s5225_s17, %s6742_s17   ;;  %s5181_s16 = sphi %s5223_s16, %s6741_s16   ;;  %s5177_s15 = sphi %s5221_s15, %s6740_s15  }
   0x4   : > { %p29_p0 = scmp.ge.s32.totalorder %s27_s20, 2  ;;  %p67_p1 = scmp.ne.s32.totalorder %s5181_s16, %s5177_s15 }
   0x5   : > { %p68_p2 = scmp.eq.s32.totalorder %s5193_s19, 0  ;;  %p99_p4 = scmp.eq.s32.totalorder %s4204_s21, 1 }
   0x6   : > { %s6745_s20 = smov (%p29_p0, %s27_s20), 0  ;;  %s60_s23 = sadd.s32 1, %s5181_s16 }
   0x7   : > { %p69_p3 = por %p68_p2, %p67_p1  ;;  %s57_s22 = ssub.s32 %s5189_s18, %s6745_s20 }
   0x8   : > { %p58_p5 = scmp.eq.s32.totalorder %s57_s22, 0  ;;  %p5256_p6 = por %p99_p4, %p67_p1 }
   0x9   : > { %p4208_p7 = scmp.ge.s32.totalorder %s5193_s19, 2 }
   0xa   : > { %s5261_s25 = scalar_select %p58_p5, %s5181_s16, %s60_s23  }
   0xb   : > { %183 = sbr.rel (%p4208_p7) target bundleno = 190 (0xbe), region = 20 }
  0x10   : > { %186 = sbr.rel (!%p69_p3) target bundleno = 190 (0xbe), region = 24  ;;  %s188_s26 = sand.u32 (%p69_p3), 1, %s5181_s16  }
  0x11   : > { %s4210_s27 = sshll.u32 (%p69_p3), %s5189_s18, 2  ;;  %s4209_s28 = sshll.u32 (%p69_p3), %s188_s26, 10 }
  0x12   : > { %s5269_s5 = scalar_lea.vmem (%p69_p3), %s6681_s1, %s4210_s27  ;;  %s5273_s6 = scalar_lea.vmem (%p69_p3), [#allocation2], %s4209_s28 }
  0x13   : > { %v209_v0 = vld [vmem:[%s5269_s5] sm:$0xf] (%p69_p3)  ;;  %v211_v1 = vld [vmem:[%s5269_s5 + $0x8] sm:$0xf] (%p69_p3)  ;;  %v213_v2 = vld [vmem:[%s5269_s5 + $0x10] sm:$0xf] (%p69_p3) }
  0x14   : > { %210 = vst [vmem:[%s5273_s6] sm:$0xf] (%p69_p3), %v209_v0  ;;  %212 = vst [vmem:[%s5273_s6 + $0x4] sm:$0xf] (%p69_p3), %v211_v1  ;;  %v215_v3 = vld [vmem:[%s5269_s5 + $0x18] sm:$0xf] (%p69_p3) }
  0x15   : > { %v217_v4 = vld [vmem:[%s5269_s5 + $0x20] sm:$0xf]  ;;  %214 = vst [vmem:[%s5273_s6 + $0x8] sm:$0xf] %v213_v2  ;;  %216 = vst [vmem:[%s5273_s6 + $0xc] sm:$0xf] %v215_v3 }
  0x16   : > { %218 = vst [vmem:[%s5273_s6 + $0x10] sm:$0xf] %v217_v4  ;;  %v219_v5 = vld [vmem:[%s5269_s5 + $0x28] sm:$0xf]  ;;  %v221_v6 = vld [vmem:[%s5269_s5 + $0x30] sm:$0xf] }
  0x17   : > { %v223_v7 = vld [vmem:[%s5269_s5 + $0x38] sm:$0xf]  ;;  %220 = vst [vmem:[%s5273_s6 + $0x14] sm:$0xf] %v219_v5  ;;  %222 = vst [vmem:[%s5273_s6 + $0x18] sm:$0xf] %v221_v6 }
  0x18   : > { %224 = vst [vmem:[%s5273_s6 + $0x1c] sm:$0xf] %v223_v7  ;;  %v225_v8 = vld [vmem:[%s5269_s5 + $0x40] sm:$0xf]  ;;  %v227_v9 = vld [vmem:[%s5269_s5 + $0x48] sm:$0xf] }
  0x19   : > { %v229_v10 = vld [vmem:[%s5269_s5 + $0x50] sm:$0xf]  ;;  %226 = vst [vmem:[%s5273_s6 + $0x20] sm:$0xf] %v225_v8  ;;  %228 = vst [vmem:[%s5273_s6 + $0x24] sm:$0xf] %v227_v9 }
  0x1a   : > { %230 = vst [vmem:[%s5273_s6 + $0x28] sm:$0xf] %v229_v10  ;;  %v231_v11 = vld [vmem:[%s5269_s5 + $0x58] sm:$0xf]  ;;  %v233_v12 = vld [vmem:[%s5269_s5 + $0x60] sm:$0xf] }
  0x1b   : > { %v235_v13 = vld [vmem:[%s5269_s5 + $0x68] sm:$0xf]  ;;  %232 = vst [vmem:[%s5273_s6 + $0x2c] sm:$0xf] %v231_v11  ;;  %234 = vst [vmem:[%s5273_s6 + $0x30] sm:$0xf] %v233_v12 }
  0x1c   : > { %236 = vst [vmem:[%s5273_s6 + $0x34] sm:$0xf] %v235_v13  ;;  %v237_v14 = vld [vmem:[%s5269_s5 + $0x70] sm:$0xf]  ;;  %v239_v15 = vld [vmem:[%s5269_s5 + $0x78] sm:$0xf] }
  0x1d   : > { %v241_v16 = vld [vmem:[%s5269_s5 + $0x80] sm:$0xf]  ;;  %238 = vst [vmem:[%s5273_s6 + $0x38] sm:$0xf] %v237_v14  ;;  %240 = vst [vmem:[%s5273_s6 + $0x3c] sm:$0xf] %v239_v15 }
  0x1e   : > { %242 = vst [vmem:[%s5273_s6 + $0x40] sm:$0xf] %v241_v16  ;;  %v243_v17 = vld [vmem:[%s5269_s5 + $0x88] sm:$0xf]  ;;  %v245_v18 = vld [vmem:[%s5269_s5 + $0x90] sm:$0xf] }
  0x1f   : > { %v247_v19 = vld [vmem:[%s5269_s5 + $0x98] sm:$0xf]  ;;  %244 = vst [vmem:[%s5273_s6 + $0x44] sm:$0xf] %v243_v17  ;;  %246 = vst [vmem:[%s5273_s6 + $0x48] sm:$0xf] %v245_v18 }
  0x20   : > { %248 = vst [vmem:[%s5273_s6 + $0x4c] sm:$0xf] %v247_v19  ;;  %v249_v20 = vld [vmem:[%s5269_s5 + $0xa0] sm:$0xf]  ;;  %v251_v21 = vld [vmem:[%s5269_s5 + $0xa8] sm:$0xf] }
  0x21   : > { %v253_v22 = vld [vmem:[%s5269_s5 + $0xb0] sm:$0xf]  ;;  %250 = vst [vmem:[%s5273_s6 + $0x50] sm:$0xf] %v249_v20  ;;  %252 = vst [vmem:[%s5273_s6 + $0x54] sm:$0xf] %v251_v21 }
  0x22   : > { %254 = vst [vmem:[%s5273_s6 + $0x58] sm:$0xf] %v253_v22  ;;  %v255_v23 = vld [vmem:[%s5269_s5 + $0xb8] sm:$0xf]  ;;  %v257_v24 = vld [vmem:[%s5269_s5 + $0xc0] sm:$0xf] }
  0x23   : > { %v259_v25 = vld [vmem:[%s5269_s5 + $0xc8] sm:$0xf]  ;;  %256 = vst [vmem:[%s5273_s6 + $0x5c] sm:$0xf] %v255_v23  ;;  %258 = vst [vmem:[%s5273_s6 + $0x60] sm:$0xf] %v257_v24 }
  0x24   : > { %260 = vst [vmem:[%s5273_s6 + $0x64] sm:$0xf] %v259_v25  ;;  %v261_v26 = vld [vmem:[%s5269_s5 + $0xd0] sm:$0xf]  ;;  %v263_v27 = vld [vmem:[%s5269_s5 + $0xd8] sm:$0xf] }
  0x25   : > { %v265_v28 = vld [vmem:[%s5269_s5 + $0xe0] sm:$0xf]  ;;  %262 = vst [vmem:[%s5273_s6 + $0x68] sm:$0xf] %v261_v26  ;;  %264 = vst [vmem:[%s5273_s6 + $0x6c] sm:$0xf] %v263_v27 }
  0x26   : > { %266 = vst [vmem:[%s5273_s6 + $0x70] sm:$0xf] %v265_v28  ;;  %v267_v29 = vld [vmem:[%s5269_s5 + $0xe8] sm:$0xf]  ;;  %v269_v30 = vld [vmem:[%s5269_s5 + $0xf0] sm:$0xf] }
  0x27   : > { %v271_v31 = vld [vmem:[%s5269_s5 + $0xf8] sm:$0xf]  ;;  %268 = vst [vmem:[%s5273_s6 + $0x74] sm:$0xf] %v267_v29  ;;  %270 = vst [vmem:[%s5273_s6 + $0x78] sm:$0xf] %v269_v30 }
  0x28   : > { %272 = vst [vmem:[%s5273_s6 + $0x7c] sm:$0xf] %v271_v31  ;;  %v273_v32 = vld [vmem:[%s5269_s5 + $0x100] sm:$0xf]  ;;  %v275_v33 = vld [vmem:[%s5269_s5 + $0x108] sm:$0xf] }
  0x29   : > { %v277_v34 = vld [vmem:[%s5269_s5 + $0x110] sm:$0xf]  ;;  %274 = vst [vmem:[%s5273_s6 + $0x80] sm:$0xf] %v273_v32  ;;  %276 = vst [vmem:[%s5273_s6 + $0x84] sm:$0xf] %v275_v33 }
  0x2a   : > { %278 = vst [vmem:[%s5273_s6 + $0x88] sm:$0xf] %v277_v34  ;;  %v279_v35 = vld [vmem:[%s5269_s5 + $0x118] sm:$0xf]  ;;  %v281_v36 = vld [vmem:[%s5269_s5 + $0x120] sm:$0xf] }
  0x2b   : > { %v283_v37 = vld [vmem:[%s5269_s5 + $0x128] sm:$0xf]  ;;  %280 = vst [vmem:[%s5273_s6 + $0x8c] sm:$0xf] %v279_v35  ;;  %282 = vst [vmem:[%s5273_s6 + $0x90] sm:$0xf] %v281_v36 }
  0x2c   : > { %284 = vst [vmem:[%s5273_s6 + $0x94] sm:$0xf] %v283_v37  ;;  %v285_v38 = vld [vmem:[%s5269_s5 + $0x130] sm:$0xf]  ;;  %v287_v39 = vld [vmem:[%s5269_s5 + $0x138] sm:$0xf] }
  0x2d   : > { %v289_v40 = vld [vmem:[%s5269_s5 + $0x140] sm:$0xf]  ;;  %286 = vst [vmem:[%s5273_s6 + $0x98] sm:$0xf] %v285_v38  ;;  %288 = vst [vmem:[%s5273_s6 + $0x9c] sm:$0xf] %v287_v39 }
  0x2e   : > { %290 = vst [vmem:[%s5273_s6 + $0xa0] sm:$0xf] %v289_v40  ;;  %v291_v41 = vld [vmem:[%s5269_s5 + $0x148] sm:$0xf]  ;;  %v293_v42 = vld [vmem:[%s5269_s5 + $0x150] sm:$0xf] }
  0x2f   : > { %v295_v43 = vld [vmem:[%s5269_s5 + $0x158] sm:$0xf]  ;;  %292 = vst [vmem:[%s5273_s6 + $0xa4] sm:$0xf] %v291_v41  ;;  %294 = vst [vmem:[%s5273_s6 + $0xa8] sm:$0xf] %v293_v42 }
  0x30   : > { %296 = vst [vmem:[%s5273_s6 + $0xac] sm:$0xf] %v295_v43  ;;  %v297_v44 = vld [vmem:[%s5269_s5 + $0x160] sm:$0xf]  ;;  %v299_v45 = vld [vmem:[%s5269_s5 + $0x168] sm:$0xf] }
  0x31   : > { %v301_v46 = vld [vmem:[%s5269_s5 + $0x170] sm:$0xf]  ;;  %298 = vst [vmem:[%s5273_s6 + $0xb0] sm:$0xf] %v297_v44  ;;  %300 = vst [vmem:[%s5273_s6 + $0xb4] sm:$0xf] %v299_v45 }
  0x32   : > { %302 = vst [vmem:[%s5273_s6 + $0xb8] sm:$0xf] %v301_v46  ;;  %v303_v47 = vld [vmem:[%s5269_s5 + $0x178] sm:$0xf]  ;;  %v305_v48 = vld [vmem:[%s5269_s5 + $0x180] sm:$0xf] }
  0x33   : > { %v307_v49 = vld [vmem:[%s5269_s5 + $0x188] sm:$0xf]  ;;  %304 = vst [vmem:[%s5273_s6 + $0xbc] sm:$0xf] %v303_v47  ;;  %306 = vst [vmem:[%s5273_s6 + $0xc0] sm:$0xf] %v305_v48 }
  0x34   : > { %308 = vst [vmem:[%s5273_s6 + $0xc4] sm:$0xf] %v307_v49  ;;  %v309_v50 = vld [vmem:[%s5269_s5 + $0x190] sm:$0xf]  ;;  %v311_v51 = vld [vmem:[%s5269_s5 + $0x198] sm:$0xf] }
  0x35   : > { %v313_v52 = vld [vmem:[%s5269_s5 + $0x1a0] sm:$0xf]  ;;  %310 = vst [vmem:[%s5273_s6 + $0xc8] sm:$0xf] %v309_v50  ;;  %312 = vst [vmem:[%s5273_s6 + $0xcc] sm:$0xf] %v311_v51 }
  0x36   : > { %314 = vst [vmem:[%s5273_s6 + $0xd0] sm:$0xf] %v313_v52  ;;  %v315_v53 = vld [vmem:[%s5269_s5 + $0x1a8] sm:$0xf]  ;;  %v317_v54 = vld [vmem:[%s5269_s5 + $0x1b0] sm:$0xf] }
  0x37   : > { %v319_v55 = vld [vmem:[%s5269_s5 + $0x1b8] sm:$0xf]  ;;  %316 = vst [vmem:[%s5273_s6 + $0xd4] sm:$0xf] %v315_v53  ;;  %318 = vst [vmem:[%s5273_s6 + $0xd8] sm:$0xf] %v317_v54 }
  0x38   : > { %320 = vst [vmem:[%s5273_s6 + $0xdc] sm:$0xf] %v319_v55  ;;  %v321_v56 = vld [vmem:[%s5269_s5 + $0x1c0] sm:$0xf]  ;;  %v323_v57 = vld [vmem:[%s5269_s5 + $0x1c8] sm:$0xf] }
  0x39   : > { %v325_v58 = vld [vmem:[%s5269_s5 + $0x1d0] sm:$0xf]  ;;  %322 = vst [vmem:[%s5273_s6 + $0xe0] sm:$0xf] %v321_v56  ;;  %324 = vst [vmem:[%s5273_s6 + $0xe4] sm:$0xf] %v323_v57 }
  0x3a   : > { %326 = vst [vmem:[%s5273_s6 + $0xe8] sm:$0xf] %v325_v58  ;;  %v327_v59 = vld [vmem:[%s5269_s5 + $0x1d8] sm:$0xf]  ;;  %v329_v60 = vld [vmem:[%s5269_s5 + $0x1e0] sm:$0xf] }
  0x3b   : > { %v331_v61 = vld [vmem:[%s5269_s5 + $0x1e8] sm:$0xf]  ;;  %328 = vst [vmem:[%s5273_s6 + $0xec] sm:$0xf] %v327_v59  ;;  %330 = vst [vmem:[%s5273_s6 + $0xf0] sm:$0xf] %v329_v60 }
  0x3c   : > { %332 = vst [vmem:[%s5273_s6 + $0xf4] sm:$0xf] %v331_v61  ;;  %v333_v62 = vld [vmem:[%s5269_s5 + $0x1f0] sm:$0xf]  ;;  %v335_v63 = vld [vmem:[%s5269_s5 + $0x1f8] sm:$0xf] }
  0x3d   : > { %v337_v0 = vld [vmem:[%s5269_s5 + $0x200] sm:$0xf]  ;;  %334 = vst [vmem:[%s5273_s6 + $0xf8] sm:$0xf] %v333_v62  ;;  %336 = vst [vmem:[%s5273_s6 + $0xfc] sm:$0xf] %v335_v63 }
  0x3e   : > { %338 = vst [vmem:[%s5273_s6 + $0x100] sm:$0xf] %v337_v0  ;;  %v339_v1 = vld [vmem:[%s5269_s5 + $0x208] sm:$0xf]  ;;  %v341_v2 = vld [vmem:[%s5269_s5 + $0x210] sm:$0xf] }
  0x3f   : > { %v343_v3 = vld [vmem:[%s5269_s5 + $0x218] sm:$0xf]  ;;  %340 = vst [vmem:[%s5273_s6 + $0x104] sm:$0xf] %v339_v1  ;;  %342 = vst [vmem:[%s5273_s6 + $0x108] sm:$0xf] %v341_v2 }
  0x40   : > { %344 = vst [vmem:[%s5273_s6 + $0x10c] sm:$0xf] %v343_v3  ;;  %v345_v4 = vld [vmem:[%s5269_s5 + $0x220] sm:$0xf]  ;;  %v347_v5 = vld [vmem:[%s5269_s5 + $0x228] sm:$0xf] }
  0x41   : > { %v349_v6 = vld [vmem:[%s5269_s5 + $0x230] sm:$0xf]  ;;  %346 = vst [vmem:[%s5273_s6 + $0x110] sm:$0xf] %v345_v4  ;;  %348 = vst [vmem:[%s5273_s6 + $0x114] sm:$0xf] %v347_v5 }
  0x42   : > { %350 = vst [vmem:[%s5273_s6 + $0x118] sm:$0xf] %v349_v6  ;;  %v351_v7 = vld [vmem:[%s5269_s5 + $0x238] sm:$0xf]  ;;  %v353_v8 = vld [vmem:[%s5269_s5 + $0x240] sm:$0xf] }
  0x43   : > { %v355_v9 = vld [vmem:[%s5269_s5 + $0x248] sm:$0xf]  ;;  %352 = vst [vmem:[%s5273_s6 + $0x11c] sm:$0xf] %v351_v7  ;;  %354 = vst [vmem:[%s5273_s6 + $0x120] sm:$0xf] %v353_v8 }
  0x44   : > { %356 = vst [vmem:[%s5273_s6 + $0x124] sm:$0xf] %v355_v9  ;;  %v357_v10 = vld [vmem:[%s5269_s5 + $0x250] sm:$0xf]  ;;  %v359_v11 = vld [vmem:[%s5269_s5 + $0x258] sm:$0xf] }
  0x45   : > { %v361_v12 = vld [vmem:[%s5269_s5 + $0x260] sm:$0xf]  ;;  %358 = vst [vmem:[%s5273_s6 + $0x128] sm:$0xf] %v357_v10  ;;  %360 = vst [vmem:[%s5273_s6 + $0x12c] sm:$0xf] %v359_v11 }
  0x46   : > { %362 = vst [vmem:[%s5273_s6 + $0x130] sm:$0xf] %v361_v12  ;;  %v363_v13 = vld [vmem:[%s5269_s5 + $0x268] sm:$0xf]  ;;  %v365_v14 = vld [vmem:[%s5269_s5 + $0x270] sm:$0xf] }
  0x47   : > { %v367_v15 = vld [vmem:[%s5269_s5 + $0x278] sm:$0xf]  ;;  %364 = vst [vmem:[%s5273_s6 + $0x134] sm:$0xf] %v363_v13  ;;  %366 = vst [vmem:[%s5273_s6 + $0x138] sm:$0xf] %v365_v14 }
  0x48   : > { %368 = vst [vmem:[%s5273_s6 + $0x13c] sm:$0xf] %v367_v15  ;;  %v369_v16 = vld [vmem:[%s5269_s5 + $0x280] sm:$0xf]  ;;  %v371_v17 = vld [vmem:[%s5269_s5 + $0x288] sm:$0xf] }
  0x49   : > { %v373_v18 = vld [vmem:[%s5269_s5 + $0x290] sm:$0xf]  ;;  %370 = vst [vmem:[%s5273_s6 + $0x140] sm:$0xf] %v369_v16  ;;  %372 = vst [vmem:[%s5273_s6 + $0x144] sm:$0xf] %v371_v17 }
  0x4a   : > { %374 = vst [vmem:[%s5273_s6 + $0x148] sm:$0xf] %v373_v18  ;;  %v375_v19 = vld [vmem:[%s5269_s5 + $0x298] sm:$0xf]  ;;  %v377_v20 = vld [vmem:[%s5269_s5 + $0x2a0] sm:$0xf] }
  0x4b   : > { %v379_v21 = vld [vmem:[%s5269_s5 + $0x2a8] sm:$0xf]  ;;  %376 = vst [vmem:[%s5273_s6 + $0x14c] sm:$0xf] %v375_v19  ;;  %378 = vst [vmem:[%s5273_s6 + $0x150] sm:$0xf] %v377_v20 }
  0x4c   : > { %380 = vst [vmem:[%s5273_s6 + $0x154] sm:$0xf] %v379_v21  ;;  %v381_v22 = vld [vmem:[%s5269_s5 + $0x2b0] sm:$0xf]  ;;  %v383_v23 = vld [vmem:[%s5269_s5 + $0x2b8] sm:$0xf] }
  0x4d   : > { %v385_v24 = vld [vmem:[%s5269_s5 + $0x2c0] sm:$0xf]  ;;  %382 = vst [vmem:[%s5273_s6 + $0x158] sm:$0xf] %v381_v22  ;;  %384 = vst [vmem:[%s5273_s6 + $0x15c] sm:$0xf] %v383_v23 }
  0x4e   : > { %386 = vst [vmem:[%s5273_s6 + $0x160] sm:$0xf] %v385_v24  ;;  %v387_v25 = vld [vmem:[%s5269_s5 + $0x2c8] sm:$0xf]  ;;  %v389_v26 = vld [vmem:[%s5269_s5 + $0x2d0] sm:$0xf] }
  0x4f   : > { %v391_v27 = vld [vmem:[%s5269_s5 + $0x2d8] sm:$0xf]  ;;  %388 = vst [vmem:[%s5273_s6 + $0x164] sm:$0xf] %v387_v25  ;;  %390 = vst [vmem:[%s5273_s6 + $0x168] sm:$0xf] %v389_v26 }
  0x50   : > { %392 = vst [vmem:[%s5273_s6 + $0x16c] sm:$0xf] %v391_v27  ;;  %v393_v28 = vld [vmem:[%s5269_s5 + $0x2e0] sm:$0xf]  ;;  %v395_v29 = vld [vmem:[%s5269_s5 + $0x2e8] sm:$0xf] }
  0x51   : > { %v397_v30 = vld [vmem:[%s5269_s5 + $0x2f0] sm:$0xf]  ;;  %394 = vst [vmem:[%s5273_s6 + $0x170] sm:$0xf] %v393_v28  ;;  %396 = vst [vmem:[%s5273_s6 + $0x174] sm:$0xf] %v395_v29 }
  0x52   : > { %398 = vst [vmem:[%s5273_s6 + $0x178] sm:$0xf] %v397_v30  ;;  %v399_v31 = vld [vmem:[%s5269_s5 + $0x2f8] sm:$0xf]  ;;  %v401_v32 = vld [vmem:[%s5269_s5 + $0x300] sm:$0xf] }
  0x53   : > { %v403_v33 = vld [vmem:[%s5269_s5 + $0x308] sm:$0xf]  ;;  %400 = vst [vmem:[%s5273_s6 + $0x17c] sm:$0xf] %v399_v31  ;;  %402 = vst [vmem:[%s5273_s6 + $0x180] sm:$0xf] %v401_v32 }
  0x54   : > { %404 = vst [vmem:[%s5273_s6 + $0x184] sm:$0xf] %v403_v33  ;;  %v405_v34 = vld [vmem:[%s5269_s5 + $0x310] sm:$0xf]  ;;  %v407_v35 = vld [vmem:[%s5269_s5 + $0x318] sm:$0xf] }
  0x55   : > { %v409_v36 = vld [vmem:[%s5269_s5 + $0x320] sm:$0xf]  ;;  %406 = vst [vmem:[%s5273_s6 + $0x188] sm:$0xf] %v405_v34  ;;  %408 = vst [vmem:[%s5273_s6 + $0x18c] sm:$0xf] %v407_v35 }
  0x56   : > { %410 = vst [vmem:[%s5273_s6 + $0x190] sm:$0xf] %v409_v36  ;;  %v411_v37 = vld [vmem:[%s5269_s5 + $0x328] sm:$0xf]  ;;  %v413_v38 = vld [vmem:[%s5269_s5 + $0x330] sm:$0xf] }
  0x57   : > { %v415_v39 = vld [vmem:[%s5269_s5 + $0x338] sm:$0xf]  ;;  %412 = vst [vmem:[%s5273_s6 + $0x194] sm:$0xf] %v411_v37  ;;  %414 = vst [vmem:[%s5273_s6 + $0x198] sm:$0xf] %v413_v38 }
  0x58   : > { %416 = vst [vmem:[%s5273_s6 + $0x19c] sm:$0xf] %v415_v39  ;;  %v417_v40 = vld [vmem:[%s5269_s5 + $0x340] sm:$0xf]  ;;  %v419_v41 = vld [vmem:[%s5269_s5 + $0x348] sm:$0xf] }
  0x59   : > { %v421_v42 = vld [vmem:[%s5269_s5 + $0x350] sm:$0xf]  ;;  %418 = vst [vmem:[%s5273_s6 + $0x1a0] sm:$0xf] %v417_v40  ;;  %420 = vst [vmem:[%s5273_s6 + $0x1a4] sm:$0xf] %v419_v41 }
  0x5a   : > { %422 = vst [vmem:[%s5273_s6 + $0x1a8] sm:$0xf] %v421_v42  ;;  %v423_v43 = vld [vmem:[%s5269_s5 + $0x358] sm:$0xf]  ;;  %v425_v44 = vld [vmem:[%s5269_s5 + $0x360] sm:$0xf] }
  0x5b   : > { %v427_v45 = vld [vmem:[%s5269_s5 + $0x368] sm:$0xf]  ;;  %424 = vst [vmem:[%s5273_s6 + $0x1ac] sm:$0xf] %v423_v43  ;;  %426 = vst [vmem:[%s5273_s6 + $0x1b0] sm:$0xf] %v425_v44 }
  0x5c   : > { %428 = vst [vmem:[%s5273_s6 + $0x1b4] sm:$0xf] %v427_v45  ;;  %v429_v46 = vld [vmem:[%s5269_s5 + $0x370] sm:$0xf]  ;;  %v431_v47 = vld [vmem:[%s5269_s5 + $0x378] sm:$0xf] }
  0x5d   : > { %v433_v48 = vld [vmem:[%s5269_s5 + $0x380] sm:$0xf]  ;;  %430 = vst [vmem:[%s5273_s6 + $0x1b8] sm:$0xf] %v429_v46  ;;  %432 = vst [vmem:[%s5273_s6 + $0x1bc] sm:$0xf] %v431_v47 }
  0x5e   : > { %434 = vst [vmem:[%s5273_s6 + $0x1c0] sm:$0xf] %v433_v48  ;;  %v435_v49 = vld [vmem:[%s5269_s5 + $0x388] sm:$0xf]  ;;  %v437_v50 = vld [vmem:[%s5269_s5 + $0x390] sm:$0xf] }
  0x5f   : > { %v439_v51 = vld [vmem:[%s5269_s5 + $0x398] sm:$0xf]  ;;  %436 = vst [vmem:[%s5273_s6 + $0x1c4] sm:$0xf] %v435_v49  ;;  %438 = vst [vmem:[%s5273_s6 + $0x1c8] sm:$0xf] %v437_v50 }
  0x60   : > { %440 = vst [vmem:[%s5273_s6 + $0x1cc] sm:$0xf] %v439_v51  ;;  %v441_v52 = vld [vmem:[%s5269_s5 + $0x3a0] sm:$0xf]  ;;  %v443_v53 = vld [vmem:[%s5269_s5 + $0x3a8] sm:$0xf] }
  0x61   : > { %v445_v54 = vld [vmem:[%s5269_s5 + $0x3b0] sm:$0xf]  ;;  %442 = vst [vmem:[%s5273_s6 + $0x1d0] sm:$0xf] %v441_v52  ;;  %444 = vst [vmem:[%s5273_s6 + $0x1d4] sm:$0xf] %v443_v53 }
  0x62   : > { %446 = vst [vmem:[%s5273_s6 + $0x1d8] sm:$0xf] %v445_v54  ;;  %v447_v55 = vld [vmem:[%s5269_s5 + $0x3b8] sm:$0xf]  ;;  %v449_v56 = vld [vmem:[%s5269_s5 + $0x3c0] sm:$0xf] }
  0x63   : > { %v451_v57 = vld [vmem:[%s5269_s5 + $0x3c8] sm:$0xf]  ;;  %448 = vst [vmem:[%s5273_s6 + $0x1dc] sm:$0xf] %v447_v55  ;;  %450 = vst [vmem:[%s5273_s6 + $0x1e0] sm:$0xf] %v449_v56 }
  0x64   : > { %452 = vst [vmem:[%s5273_s6 + $0x1e4] sm:$0xf] %v451_v57  ;;  %v453_v58 = vld [vmem:[%s5269_s5 + $0x3d0] sm:$0xf]  ;;  %v455_v59 = vld [vmem:[%s5269_s5 + $0x3d8] sm:$0xf] }
  0x65   : > { %v457_v60 = vld [vmem:[%s5269_s5 + $0x3e0] sm:$0xf]  ;;  %454 = vst [vmem:[%s5273_s6 + $0x1e8] sm:$0xf] %v453_v58  ;;  %456 = vst [vmem:[%s5273_s6 + $0x1ec] sm:$0xf] %v455_v59 }
  0x66   : > { %458 = vst [vmem:[%s5273_s6 + $0x1f0] sm:$0xf] %v457_v60  ;;  %v459_v61 = vld [vmem:[%s5269_s5 + $0x3e8] sm:$0xf]  ;;  %v461_v62 = vld [vmem:[%s5269_s5 + $0x3f0] sm:$0xf] }
  0x67   : > { %v463_v63 = vld [vmem:[%s5269_s5 + $0x3f8] sm:$0xf]  ;;  %460 = vst [vmem:[%s5273_s6 + $0x1f4] sm:$0xf] %v459_v61  ;;  %462 = vst [vmem:[%s5273_s6 + $0x1f8] sm:$0xf] %v461_v62 }
  0x68   : > { %464 = vst [vmem:[%s5273_s6 + $0x1fc] sm:$0xf] %v463_v63  ;;  %v465_v0 = vld [vmem:[%s5269_s5 + $0x400] sm:$0xf]  ;;  %v467_v1 = vld [vmem:[%s5269_s5 + $0x408] sm:$0xf] }
  0x69   : > { %v469_v2 = vld [vmem:[%s5269_s5 + $0x410] sm:$0xf]  ;;  %466 = vst [vmem:[%s5273_s6 + $0x200] sm:$0xf] %v465_v0  ;;  %468 = vst [vmem:[%s5273_s6 + $0x204] sm:$0xf] %v467_v1 }
  0x6a   : > { %470 = vst [vmem:[%s5273_s6 + $0x208] sm:$0xf] %v469_v2  ;;  %v471_v3 = vld [vmem:[%s5269_s5 + $0x418] sm:$0xf]  ;;  %v473_v4 = vld [vmem:[%s5269_s5 + $0x420] sm:$0xf] }
  0x6b   : > { %v475_v5 = vld [vmem:[%s5269_s5 + $0x428] sm:$0xf]  ;;  %472 = vst [vmem:[%s5273_s6 + $0x20c] sm:$0xf] %v471_v3  ;;  %474 = vst [vmem:[%s5273_s6 + $0x210] sm:$0xf] %v473_v4 }
  0x6c   : > { %476 = vst [vmem:[%s5273_s6 + $0x214] sm:$0xf] %v475_v5  ;;  %v477_v6 = vld [vmem:[%s5269_s5 + $0x430] sm:$0xf]  ;;  %v479_v7 = vld [vmem:[%s5269_s5 + $0x438] sm:$0xf] }
  0x6d   : > { %v481_v8 = vld [vmem:[%s5269_s5 + $0x440] sm:$0xf]  ;;  %478 = vst [vmem:[%s5273_s6 + $0x218] sm:$0xf] %v477_v6  ;;  %480 = vst [vmem:[%s5273_s6 + $0x21c] sm:$0xf] %v479_v7 }
  0x6e   : > { %482 = vst [vmem:[%s5273_s6 + $0x220] sm:$0xf] %v481_v8  ;;  %v483_v9 = vld [vmem:[%s5269_s5 + $0x448] sm:$0xf]  ;;  %v485_v10 = vld [vmem:[%s5269_s5 + $0x450] sm:$0xf] }
  0x6f   : > { %v487_v11 = vld [vmem:[%s5269_s5 + $0x458] sm:$0xf]  ;;  %484 = vst [vmem:[%s5273_s6 + $0x224] sm:$0xf] %v483_v9  ;;  %486 = vst [vmem:[%s5273_s6 + $0x228] sm:$0xf] %v485_v10 }
  0x70   : > { %488 = vst [vmem:[%s5273_s6 + $0x22c] sm:$0xf] %v487_v11  ;;  %v489_v12 = vld [vmem:[%s5269_s5 + $0x460] sm:$0xf]  ;;  %v491_v13 = vld [vmem:[%s5269_s5 + $0x468] sm:$0xf] }
  0x71   : > { %v493_v14 = vld [vmem:[%s5269_s5 + $0x470] sm:$0xf]  ;;  %490 = vst [vmem:[%s5273_s6 + $0x230] sm:$0xf] %v489_v12  ;;  %492 = vst [vmem:[%s5273_s6 + $0x234] sm:$0xf] %v491_v13 }
  0x72   : > { %494 = vst [vmem:[%s5273_s6 + $0x238] sm:$0xf] %v493_v14  ;;  %v495_v15 = vld [vmem:[%s5269_s5 + $0x478] sm:$0xf]  ;;  %v497_v16 = vld [vmem:[%s5269_s5 + $0x480] sm:$0xf] }
  0x73   : > { %v499_v17 = vld [vmem:[%s5269_s5 + $0x488] sm:$0xf]  ;;  %496 = vst [vmem:[%s5273_s6 + $0x23c] sm:$0xf] %v495_v15  ;;  %498 = vst [vmem:[%s5273_s6 + $0x240] sm:$0xf] %v497_v16 }
  0x74   : > { %500 = vst [vmem:[%s5273_s6 + $0x244] sm:$0xf] %v499_v17  ;;  %v501_v18 = vld [vmem:[%s5269_s5 + $0x490] sm:$0xf]  ;;  %v503_v19 = vld [vmem:[%s5269_s5 + $0x498] sm:$0xf] }
  0x75   : > { %v505_v20 = vld [vmem:[%s5269_s5 + $0x4a0] sm:$0xf]  ;;  %502 = vst [vmem:[%s5273_s6 + $0x248] sm:$0xf] %v501_v18  ;;  %504 = vst [vmem:[%s5273_s6 + $0x24c] sm:$0xf] %v503_v19 }
  0x76   : > { %506 = vst [vmem:[%s5273_s6 + $0x250] sm:$0xf] %v505_v20  ;;  %v507_v21 = vld [vmem:[%s5269_s5 + $0x4a8] sm:$0xf]  ;;  %v509_v22 = vld [vmem:[%s5269_s5 + $0x4b0] sm:$0xf] }
  0x77   : > { %v511_v23 = vld [vmem:[%s5269_s5 + $0x4b8] sm:$0xf]  ;;  %508 = vst [vmem:[%s5273_s6 + $0x254] sm:$0xf] %v507_v21  ;;  %510 = vst [vmem:[%s5273_s6 + $0x258] sm:$0xf] %v509_v22 }
  0x78   : > { %512 = vst [vmem:[%s5273_s6 + $0x25c] sm:$0xf] %v511_v23  ;;  %v513_v24 = vld [vmem:[%s5269_s5 + $0x4c0] sm:$0xf]  ;;  %v515_v25 = vld [vmem:[%s5269_s5 + $0x4c8] sm:$0xf] }
  0x79   : > { %v517_v26 = vld [vmem:[%s5269_s5 + $0x4d0] sm:$0xf]  ;;  %514 = vst [vmem:[%s5273_s6 + $0x260] sm:$0xf] %v513_v24  ;;  %516 = vst [vmem:[%s5273_s6 + $0x264] sm:$0xf] %v515_v25 }
  0x7a   : > { %518 = vst [vmem:[%s5273_s6 + $0x268] sm:$0xf] %v517_v26  ;;  %v519_v27 = vld [vmem:[%s5269_s5 + $0x4d8] sm:$0xf]  ;;  %v521_v28 = vld [vmem:[%s5269_s5 + $0x4e0] sm:$0xf] }
  0x7b   : > { %v523_v29 = vld [vmem:[%s5269_s5 + $0x4e8] sm:$0xf]  ;;  %520 = vst [vmem:[%s5273_s6 + $0x26c] sm:$0xf] %v519_v27  ;;  %522 = vst [vmem:[%s5273_s6 + $0x270] sm:$0xf] %v521_v28 }
  0x7c   : > { %524 = vst [vmem:[%s5273_s6 + $0x274] sm:$0xf] %v523_v29  ;;  %v525_v30 = vld [vmem:[%s5269_s5 + $0x4f0] sm:$0xf]  ;;  %v527_v31 = vld [vmem:[%s5269_s5 + $0x4f8] sm:$0xf] }
  0x7d   : > { %v529_v32 = vld [vmem:[%s5269_s5 + $0x500] sm:$0xf]  ;;  %526 = vst [vmem:[%s5273_s6 + $0x278] sm:$0xf] %v525_v30  ;;  %528 = vst [vmem:[%s5273_s6 + $0x27c] sm:$0xf] %v527_v31 }
  0x7e   : > { %530 = vst [vmem:[%s5273_s6 + $0x280] sm:$0xf] %v529_v32  ;;  %v531_v33 = vld [vmem:[%s5269_s5 + $0x508] sm:$0xf]  ;;  %v533_v34 = vld [vmem:[%s5269_s5 + $0x510] sm:$0xf] }
  0x7f   : > { %v535_v35 = vld [vmem:[%s5269_s5 + $0x518] sm:$0xf]  ;;  %532 = vst [vmem:[%s5273_s6 + $0x284] sm:$0xf] %v531_v33  ;;  %534 = vst [vmem:[%s5273_s6 + $0x288] sm:$0xf] %v533_v34 }
  0x80   : > { %536 = vst [vmem:[%s5273_s6 + $0x28c] sm:$0xf] %v535_v35  ;;  %v537_v36 = vld [vmem:[%s5269_s5 + $0x520] sm:$0xf]  ;;  %v539_v37 = vld [vmem:[%s5269_s5 + $0x528] sm:$0xf] }
  0x81   : > { %v541_v38 = vld [vmem:[%s5269_s5 + $0x530] sm:$0xf]  ;;  %538 = vst [vmem:[%s5273_s6 + $0x290] sm:$0xf] %v537_v36  ;;  %540 = vst [vmem:[%s5273_s6 + $0x294] sm:$0xf] %v539_v37 }
  0x82   : > { %542 = vst [vmem:[%s5273_s6 + $0x298] sm:$0xf] %v541_v38  ;;  %v543_v39 = vld [vmem:[%s5269_s5 + $0x538] sm:$0xf]  ;;  %v545_v40 = vld [vmem:[%s5269_s5 + $0x540] sm:$0xf] }
  0x83   : > { %v547_v41 = vld [vmem:[%s5269_s5 + $0x548] sm:$0xf]  ;;  %544 = vst [vmem:[%s5273_s6 + $0x29c] sm:$0xf] %v543_v39  ;;  %546 = vst [vmem:[%s5273_s6 + $0x2a0] sm:$0xf] %v545_v40 }
  0x84   : > { %548 = vst [vmem:[%s5273_s6 + $0x2a4] sm:$0xf] %v547_v41  ;;  %v549_v42 = vld [vmem:[%s5269_s5 + $0x550] sm:$0xf]  ;;  %v551_v43 = vld [vmem:[%s5269_s5 + $0x558] sm:$0xf] }
  0x85   : > { %v553_v44 = vld [vmem:[%s5269_s5 + $0x560] sm:$0xf]  ;;  %550 = vst [vmem:[%s5273_s6 + $0x2a8] sm:$0xf] %v549_v42  ;;  %552 = vst [vmem:[%s5273_s6 + $0x2ac] sm:$0xf] %v551_v43 }
  0x86   : > { %554 = vst [vmem:[%s5273_s6 + $0x2b0] sm:$0xf] %v553_v44  ;;  %v555_v45 = vld [vmem:[%s5269_s5 + $0x568] sm:$0xf]  ;;  %v557_v46 = vld [vmem:[%s5269_s5 + $0x570] sm:$0xf] }
  0x87   : > { %v559_v47 = vld [vmem:[%s5269_s5 + $0x578] sm:$0xf]  ;;  %556 = vst [vmem:[%s5273_s6 + $0x2b4] sm:$0xf] %v555_v45  ;;  %558 = vst [vmem:[%s5273_s6 + $0x2b8] sm:$0xf] %v557_v46 }
  0x88   : > { %560 = vst [vmem:[%s5273_s6 + $0x2bc] sm:$0xf] %v559_v47  ;;  %v561_v48 = vld [vmem:[%s5269_s5 + $0x580] sm:$0xf]  ;;  %v563_v49 = vld [vmem:[%s5269_s5 + $0x588] sm:$0xf] }
  0x89   : > { %v565_v50 = vld [vmem:[%s5269_s5 + $0x590] sm:$0xf]  ;;  %562 = vst [vmem:[%s5273_s6 + $0x2c0] sm:$0xf] %v561_v48  ;;  %564 = vst [vmem:[%s5273_s6 + $0x2c4] sm:$0xf] %v563_v49 }
  0x8a   : > { %566 = vst [vmem:[%s5273_s6 + $0x2c8] sm:$0xf] %v565_v50  ;;  %v567_v51 = vld [vmem:[%s5269_s5 + $0x598] sm:$0xf]  ;;  %v569_v52 = vld [vmem:[%s5269_s5 + $0x5a0] sm:$0xf] }
  0x8b   : > { %v571_v53 = vld [vmem:[%s5269_s5 + $0x5a8] sm:$0xf]  ;;  %568 = vst [vmem:[%s5273_s6 + $0x2cc] sm:$0xf] %v567_v51  ;;  %570 = vst [vmem:[%s5273_s6 + $0x2d0] sm:$0xf] %v569_v52 }
  0x8c   : > { %572 = vst [vmem:[%s5273_s6 + $0x2d4] sm:$0xf] %v571_v53  ;;  %v573_v54 = vld [vmem:[%s5269_s5 + $0x5b0] sm:$0xf]  ;;  %v575_v55 = vld [vmem:[%s5269_s5 + $0x5b8] sm:$0xf] }
  0x8d   : > { %v577_v56 = vld [vmem:[%s5269_s5 + $0x5c0] sm:$0xf]  ;;  %574 = vst [vmem:[%s5273_s6 + $0x2d8] sm:$0xf] %v573_v54  ;;  %576 = vst [vmem:[%s5273_s6 + $0x2dc] sm:$0xf] %v575_v55 }
  0x8e   : > { %578 = vst [vmem:[%s5273_s6 + $0x2e0] sm:$0xf] %v577_v56  ;;  %v579_v57 = vld [vmem:[%s5269_s5 + $0x5c8] sm:$0xf]  ;;  %v581_v58 = vld [vmem:[%s5269_s5 + $0x5d0] sm:$0xf] }
  0x8f   : > { %v583_v59 = vld [vmem:[%s5269_s5 + $0x5d8] sm:$0xf]  ;;  %580 = vst [vmem:[%s5273_s6 + $0x2e4] sm:$0xf] %v579_v57  ;;  %582 = vst [vmem:[%s5273_s6 + $0x2e8] sm:$0xf] %v581_v58 }
  0x90   : > { %584 = vst [vmem:[%s5273_s6 + $0x2ec] sm:$0xf] %v583_v59  ;;  %v585_v60 = vld [vmem:[%s5269_s5 + $0x5e0] sm:$0xf]  ;;  %v587_v61 = vld [vmem:[%s5269_s5 + $0x5e8] sm:$0xf] }
  0x91   : > { %v589_v62 = vld [vmem:[%s5269_s5 + $0x5f0] sm:$0xf]  ;;  %586 = vst [vmem:[%s5273_s6 + $0x2f0] sm:$0xf] %v585_v60  ;;  %588 = vst [vmem:[%s5273_s6 + $0x2f4] sm:$0xf] %v587_v61 }
  0x92   : > { %590 = vst [vmem:[%s5273_s6 + $0x2f8] sm:$0xf] %v589_v62  ;;  %v591_v63 = vld [vmem:[%s5269_s5 + $0x5f8] sm:$0xf]  ;;  %v593_v0 = vld [vmem:[%s5269_s5 + $0x600] sm:$0xf] }
  0x93   : > { %v595_v1 = vld [vmem:[%s5269_s5 + $0x608] sm:$0xf]  ;;  %592 = vst [vmem:[%s5273_s6 + $0x2fc] sm:$0xf] %v591_v63  ;;  %594 = vst [vmem:[%s5273_s6 + $0x300] sm:$0xf] %v593_v0 }
  0x94   : > { %596 = vst [vmem:[%s5273_s6 + $0x304] sm:$0xf] %v595_v1  ;;  %v597_v2 = vld [vmem:[%s5269_s5 + $0x610] sm:$0xf]  ;;  %v599_v3 = vld [vmem:[%s5269_s5 + $0x618] sm:$0xf] }
  0x95   : > { %v601_v4 = vld [vmem:[%s5269_s5 + $0x620] sm:$0xf]  ;;  %598 = vst [vmem:[%s5273_s6 + $0x308] sm:$0xf] %v597_v2  ;;  %600 = vst [vmem:[%s5273_s6 + $0x30c] sm:$0xf] %v599_v3 }
  0x96   : > { %602 = vst [vmem:[%s5273_s6 + $0x310] sm:$0xf] %v601_v4  ;;  %v603_v5 = vld [vmem:[%s5269_s5 + $0x628] sm:$0xf]  ;;  %v605_v6 = vld [vmem:[%s5269_s5 + $0x630] sm:$0xf] }
  0x97   : > { %v607_v7 = vld [vmem:[%s5269_s5 + $0x638] sm:$0xf]  ;;  %604 = vst [vmem:[%s5273_s6 + $0x314] sm:$0xf] %v603_v5  ;;  %606 = vst [vmem:[%s5273_s6 + $0x318] sm:$0xf] %v605_v6 }
  0x98   : > { %608 = vst [vmem:[%s5273_s6 + $0x31c] sm:$0xf] %v607_v7  ;;  %v609_v8 = vld [vmem:[%s5269_s5 + $0x640] sm:$0xf]  ;;  %v611_v9 = vld [vmem:[%s5269_s5 + $0x648] sm:$0xf] }
  0x99   : > { %v613_v10 = vld [vmem:[%s5269_s5 + $0x650] sm:$0xf]  ;;  %610 = vst [vmem:[%s5273_s6 + $0x320] sm:$0xf] %v609_v8  ;;  %612 = vst [vmem:[%s5273_s6 + $0x324] sm:$0xf] %v611_v9 }
  0x9a   : > { %614 = vst [vmem:[%s5273_s6 + $0x328] sm:$0xf] %v613_v10  ;;  %v615_v11 = vld [vmem:[%s5269_s5 + $0x658] sm:$0xf]  ;;  %v617_v12 = vld [vmem:[%s5269_s5 + $0x660] sm:$0xf] }
  0x9b   : > { %v619_v13 = vld [vmem:[%s5269_s5 + $0x668] sm:$0xf]  ;;  %616 = vst [vmem:[%s5273_s6 + $0x32c] sm:$0xf] %v615_v11  ;;  %618 = vst [vmem:[%s5273_s6 + $0x330] sm:$0xf] %v617_v12 }
  0x9c   : > { %620 = vst [vmem:[%s5273_s6 + $0x334] sm:$0xf] %v619_v13  ;;  %v621_v14 = vld [vmem:[%s5269_s5 + $0x670] sm:$0xf]  ;;  %v623_v15 = vld [vmem:[%s5269_s5 + $0x678] sm:$0xf] }
  0x9d   : > { %v625_v16 = vld [vmem:[%s5269_s5 + $0x680] sm:$0xf]  ;;  %622 = vst [vmem:[%s5273_s6 + $0x338] sm:$0xf] %v621_v14  ;;  %624 = vst [vmem:[%s5273_s6 + $0x33c] sm:$0xf] %v623_v15 }
  0x9e   : > { %626 = vst [vmem:[%s5273_s6 + $0x340] sm:$0xf] %v625_v16  ;;  %v627_v17 = vld [vmem:[%s5269_s5 + $0x688] sm:$0xf]  ;;  %v629_v18 = vld [vmem:[%s5269_s5 + $0x690] sm:$0xf] }
  0x9f   : > { %v631_v19 = vld [vmem:[%s5269_s5 + $0x698] sm:$0xf]  ;;  %628 = vst [vmem:[%s5273_s6 + $0x344] sm:$0xf] %v627_v17  ;;  %630 = vst [vmem:[%s5273_s6 + $0x348] sm:$0xf] %v629_v18 }
  0xa0   : > { %632 = vst [vmem:[%s5273_s6 + $0x34c] sm:$0xf] %v631_v19  ;;  %v633_v20 = vld [vmem:[%s5269_s5 + $0x6a0] sm:$0xf]  ;;  %v635_v21 = vld [vmem:[%s5269_s5 + $0x6a8] sm:$0xf] }
  0xa1   : > { %v637_v22 = vld [vmem:[%s5269_s5 + $0x6b0] sm:$0xf]  ;;  %634 = vst [vmem:[%s5273_s6 + $0x350] sm:$0xf] %v633_v20  ;;  %636 = vst [vmem:[%s5273_s6 + $0x354] sm:$0xf] %v635_v21 }
  0xa2   : > { %638 = vst [vmem:[%s5273_s6 + $0x358] sm:$0xf] %v637_v22  ;;  %v639_v23 = vld [vmem:[%s5269_s5 + $0x6b8] sm:$0xf]  ;;  %v641_v24 = vld [vmem:[%s5269_s5 + $0x6c0] sm:$0xf] }
  0xa3   : > { %v643_v25 = vld [vmem:[%s5269_s5 + $0x6c8] sm:$0xf]  ;;  %640 = vst [vmem:[%s5273_s6 + $0x35c] sm:$0xf] %v639_v23  ;;  %642 = vst [vmem:[%s5273_s6 + $0x360] sm:$0xf] %v641_v24 }
  0xa4   : > { %644 = vst [vmem:[%s5273_s6 + $0x364] sm:$0xf] %v643_v25  ;;  %v645_v26 = vld [vmem:[%s5269_s5 + $0x6d0] sm:$0xf]  ;;  %v647_v27 = vld [vmem:[%s5269_s5 + $0x6d8] sm:$0xf] }
  0xa5   : > { %v649_v28 = vld [vmem:[%s5269_s5 + $0x6e0] sm:$0xf]  ;;  %646 = vst [vmem:[%s5273_s6 + $0x368] sm:$0xf] %v645_v26  ;;  %648 = vst [vmem:[%s5273_s6 + $0x36c] sm:$0xf] %v647_v27 }
  0xa6   : > { %650 = vst [vmem:[%s5273_s6 + $0x370] sm:$0xf] %v649_v28  ;;  %v651_v29 = vld [vmem:[%s5269_s5 + $0x6e8] sm:$0xf]  ;;  %v653_v30 = vld [vmem:[%s5269_s5 + $0x6f0] sm:$0xf] }
  0xa7   : > { %v655_v31 = vld [vmem:[%s5269_s5 + $0x6f8] sm:$0xf]  ;;  %652 = vst [vmem:[%s5273_s6 + $0x374] sm:$0xf] %v651_v29  ;;  %654 = vst [vmem:[%s5273_s6 + $0x378] sm:$0xf] %v653_v30 }
  0xa8   : > { %656 = vst [vmem:[%s5273_s6 + $0x37c] sm:$0xf] %v655_v31  ;;  %v657_v32 = vld [vmem:[%s5269_s5 + $0x700] sm:$0xf]  ;;  %v659_v33 = vld [vmem:[%s5269_s5 + $0x708] sm:$0xf] }
  0xa9   : > { %v661_v34 = vld [vmem:[%s5269_s5 + $0x710] sm:$0xf]  ;;  %658 = vst [vmem:[%s5273_s6 + $0x380] sm:$0xf] %v657_v32  ;;  %660 = vst [vmem:[%s5273_s6 + $0x384] sm:$0xf] %v659_v33 }
  0xaa   : > { %662 = vst [vmem:[%s5273_s6 + $0x388] sm:$0xf] %v661_v34  ;;  %v663_v35 = vld [vmem:[%s5269_s5 + $0x718] sm:$0xf]  ;;  %v665_v36 = vld [vmem:[%s5269_s5 + $0x720] sm:$0xf] }
  0xab   : > { %v667_v37 = vld [vmem:[%s5269_s5 + $0x728] sm:$0xf]  ;;  %664 = vst [vmem:[%s5273_s6 + $0x38c] sm:$0xf] %v663_v35  ;;  %666 = vst [vmem:[%s5273_s6 + $0x390] sm:$0xf] %v665_v36 }
  0xac   : > { %668 = vst [vmem:[%s5273_s6 + $0x394] sm:$0xf] %v667_v37  ;;  %v669_v38 = vld [vmem:[%s5269_s5 + $0x730] sm:$0xf]  ;;  %v671_v39 = vld [vmem:[%s5269_s5 + $0x738] sm:$0xf] }
  0xad   : > { %v673_v40 = vld [vmem:[%s5269_s5 + $0x740] sm:$0xf]  ;;  %670 = vst [vmem:[%s5273_s6 + $0x398] sm:$0xf] %v669_v38  ;;  %672 = vst [vmem:[%s5273_s6 + $0x39c] sm:$0xf] %v671_v39 }
  0xae   : > { %674 = vst [vmem:[%s5273_s6 + $0x3a0] sm:$0xf] %v673_v40  ;;  %v675_v41 = vld [vmem:[%s5269_s5 + $0x748] sm:$0xf]  ;;  %v677_v42 = vld [vmem:[%s5269_s5 + $0x750] sm:$0xf] }
  0xaf   : > { %v679_v43 = vld [vmem:[%s5269_s5 + $0x758] sm:$0xf]  ;;  %676 = vst [vmem:[%s5273_s6 + $0x3a4] sm:$0xf] %v675_v41  ;;  %678 = vst [vmem:[%s5273_s6 + $0x3a8] sm:$0xf] %v677_v42 }
  0xb0   : > { %680 = vst [vmem:[%s5273_s6 + $0x3ac] sm:$0xf] %v679_v43  ;;  %v681_v44 = vld [vmem:[%s5269_s5 + $0x760] sm:$0xf]  ;;  %v683_v45 = vld [vmem:[%s5269_s5 + $0x768] sm:$0xf] }
  0xb1   : > { %v685_v46 = vld [vmem:[%s5269_s5 + $0x770] sm:$0xf]  ;;  %682 = vst [vmem:[%s5273_s6 + $0x3b0] sm:$0xf] %v681_v44  ;;  %684 = vst [vmem:[%s5273_s6 + $0x3b4] sm:$0xf] %v683_v45 }
  0xb2   : > { %686 = vst [vmem:[%s5273_s6 + $0x3b8] sm:$0xf] %v685_v46  ;;  %v687_v47 = vld [vmem:[%s5269_s5 + $0x778] sm:$0xf]  ;;  %v689_v48 = vld [vmem:[%s5269_s5 + $0x780] sm:$0xf] }
  0xb3   : > { %v691_v49 = vld [vmem:[%s5269_s5 + $0x788] sm:$0xf]  ;;  %688 = vst [vmem:[%s5273_s6 + $0x3bc] sm:$0xf] %v687_v47  ;;  %690 = vst [vmem:[%s5273_s6 + $0x3c0] sm:$0xf] %v689_v48 }
  0xb4   : > { %692 = vst [vmem:[%s5273_s6 + $0x3c4] sm:$0xf] %v691_v49  ;;  %v693_v50 = vld [vmem:[%s5269_s5 + $0x790] sm:$0xf]  ;;  %v695_v51 = vld [vmem:[%s5269_s5 + $0x798] sm:$0xf] }
  0xb5   : > { %v697_v52 = vld [vmem:[%s5269_s5 + $0x7a0] sm:$0xf]  ;;  %694 = vst [vmem:[%s5273_s6 + $0x3c8] sm:$0xf] %v693_v50  ;;  %696 = vst [vmem:[%s5273_s6 + $0x3cc] sm:$0xf] %v695_v51 }
  0xb6   : > { %698 = vst [vmem:[%s5273_s6 + $0x3d0] sm:$0xf] %v697_v52  ;;  %v699_v53 = vld [vmem:[%s5269_s5 + $0x7a8] sm:$0xf]  ;;  %v701_v54 = vld [vmem:[%s5269_s5 + $0x7b0] sm:$0xf] }
  0xb7   : > { %v703_v55 = vld [vmem:[%s5269_s5 + $0x7b8] sm:$0xf]  ;;  %700 = vst [vmem:[%s5273_s6 + $0x3d4] sm:$0xf] %v699_v53  ;;  %702 = vst [vmem:[%s5273_s6 + $0x3d8] sm:$0xf] %v701_v54 }
  0xb8   : > { %704 = vst [vmem:[%s5273_s6 + $0x3dc] sm:$0xf] %v703_v55  ;;  %v705_v56 = vld [vmem:[%s5269_s5 + $0x7c0] sm:$0xf]  ;;  %v707_v57 = vld [vmem:[%s5269_s5 + $0x7c8] sm:$0xf] }
  0xb9   : > { %v709_v58 = vld [vmem:[%s5269_s5 + $0x7d0] sm:$0xf]  ;;  %706 = vst [vmem:[%s5273_s6 + $0x3e0] sm:$0xf] %v705_v56  ;;  %708 = vst [vmem:[%s5273_s6 + $0x3e4] sm:$0xf] %v707_v57 }
  0xba   : > { %710 = vst [vmem:[%s5273_s6 + $0x3e8] sm:$0xf] %v709_v58  ;;  %v711_v59 = vld [vmem:[%s5269_s5 + $0x7d8] sm:$0xf]  ;;  %v713_v60 = vld [vmem:[%s5269_s5 + $0x7e0] sm:$0xf] }
  0xbb   : > { %v715_v61 = vld [vmem:[%s5269_s5 + $0x7e8] sm:$0xf]  ;;  %712 = vst [vmem:[%s5273_s6 + $0x3ec] sm:$0xf] %v711_v59  ;;  %714 = vst [vmem:[%s5273_s6 + $0x3f0] sm:$0xf] %v713_v60 }
  0xbc   : > { %716 = vst [vmem:[%s5273_s6 + $0x3f4] sm:$0xf] %v715_v61  ;;  %v717_v62 = vld [vmem:[%s5269_s5 + $0x7f0] sm:$0xf]  ;;  %v719_v63 = vld [vmem:[%s5269_s5 + $0x7f8] sm:$0xf] }
  0xbd   : > { %718 = vst [vmem:[%s5273_s6 + $0x3f8] sm:$0xf] %v717_v62  ;;  %720 = vst [vmem:[%s5273_s6 + $0x3fc] sm:$0xf] %v719_v63 }
  0xbe PF: > { %p4211_p8 = scmp.ge.s32.totalorder %s5193_s19, 1  ;;  %p1255_p9 = scmp.lt.s32.totalorder %s5193_s19, 3 }
  0xc0   : > { %p1256_p10 = pnand %p4211_p8, %p1255_p9 }
  0xc2   : > { %1259 = sbr.rel (%p1256_p10) target bundleno = 708 (0x2c4), region = 65 }
  0xc7   : > { %s1262_s7 = sand.u32 1, %s5177_s15   ;;  %v5791_v0 = vld [vmem:[%s6680_s0] sm:$0xff]  ;;  %v5801_v2 = vld [vmem:[%s6680_s0 + $0x8] sm:$0xff]  ;;  %p1306_p11 = scmp.lt.s32.totalorder %s5185_s17, 1 }
  0xc8   : > { %v5796_v1 = vld [vmem:[%s6680_s0 + $0x40] sm:$0xff]  ;;  %s4212_s14 = sshll.u32 %s1262_s7, 10  ;;  %v5810_v4 = vld [vmem:[%s6680_s0 + $0x48] sm:$0xff]  ;;  %s4213_s11 = sshll.u32 %s1262_s7, 7 }
  0xc9   : > { %v4215_v3 = vcombine.high %v5791_v0, %v5796_v1  ;;  %v4217_v5 = vcombine.high %v5801_v2, %v5810_v4  ;;  %s5814_s23 = scalar_lea.vmem [#allocation2], %s4212_s14  ;;  %v1329_v35 = vld [vmem:[%s6680_s0 + $0x80] sm:$0xff]  ;;  %v1330_v38 = vld [vmem:[%s6680_s0 + $0x88] sm:$0xff]  ;;  %v4214_v42 = vcombine.low %v5791_v0, %v5796_v1  ;;  %v4216_v43 = vcombine.low %v5801_v2, %v5810_v4  ;;  %s6558_s15 = scalar_lea.vmem [#allocation3], %s4213_s11 }
  0xca   : > { %v5027_v6 = vld [vmem:[%s5814_s23 + $0x78] sm:$0xff]   ;;  %v5031_v10 = vld [vmem:[%s5814_s23 + $0x70] sm:$0xff]   ;;  %v5035_v14 = vld [vmem:[%s5814_s23 + $0x68] sm:$0xff]   ;;  %s1307_s29 = scalar_select %p1306_p11, %s5185_s17, 1 }
  0xcb   : > { %3137 = vmatprep.mubr.bf16.mxu0 %v4215_v3  ;;  %v5028_v7 = vld [vmem:[%s5814_s23 + $0xf8] sm:$0xff]   ;;  %3234 = vmatprep.mubr.bf16.mxu1 %v4217_v5  ;;  %v5032_v11 = vld [vmem:[%s5814_s23 + $0xf0] sm:$0xff]   ;;  %v5036_v15 = vld [vmem:[%s5814_s23 + $0xe8] sm:$0xff]   ;;  %s4471_s7 = sshll.u32 (%p5256_p6), %s5185_s17, 3 }
  0xcc   : > { %4474 = vmatprep.subr.bf16.mxu0 %v5027_v6  ;;  %v5029_v8 = vld [vmem:[%s5814_s23 + $0x38] sm:$0xff]   ;;  %4538 = vmatprep.subr.bf16.mxu1 %v5028_v7  ;;  %v5033_v12 = vld [vmem:[%s5814_s23 + $0x30] sm:$0xff]   ;;  %v5037_v16 = vld [vmem:[%s5814_s23 + $0x28] sm:$0xff]   ;;  %s6419_s6 = scalar_lea.vmem %s6683_s3, %s1307_s29  ;;  %s6424_s10 = scalar_lea.vmem %s6684_s4, %s1307_s29 }
  0xcd   : > { %v5030_v9 = vld [vmem:[%s5814_s23 + $0xb8] sm:$0xff]   ;;  %4475 = vmatpush3.bf16.msra.mxu0 %v5029_v8  ;;  %v5034_v13 = vld [vmem:[%s5814_s23 + $0xb0] sm:$0xff]   ;;  %v5038_v17 = vld [vmem:[%s5814_s23 + $0xa8] sm:$0xff]   ;;  %s3984_s13 = scalar_lea.vmem (%p5256_p6), %s6682_s2, %s4471_s7 }
  0xce   : > { %4539 = vmatpush3.bf16.msra.mxu1 %v5030_v9  ;;  %4476 = vmatprep.subr.bf16.mxu0 %v5031_v10  ;;  %v5039_v18 = vld [vmem:[%s5814_s23 + $0x60] sm:$0xff]   ;;  %v5043_v22 = vld [vmem:[%s5814_s23 + $0x58] sm:$0xff]   ;;  %v5047_v26 = vld [vmem:[%s5814_s23 + $0x50] sm:$0xff]  }
  0xcf   : > { %4540 = vmatprep.subr.bf16.mxu1 %v5032_v11  ;;  %v5040_v19 = vld [vmem:[%s5814_s23 + $0xe0] sm:$0xff]   ;;  %v5044_v23 = vld [vmem:[%s5814_s23 + $0xd8] sm:$0xff]   ;;  %v5048_v27 = vld [vmem:[%s5814_s23 + $0xd0] sm:$0xff]  }
  0xd0   : > { %v5041_v20 = vld [vmem:[%s5814_s23 + $0x20] sm:$0xff]   ;;  %v5045_v24 = vld [vmem:[%s5814_s23 + $0x18] sm:$0xff]   ;;  %v5049_v28 = vld [vmem:[%s5814_s23 + $0x10] sm:$0xff]  }
  0xd1   : > { %4477 = vmatpush3.bf16.msra.mxu0 %v5033_v12  ;;  %v5042_v21 = vld [vmem:[%s5814_s23 + $0xa0] sm:$0xff]   ;;  %v5046_v25 = vld [vmem:[%s5814_s23 + $0x98] sm:$0xff]   ;;  %v5050_v29 = vld [vmem:[%s5814_s23 + $0x90] sm:$0xff]  }
  0xd2   : > { %4541 = vmatpush3.bf16.msra.mxu1 %v5034_v13  ;;  %4478 = vmatprep.subr.bf16.mxu0 %v5035_v14  ;;  %v5051_v30 = vld [vmem:[%s5814_s23 + $0x48] sm:$0xff]   ;;  %v5055_v34 = vld [vmem:[%s5814_s23 + $0x40] sm:$0xff]   ;;  %v5059_v44 = vld [vmem:[%s5814_s23 + $0x178] sm:$0xff]  }
  0xd3   : > { %4542 = vmatprep.subr.bf16.mxu1 %v5036_v15  ;;  %v5052_v31 = vld [vmem:[%s5814_s23 + $0xc8] sm:$0xff]   ;;  %v1337_v36 = vld [vmem:[%s6680_s0 + $0xc0] sm:$0xff]  ;;  %v5060_v45 = vld [vmem:[%s5814_s23 + $0x138] sm:$0xff]  }
  0xd4   : > { %v5053_v32 = vld [vmem:[%s5814_s23 + $0x8] sm:$0xff]   ;;  %v5056_v37 = vld [vmem:[%s5814_s23 + $0xc0] sm:$0xff]   ;;  %v4231_v46 = vcombine.high %v1329_v35, %v1337_v36  ;;  %v5061_v47 = vld [vmem:[%s5814_s23 + $0x1f8] sm:$0xff]   ;;  %v4230_v54 = vcombine.low %v1329_v35, %v1337_v36 }
  0xd5   : > { %4479 = vmatpush3.bf16.msra.mxu0 %v5037_v16  ;;  %v5054_v33 = vld [vmem:[%s5814_s23 + $0x88] sm:$0xff]   ;;  %v5057_v40 = vld [vmem:[%s5814_s23] sm:$0xff]   ;;  %v5062_v49 = vld [vmem:[%s5814_s23 + $0x1b8] sm:$0xff]  }
  0xd6   : > { %4543 = vmatpush3.bf16.msra.mxu1 %v5038_v17  ;;  %4480 = vmatprep.subr.bf16.mxu0 %v5039_v18  ;;  %v1338_v39 = vld [vmem:[%s6680_s0 + $0xc8] sm:$0xff]  ;;  %v5058_v41 = vld [vmem:[%s5814_s23 + $0x80] sm:$0xff]   ;;  %v5063_v50 = vld [vmem:[%s5814_s23 + $0x170] sm:$0xff]  }
  0xd7   : > { %4544 = vmatprep.subr.bf16.mxu1 %v5040_v19  ;;  %v4233_v48 = vcombine.high %v1330_v38, %v1338_v39  ;;  %v1345_v51 = vld [vmem:[%s6680_s0 + $0x100] sm:$0xff]  ;;  %v5064_v52 = vld [vmem:[%s5814_s23 + $0x130] sm:$0xff]   ;;  %v4232_v56 = vcombine.low %v1330_v38, %v1338_v39  ;;  %v1346_v58 = vld [vmem:[%s6680_s0 + $0x108] sm:$0xff] }
  0xd8   : > { %v5065_v53 = vld [vmem:[%s5814_s23 + $0x1f0] sm:$0xff]   ;;  %v1353_v57 = vld [vmem:[%s6680_s0 + $0x140] sm:$0xff]  ;;  %v1354_v59 = vld [vmem:[%s6680_s0 + $0x148] sm:$0xff] }
  0xd9   : > { %4481 = vmatpush3.bf16.msra.mxu0 %v5041_v20  ;;  %v5066_v55 = vld [vmem:[%s5814_s23 + $0x1b0] sm:$0xff]   ;;  %v4247_v60 = vcombine.high %v1345_v51, %v1353_v57  ;;  %v4249_v61 = vcombine.high %v1346_v58, %v1354_v59  ;;  %v5067_v62 = vld [vmem:[%s5814_s23 + $0x168] sm:$0xff]   ;;  %v1361_v2 = vld [vmem:[%s6680_s0 + $0x180] sm:$0xff]  ;;  %v4246_v6 = vcombine.low %v1345_v51, %v1353_v57  ;;  %v4248_v8 = vcombine.low %v1346_v58, %v1354_v59 }
  0xda   : > { %4545 = vmatpush3.bf16.msra.mxu1 %v5042_v21  ;;  %4482 = vmatprep.subr.bf16.mxu0 %v5043_v22  ;;  %v5068_v63 = vld [vmem:[%s5814_s23 + $0x128] sm:$0xff]   ;;  %v1369_v3 = vld [vmem:[%s6680_s0 + $0x1c0] sm:$0xff]  ;;  %v5075_v18 = vld [vmem:[%s5814_s23 + $0x158] sm:$0xff]  }
  0xdb   : > { %4546 = vmatprep.subr.bf16.mxu1 %v5044_v23  ;;  %v5069_v0 = vld [vmem:[%s5814_s23 + $0x1e8] sm:$0xff]   ;;  %v5071_v7 = vld [vmem:[%s5814_s23 + $0x160] sm:$0xff]   ;;  %v4263_v9 = vcombine.high %v1361_v2, %v1369_v3  ;;  %v5076_v19 = vld [vmem:[%s5814_s23 + $0x118] sm:$0xff]   ;;  %v4262_v21 = vcombine.low %v1361_v2, %v1369_v3 }
  0xdc   : > { %v5070_v1 = vld [vmem:[%s5814_s23 + $0x1a8] sm:$0xff]   ;;  %v5072_v10 = vld [vmem:[%s5814_s23 + $0x120] sm:$0xff]   ;;  %v5077_v20 = vld [vmem:[%s5814_s23 + $0x1d8] sm:$0xff]  }
  0xdd   : > { %4483 = vmatpush3.bf16.msra.mxu0 %v5045_v24  ;;  %v1362_v4 = vld [vmem:[%s6680_s0 + $0x188] sm:$0xff]  ;;  %v5073_v12 = vld [vmem:[%s5814_s23 + $0x1e0] sm:$0xff]   ;;  %v5078_v22 = vld [vmem:[%s5814_s23 + $0x198] sm:$0xff]  }
  0xde   : > { %4547 = vmatpush3.bf16.msra.mxu1 %v5046_v25  ;;  %4484 = vmatprep.subr.bf16.mxu0 %v5047_v26  ;;  %v1370_v5 = vld [vmem:[%s6680_s0 + $0x1c8] sm:$0xff]  ;;  %v5074_v13 = vld [vmem:[%s5814_s23 + $0x1a0] sm:$0xff]   ;;  %v5079_v26 = vld [vmem:[%s5814_s23 + $0x150] sm:$0xff]  }
  0xdf   : > { %4548 = vmatprep.subr.bf16.mxu1 %v5048_v27  ;;  %v4265_v11 = vcombine.high %v1362_v4, %v1370_v5  ;;  %v1377_v14 = vld [vmem:[%s6680_s0 + $0x200] sm:$0xff]  ;;  %v1378_v16 = vld [vmem:[%s6680_s0 + $0x208] sm:$0xff]  ;;  %v4264_v23 = vcombine.low %v1362_v4, %v1370_v5  ;;  %v5080_v27 = vld [vmem:[%s5814_s23 + $0x110] sm:$0xff]  }
  0xe0   : > { %v1385_v15 = vld [vmem:[%s6680_s0 + $0x240] sm:$0xff]  ;;  %v1386_v17 = vld [vmem:[%s6680_s0 + $0x248] sm:$0xff]  ;;  %v1316_v2 = vld [vmem:[%s6680_s0 + $0x18] sm:$0xff] }
  0xe1   : > { %4485 = vmatpush3.bf16.msra.mxu0 %v5049_v28  ;;  %v4279_v24 = vcombine.high %v1377_v14, %v1385_v15  ;;  %v4281_v25 = vcombine.high %v1378_v16, %v1386_v17  ;;  %v5081_v28 = vld [vmem:[%s5814_s23 + $0x1d0] sm:$0xff]   ;;  %v5083_v35 = vld [vmem:[%s5814_s23 + $0x148] sm:$0xff]   ;;  %v4280_v36 = vcombine.low %v1378_v16, %v1386_v17  ;;  %v1433_v57 = vld [vmem:[%s6680_s0 + $0x3c0] sm:$0xff] }
  0xe2   : > { %4549 = vmatpush3.bf16.msra.mxu1 %v5050_v29  ;;  %4486 = vmatprep.subr.bf16.mxu0 %v5051_v30  ;;  %v5082_v29 = vld [vmem:[%s5814_s23 + $0x190] sm:$0xff]   ;;  %v1393_v30 = vld [vmem:[%s6680_s0 + $0x280] sm:$0xff]  ;;  %v5084_v38 = vld [vmem:[%s5814_s23 + $0x108] sm:$0xff]  }
  0xe3   : > { %4550 = vmatprep.subr.bf16.mxu1 %v5052_v31  ;;  %v1401_v31 = vld [vmem:[%s6680_s0 + $0x2c0] sm:$0xff]  ;;  %v1426_v58 = vld [vmem:[%s6680_s0 + $0x388] sm:$0xff]  ;;  %v1324_v3 = vld [vmem:[%s6680_s0 + $0x58] sm:$0xff] }
  0xe4   : > { %v1434_v59 = vld [vmem:[%s6680_s0 + $0x3c8] sm:$0xff] }
  0xe5   : > { %4487 = vmatpush3.bf16.msra.mxu0 %v5053_v32  ;;  %v1394_v32 = vld [vmem:[%s6680_s0 + $0x288] sm:$0xff]  ;;  %v4328_v5 = vcombine.low %v1426_v58, %v1434_v59 }
  0xe6   : > { %4551 = vmatpush3.bf16.msra.mxu1 %v5054_v33  ;;  %4488 = vmatprep.subr.bf16.mxu0 %v5055_v34  ;;  %v1402_v33 = vld [vmem:[%s6680_s0 + $0x2c8] sm:$0xff]  ;;  %v4278_v34 = vcombine.low %v1377_v14, %v1385_v15  ;;  %v5092_v14 = vld [vmem:[%s5814_s23 + $0x238] sm:$0xff]  }
  0xe7   : > { %4552 = vmatprep.subr.bf16.mxu1 %v5056_v37  ;;  %v4295_v37 = vcombine.high %v1393_v30, %v1401_v31  ;;  %v4297_v39 = vcombine.high %v1394_v32, %v1402_v33  ;;  %v4296_v51 = vcombine.low %v1394_v32, %v1402_v33  ;;  %v5094_v15 = vld [vmem:[%s5814_s23 + $0x2b8] sm:$0xff]   ;;  %v5102_v33 = vld [vmem:[%s5814_s23 + $0x2a8] sm:$0xff]  }
  0xe9   : > { %4489 = vmatpush3.bf16.msra.mxu0 %v5057_v40  ;;  %v5085_v40 = vld [vmem:[%s5814_s23 + $0x1c8] sm:$0xff]  }
  0xea   : > { %4553 = vmatpush3.bf16.msra.mxu1 %v5058_v41  ;;  %4602 = vmatprep.subr.bf16.mxu0 %v5059_v44  ;;  %v5086_v41 = vld [vmem:[%s5814_s23 + $0x188] sm:$0xff]  }
  0xeb   : > { %4666 = vmatprep.subr.bf16.mxu1 %v5061_v47  ;;  %v1410_v44 = vld [vmem:[%s6680_s0 + $0x308] sm:$0xff]  ;;  %v5088_v47 = vld [vmem:[%s5814_s23 + $0x100] sm:$0xff]  }
  0xec   : > { %3138 = vmatmul.mubr.bf16.vlgmr.msra.gmra.mxu0 %v4214_v42  ;;  %v1409_v42 = vld [vmem:[%s6680_s0 + $0x300] sm:$0xff] }
  0xed   : > { %3235 = vmatmul.mubr.bf16.vlgmr.msra.gmra.mxu1 %v4216_v43  ;;  %4603 = vmatpush3.bf16.msra.mxu0 %v5060_v45  ;;  %v1417_v43 = vld [vmem:[%s6680_s0 + $0x340] sm:$0xff]  ;;  %v1418_v45 = vld [vmem:[%s6680_s0 + $0x348] sm:$0xff] }
  0xee   : > { %3145 = vmatprep.mubr.bf16.mxu0 %v4231_v46  ;;  %4667 = vmatpush3.bf16.msra.mxu1 %v5062_v49  ;;  %v5087_v46 = vld [vmem:[%s5814_s23 + $0x140] sm:$0xff]   ;;  %v4294_v49 = vcombine.low %v1393_v30, %v1401_v31  ;;  %v5100_v31 = vld [vmem:[%s5814_s23 + $0x228] sm:$0xff]  }
  0xef   : > { %3242 = vmatprep.mubr.bf16.mxu1 %v4233_v48  ;;  %4604 = vmatprep.subr.bf16.mxu0 %v5063_v50  ;;  %v5089_v48 = vld [vmem:[%s5814_s23 + $0x1c0] sm:$0xff]  }
  0xf0   : > { %4668 = vmatprep.subr.bf16.mxu1 %v5065_v53  ;;  %v5090_v50 = vld [vmem:[%s5814_s23 + $0x180] sm:$0xff]   ;;  %v4313_v53 = vcombine.high %v1410_v44, %v1418_v45 }
  0xf1   : > { %4605 = vmatpush3.bf16.msra.mxu0 %v5064_v52  ;;  %v4311_v52 = vcombine.high %v1409_v42, %v1417_v43 }
  0xf2   : > { %4669 = vmatpush3.bf16.msra.mxu1 %v5066_v55  ;;  %4606 = vmatprep.subr.bf16.mxu0 %v5067_v62  ;;  %v5093_v55 = vld [vmem:[%s5814_s23 + $0x2f8] sm:$0xff]  }
  0xf3   : > { %4670 = vmatprep.subr.bf16.mxu1 %v5069_v0  ;;  %v1315_v0 = vld [vmem:[%s6680_s0 + $0x10] sm:$0xff] }
  0xf4   : > { %3146 = vmatmul.mubr.bf16.gmra.mxu0 %v4230_v54  ;;  %v5091_v54 = vld [vmem:[%s5814_s23 + $0x278] sm:$0xff]  }
  0xf5   : > { %3243 = vmatmul.mubr.bf16.gmra.mxu1 %v4232_v56  ;;  %3153 = vmatprep.mubr.bf16.mxu0 %v4247_v60  ;;  %v1425_v56 = vld [vmem:[%s6680_s0 + $0x380] sm:$0xff]  ;;  %v4310_v60 = vcombine.low %v1409_v42, %v1417_v43  ;;  %v5107_v42 = vld [vmem:[%s5814_s23 + $0x258] sm:$0xff]  }
  0xf6   : > { %3250 = vmatprep.mubr.bf16.mxu1 %v4249_v61  ;;  %4607 = vmatpush3.bf16.msra.mxu0 %v5068_v63  ;;  %v4312_v61 = vcombine.low %v1410_v44, %v1418_v45  ;;  %v4327_v62 = vcombine.high %v1425_v56, %v1433_v57  ;;  %v4329_v63 = vcombine.high %v1426_v58, %v1434_v59  ;;  %v5109_v44 = vld [vmem:[%s5814_s23 + $0x2d8] sm:$0xff]   ;;  %v5115_v58 = vld [vmem:[%s5814_s23 + $0x248] sm:$0xff]  }
  0xf7   : > { %4671 = vmatpush3.bf16.msra.mxu1 %v5070_v1  ;;  %4608 = vmatprep.subr.bf16.mxu0 %v5071_v7  ;;  %v1323_v1 = vld [vmem:[%s6680_s0 + $0x50] sm:$0xff]  ;;  %v4326_v4 = vcombine.low %v1425_v56, %v1433_v57  ;;  %v4221_v7 = vcombine.high %v1316_v2, %v1324_v3 }
  0xf8   : > { %4672 = vmatprep.subr.bf16.mxu1 %v5073_v12  ;;  %v1340_v12 = vld [vmem:[%s6680_s0 + $0xd8] sm:$0xff]  ;;  %v5112_v56 = vld [vmem:[%s5814_s23 + $0x210] sm:$0xff]  }
  0xf9   : > { %v5114_v57 = vld [vmem:[%s5814_s23 + $0x290] sm:$0xff]  }
  0xfa   : > { %4609 = vmatpush3.bf16.msra.mxu0 %v5072_v10  ;;  %v1332_v10 = vld [vmem:[%s6680_s0 + $0x98] sm:$0xff] }
  0xfb   : > { %4673 = vmatpush3.bf16.msra.mxu1 %v5074_v13  ;;  %4610 = vmatprep.subr.bf16.mxu0 %v5075_v18  ;;  %v4220_v13 = vcombine.low %v1316_v2, %v1324_v3  ;;  %v4237_v17 = vcombine.high %v1332_v10, %v1340_v12  ;;  %v5095_v18 = vld [vmem:[%s5814_s23 + $0x270] sm:$0xff]   ;;  %v5119_v2 = vld [vmem:[%s5814_s23 + $0x240] sm:$0xff]  }
  0xfc   : > { %3154 = vmatmul.mubr.bf16.gmra.mxu0 %v4246_v6  ;;  %4674 = vmatprep.subr.bf16.mxu1 %v5077_v20  ;;  %v4219_v6 = vcombine.high %v1315_v0, %v1323_v1  ;;  %v5097_v20 = vld [vmem:[%s5814_s23 + $0x2f0] sm:$0xff]  }
  0xfd   : > { %3251 = vmatmul.mubr.bf16.gmra.mxu1 %v4248_v8  ;;  %3161 = vmatprep.mubr.bf16.mxu0 %v4263_v9  ;;  %v1331_v8 = vld [vmem:[%s6680_s0 + $0x90] sm:$0xff] }
  0xfe   : > { %3258 = vmatprep.mubr.bf16.mxu1 %v4265_v11  ;;  %4611 = vmatpush3.bf16.msra.mxu0 %v5076_v19  ;;  %v1339_v9 = vld [vmem:[%s6680_s0 + $0xd0] sm:$0xff]  ;;  %v4218_v11 = vcombine.low %v1315_v0, %v1323_v1  ;;  %v5118_v1 = vld [vmem:[%s5814_s23 + $0x288] sm:$0xff]  }
  0xff   : > { %4675 = vmatpush3.bf16.msra.mxu1 %v5078_v22  ;;  %4612 = vmatprep.subr.bf16.mxu0 %v5079_v26  ;;  %v4235_v16 = vcombine.high %v1331_v8, %v1339_v9  ;;  %v5096_v19 = vld [vmem:[%s5814_s23 + $0x230] sm:$0xff]   ;;  %v5099_v26 = vld [vmem:[%s5814_s23 + $0x268] sm:$0xff]  }
 0x100   : > { %4676 = vmatprep.subr.bf16.mxu1 %v5081_v28  ;;  %v1347_v22 = vld [vmem:[%s6680_s0 + $0x110] sm:$0xff]  ;;  %v4234_v28 = vcombine.low %v1331_v8, %v1339_v9  ;;  %v5120_v8 = vld [vmem:[%s5814_s23 + $0x200] sm:$0xff]  }
 0x101   : > { %v1395_v3 = vld [vmem:[%s6680_s0 + $0x290] sm:$0xff]  ;;  %v5122_v9 = vld [vmem:[%s5814_s23 + $0x280] sm:$0xff]  }
 0x102   : > { %4613 = vmatpush3.bf16.msra.mxu0 %v5080_v27  ;;  %v5101_v27 = vld [vmem:[%s5814_s23 + $0x2e8] sm:$0xff]  }
 0x103   : > { %4677 = vmatpush3.bf16.msra.mxu1 %v5082_v29  ;;  %4614 = vmatprep.subr.bf16.mxu0 %v5083_v35  ;;  %v4236_v29 = vcombine.low %v1332_v10, %v1340_v12  ;;  %v1363_v35 = vld [vmem:[%s6680_s0 + $0x190] sm:$0xff]  ;;  %v5123_v10 = vld [vmem:[%s5814_s23 + $0x378] sm:$0xff]  }
 0x104   : > { %3162 = vmatmul.mubr.bf16.gmra.mxu0 %v4262_v21  ;;  %4678 = vmatprep.subr.bf16.mxu1 %v5085_v40  ;;  %v5098_v21 = vld [vmem:[%s5814_s23 + $0x2b0] sm:$0xff]   ;;  %v5104_v40 = vld [vmem:[%s5814_s23 + $0x220] sm:$0xff]   ;;  %v5125_v12 = vld [vmem:[%s5814_s23 + $0x3f8] sm:$0xff]  }
 0x105   : > { %3259 = vmatmul.mubr.bf16.gmra.mxu1 %v4264_v23  ;;  %3169 = vmatprep.mubr.bf16.mxu0 %v4279_v24  ;;  %v1355_v23 = vld [vmem:[%s6680_s0 + $0x150] sm:$0xff]  ;;  %v1348_v24 = vld [vmem:[%s6680_s0 + $0x118] sm:$0xff] }
 0x106   : > { %3266 = vmatprep.mubr.bf16.mxu1 %v4281_v25  ;;  %4615 = vmatpush3.bf16.msra.mxu0 %v5084_v38  ;;  %v1356_v25 = vld [vmem:[%s6680_s0 + $0x158] sm:$0xff]  ;;  %v4251_v30 = vcombine.high %v1347_v22, %v1355_v23  ;;  %v4250_v43 = vcombine.low %v1347_v22, %v1355_v23 }
 0x107   : > { %4679 = vmatpush3.bf16.msra.mxu1 %v5086_v41  ;;  %4616 = vmatprep.subr.bf16.mxu0 %v5087_v46  ;;  %v4253_v32 = vcombine.high %v1348_v24, %v1356_v25  ;;  %v1364_v38 = vld [vmem:[%s6680_s0 + $0x198] sm:$0xff]  ;;  %v5106_v41 = vld [vmem:[%s5814_s23 + $0x2a0] sm:$0xff]   ;;  %v4252_v45 = vcombine.low %v1348_v24, %v1356_v25  ;;  %v1427_v24 = vld [vmem:[%s6680_s0 + $0x390] sm:$0xff] }
 0x108   : > { %4680 = vmatprep.subr.bf16.mxu1 %v5089_v48  ;;  %v5108_v48 = vld [vmem:[%s5814_s23 + $0x218] sm:$0xff]   ;;  %v1435_v25 = vld [vmem:[%s6680_s0 + $0x3d0] sm:$0xff] }
 0x10a   : > { %4617 = vmatpush3.bf16.msra.mxu0 %v5088_v47 }
 0x10b   : > { %4681 = vmatpush3.bf16.msra.mxu1 %v5090_v50  ;;  %4730 = vmatprep.subr.bf16.mxu0 %v5091_v54  ;;  %v5111_v50 = vld [vmem:[%s5814_s23 + $0x250] sm:$0xff]   ;;  %v1380_v54 = vld [vmem:[%s6680_s0 + $0x218] sm:$0xff] }
 0x10c   : > { %3170 = vmatmul.mubr.bf16.gmra.mxu0 %v4278_v34  ;;  %4794 = vmatprep.subr.bf16.mxu1 %v5093_v55  ;;  %v5103_v34 = vld [vmem:[%s5814_s23 + $0x260] sm:$0xff]   ;;  %v1388_v55 = vld [vmem:[%s6680_s0 + $0x258] sm:$0xff] }
 0x10d   : > { %3267 = vmatmul.mubr.bf16.gmra.mxu1 %v4280_v36  ;;  %3177 = vmatprep.mubr.bf16.mxu0 %v4295_v37  ;;  %v1371_v36 = vld [vmem:[%s6680_s0 + $0x1d0] sm:$0xff]  ;;  %v5105_v37 = vld [vmem:[%s5814_s23 + $0x2e0] sm:$0xff]   ;;  %v4285_v0 = vcombine.high %v1380_v54, %v1388_v55 }
 0x10e   : > { %3274 = vmatprep.mubr.bf16.mxu1 %v4297_v39  ;;  %v1372_v39 = vld [vmem:[%s6680_s0 + $0x1d8] sm:$0xff]  ;;  %v4267_v46 = vcombine.high %v1363_v35, %v1371_v36  ;;  %v4266_v59 = vcombine.low %v1363_v35, %v1371_v36  ;;  %v1326_v35 = vld [vmem:[%s6680_s0 + $0x68] sm:$0xff]  ;;  %v4330_v36 = vcombine.low %v1427_v24, %v1435_v25 }
 0x10f   : > { %v4269_v47 = vcombine.high %v1364_v38, %v1372_v39 }
 0x114   : > { %3178 = vmatmul.mubr.bf16.gmra.mxu0 %v4294_v49  ;;  %v5110_v49 = vld [vmem:[%s5814_s23 + $0x298] sm:$0xff]  }
 0x115   : > { %3275 = vmatmul.mubr.bf16.gmra.mxu1 %v4296_v51  ;;  %3185 = vmatprep.mubr.bf16.mxu0 %v4311_v52  ;;  %v1379_v51 = vld [vmem:[%s6680_s0 + $0x210] sm:$0xff] }
 0x116   : > { %3282 = vmatprep.mubr.bf16.mxu1 %v4313_v53  ;;  %v1387_v52 = vld [vmem:[%s6680_s0 + $0x250] sm:$0xff] }
 0x117   : > { %v5113_v53 = vld [vmem:[%s5814_s23 + $0x2d0] sm:$0xff]  }
 0x11c   : > { %3186 = vmatmul.mubr.bf16.gmra.mxu0 %v4310_v60  ;;  %v5117_v60 = vld [vmem:[%s5814_s23 + $0x2c8] sm:$0xff]  }
 0x11d   : > { %3283 = vmatmul.mubr.bf16.gmra.mxu1 %v4312_v61  ;;  %3193 = vmatprep.mubr.bf16.mxu0 %v4327_v62  ;;  %v4268_v61 = vcombine.low %v1364_v38, %v1372_v39  ;;  %v4283_v62 = vcombine.high %v1379_v51, %v1387_v52 }
 0x11e   : > { %3290 = vmatprep.mubr.bf16.mxu1 %v4329_v63  ;;  %v5116_v63 = vld [vmem:[%s5814_s23 + $0x208] sm:$0xff]  }
 0x124   : > { %3194 = vmatmul.mubr.bf16.gmra.mxu0 %v4326_v4  ;;  %v1403_v4 = vld [vmem:[%s6680_s0 + $0x2d0] sm:$0xff] }
 0x125   : > { %3291 = vmatmul.mubr.bf16.gmra.mxu1 %v4328_v5  ;;  %3331 = vmatprep.mubr.bf16.mxu0 %v4219_v6  ;;  %v5121_v5 = vld [vmem:[%s5814_s23 + $0x2c0] sm:$0xff]   ;;  %v1396_v6 = vld [vmem:[%s6680_s0 + $0x298] sm:$0xff] }
 0x126   : > { %3428 = vmatprep.mubr.bf16.mxu1 %v4221_v7  ;;  %v1404_v7 = vld [vmem:[%s6680_s0 + $0x2d8] sm:$0xff] }
 0x12c   : > { %3332 = vmatmul.mubr.bf16.vlgmr.msra.gmra.mxu0 %v4218_v11  ;;  %v4282_v11 = vcombine.low %v1379_v51, %v1387_v52  ;;  %v5129_v51 = vld [vmem:[%s5814_s23 + $0x3f0] sm:$0xff]  }
 0x12d   : > { %3429 = vmatmul.mubr.bf16.vlgmr.msra.gmra.mxu1 %v4220_v13  ;;  %4731 = vmatpush3.bf16.msra.mxu0 %v5092_v14  ;;  %v4284_v13 = vcombine.low %v1380_v54, %v1388_v55  ;;  %v4299_v14 = vcombine.high %v1395_v3, %v1403_v4  ;;  %v5128_v52 = vld [vmem:[%s5814_s23 + $0x330] sm:$0xff]   ;;  %v1349_v54 = vld [vmem:[%s6680_s0 + $0x120] sm:$0xff] }
 0x12e   : > { %4795 = vmatpush3.bf16.msra.mxu1 %v5094_v15  ;;  %3339 = vmatprep.mubr.bf16.mxu0 %v4235_v16  ;;  %v4301_v15 = vcombine.high %v1396_v6, %v1404_v7  ;;  %v1411_v16 = vld [vmem:[%s6680_s0 + $0x310] sm:$0xff]  ;;  %v1357_v55 = vld [vmem:[%s6680_s0 + $0x160] sm:$0xff] }
 0x12f   : > { %3436 = vmatprep.mubr.bf16.mxu1 %v4237_v17  ;;  %4732 = vmatprep.subr.bf16.mxu0 %v5095_v18  ;;  %v1419_v17 = vld [vmem:[%s6680_s0 + $0x350] sm:$0xff]  ;;  %v1412_v18 = vld [vmem:[%s6680_s0 + $0x318] sm:$0xff] }
 0x130   : > { %4796 = vmatprep.subr.bf16.mxu1 %v5097_v20  ;;  %v4298_v20 = vcombine.low %v1395_v3, %v1403_v4  ;;  %v4315_v22 = vcombine.high %v1411_v16, %v1419_v17  ;;  %v5137_v3 = vld [vmem:[%s5814_s23 + $0x3e0] sm:$0xff]  }
 0x131   : > { %4733 = vmatpush3.bf16.msra.mxu0 %v5096_v19  ;;  %v1420_v19 = vld [vmem:[%s6680_s0 + $0x358] sm:$0xff]  ;;  %v1365_v4 = vld [vmem:[%s6680_s0 + $0x1a0] sm:$0xff] }
 0x132   : > { %4797 = vmatpush3.bf16.msra.mxu1 %v5098_v21  ;;  %4734 = vmatprep.subr.bf16.mxu0 %v5099_v26  ;;  %v4300_v21 = vcombine.low %v1396_v6, %v1404_v7  ;;  %v4317_v23 = vcombine.high %v1412_v18, %v1420_v19  ;;  %v1428_v26 = vld [vmem:[%s6680_s0 + $0x398] sm:$0xff]  ;;  %v1366_v6 = vld [vmem:[%s6680_s0 + $0x1a8] sm:$0xff]  ;;  %v5136_v7 = vld [vmem:[%s5814_s23 + $0x320] sm:$0xff]  }
 0x133   : > { %4798 = vmatprep.subr.bf16.mxu1 %v5101_v27  ;;  %v1436_v27 = vld [vmem:[%s6680_s0 + $0x3d8] sm:$0xff] }
 0x134   : > { %3340 = vmatmul.mubr.bf16.gmra.mxu0 %v4234_v28  ;;  %v4314_v28 = vcombine.low %v1411_v16, %v1419_v17  ;;  %v5140_v16 = vld [vmem:[%s5814_s23 + $0x318] sm:$0xff]  }
 0x135   : > { %3437 = vmatmul.mubr.bf16.gmra.mxu1 %v4236_v29  ;;  %3347 = vmatprep.mubr.bf16.mxu0 %v4251_v30  ;;  %v4316_v29 = vcombine.low %v1412_v18, %v1420_v19  ;;  %v4331_v30 = vcombine.high %v1427_v24, %v1435_v25  ;;  %v5142_v17 = vld [vmem:[%s5814_s23 + $0x398] sm:$0xff]   ;;  %v5143_v18 = vld [vmem:[%s5814_s23 + $0x350] sm:$0xff]   ;;  %v1390_v24 = vld [vmem:[%s6680_s0 + $0x268] sm:$0xff] }
 0x136   : > { %3444 = vmatprep.mubr.bf16.mxu1 %v4253_v32  ;;  %4735 = vmatpush3.bf16.msra.mxu0 %v5100_v31  ;;  %v4333_v31 = vcombine.high %v1428_v26, %v1436_v27  ;;  %v1317_v32 = vld [vmem:[%s6680_s0 + $0x20] sm:$0xff]  ;;  %v5145_v19 = vld [vmem:[%s5814_s23 + $0x3d0] sm:$0xff]  }
 0x137   : > { %4799 = vmatpush3.bf16.msra.mxu1 %v5102_v33  ;;  %4736 = vmatprep.subr.bf16.mxu0 %v5103_v34  ;;  %v1325_v33 = vld [vmem:[%s6680_s0 + $0x60] sm:$0xff]  ;;  %v1318_v34 = vld [vmem:[%s6680_s0 + $0x28] sm:$0xff]  ;;  %v5146_v25 = vld [vmem:[%s5814_s23 + $0x390] sm:$0xff]  }
 0x138   : > { %4800 = vmatprep.subr.bf16.mxu1 %v5105_v37  ;;  %v4332_v37 = vcombine.low %v1428_v26, %v1436_v27  ;;  %v4223_v38 = vcombine.high %v1317_v32, %v1325_v33  ;;  %v4225_v39 = vcombine.high %v1318_v34, %v1326_v35  ;;  %v5147_v26 = vld [vmem:[%s5814_s23 + $0x348] sm:$0xff]  }
 0x13a   : > { %4737 = vmatpush3.bf16.msra.mxu0 %v5104_v40  ;;  %v1333_v40 = vld [vmem:[%s6680_s0 + $0xa0] sm:$0xff] }
 0x13b   : > { %4801 = vmatpush3.bf16.msra.mxu1 %v5106_v41  ;;  %4738 = vmatprep.subr.bf16.mxu0 %v5107_v42  ;;  %v1341_v41 = vld [vmem:[%s6680_s0 + $0xe0] sm:$0xff]  ;;  %v4222_v42 = vcombine.low %v1317_v32, %v1325_v33  ;;  %v5148_v32 = vld [vmem:[%s5814_s23 + $0x308] sm:$0xff]  }
 0x13c   : > { %3348 = vmatmul.mubr.bf16.gmra.mxu0 %v4250_v43  ;;  %4802 = vmatprep.subr.bf16.mxu1 %v5109_v44  ;;  %v1334_v43 = vld [vmem:[%s6680_s0 + $0xa8] sm:$0xff] }
 0x13d   : > { %3445 = vmatmul.mubr.bf16.gmra.mxu1 %v4252_v45  ;;  %3355 = vmatprep.mubr.bf16.mxu0 %v4267_v46  ;;  %v1342_v44 = vld [vmem:[%s6680_s0 + $0xe8] sm:$0xff]  ;;  %v4224_v45 = vcombine.low %v1318_v34, %v1326_v35  ;;  %v5124_v46 = vld [vmem:[%s5814_s23 + $0x338] sm:$0xff]   ;;  %v5151_v34 = vld [vmem:[%s5814_s23 + $0x340] sm:$0xff]  }
 0x13e   : > { %3452 = vmatprep.mubr.bf16.mxu1 %v4269_v47  ;;  %4739 = vmatpush3.bf16.msra.mxu0 %v5108_v48  ;;  %v5126_v47 = vld [vmem:[%s5814_s23 + $0x3b8] sm:$0xff]   ;;  %v4239_v48 = vcombine.high %v1333_v40, %v1341_v41  ;;  %v5150_v33 = vld [vmem:[%s5814_s23 + $0x388] sm:$0xff]   ;;  %v5153_v35 = vld [vmem:[%s5814_s23 + $0x3c0] sm:$0xff]  }
 0x13f   : > { %4803 = vmatpush3.bf16.msra.mxu1 %v5110_v49  ;;  %4740 = vmatprep.subr.bf16.mxu0 %v5111_v50  ;;  %v4241_v49 = vcombine.high %v1334_v43, %v1342_v44  ;;  %v5127_v50 = vld [vmem:[%s5814_s23 + $0x370] sm:$0xff]  }
 0x140   : > { %4804 = vmatprep.subr.bf16.mxu1 %v5113_v53  ;;  %v5130_v53 = vld [vmem:[%s5814_s23 + $0x3b0] sm:$0xff]  }
 0x142   : > { %4741 = vmatpush3.bf16.msra.mxu0 %v5112_v56  ;;  %v5131_v56 = vld [vmem:[%s5814_s23 + $0x368] sm:$0xff]  }
 0x143   : > { %4805 = vmatpush3.bf16.msra.mxu1 %v5114_v57  ;;  %4742 = vmatprep.subr.bf16.mxu0 %v5115_v58  ;;  %v1350_v57 = vld [vmem:[%s6680_s0 + $0x128] sm:$0xff] }
 0x144   : > { %3356 = vmatmul.mubr.bf16.gmra.mxu0 %v4266_v59  ;;  %4806 = vmatprep.subr.bf16.mxu1 %v5117_v60  ;;  %v1358_v58 = vld [vmem:[%s6680_s0 + $0x168] sm:$0xff]  ;;  %v4238_v60 = vcombine.low %v1333_v40, %v1341_v41  ;;  %v5154_v41 = vld [vmem:[%s5814_s23 + $0x380] sm:$0xff]  }
 0x145   : > { %3453 = vmatmul.mubr.bf16.gmra.mxu1 %v4268_v61  ;;  %3363 = vmatprep.mubr.bf16.mxu0 %v4283_v62  ;;  %v5133_v59 = vld [vmem:[%s5814_s23 + $0x3e8] sm:$0xff]   ;;  %v4240_v61 = vcombine.low %v1334_v43, %v1342_v44  ;;  %v4255_v62 = vcombine.high %v1349_v54, %v1357_v55 }
 0x146   : > { %3460 = vmatprep.mubr.bf16.mxu1 %v4285_v0  ;;  %4743 = vmatpush3.bf16.msra.mxu0 %v5116_v63  ;;  %v4257_v63 = vcombine.high %v1350_v57, %v1358_v58  ;;  %v5132_v0 = vld [vmem:[%s5814_s23 + $0x328] sm:$0xff]  }
 0x147   : > { %4807 = vmatpush3.bf16.msra.mxu1 %v5118_v1  ;;  %4744 = vmatprep.subr.bf16.mxu0 %v5119_v2  ;;  %v5134_v1 = vld [vmem:[%s5814_s23 + $0x3a8] sm:$0xff]   ;;  %v5135_v2 = vld [vmem:[%s5814_s23 + $0x360] sm:$0xff]  }
 0x148   : > { %4808 = vmatprep.subr.bf16.mxu1 %v5121_v5  ;;  %v1373_v5 = vld [vmem:[%s6680_s0 + $0x1e0] sm:$0xff]  ;;  %v1406_v40 = vld [vmem:[%s6680_s0 + $0x2e8] sm:$0xff] }
 0x149   : > { %v4270_v27 = vcombine.low %v1365_v4, %v1373_v5 }
 0x14a   : > { %4745 = vmatpush3.bf16.msra.mxu0 %v5120_v8  ;;  %v1374_v8 = vld [vmem:[%s6680_s0 + $0x1e8] sm:$0xff] }
 0x14b   : > { %4809 = vmatpush3.bf16.msra.mxu1 %v5122_v9  ;;  %4858 = vmatprep.subr.bf16.mxu0 %v5123_v10  ;;  %v5138_v9 = vld [vmem:[%s5814_s23 + $0x3a0] sm:$0xff]   ;;  %v5139_v10 = vld [vmem:[%s5814_s23 + $0x358] sm:$0xff]  }
 0x14c   : > { %3364 = vmatmul.mubr.bf16.gmra.mxu0 %v4282_v11  ;;  %4922 = vmatprep.subr.bf16.mxu1 %v5125_v12  ;;  %v4254_v11 = vcombine.low %v1349_v54, %v1357_v55  ;;  %v5141_v12 = vld [vmem:[%s5814_s23 + $0x3d8] sm:$0xff]   ;;  %v1429_v54 = vld [vmem:[%s6680_s0 + $0x3a0] sm:$0xff] }
 0x14d   : > { %3461 = vmatmul.mubr.bf16.gmra.mxu1 %v4284_v13  ;;  %3371 = vmatprep.mubr.bf16.mxu0 %v4299_v14  ;;  %v4256_v13 = vcombine.low %v1350_v57, %v1358_v58  ;;  %v4271_v14 = vcombine.high %v1365_v4, %v1373_v5  ;;  %v1437_v55 = vld [vmem:[%s6680_s0 + $0x3e0] sm:$0xff]  ;;  %v1438_v57 = vld [vmem:[%s6680_s0 + $0x3e8] sm:$0xff] }
 0x14e   : > { %3468 = vmatprep.mubr.bf16.mxu1 %v4301_v15  ;;  %v4273_v15 = vcombine.high %v1366_v6, %v1374_v8 }
 0x154   : > { %3372 = vmatmul.mubr.bf16.gmra.mxu0 %v4298_v20  ;;  %v1381_v20 = vld [vmem:[%s6680_s0 + $0x220] sm:$0xff] }
 0x155   : > { %3469 = vmatmul.mubr.bf16.gmra.mxu1 %v4300_v21  ;;  %3379 = vmatprep.mubr.bf16.mxu0 %v4315_v22  ;;  %v1389_v21 = vld [vmem:[%s6680_s0 + $0x260] sm:$0xff]  ;;  %v1382_v22 = vld [vmem:[%s6680_s0 + $0x228] sm:$0xff] }
 0x156   : > { %3476 = vmatprep.mubr.bf16.mxu1 %v4317_v23  ;;  %v5144_v23 = vld [vmem:[%s5814_s23 + $0x310] sm:$0xff]   ;;  %v4288_v43 = vcombine.low %v1382_v22, %v1390_v24 }
 0x15c   : > { %3380 = vmatmul.mubr.bf16.gmra.mxu0 %v4314_v28  ;;  %v5149_v28 = vld [vmem:[%s5814_s23 + $0x3c8] sm:$0xff]  }
 0x15d   : > { %3477 = vmatmul.mubr.bf16.gmra.mxu1 %v4316_v29  ;;  %3387 = vmatprep.mubr.bf16.mxu0 %v4331_v30  ;;  %v4272_v29 = vcombine.low %v1366_v6, %v1374_v8  ;;  %v4287_v30 = vcombine.high %v1381_v20, %v1389_v21  ;;  %v1335_v6 = vld [vmem:[%s6680_s0 + $0xb0] sm:$0xff]  ;;  %v1336_v8 = vld [vmem:[%s6680_s0 + $0xb8] sm:$0xff] }
 0x15e   : > { %3484 = vmatprep.mubr.bf16.mxu1 %v4333_v31  ;;  %v4289_v31 = vcombine.high %v1382_v22, %v1390_v24  ;;  %v1360_v22 = vld [vmem:[%s6680_s0 + $0x178] sm:$0xff] }
 0x164   : > { %3388 = vmatmul.mubr.bf16.gmra.mxu0 %v4330_v36  ;;  %v1397_v36 = vld [vmem:[%s6680_s0 + $0x2a0] sm:$0xff] }
 0x165   : > { %3485 = vmatmul.mubr.bf16.gmra.mxu1 %v4332_v37  ;;  %3525 = vmatprep.mubr.bf16.mxu0 %v4223_v38  ;;  %v1405_v37 = vld [vmem:[%s6680_s0 + $0x2e0] sm:$0xff] }
 0x166   : > { %3622 = vmatprep.mubr.bf16.mxu1 %v4225_v39  ;;  %v5152_v38 = vld [vmem:[%s5814_s23 + $0x300] sm:$0xff]   ;;  %v1398_v39 = vld [vmem:[%s6680_s0 + $0x2a8] sm:$0xff]  ;;  %v4303_v44 = vcombine.high %v1397_v36, %v1405_v37 }
 0x16c   : > { %3526 = vmatmul.mubr.bf16.vlgmr.msra.gmra.mxu0 %v4222_v42  ;;  %v4286_v42 = vcombine.low %v1381_v20, %v1389_v21  ;;  %v1352_v21 = vld [vmem:[%s6680_s0 + $0x138] sm:$0xff] }
 0x16d   : > { %3623 = vmatmul.mubr.bf16.vlgmr.msra.gmra.mxu1 %v4224_v45  ;;  %4859 = vmatpush3.bf16.msra.mxu0 %v5124_v46  ;;  %v4305_v45 = vcombine.high %v1398_v39, %v1406_v40  ;;  %v1413_v46 = vld [vmem:[%s6680_s0 + $0x320] sm:$0xff] }
 0x16e   : > { %4923 = vmatpush3.bf16.msra.mxu1 %v5126_v47  ;;  %3533 = vmatprep.mubr.bf16.mxu0 %v4239_v48  ;;  %v1421_v47 = vld [vmem:[%s6680_s0 + $0x360] sm:$0xff]  ;;  %v1414_v48 = vld [vmem:[%s6680_s0 + $0x328] sm:$0xff] }
 0x16f   : > { %3630 = vmatprep.mubr.bf16.mxu1 %v4241_v49  ;;  %4860 = vmatprep.subr.bf16.mxu0 %v5127_v50  ;;  %v1422_v49 = vld [vmem:[%s6680_s0 + $0x368] sm:$0xff]  ;;  %v4302_v50 = vcombine.low %v1397_v36, %v1405_v37  ;;  %v4318_v58 = vcombine.low %v1413_v46, %v1421_v47 }
 0x170   : > { %4924 = vmatprep.subr.bf16.mxu1 %v5129_v51  ;;  %v4304_v51 = vcombine.low %v1398_v39, %v1406_v40  ;;  %v1367_v39 = vld [vmem:[%s6680_s0 + $0x1b0] sm:$0xff] }
 0x171   : > { %4861 = vmatpush3.bf16.msra.mxu0 %v5128_v52  ;;  %v4319_v52 = vcombine.high %v1413_v46, %v1421_v47  ;;  %v1375_v40 = vld [vmem:[%s6680_s0 + $0x1f0] sm:$0xff] }
 0x172   : > { %4925 = vmatpush3.bf16.msra.mxu1 %v5130_v53  ;;  %4862 = vmatprep.subr.bf16.mxu0 %v5131_v56  ;;  %v4321_v53 = vcombine.high %v1414_v48, %v1422_v49  ;;  %v1430_v56 = vld [vmem:[%s6680_s0 + $0x3a8] sm:$0xff] }
 0x173   : > { %4926 = vmatprep.subr.bf16.mxu1 %v5133_v59  ;;  %v4320_v59 = vcombine.low %v1414_v48, %v1422_v49  ;;  %v4260_v49 = vcombine.low %v1352_v21, %v1360_v22 }
 0x174   : > { %3534 = vmatmul.mubr.bf16.gmra.mxu0 %v4238_v60  ;;  %v4335_v60 = vcombine.high %v1429_v54, %v1437_v55 }
 0x175   : > { %3631 = vmatmul.mubr.bf16.gmra.mxu1 %v4240_v61  ;;  %3541 = vmatprep.mubr.bf16.mxu0 %v4255_v62  ;;  %v4337_v61 = vcombine.high %v1430_v56, %v1438_v57  ;;  %v1319_v62 = vld [vmem:[%s6680_s0 + $0x30] sm:$0xff] }
 0x176   : > { %3638 = vmatprep.mubr.bf16.mxu1 %v4257_v63  ;;  %4863 = vmatpush3.bf16.msra.mxu0 %v5132_v0  ;;  %v1327_v63 = vld [vmem:[%s6680_s0 + $0x70] sm:$0xff]  ;;  %v1320_v0 = vld [vmem:[%s6680_s0 + $0x38] sm:$0xff] }
 0x177   : > { %4927 = vmatpush3.bf16.msra.mxu1 %v5134_v1  ;;  %4864 = vmatprep.subr.bf16.mxu0 %v5135_v2  ;;  %v1328_v1 = vld [vmem:[%s6680_s0 + $0x78] sm:$0xff]  ;;  %v4334_v2 = vcombine.low %v1429_v54, %v1437_v55  ;;  %v4227_v4 = vcombine.high %v1319_v62, %v1327_v63 }
 0x178   : > { %4928 = vmatprep.subr.bf16.mxu1 %v5137_v3  ;;  %v4336_v3 = vcombine.low %v1430_v56, %v1438_v57  ;;  %v4229_v5 = vcombine.high %v1320_v0, %v1328_v1 }
 0x17a   : > { %4865 = vmatpush3.bf16.msra.mxu0 %v5136_v7  ;;  %v1343_v7 = vld [vmem:[%s6680_s0 + $0xf0] sm:$0xff] }
 0x17b   : > { %4929 = vmatpush3.bf16.msra.mxu1 %v5138_v9  ;;  %4866 = vmatprep.subr.bf16.mxu0 %v5139_v10  ;;  %v1344_v9 = vld [vmem:[%s6680_s0 + $0xf8] sm:$0xff]  ;;  %v4226_v10 = vcombine.low %v1319_v62, %v1327_v63  ;;  %v1391_v62 = vld [vmem:[%s6680_s0 + $0x270] sm:$0xff] }
 0x17c   : > { %3542 = vmatmul.mubr.bf16.gmra.mxu0 %v4254_v11  ;;  %4930 = vmatprep.subr.bf16.mxu1 %v5141_v12  ;;  %v4228_v11 = vcombine.low %v1320_v0, %v1328_v1  ;;  %v4243_v12 = vcombine.high %v1335_v6, %v1343_v7  ;;  %v1384_v1 = vld [vmem:[%s6680_s0 + $0x238] sm:$0xff] }
 0x17d   : > { %3639 = vmatmul.mubr.bf16.gmra.mxu1 %v4256_v13  ;;  %3549 = vmatprep.mubr.bf16.mxu0 %v4271_v14  ;;  %v4245_v13 = vcombine.high %v1336_v8, %v1344_v9 }
 0x17e   : > { %3646 = vmatprep.mubr.bf16.mxu1 %v4273_v15  ;;  %4867 = vmatpush3.bf16.msra.mxu0 %v5140_v16 }
 0x17f   : > { %4931 = vmatpush3.bf16.msra.mxu1 %v5142_v17  ;;  %4868 = vmatprep.subr.bf16.mxu0 %v5143_v18  ;;  %v1351_v17 = vld [vmem:[%s6680_s0 + $0x130] sm:$0xff] }
 0x180   : > { %4932 = vmatprep.subr.bf16.mxu1 %v5145_v19  ;;  %v1359_v18 = vld [vmem:[%s6680_s0 + $0x170] sm:$0xff] }
 0x181   : > { %v4258_v47 = vcombine.low %v1351_v17, %v1359_v18 }
 0x182   : > { %4869 = vmatpush3.bf16.msra.mxu0 %v5144_v23 }
 0x183   : > { %4933 = vmatpush3.bf16.msra.mxu1 %v5146_v25  ;;  %4870 = vmatprep.subr.bf16.mxu0 %v5147_v26  ;;  %v4242_v25 = vcombine.low %v1335_v6, %v1343_v7 }
 0x184   : > { %3550 = vmatmul.mubr.bf16.gmra.mxu0 %v4270_v27  ;;  %4934 = vmatprep.subr.bf16.mxu1 %v5149_v28  ;;  %v4244_v27 = vcombine.low %v1336_v8, %v1344_v9  ;;  %v4259_v28 = vcombine.high %v1351_v17, %v1359_v18 }
 0x185   : > { %3647 = vmatmul.mubr.bf16.gmra.mxu1 %v4272_v29  ;;  %3557 = vmatprep.mubr.bf16.mxu0 %v4287_v30 }
 0x186   : > { %3654 = vmatprep.mubr.bf16.mxu1 %v4289_v31  ;;  %4871 = vmatpush3.bf16.msra.mxu0 %v5148_v32  ;;  %v4261_v31 = vcombine.high %v1352_v21, %v1360_v22 }
 0x187   : > { %4935 = vmatpush3.bf16.msra.mxu1 %v5150_v33  ;;  %4872 = vmatprep.subr.bf16.mxu0 %v5151_v34 }
 0x188   : > { %4936 = vmatprep.subr.bf16.mxu1 %v5153_v35 }
 0x18a   : > { %4873 = vmatpush3.bf16.msra.mxu0 %v5152_v38 }
 0x18b   : > { %4937 = vmatpush3.bf16.msra.mxu1 %v5154_v41 }
 0x18c   : > { %3558 = vmatmul.mubr.bf16.gmra.mxu0 %v4286_v42 }
 0x18d   : > { %3655 = vmatmul.mubr.bf16.gmra.mxu1 %v4288_v43  ;;  %3565 = vmatprep.mubr.bf16.mxu0 %v4303_v44  ;;  %v1368_v43 = vld [vmem:[%s6680_s0 + $0x1b8] sm:$0xff] }
 0x18e   : > { %3662 = vmatprep.mubr.bf16.mxu1 %v4305_v45  ;;  %v1376_v44 = vld [vmem:[%s6680_s0 + $0x1f8] sm:$0xff] }
 0x18f   : > { %v4276_v7 = vcombine.low %v1368_v43, %v1376_v44 }
 0x194   : > { %3566 = vmatmul.mubr.bf16.gmra.mxu0 %v4302_v50  ;;  %v4275_v50 = vcombine.high %v1367_v39, %v1375_v40 }
 0x195   : > { %3663 = vmatmul.mubr.bf16.gmra.mxu1 %v4304_v51  ;;  %3573 = vmatprep.mubr.bf16.mxu0 %v4319_v52 }
 0x196   : > { %3670 = vmatprep.mubr.bf16.mxu1 %v4321_v53  ;;  %v4277_v53 = vcombine.high %v1368_v43, %v1376_v44  ;;  %v1415_v43 = vld [vmem:[%s6680_s0 + $0x330] sm:$0xff] }
 0x197   : > { %v1423_v44 = vld [vmem:[%s6680_s0 + $0x370] sm:$0xff] }
 0x19c   : > { %3574 = vmatmul.mubr.bf16.gmra.mxu0 %v4318_v58 }
 0x19d   : > { %3671 = vmatmul.mubr.bf16.gmra.mxu1 %v4320_v59  ;;  %3581 = vmatprep.mubr.bf16.mxu0 %v4335_v60 }
 0x19e   : > { %3678 = vmatprep.mubr.bf16.mxu1 %v4337_v61  ;;  %v1383_v61 = vld [vmem:[%s6680_s0 + $0x230] sm:$0xff] }
 0x19f   : > { %v4291_v8 = vcombine.high %v1383_v61, %v1391_v62 }
 0x1a4   : > { %3582 = vmatmul.mubr.bf16.gmra.mxu0 %v4334_v2  ;;  %v1392_v2 = vld [vmem:[%s6680_s0 + $0x278] sm:$0xff] }
 0x1a5   : > { %3679 = vmatmul.mubr.bf16.gmra.mxu1 %v4336_v3  ;;  %3719 = vmatprep.mubr.bf16.mxu0 %v4227_v4 }
 0x1a6   : > { %3816 = vmatprep.mubr.bf16.mxu1 %v4229_v5  ;;  %v4274_v5 = vcombine.low %v1367_v39, %v1375_v40 }
 0x1ac   : > { %v4490_v14 = vpop.f32.mrf.mxu0  ;;  %3720 = vmatmul.mubr.bf16.vlgmr.msra.gmra.mxu0 %v4226_v10 }
 0x1ad   : > { %v4554_v15 = vpop.f32.mrf.mxu1  ;;  %3817 = vmatmul.mubr.bf16.vlgmr.msra.gmra.mxu1 %v4228_v11  ;;  %3727 = vmatprep.mubr.bf16.mxu0 %v4243_v12  ;;  %v4293_v11 = vcombine.high %v1384_v1, %v1392_v2 }
 0x1ae   : > { %v4491_v16 = vpop.f32.mrf.mxu0  ;;  %3824 = vmatprep.mubr.bf16.mxu1 %v4245_v13 }
 0x1af   : > { %v4492_v19 = vadd.f32 %v4491_v16, %v4490_v14  ;;  %v4555_v20 = vpop.f32.mrf.mxu1 }
 0x1b0   : > { %v4556_v23 = vadd.f32 %v4555_v20, %v4554_v15  ;;  %v4493_v24 = vpop.f32.mrf.mxu0  ;;  %v1407_v20 = vld [vmem:[%s6680_s0 + $0x2f0] sm:$0xff] }
 0x1b1   : > { %v4557_v26 = vpop.f32.mrf.mxu1 }
 0x1b2   : > { %v6260_v29 = vadd.f32 %v4556_v23, %v4492_v19  ;;  %v4494_v30 = vpop.f32.mrf.mxu0  ;;  %v1399_v19 = vld [vmem:[%s6680_s0 + $0x2b0] sm:$0xff]  ;;  %v1400_v23 = vld [vmem:[%s6680_s0 + $0x2b8] sm:$0xff] }
 0x1b3   : > { %v4495_v32 = vadd.f32 %v4494_v30, %v4493_v24  ;;  %v4558_v33 = vpop.f32.mrf.mxu1  ;;  %v1408_v24 = vld [vmem:[%s6680_s0 + $0x2f8] sm:$0xff]  ;;  %v4292_v30 = vcombine.low %v1384_v1, %v1392_v2 }
 0x1b4   : > { %v4559_v34 = vadd.f32 %v4558_v33, %v4557_v26  ;;  %v4496_v35 = vpop.f32.mrf.mxu0  ;;  %3728 = vmatmul.mubr.bf16.gmra.mxu0 %v4242_v25 }
 0x1b5   : > { %v4560_v36 = vpop.f32.mrf.mxu1  ;;  %3825 = vmatmul.mubr.bf16.gmra.mxu1 %v4244_v27  ;;  %3735 = vmatprep.mubr.bf16.mxu0 %v4259_v28  ;;  %v4290_v27 = vcombine.low %v1383_v61, %v1391_v62 }
 0x1b6   : > { %v6262_v37 = vadd.f32 %v4559_v34, %v4495_v32  ;;  %v4497_v38 = vpop.f32.mrf.mxu0  ;;  %3832 = vmatprep.mubr.bf16.mxu1 %v4261_v31  ;;  %v4307_v31 = vcombine.high %v1399_v19, %v1407_v20  ;;  %v4309_v34 = vcombine.high %v1400_v23, %v1408_v24 }
 0x1b7   : > { %v4498_v41 = vadd.f32 %v4497_v38, %v4496_v35  ;;  %v4561_v42 = vpop.f32.mrf.mxu1 }
 0x1b8   : > { %v4562_v45 = vadd.f32 %v4561_v42, %v4560_v36  ;;  %v4499_v46 = vpop.f32.mrf.mxu0 }
 0x1b9   : > { %v4563_v48 = vpop.f32.mrf.mxu1 }
 0x1ba   : > { %v6276_v51 = vadd.f32 %v4562_v45, %v4498_v41  ;;  %v4500_v52 = vpop.f32.mrf.mxu0 }
 0x1bb   : > { %v4501_v54 = vadd.f32 %v4500_v52, %v4499_v46  ;;  %v4564_v55 = vpop.f32.mrf.mxu1  ;;  %v4306_v52 = vcombine.low %v1399_v19, %v1407_v20 }
 0x1bc   : > { %v4565_v56 = vadd.f32 %v4564_v55, %v4563_v48  ;;  %v4502_v57 = vpop.f32.mrf.mxu0  ;;  %3736 = vmatmul.mubr.bf16.gmra.mxu0 %v4258_v47  ;;  %v1416_v47 = vld [vmem:[%s6680_s0 + $0x338] sm:$0xff]  ;;  %v4323_v55 = vcombine.high %v1415_v43, %v1423_v44 }
 0x1bd   : > { %v4566_v58 = vpop.f32.mrf.mxu1  ;;  %3833 = vmatmul.mubr.bf16.gmra.mxu1 %v4260_v49  ;;  %3743 = vmatprep.mubr.bf16.mxu0 %v4275_v50  ;;  %v1424_v48 = vld [vmem:[%s6680_s0 + $0x378] sm:$0xff] }
 0x1be   : > { %v6278_v59 = vadd.f32 %v4565_v56, %v4501_v54  ;;  %v4503_v60 = vpop.f32.mrf.mxu0  ;;  %3840 = vmatprep.mubr.bf16.mxu1 %v4277_v53  ;;  %v4308_v54 = vcombine.low %v1400_v23, %v1408_v24 }
 0x1bf   : > { %v4504_v63 = vadd.f32 %v4503_v60, %v4502_v57  ;;  %v4567_v0 = vpop.f32.mrf.mxu1 }
 0x1c0   : > { %v4568_v3 = vadd.f32 %v4567_v0, %v4566_v58  ;;  %v4505_v4 = vpop.f32.mrf.mxu0  ;;  %v4325_v58 = vcombine.high %v1416_v47, %v1424_v48 }
 0x1c1   : > { %v4569_v6 = vpop.f32.mrf.mxu1 }
 0x1c2   : > { %v6292_v9 = vadd.f32 %v4568_v3, %v4504_v63  ;;  %v4506_v10 = vpop.f32.mrf.mxu0  ;;  %v1431_v3 = vld [vmem:[%s6680_s0 + $0x3b0] sm:$0xff] }
 0x1c3   : > { %v4507_v12 = vadd.f32 %v4506_v10, %v4505_v4  ;;  %v4570_v13 = vpop.f32.mrf.mxu1  ;;  %v1439_v4 = vld [vmem:[%s6680_s0 + $0x3f0] sm:$0xff] }
 0x1c4   : > { %v4571_v14 = vadd.f32 %v4570_v13, %v4569_v6  ;;  %v4508_v15 = vpop.f32.mrf.mxu0  ;;  %3744 = vmatmul.mubr.bf16.gmra.mxu0 %v4274_v5 }
 0x1c5   : > { %v4572_v16 = vpop.f32.mrf.mxu1  ;;  %3841 = vmatmul.mubr.bf16.gmra.mxu1 %v4276_v7  ;;  %3751 = vmatprep.mubr.bf16.mxu0 %v4291_v8  ;;  %v1432_v7 = vld [vmem:[%s6680_s0 + $0x3b8] sm:$0xff] }
 0x1c6   : > { %v6294_v17 = vadd.f32 %v4571_v14, %v4507_v12  ;;  %v4509_v18 = vpop.f32.mrf.mxu0  ;;  %3848 = vmatprep.mubr.bf16.mxu1 %v4293_v11  ;;  %v1440_v8 = vld [vmem:[%s6680_s0 + $0x3f8] sm:$0xff]  ;;  %v4322_v12 = vcombine.low %v1415_v43, %v1423_v44  ;;  %v4324_v14 = vcombine.low %v1416_v47, %v1424_v48 }
 0x1c7   : > { %v4510_v21 = vadd.f32 %v4509_v18, %v4508_v15  ;;  %v4573_v22 = vpop.f32.mrf.mxu1  ;;  %v4339_v15 = vcombine.high %v1431_v3, %v1439_v4  ;;  %v4341_v19 = vcombine.high %v1432_v7, %v1440_v8 }
 0x1c8   : > { %v4574_v25 = vadd.f32 %v4573_v22, %v4572_v16  ;;  %v4511_v26 = vpop.f32.mrf.mxu0 }
 0x1c9   : > { %v4575_v28 = vpop.f32.mrf.mxu1 }
 0x1ca   : > { %v6308_v32 = vadd.f32 %v4574_v25, %v4510_v21  ;;  %v4512_v33 = vpop.f32.mrf.mxu0 }
 0x1cb   : > { %v4513_v35 = vadd.f32 %v4512_v33, %v4511_v26  ;;  %v4576_v36 = vpop.f32.mrf.mxu1  ;;  %v4338_v33 = vcombine.low %v1431_v3, %v1439_v4 }
 0x1cc   : > { %v4577_v38 = vadd.f32 %v4576_v36, %v4575_v28  ;;  %v4514_v39 = vpop.f32.mrf.mxu0  ;;  %3752 = vmatmul.mubr.bf16.gmra.mxu0 %v4290_v27 }
 0x1cd   : > { %v4578_v40 = vpop.f32.mrf.mxu1  ;;  %3849 = vmatmul.mubr.bf16.gmra.mxu1 %v4292_v30  ;;  %3759 = vmatprep.mubr.bf16.mxu0 %v4307_v31 }
 0x1ce   : > { %v6310_v41 = vadd.f32 %v4577_v38, %v4513_v35  ;;  %v4515_v42 = vpop.f32.mrf.mxu0  ;;  %3856 = vmatprep.mubr.bf16.mxu1 %v4309_v34  ;;  %v4340_v35 = vcombine.low %v1432_v7, %v1440_v8 }
 0x1cf   : > { %v4516_v45 = vadd.f32 %v4515_v42, %v4514_v39  ;;  %v4579_v46 = vpop.f32.mrf.mxu1 }
 0x1d0   : > { %v4580_v49 = vadd.f32 %v4579_v46, %v4578_v40  ;;  %v4517_v50 = vpop.f32.mrf.mxu0 }
 0x1d1   : > { %v4581_v53 = vpop.f32.mrf.mxu1 }
 0x1d2   : > { %v6324_v56 = vadd.f32 %v4580_v49, %v4516_v45  ;;  %v4518_v57 = vpop.f32.mrf.mxu0 }
 0x1d3   : > { %v4519_v60 = vadd.f32 %v4518_v57, %v4517_v50  ;;  %v4582_v61 = vpop.f32.mrf.mxu1 }
 0x1d4   : > { %v4583_v62 = vadd.f32 %v4582_v61, %v4581_v53  ;;  %v4520_v63 = vpop.f32.mrf.mxu0  ;;  %3760 = vmatmul.mubr.bf16.gmra.mxu0 %v4306_v52 }
 0x1d5   : > { %v4584_v0 = vpop.f32.mrf.mxu1  ;;  %3857 = vmatmul.mubr.bf16.gmra.mxu1 %v4308_v54  ;;  %3767 = vmatprep.mubr.bf16.mxu0 %v4323_v55 }
 0x1d6   : > { %v6326_v1 = vadd.f32 %v4583_v62, %v4519_v60  ;;  %v4521_v2 = vpop.f32.mrf.mxu0  ;;  %3864 = vmatprep.mubr.bf16.mxu1 %v4325_v58 }
 0x1d7   : > { %v4522_v5 = vadd.f32 %v4521_v2, %v4520_v63  ;;  %v4585_v6 = vpop.f32.mrf.mxu1 }
 0x1d8   : > { %v4586_v10 = vadd.f32 %v4585_v6, %v4584_v0  ;;  %v4523_v11 = vpop.f32.mrf.mxu0 }
 0x1d9   : > { %v4587_v13 = vpop.f32.mrf.mxu1 }
 0x1da   : > { %v6340_v16 = vadd.f32 %v4586_v10, %v4522_v5  ;;  %v4524_v18 = vpop.f32.mrf.mxu0 }
 0x1db   : > { %v4525_v20 = vadd.f32 %v4524_v18, %v4523_v11  ;;  %v4588_v21 = vpop.f32.mrf.mxu1 }
 0x1dc   : > { %v4589_v22 = vadd.f32 %v4588_v21, %v4587_v13  ;;  %v4526_v23 = vpop.f32.mrf.mxu0  ;;  %3768 = vmatmul.mubr.bf16.gmra.mxu0 %v4322_v12 }
 0x1dd   : > { %v4590_v24 = vpop.f32.mrf.mxu1  ;;  %3865 = vmatmul.mubr.bf16.gmra.mxu1 %v4324_v14  ;;  %3775 = vmatprep.mubr.bf16.mxu0 %v4339_v15 }
 0x1de   : > { %v6342_v25 = vadd.f32 %v4589_v22, %v4525_v20  ;;  %v4527_v26 = vpop.f32.mrf.mxu0  ;;  %3872 = vmatprep.mubr.bf16.mxu1 %v4341_v19 }
 0x1df   : > { %v4528_v27 = vadd.f32 %v4527_v26, %v4526_v23  ;;  %v4591_v28 = vpop.f32.mrf.mxu1 }
 0x1e0   : > { %v4592_v30 = vadd.f32 %v4591_v28, %v4590_v24  ;;  %v4529_v31 = vpop.f32.mrf.mxu0 }
 0x1e1   : > { %v4593_v34 = vpop.f32.mrf.mxu1 }
 0x1e2   : > { %v6344_v36 = vadd.f32 %v4592_v30, %v4528_v27  ;;  %v4530_v38 = vpop.f32.mrf.mxu0 }
 0x1e3   : > { %v4531_v39 = vadd.f32 %v4530_v38, %v4529_v31  ;;  %v4594_v40 = vpop.f32.mrf.mxu1 }
 0x1e4   : > { %v4595_v42 = vadd.f32 %v4594_v40, %v4593_v34  ;;  %v4532_v43 = vpop.f32.mrf.mxu0  ;;  %3776 = vmatmul.mubr.bf16.gmra.mxu0 %v4338_v33 }
 0x1e5   : > { %v4596_v44 = vpop.f32.mrf.mxu1  ;;  %3873 = vmatmul.mubr.bf16.gmra.mxu1 %v4340_v35 }
 0x1e6   : > { %v6346_v45 = vadd.f32 %v4595_v42, %v4531_v39  ;;  %v4533_v46 = vpop.f32.mrf.mxu0 }
 0x1e7   : > { %v4534_v47 = vadd.f32 %v4533_v46, %v4532_v43  ;;  %v4597_v48 = vpop.f32.mrf.mxu1 }
 0x1e8   : > { %v4598_v49 = vadd.f32 %v4597_v48, %v4596_v44  ;;  %v4535_v50 = vpop.f32.mrf.mxu0 }
 0x1e9   : > { %v4599_v52 = vpop.f32.mrf.mxu1 }
 0x1ea   : > { %v6348_v53 = vadd.f32 %v4598_v49, %v4534_v47  ;;  %v4536_v54 = vpop.f32.mrf.mxu0 }
 0x1eb   : > { %v4537_v55 = vadd.f32 %v4536_v54, %v4535_v50  ;;  %v4600_v57 = vpop.f32.mrf.mxu1 }
 0x1ec   : > { %v4601_v58 = vadd.f32 %v4600_v57, %v4599_v52  ;;  %v4618_v60 = vpop.f32.mrf.mxu0 }
 0x1ed   : > { %v4682_v61 = vpop.f32.mrf.mxu1 }
 0x1ee   : > { %v6350_v62 = vadd.f32 %v4601_v58, %v4537_v55  ;;  %v4619_v63 = vpop.f32.mrf.mxu0 }
 0x1ef   : > { %v4620_v0 = vadd.f32 %v4619_v63, %v4618_v60  ;;  %v4683_v2 = vpop.f32.mrf.mxu1 }
 0x1f0   : > { %v4684_v3 = vadd.f32 %v4683_v2, %v4682_v61  ;;  %v4621_v4 = vpop.f32.mrf.mxu0 }
 0x1f1   : > { %v3334_v5 = vadd.f32 %v4620_v0, %v6260_v29  ;;  %v4685_v6 = vpop.f32.mrf.mxu1 }
 0x1f2   : > { %v4622_v7 = vpop.f32.mrf.mxu0 }
 0x1f3   : > { %v6353_v8 = vadd.f32 %v4684_v3, %v3334_v5  ;;  %v4623_v10 = vadd.f32 %v4622_v7, %v4621_v4  ;;  %v4686_v11 = vpop.f32.mrf.mxu1 }
 0x1f4   : > { %v4687_v12 = vadd.f32 %v4686_v11, %v4685_v6  ;;  %v4624_v13 = vpop.f32.mrf.mxu0 }
 0x1f5   : > { %v3337_v14 = vadd.f32 %v4623_v10, %v6262_v37  ;;  %v4688_v15 = vpop.f32.mrf.mxu1 }
 0x1f6   : > { %v4625_v18 = vpop.f32.mrf.mxu0 }
 0x1f7   : > { %v6356_v19 = vadd.f32 %v4687_v12, %v3337_v14  ;;  %v4626_v20 = vadd.f32 %v4625_v18, %v4624_v13  ;;  %v4689_v21 = vpop.f32.mrf.mxu1 }
 0x1f8   : > { %v4690_v22 = vadd.f32 %v4689_v21, %v4688_v15  ;;  %v4627_v23 = vpop.f32.mrf.mxu0 }
 0x1f9   : > { %v3342_v29 = vadd.f32 %v4626_v20, %v6276_v51  ;;  %v4691_v24 = vpop.f32.mrf.mxu1 }
 0x1fa   : > { %v4628_v26 = vpop.f32.mrf.mxu0 }
 0x1fb   : > { %v6359_v27 = vadd.f32 %v4690_v22, %v3342_v29  ;;  %v4629_v28 = vadd.f32 %v4628_v26, %v4627_v23  ;;  %v4692_v30 = vpop.f32.mrf.mxu1 }
 0x1fc   : > { %v4693_v31 = vadd.f32 %v4692_v30, %v4691_v24  ;;  %v4630_v33 = vpop.f32.mrf.mxu0 }
 0x1fd   : > { %v3345_v37 = vadd.f32 %v4629_v28, %v6278_v59  ;;  %v4694_v34 = vpop.f32.mrf.mxu1 }
 0x1fe   : > { %v4631_v35 = vpop.f32.mrf.mxu0 }
 0x1ff   : > { %v6362_v38 = vadd.f32 %v4693_v31, %v3345_v37  ;;  %v4632_v39 = vadd.f32 %v4631_v35, %v4630_v33  ;;  %v4695_v40 = vpop.f32.mrf.mxu1 }
 0x200   : > { %v4696_v42 = vadd.f32 %v4695_v40, %v4694_v34  ;;  %v4633_v43 = vpop.f32.mrf.mxu0 }
 0x201   : > { %v3350_v51 = vadd.f32 %v4632_v39, %v6292_v9  ;;  %v4697_v44 = vpop.f32.mrf.mxu1 }
 0x202   : > { %v4634_v46 = vpop.f32.mrf.mxu0 }
 0x203   : > { %v6365_v47 = vadd.f32 %v4696_v42, %v3350_v51  ;;  %v4635_v48 = vadd.f32 %v4634_v46, %v4633_v43  ;;  %v4698_v49 = vpop.f32.mrf.mxu1 }
 0x204   : > { %v4699_v50 = vadd.f32 %v4698_v49, %v4697_v44  ;;  %v4636_v52 = vpop.f32.mrf.mxu0 }
 0x205   : > { %v3353_v59 = vadd.f32 %v4635_v48, %v6294_v17  ;;  %v4700_v54 = vpop.f32.mrf.mxu1 }
 0x206   : > { %v4637_v55 = vpop.f32.mrf.mxu0 }
 0x207   : > { %v6368_v57 = vadd.f32 %v4699_v50, %v3353_v59  ;;  %v4638_v58 = vadd.f32 %v4637_v55, %v4636_v52  ;;  %v4701_v60 = vpop.f32.mrf.mxu1 }
 0x208   : > { %v4702_v61 = vadd.f32 %v4701_v60, %v4700_v54  ;;  %v4639_v63 = vpop.f32.mrf.mxu0 }
 0x209   : > { %v3358_v9 = vadd.f32 %v4638_v58, %v6308_v32  ;;  %v4703_v0 = vpop.f32.mrf.mxu1 }
 0x20a   : > { %v4640_v2 = vpop.f32.mrf.mxu0 }
 0x20b   : > { %v6371_v3 = vadd.f32 %v4702_v61, %v3358_v9  ;;  %v4641_v4 = vadd.f32 %v4640_v2, %v4639_v63  ;;  %v4704_v5 = vpop.f32.mrf.mxu1 }
 0x20c   : > { %v4705_v6 = vadd.f32 %v4704_v5, %v4703_v0  ;;  %v4642_v7 = vpop.f32.mrf.mxu0 }
 0x20d   : > { %v3361_v17 = vadd.f32 %v4641_v4, %v6310_v41  ;;  %v4706_v10 = vpop.f32.mrf.mxu1 }
 0x20e   : > { %v4643_v11 = vpop.f32.mrf.mxu0 }
 0x20f   : > { %v6374_v12 = vadd.f32 %v4705_v6, %v3361_v17  ;;  %v4644_v13 = vadd.f32 %v4643_v11, %v4642_v7  ;;  %v4707_v14 = vpop.f32.mrf.mxu1 }
 0x210   : > { %v4708_v15 = vadd.f32 %v4707_v14, %v4706_v10  ;;  %v4645_v18 = vpop.f32.mrf.mxu0 }
 0x211   : > { %v3366_v32 = vadd.f32 %v4644_v13, %v6324_v56  ;;  %v4709_v20 = vpop.f32.mrf.mxu1 }
 0x212   : > { %v4646_v21 = vpop.f32.mrf.mxu0 }
 0x213   : > { %v6377_v22 = vadd.f32 %v4708_v15, %v3366_v32  ;;  %v4647_v23 = vadd.f32 %v4646_v21, %v4645_v18  ;;  %v4710_v29 = vpop.f32.mrf.mxu1 }
 0x214   : > { %v4711_v24 = vadd.f32 %v4710_v29, %v4709_v20  ;;  %v4648_v26 = vpop.f32.mrf.mxu0 }
 0x215   : > { %v3369_v41 = vadd.f32 %v4647_v23, %v6326_v1  ;;  %v4712_v28 = vpop.f32.mrf.mxu1 }
 0x216   : > { %v4649_v30 = vpop.f32.mrf.mxu0 }
 0x217   : > { %v6380_v31 = vadd.f32 %v4711_v24, %v3369_v41  ;;  %v4650_v33 = vadd.f32 %v4649_v30, %v4648_v26  ;;  %v4713_v37 = vpop.f32.mrf.mxu1 }
 0x218   : > { %v4714_v34 = vadd.f32 %v4713_v37, %v4712_v28  ;;  %v4651_v35 = vpop.f32.mrf.mxu0 }
 0x219   : > { %v3374_v56 = vadd.f32 %v4650_v33, %v6340_v16  ;;  %v4715_v39 = vpop.f32.mrf.mxu1  ;;  %v5195_v33 = vmov 0.0  }
 0x21a   : > { %v4652_v40 = vpop.f32.mrf.mxu0  ;;  %3901 = vst [vmem:[%s6419_s6] sm:$0x1] %v5195_v33  ;;  %3902 = vst [vmem:[%s6424_s10] sm:$0x1] %v5195_v33 }
 0x21b   : > { %v6383_v42 = vadd.f32 %v4714_v34, %v3374_v56  ;;  %v4653_v43 = vadd.f32 %v4652_v40, %v4651_v35  ;;  %v4716_v51 = vpop.f32.mrf.mxu1 }
 0x21c   : > { %v4717_v44 = vadd.f32 %v4716_v51, %v4715_v39  ;;  %v4654_v46 = vpop.f32.mrf.mxu0 }
 0x21d   : > { %v3377_v1 = vadd.f32 %v4653_v43, %v6342_v25  ;;  %v4718_v48 = vpop.f32.mrf.mxu1 }
 0x21e   : > { %v4655_v49 = vpop.f32.mrf.mxu0 }
 0x21f   : > { %v6386_v50 = vadd.f32 %v4717_v44, %v3377_v1  ;;  %v4656_v52 = vadd.f32 %v4655_v49, %v4654_v46  ;;  %v4719_v59 = vpop.f32.mrf.mxu1 }
 0x220   : > { %v4720_v54 = vadd.f32 %v4719_v59, %v4718_v48  ;;  %v4657_v55 = vpop.f32.mrf.mxu0 }
 0x221   : > { %6686 = vst [vmem:[#allocation4_spill] sm:$0xff] %v6386_v50  ;;  %v3382_v16 = vadd.f32 %v4656_v52, %v6344_v36  ;;  %v4721_v58 = vpop.f32.mrf.mxu1 }
 0x222   : > { %v4658_v60 = vpop.f32.mrf.mxu0 }
 0x223   : > { %v6389_v61 = vadd.f32 %v4720_v54, %v3382_v16  ;;  %v4659_v63 = vadd.f32 %v4658_v60, %v4657_v55  ;;  %v4722_v9 = vpop.f32.mrf.mxu1 }
 0x224   : > { %v4723_v0 = vadd.f32 %v4722_v9, %v4721_v58  ;;  %v4660_v2 = vpop.f32.mrf.mxu0 }
 0x225   : > { %6687 = vst [vmem:[#allocation5_spill] sm:$0xff] %v6389_v61  ;;  %v3385_v25 = vadd.f32 %v4659_v63, %v6346_v45  ;;  %v4724_v4 = vpop.f32.mrf.mxu1 }
 0x226   : > { %v4661_v5 = vpop.f32.mrf.mxu0 }
 0x227   : > { %v6392_v6 = vadd.f32 %v4723_v0, %v3385_v25  ;;  %v4662_v7 = vadd.f32 %v4661_v5, %v4660_v2  ;;  %v4725_v17 = vpop.f32.mrf.mxu1 }
 0x228   : > { %v4726_v10 = vadd.f32 %v4725_v17, %v4724_v4  ;;  %v4663_v11 = vpop.f32.mrf.mxu0 }
 0x229   : > { %6688 = vst [vmem:[#allocation6_spill] sm:$0xff] %v6392_v6  ;;  %v3390_v36 = vadd.f32 %v4662_v7, %v6348_v53  ;;  %v4727_v13 = vpop.f32.mrf.mxu1 }
 0x22a   : > { %v4664_v14 = vpop.f32.mrf.mxu0 }
 0x22b   : > { %v6395_v15 = vadd.f32 %v4726_v10, %v3390_v36  ;;  %v4665_v18 = vadd.f32 %v4664_v14, %v4663_v11  ;;  %v4728_v32 = vpop.f32.mrf.mxu1 }
 0x22c   : > { %v4729_v20 = vadd.f32 %v4728_v32, %v4727_v13  ;;  %v6397_v45 = vpop.f32.mrf.mxu0 }
 0x22d   : > { %6689 = vst [vmem:[#allocation7_spill] sm:$0xff] %v6395_v15  ;;  %v3393_v21 = vadd.f32 %v4665_v18, %v6350_v62  ;;  %v6400_v23 = vpop.f32.mrf.mxu1 }
 0x22e   : > { %v6402_v29 = vpop.f32.mrf.mxu0 }
 0x22f   : > { %v6404_v24 = vadd.f32 %v4729_v20, %v3393_v21  ;;  %v6406_v26 = vpop.f32.mrf.mxu1 }
 0x230   : > { %v6409_v53 = vpop.f32.mrf.mxu0 }
 0x231   : > { %6690 = vst [vmem:[#allocation8_spill] sm:$0xff] %v6404_v24  ;;  %v6411_v41 = vpop.f32.mrf.mxu1 }
 0x232   : > { %v4750_v28 = vpop.f32.mrf.mxu0 }
 0x233   : > { %v6414_v30 = vpop.f32.mrf.mxu1 }
 0x234   : > { %v6426_v62 = vpop.f32.mrf.mxu0 }
 0x235   : > { %v6430_v37 = vpop.f32.mrf.mxu1 }
 0x236   : > { %v6432_v34 = vpop.f32.mrf.mxu0 }
 0x237   : > { %v6434_v35 = vpop.f32.mrf.mxu1 }
 0x238   : > { %v6436_v56 = vpop.f32.mrf.mxu0 }
 0x239   : > { %v6438_v39 = vpop.f32.mrf.mxu1 }
 0x23a   : > { %v6440_v40 = vpop.f32.mrf.mxu0 }
 0x23b   : > { %v6442_v43 = vpop.f32.mrf.mxu1 }
 0x23c   : > { %v6444_v51 = vpop.f32.mrf.mxu0 }
 0x23d   : > { %v6446_v44 = vpop.f32.mrf.mxu1 }
 0x23e   : > { %v6448_v46 = vpop.f32.mrf.mxu0 }
 0x23f   : > { %v6450_v1 = vpop.f32.mrf.mxu1 }
 0x240   : > { %v6452_v48 = vpop.f32.mrf.mxu0 }
 0x241   : > { %v6454_v49 = vpop.f32.mrf.mxu1 }
 0x242   : > { %v6456_v52 = vpop.f32.mrf.mxu0 }
 0x243   : > { %v6458_v59 = vpop.f32.mrf.mxu1 }
 0x244   : > { %v6460_v54 = vpop.f32.mrf.mxu0 }
 0x245   : > { %v6462_v55 = vpop.f32.mrf.mxu1 }
 0x246   : > { %v6464_v16 = vpop.f32.mrf.mxu0 }
 0x247   : > { %v6466_v58 = vpop.f32.mrf.mxu1 }
 0x248   : > { %v6468_v60 = vpop.f32.mrf.mxu0 }
 0x249   : > { %v6470_v63 = vpop.f32.mrf.mxu1 }
 0x24a   : > { %v6472_v9 = vpop.f32.mrf.mxu0 }
 0x24b   : > { %v6474_v0 = vpop.f32.mrf.mxu1 }
 0x24c   : > { %v6476_v2 = vpop.f32.mrf.mxu0 }
 0x24d   : > { %v6478_v25 = vpop.f32.mrf.mxu1 }
 0x24e   : > { %v6480_v4 = vpop.f32.mrf.mxu0 }
 0x24f   : > { %v6482_v5 = vpop.f32.mrf.mxu1 }
 0x250   : > { %v6484_v7 = vpop.f32.mrf.mxu0 }
 0x251   : > { %v6486_v17 = vpop.f32.mrf.mxu1 }
 0x252   : > { %v6488_v10 = vpop.f32.mrf.mxu0 }
 0x253   : > { %v6490_v11 = vpop.f32.mrf.mxu1 }
 0x254   : > { %v6492_v36 = vpop.f32.mrf.mxu0 }
 0x255   : > { %v6494_v13 = vpop.f32.mrf.mxu1 }
 0x256   : > { %6691 = vst [vmem:[#allocation9_spill] sm:$0xff] %v6494_v13  ;;  %v6496_v14 = vpop.f32.mrf.mxu0 }
 0x257   : > { %v6498_v18 = vpop.f32.mrf.mxu1 }
 0x258   : > { %6692 = vst [vmem:[#allocation10_spill] sm:$0xff] %v6498_v18  ;;  %v6500_v32 = vpop.f32.mrf.mxu0 }
 0x259   : > { %6693 = vst [vmem:[#allocation11_spill] sm:$0xff] %v6500_v32  ;;  %v6502_v20 = vpop.f32.mrf.mxu1 }
 0x25a   : > { %6694 = vst [vmem:[#allocation12_spill] sm:$0xff] %v6502_v20  ;;  %v6504_v21 = vpop.f32.mrf.mxu0 }
 0x25b   : > { %6695 = vst [vmem:[#allocation13_spill] sm:$0xff] %v6504_v21  ;;  %v6506_v33 = vpop.f32.mrf.mxu1 }
 0x25c   : > { %6696 = vst [vmem:[#allocation14_spill] sm:$0xff] %v6506_v33  ;;  %v6508_v24 = vpop.f32.mrf.mxu0 }
 0x25d   : > { %6697 = vst [vmem:[#allocation15_spill] sm:$0xff] %v6508_v24  ;;  %v6510_v15 = vpop.f32.mrf.mxu1 }
 0x25e   : > { %6698 = vst [vmem:[#allocation16_spill] sm:$0xff] %v6510_v15  ;;  %v6512_v6 = vpop.f32.mrf.mxu0  ;;  %v4748_v15 = vadd.f32 %v6402_v29, %v6397_v45 }
 0x25f   : > { %6699 = vst [vmem:[#allocation17_spill] sm:$0xff] %v6512_v6  ;;  %v6514_v61 = vpop.f32.mrf.mxu1 }
 0x260   : > { %6700 = vst [vmem:[#allocation18_spill] sm:$0xff] %v6514_v61  ;;  %v6516_v50 = vpop.f32.mrf.mxu0 }
 0x261   : > { %6701 = vst [vmem:[#allocation19_spill] sm:$0xff] %v6516_v50  ;;  %v6518_v13 = vpop.f32.mrf.mxu1 }
 0x262   : > { %6702 = vst [vmem:[#allocation20_spill] sm:$0xff] %v6518_v13  ;;  %v6520_v18 = vpop.f32.mrf.mxu0  ;;  %v4751_v13 = vadd.f32 %v4750_v28, %v6409_v53 }
 0x263   : > { %6703 = vst [vmem:[#allocation21_spill] sm:$0xff] %v6520_v18  ;;  %v6522_v32 = vpop.f32.mrf.mxu1 }
 0x264   : > { %6704 = vst [vmem:[#allocation22_spill] sm:$0xff] %v6522_v32  ;;  %v6524_v20 = vpop.f32.mrf.mxu0  ;;  %v3528_v32 = vadd.f32 %v4748_v15, %v6353_v8  ;;  %v3531_v29 = vadd.f32 %v4751_v13, %v6356_v19  ;;  %v4815_v8 = vadd.f32 %v6414_v30, %v6411_v41  ;;  %v4757_v13 = vadd.f32 %v6440_v40, %v6436_v56 }
 0x265   : > { %6705 = vst [vmem:[#allocation23_spill] sm:$0xff] %v6524_v20  ;;  %v6526_v21 = vpop.f32.mrf.mxu1 }
 0x266   : > { %6706 = vst [vmem:[#allocation24_spill] sm:$0xff] %v6526_v21  ;;  %v6528_v33 = vpop.f32.mrf.mxu0  ;;  %v3539_v56 = vadd.f32 %v4757_v13, %v6362_v38  ;;  %v4763_v38 = vadd.f32 %v6456_v52, %v6452_v48 }
 0x267   : > { %6707 = vst [vmem:[#allocation25_spill] sm:$0xff] %v6528_v33  ;;  %v6532_v6 = vpop.f32.mrf.mxu1  ;;  %v4812_v33 = vadd.f32 %v6406_v26, %v6400_v23  ;;  %v3628_v23 = vadd.f32 %v4815_v8, %v3531_v29 }
 0x268   : > { %6708 = vst [vmem:[#allocation26_spill] sm:$0xff] %v6532_v6  ;;  %v6534_v61 = vpop.f32.mrf.mxu0  ;;  %v3547_v48 = vadd.f32 %v4763_v38, %v6368_v57 }
 0x269   : > { %6709 = vst [vmem:[#allocation27_spill] sm:$0xff] %v6534_v61  ;;  %v6536_v50 = vpop.f32.mrf.mxu1  ;;  %v3625_v24 = vadd.f32 %v4812_v33, %v3528_v32 }
 0x26a   : > { %6710 = vst [vmem:[#allocation28_spill] sm:$0xff] %v6536_v50  ;;  %v6539_v18 = vpop.f32.mrf.mxu0  ;;  %v4754_v50 = vadd.f32 %v6432_v34, %v6426_v62 }
 0x26b   : > { %6711 = vst [vmem:[#allocation29_spill] sm:$0xff] %v6539_v18  ;;  %v6542_v20 = vpop.f32.mrf.mxu1 }
 0x26c   : > { %6712 = vst [vmem:[#allocation30_spill] sm:$0xff] %v6542_v20  ;;  %v4874_v21 = vpop.f32.mrf.mxu0  ;;  %v3536_v19 = vadd.f32 %v4754_v50, %v6359_v27  ;;  %v4760_v27 = vadd.f32 %v6448_v46, %v6444_v51 }
 0x26d   : > { %v4938_v45 = vpop.f32.mrf.mxu1 }
 0x26e   : > { %v4875_v6 = vpop.f32.mrf.mxu0  ;;  %v3544_v51 = vadd.f32 %v4760_v27, %v6365_v47 }
 0x26f   : > { %v4876_v61 = vadd.f32 %v4875_v6, %v4874_v21  ;;  %v4939_v53 = vpop.f32.mrf.mxu1  ;;  %v4818_v21 = vadd.f32 %v6434_v35, %v6430_v37  ;;  %v4821_v37 = vadd.f32 %v6442_v43, %v6438_v39  ;;  %v4824_v43 = vadd.f32 %v6450_v1, %v6446_v44 }
 0x270   : > { %v4877_v15 = vpop.f32.mrf.mxu0  ;;  %v4940_v20 = vadd.f32 %v4939_v53, %v4938_v45  ;;  %v4827_v44 = vadd.f32 %v6458_v59, %v6454_v49  ;;  %v4830_v49 = vadd.f32 %v6466_v58, %v6462_v55  ;;  %v4833_v55 = vadd.f32 %v6474_v0, %v6470_v63 }
 0x271   : > { %v3722_v28 = vadd.f32 %v4876_v61, %v3625_v24  ;;  %v4941_v18 = vpop.f32.mrf.mxu1  ;;  %v3633_v30 = vadd.f32 %v4818_v21, %v3536_v19  ;;  %v3641_v21 = vadd.f32 %v4824_v43, %v3544_v51  ;;  %v4836_v63 = vadd.f32 %v6482_v5, %v6478_v25 }
 0x272   : > { %v4878_v26 = vpop.f32.mrf.mxu0  ;;  %v3644_v57 = vadd.f32 %v4827_v44, %v3547_v48  ;;  %v4839_v25 = vadd.f32 %v6490_v11, %v6486_v17  ;;  %v6715_v17 = vld [vmem:[#allocation9_spill] sm:$0xff]  ;;  %v6716_v11 = vld [vmem:[#allocation10_spill] sm:$0xff] }
 0x273   : > { %v3819_v32 = vadd.f32 %v4940_v20, %v3722_v28  ;;  %v4879_v62 = vadd.f32 %v4878_v26, %v4877_v15  ;;  %v4942_v6 = vpop.f32.mrf.mxu1  ;;  %v3636_v28 = vadd.f32 %v4821_v37, %v3539_v56  ;;  %v4769_v37 = vadd.f32 %v6472_v9, %v6468_v60 }
 0x274   : > { %v4880_v34 = vpop.f32.mrf.mxu0  ;;  %v4943_v24 = vadd.f32 %v4942_v6, %v4941_v18 }
 0x275   : > { %3881 = vst [vmem:[%s6558_s15] sm:$0xff] %v3819_v32  ;;  %v3725_v61 = vadd.f32 %v4879_v62, %v3628_v23  ;;  %v4944_v41 = vpop.f32.mrf.mxu1  ;;  %v3928_v35 = vmul.f32 %v3819_v32, %v3819_v32  ;;  %v3555_v60 = vadd.f32 %v4769_v37, %v6374_v12 }
 0x276   : > { %v4881_v50 = vpop.f32.mrf.mxu0 }
 0x277   : > { %v3822_v40 = vadd.f32 %v4943_v24, %v3725_v61  ;;  %v4882_v20 = vadd.f32 %v4881_v50, %v4880_v34  ;;  %v4945_v33 = vpop.f32.mrf.mxu1  ;;  %v4766_v61 = vadd.f32 %v6464_v16, %v6460_v54 }
 0x278   : > { %v4883_v45 = vpop.f32.mrf.mxu0  ;;  %v4946_v8 = vadd.f32 %v4945_v33, %v4944_v41 }
 0x279   : > { %3882 = vst [vmem:[%s6558_s15 + $0x8] sm:$0xff] %v3822_v40  ;;  %v3904_v29 = vadd.f32 %v3822_v40, %v3819_v32  ;;  %v3929_v18 = vmul.f32 %v3822_v40, %v3822_v40  ;;  %v3730_v53 = vadd.f32 %v4882_v20, %v3633_v30  ;;  %v4947_v15 = vpop.f32.mrf.mxu1  ;;  %v3552_v16 = vadd.f32 %v4766_v61, %v6371_v3 }
 0x27a   : > { %v4884_v46 = vpop.f32.mrf.mxu0  ;;  %v4772_v3 = vadd.f32 %v6480_v4, %v6476_v2 }
 0x27b   : > { %v3944_v23 = vadd.f32 %v3929_v18, %v3928_v35  ;;  %v3827_v26 = vadd.f32 %v4946_v8, %v3730_v53  ;;  %v4885_v19 = vadd.f32 %v4884_v46, %v4883_v45  ;;  %v4948_v39 = vpop.f32.mrf.mxu1  ;;  %v3649_v46 = vadd.f32 %v4830_v49, %v3552_v16 }
 0x27c   : > { %v4886_v13 = vpop.f32.mrf.mxu0  ;;  %v4949_v34 = vadd.f32 %v4948_v39, %v4947_v15  ;;  %v3560_v2 = vadd.f32 %v4772_v3, %v6377_v22  ;;  %v6717_v3 = vld [vmem:[#allocation4_spill] sm:$0xff] }
 0x27d   : > { %3883 = vst [vmem:[%s6558_s15 + $0x10] sm:$0xff] %v3827_v26  ;;  %v3905_v32 = vadd.f32 %v3904_v29, %v3827_v26  ;;  %v3930_v62 = vmul.f32 %v3827_v26, %v3827_v26  ;;  %v3733_v6 = vadd.f32 %v4885_v19, %v3636_v28  ;;  %v4950_v47 = vpop.f32.mrf.mxu1 }
 0x27e   : > { %v4887_v52 = vpop.f32.mrf.mxu0  ;;  %v3657_v22 = vadd.f32 %v4836_v63, %v3560_v2 }
 0x27f   : > { %v3945_v24 = vadd.f32 %v3944_v23, %v3930_v62  ;;  %v3830_v41 = vadd.f32 %v4949_v34, %v3733_v6  ;;  %v4888_v27 = vadd.f32 %v4887_v52, %v4886_v13  ;;  %v4951_v50 = vpop.f32.mrf.mxu1  ;;  %v3652_v62 = vadd.f32 %v4833_v55, %v3555_v60 }
 0x280   : > { %v4889_v1 = vpop.f32.mrf.mxu0  ;;  %v4952_v20 = vadd.f32 %v4951_v50, %v4950_v47  ;;  %v4775_v6 = vadd.f32 %v6488_v10, %v6484_v7  ;;  %v4778_v50 = vadd.f32 %v6496_v14, %v6492_v36  ;;  %v6713_v14 = vld [vmem:[#allocation11_spill] sm:$0xff] }
 0x281   : > { %3884 = vst [vmem:[%s6558_s15 + $0x18] sm:$0xff] %v3830_v41  ;;  %v3906_v30 = vadd.f32 %v3905_v32, %v3830_v41  ;;  %v3931_v56 = vmul.f32 %v3830_v41, %v3830_v41  ;;  %v3738_v40 = vadd.f32 %v4888_v27, %v3641_v21  ;;  %v4953_v33 = vpop.f32.mrf.mxu1 }
 0x282   : > { %v4890_v54 = vpop.f32.mrf.mxu0  ;;  %v3563_v10 = vadd.f32 %v4775_v6, %v6380_v31  ;;  %v3568_v36 = vadd.f32 %v4778_v50, %v6383_v42  ;;  %v6725_v50 = vld [vmem:[#allocation16_spill] sm:$0xff] }
 0x283   : > { %v3946_v35 = vadd.f32 %v3945_v24, %v3931_v56  ;;  %v3835_v45 = vadd.f32 %v4952_v20, %v3738_v40  ;;  %v4891_v29 = vadd.f32 %v4890_v54, %v4889_v1  ;;  %v4954_v18 = vpop.f32.mrf.mxu1  ;;  %v6714_v54 = vld [vmem:[#allocation13_spill] sm:$0xff] }
 0x284   : > { %v4892_v59 = vpop.f32.mrf.mxu0  ;;  %v4955_v51 = vadd.f32 %v4954_v18, %v4953_v33  ;;  %v4781_v31 = vadd.f32 %v6714_v54, %v6713_v14 }
 0x285   : > { %3885 = vst [vmem:[%s6558_s15 + $0x20] sm:$0xff] %v3835_v45  ;;  %v3907_v53 = vadd.f32 %v3906_v30, %v3835_v45  ;;  %v3932_v8 = vmul.f32 %v3835_v45, %v3835_v45  ;;  %v3741_v15 = vadd.f32 %v4891_v29, %v3644_v57  ;;  %v4956_v38 = vpop.f32.mrf.mxu1 }
 0x286   : > { %v4893_v9 = vpop.f32.mrf.mxu0 }
 0x287   : > { %v3947_v28 = vadd.f32 %v3946_v35, %v3932_v8  ;;  %v3838_v23 = vadd.f32 %v4955_v51, %v3741_v15  ;;  %v4894_v26 = vadd.f32 %v4893_v9, %v4892_v59  ;;  %v4957_v19 = vpop.f32.mrf.mxu1  ;;  %v3660_v35 = vadd.f32 %v4839_v25, %v3563_v10 }
 0x288   : > { %v4895_v58 = vpop.f32.mrf.mxu0  ;;  %v4958_v32 = vadd.f32 %v4957_v19, %v4956_v38  ;;  %v4842_v59 = vadd.f32 %v6716_v11, %v6715_v17  ;;  %v3571_v9 = vadd.f32 %v4781_v31, %v6717_v3  ;;  %v6734_v3 = vld [vmem:[#allocation29_spill] sm:$0xff] }
 0x289   : > { %3886 = vst [vmem:[%s6558_s15 + $0x28] sm:$0xff] %v3838_v23  ;;  %v3908_v39 = vadd.f32 %v3907_v53, %v3838_v23  ;;  %v3933_v43 = vmul.f32 %v3838_v23, %v3838_v23  ;;  %v3746_v13 = vadd.f32 %v4894_v26, %v3649_v46  ;;  %v4959_v12 = vpop.f32.mrf.mxu1  ;;  %v6719_v23 = vld [vmem:[#allocation17_spill] sm:$0xff] }
 0x28a   : > { %v4896_v4 = vpop.f32.mrf.mxu0  ;;  %v3665_v60 = vadd.f32 %v4842_v59, %v3568_v36 }
 0x28b   : > { %v3948_v34 = vadd.f32 %v3947_v28, %v3933_v43  ;;  %v3843_v47 = vadd.f32 %v4958_v32, %v3746_v13  ;;  %v4897_v21 = vadd.f32 %v4896_v4, %v4895_v58  ;;  %v4960_v48 = vpop.f32.mrf.mxu1  ;;  %v6718_v28 = vld [vmem:[#allocation15_spill] sm:$0xff]  ;;  %v6720_v43 = vld [vmem:[#allocation12_spill] sm:$0xff]  ;;  %v6721_v13 = vld [vmem:[#allocation14_spill] sm:$0xff] }
 0x28c   : > { %v4898_v0 = vpop.f32.mrf.mxu0  ;;  %v4961_v41 = vadd.f32 %v4960_v48, %v4959_v12  ;;  %v4784_v26 = vadd.f32 %v6719_v23, %v6718_v28  ;;  %v4845_v32 = vadd.f32 %v6721_v13, %v6720_v43  ;;  %v6723_v48 = vld [vmem:[#allocation21_spill] sm:$0xff] }
 0x28d   : > { %3887 = vst [vmem:[%s6558_s15 + $0x30] sm:$0xff] %v3843_v47  ;;  %v3909_v52 = vadd.f32 %v3908_v39, %v3843_v47  ;;  %v3934_v61 = vmul.f32 %v3843_v47, %v3843_v47  ;;  %v3749_v24 = vadd.f32 %v4897_v21, %v3652_v62  ;;  %v4962_v27 = vpop.f32.mrf.mxu1  ;;  %v6722_v21 = vld [vmem:[#allocation19_spill] sm:$0xff] }
 0x28e   : > { %v4899_v7 = vpop.f32.mrf.mxu0  ;;  %v3668_v47 = vadd.f32 %v4845_v32, %v3571_v9  ;;  %v4787_v63 = vadd.f32 %v6723_v48, %v6722_v21 }
 0x28f   : > { %v3949_v44 = vadd.f32 %v3948_v34, %v3934_v61  ;;  %v3846_v1 = vadd.f32 %v4961_v41, %v3749_v24  ;;  %v4900_v30 = vadd.f32 %v4899_v7, %v4898_v0  ;;  %v4963_v56 = vpop.f32.mrf.mxu1  ;;  %v6726_v7 = vld [vmem:[#allocation18_spill] sm:$0xff] }
 0x290   : > { %v4901_v5 = vpop.f32.mrf.mxu0  ;;  %v4964_v57 = vadd.f32 %v4963_v56, %v4962_v27  ;;  %v4848_v10 = vadd.f32 %v6726_v7, %v6725_v50 }
 0x291   : > { %3888 = vst [vmem:[%s6558_s15 + $0x38] sm:$0xff] %v3846_v1  ;;  %v3910_v40 = vadd.f32 %v3909_v52, %v3846_v1  ;;  %v3935_v20 = vmul.f32 %v3846_v1, %v3846_v1  ;;  %v3754_v33 = vadd.f32 %v4900_v30, %v3657_v22  ;;  %v4965_v37 = vpop.f32.mrf.mxu1  ;;  %v6724_v52 = vld [vmem:[#allocation5_spill] sm:$0xff] }
 0x292   : > { %v4902_v16 = vpop.f32.mrf.mxu0  ;;  %v3576_v61 = vadd.f32 %v4784_v26, %v6724_v52  ;;  %v6739_v52 = vld [vmem:[#allocation30_spill] sm:$0xff] }
 0x293   : > { %v3950_v45 = vadd.f32 %v3949_v44, %v3935_v20  ;;  %v3851_v29 = vadd.f32 %v4964_v57, %v3754_v33  ;;  %v4903_v18 = vadd.f32 %v4902_v16, %v4901_v5  ;;  %v4966_v49 = vpop.f32.mrf.mxu1  ;;  %v6728_v33 = vld [vmem:[#allocation23_spill] sm:$0xff]  ;;  %v6729_v57 = vld [vmem:[#allocation25_spill] sm:$0xff] }
 0x294   : > { %v4904_v53 = vpop.f32.mrf.mxu0  ;;  %v4967_v38 = vadd.f32 %v4966_v49, %v4965_v37  ;;  %v4790_v37 = vadd.f32 %v6729_v57, %v6728_v33  ;;  %v3673_v14 = vadd.f32 %v4848_v10, %v3576_v61 }
 0x295   : > { %3889 = vst [vmem:[%s6558_s15 + $0x40] sm:$0xff] %v3851_v29  ;;  %v3911_v8 = vadd.f32 %v3910_v40, %v3851_v29  ;;  %v3936_v15 = vmul.f32 %v3851_v29, %v3851_v29  ;;  %v3757_v51 = vadd.f32 %v4903_v18, %v3660_v35  ;;  %v4968_v42 = vpop.f32.mrf.mxu1  ;;  %v6727_v40 = vld [vmem:[#allocation6_spill] sm:$0xff] }
 0x296   : > { %v4905_v46 = vpop.f32.mrf.mxu0  ;;  %v3579_v20 = vadd.f32 %v4787_v63, %v6727_v40  ;;  %v6731_v29 = vld [vmem:[#allocation22_spill] sm:$0xff] }
 0x297   : > { %v3951_v19 = vadd.f32 %v3950_v45, %v3936_v15  ;;  %v3854_v55 = vadd.f32 %v4967_v38, %v3757_v51  ;;  %v4906_v58 = vadd.f32 %v4905_v46, %v4904_v53  ;;  %v4969_v39 = vpop.f32.mrf.mxu1  ;;  %v6730_v45 = vld [vmem:[#allocation20_spill] sm:$0xff]  ;;  %v6732_v51 = vld [vmem:[#allocation7_spill] sm:$0xff] }
 0x298   : > { %v4907_v12 = vpop.f32.mrf.mxu0  ;;  %v4970_v6 = vadd.f32 %v4969_v39, %v4968_v42  ;;  %v4851_v18 = vadd.f32 %v6731_v29, %v6730_v45  ;;  %v3584_v38 = vadd.f32 %v4790_v37, %v6732_v51 }
 0x299   : > { %3890 = vst [vmem:[%s6558_s15 + $0x48] sm:$0xff] %v3854_v55  ;;  %v3912_v62 = vadd.f32 %v3911_v8, %v3854_v55  ;;  %v3937_v2 = vmul.f32 %v3854_v55, %v3854_v55  ;;  %v3762_v4 = vadd.f32 %v4906_v58, %v3665_v60  ;;  %v4971_v34 = vpop.f32.mrf.mxu1  ;;  %v6733_v60 = vld [vmem:[#allocation27_spill] sm:$0xff]  ;;  %v6736_v55 = vld [vmem:[#allocation26_spill] sm:$0xff] }
 0x29a   : > { %v4908_v0 = vpop.f32.mrf.mxu0  ;;  %v3676_v15 = vadd.f32 %v4851_v18, %v3579_v20  ;;  %v4793_v9 = vadd.f32 %v6734_v3, %v6733_v60  ;;  %v4043_v60 = vld [vmem:[%s6558_s15] sm:$0xff] (%p5256_p6)  ;;  %v4045_v3 = vld [vmem:[%s6558_s15 + $0x8] sm:$0xff] (%p5256_p6) }
 0x29b   : > { %v3952_v24 = vadd.f32 %v3951_v19, %v3937_v2  ;;  %v3859_v41 = vadd.f32 %v4970_v6, %v3762_v4  ;;  %v4909_v27 = vadd.f32 %v4908_v0, %v4907_v12  ;;  %v4972_v22 = vpop.f32.mrf.mxu1  ;;  %v6735_v19 = vld [vmem:[#allocation24_spill] sm:$0xff]  ;;  %4044 = vst [vmem:[%s3984_s13] sm:$0xff] (%p5256_p6), %v4043_v60  ;;  %4046 = vst [vmem:[%s3984_s13 + $0x10] sm:$0xff] (%p5256_p6), %v4045_v3 }
 0x29c   : > { %v4910_v44 = vpop.f32.mrf.mxu0  ;;  %v4973_v25 = vadd.f32 %v4972_v22, %v4971_v34  ;;  %v4854_v58 = vadd.f32 %v6736_v55, %v6735_v19  ;;  %v6737_v6 = vld [vmem:[#allocation8_spill] sm:$0xff]  ;;  %v4057_v19 = vld [vmem:[%s6558_s15 + $0x38] sm:$0xff] (%p5256_p6) }
 0x29d   : > { %3891 = vst [vmem:[%s6558_s15 + $0x50] sm:$0xff] %v3859_v41  ;;  %v3913_v1 = vadd.f32 %v3912_v62, %v3859_v41  ;;  %v3938_v30 = vmul.f32 %v3859_v41, %v3859_v41  ;;  %v3765_v56 = vadd.f32 %v4909_v27, %v3668_v47  ;;  %v4974_v5 = vpop.f32.mrf.mxu1  ;;  %v3587_v34 = vadd.f32 %v4793_v9, %v6737_v6  ;;  %v6738_v0 = vld [vmem:[#allocation28_spill] sm:$0xff]  ;;  %v4047_v9 = vld [vmem:[%s6558_s15 + $0x10] sm:$0xff] (%p5256_p6) }
 0x29e   : > { %v4911_v36 = vpop.f32.mrf.mxu0  ;;  %v3681_v2 = vadd.f32 %v4854_v58, %v3584_v38  ;;  %v4857_v61 = vadd.f32 %v6739_v52, %v6738_v0  ;;  %4048 = vst [vmem:[%s3984_s13 + $0x20] sm:$0xff] (%p5256_p6), %v4047_v9  ;;  %v4059_v55 = vld [vmem:[%s6558_s15 + $0x40] sm:$0xff] (%p5256_p6)  ;;  %4058 = vst [vmem:[%s3984_s13 + $0x70] sm:$0xff] (%p5256_p6), %v4057_v19 }
 0x29f   : > { %v3953_v54 = vadd.f32 %v3952_v24, %v3938_v30  ;;  %v3862_v31 = vadd.f32 %v4973_v25, %v3765_v56  ;;  %v4912_v16 = vadd.f32 %v4911_v36, %v4910_v44  ;;  %v4975_v35 = vpop.f32.mrf.mxu1  ;;  %4060 = vst [vmem:[%s3984_s13 + $0x80] sm:$0xff] (%p5256_p6), %v4059_v55 }
 0x2a0   : > { %v4913_v49 = vpop.f32.mrf.mxu0  ;;  %v4976_v53 = vadd.f32 %v4975_v35, %v4974_v5  ;;  %v3684_v44 = vadd.f32 %v4857_v61, %v3587_v34  ;;  %v4061_v58 = vld [vmem:[%s6558_s15 + $0x48] sm:$0xff] (%p5256_p6) }
 0x2a1   : > { %3892 = vst [vmem:[%s6558_s15 + $0x58] sm:$0xff] %v3862_v31  ;;  %v3914_v17 = vadd.f32 %v3913_v1, %v3862_v31  ;;  %v3939_v11 = vmul.f32 %v3862_v31, %v3862_v31  ;;  %v3770_v59 = vadd.f32 %v4912_v16, %v3673_v14  ;;  %v4977_v8 = vpop.f32.mrf.mxu1  ;;  %4062 = vst [vmem:[%s3984_s13 + $0x90] sm:$0xff] (%p5256_p6), %v4061_v58 }
 0x2a2   : > { %v4914_v42 = vpop.f32.mrf.mxu0 }
 0x2a3   : > { %v3954_v46 = vadd.f32 %v3953_v54, %v3939_v11  ;;  %v3867_v28 = vadd.f32 %v4976_v53, %v3770_v59  ;;  %v4915_v23 = vadd.f32 %v4914_v42, %v4913_v49  ;;  %v4978_v26 = vpop.f32.mrf.mxu1  ;;  %v3903_v59 = vld [vmem:[%s6419_s6] sm:$0x1] }
 0x2a4   : > { %v4916_v39 = vpop.f32.mrf.mxu0  ;;  %v4979_v12 = vadd.f32 %v4978_v26, %v4977_v8  ;;  %v4055_v26 = vld [vmem:[%s6558_s15 + $0x30] sm:$0xff] (%p5256_p6) }
 0x2a5   : > { %3893 = vst [vmem:[%s6558_s15 + $0x60] sm:$0xff] %v3867_v28  ;;  %v3915_v43 = vadd.f32 %v3914_v17, %v3867_v28  ;;  %v3940_v13 = vmul.f32 %v3867_v28, %v3867_v28  ;;  %v3773_v32 = vadd.f32 %v4915_v23, %v3676_v15  ;;  %v4980_v62 = vpop.f32.mrf.mxu1  ;;  %v3927_v15 = vld [vmem:[%s6424_s10] sm:$0x1]  ;;  %v4053_v23 = vld [vmem:[%s6558_s15 + $0x28] sm:$0xff] (%p5256_p6)  ;;  %4056 = vst [vmem:[%s3984_s13 + $0x60] sm:$0xff] (%p5256_p6), %v4055_v26 }
 0x2a6   : > { %v4917_v4 = vpop.f32.mrf.mxu0  ;;  %v4051_v28 = vld [vmem:[%s6558_s15 + $0x20] sm:$0xff] (%p5256_p6)  ;;  %4054 = vst [vmem:[%s3984_s13 + $0x50] sm:$0xff] (%p5256_p6), %v4053_v23 }
 0x2a7   : > { %v3955_v47 = vadd.f32 %v3954_v46, %v3940_v13  ;;  %v3870_v21 = vadd.f32 %v4979_v12, %v3773_v32  ;;  %v4918_v48 = vadd.f32 %v4917_v4, %v4916_v39  ;;  %v4981_v63 = vpop.f32.mrf.mxu1  ;;  %v4049_v46 = vld [vmem:[%s6558_s15 + $0x18] sm:$0xff] (%p5256_p6)  ;;  %4052 = vst [vmem:[%s3984_s13 + $0x40] sm:$0xff] (%p5256_p6), %v4051_v28  ;;  %v4063_v39 = vld [vmem:[%s6558_s15 + $0x50] sm:$0xff] (%p5256_p6) }
 0x2a8   : > { %v4919_v24 = vpop.f32.mrf.mxu0  ;;  %v4982_v50 = vadd.f32 %v4981_v63, %v4980_v62  ;;  %4050 = vst [vmem:[%s3984_s13 + $0x30] sm:$0xff] (%p5256_p6), %v4049_v46  ;;  %4064 = vst [vmem:[%s3984_s13 + $0xa0] sm:$0xff] (%p5256_p6), %v4063_v39 }
 0x2a9   : > { %3894 = vst [vmem:[%s6558_s15 + $0x68] sm:$0xff] %v3870_v21  ;;  %v3916_v41 = vadd.f32 %v3915_v43, %v3870_v21  ;;  %v3941_v27 = vmul.f32 %v3870_v21, %v3870_v21  ;;  %v3778_v22 = vadd.f32 %v4918_v48, %v3681_v2  ;;  %v4983_v7 = vpop.f32.mrf.mxu1  ;;  %v4065_v43 = vld [vmem:[%s6558_s15 + $0x58] sm:$0xff] (%p5256_p6) }
 0x2aa   : > { %v4920_v10 = vpop.f32.mrf.mxu0  ;;  %4066 = vst [vmem:[%s3984_s13 + $0xb0] sm:$0xff] (%p5256_p6), %v4065_v43 }
 0x2ab   : > { %v3956_v1 = vadd.f32 %v3955_v47, %v3941_v27  ;;  %v3875_v30 = vadd.f32 %v4982_v50, %v3778_v22  ;;  %v4921_v56 = vadd.f32 %v4920_v10, %v4919_v24  ;;  %v4984_v25 = vpop.f32.mrf.mxu1 }
 0x2ac   : > { %v4985_v33 = vadd.f32 %v4984_v25, %v4983_v7  ;;  %v4067_v13 = vld [vmem:[%s6558_s15 + $0x60] sm:$0xff] (%p5256_p6) }
 0x2ad   : > { %3895 = vst [vmem:[%s6558_s15 + $0x70] sm:$0xff] %v3875_v30  ;;  %v3917_v5 = vadd.f32 %v3916_v41, %v3875_v30  ;;  %v3942_v40 = vmul.f32 %v3875_v30, %v3875_v30  ;;  %v3781_v20 = vadd.f32 %v4921_v56, %v3684_v44  ;;  %4068 = vst [vmem:[%s3984_s13 + $0xc0] sm:$0xff] (%p5256_p6), %v4067_v13 }
 0x2af   : > { %v3957_v57 = vadd.f32 %v3956_v1, %v3942_v40  ;;  %v3878_v37 = vadd.f32 %v4985_v33, %v3781_v20 }
 0x2b0   : > { %v4069_v32 = vld [vmem:[%s6558_s15 + $0x68] sm:$0xff] (%p5256_p6) }
 0x2b1   : > { %3896 = vst [vmem:[%s6558_s15 + $0x78] sm:$0xff] %v3878_v37  ;;  %v3918_v36 = vadd.f32 %v3917_v5, %v3878_v37  ;;  %v3943_v14 = vmul.f32 %v3878_v37, %v3878_v37  ;;  %4070 = vst [vmem:[%s3984_s13 + $0xd0] sm:$0xff] (%p5256_p6), %v4069_v32 }
 0x2b3   : > { %v3919_v54 = vrot.slane %v3918_v36, 4  ;;  %v3958_v31 = vadd.f32 %v3957_v57, %v3943_v14 }
 0x2b4   : > { %v4071_v12 = vld [vmem:[%s6558_s15 + $0x70] sm:$0xff] (%p5256_p6) }
 0x2b5   : > { %v3920_v16 = vadd.f32 %v3919_v54, %v3918_v36  ;;  %v3959_v35 = vrot.slane %v3958_v31, 4  ;;  %4072 = vst [vmem:[%s3984_s13 + $0xe0] sm:$0xff] (%p5256_p6), %v4071_v12 }
 0x2b7   : > { %v3921_v45 = vrot.slane %v3920_v16, 2  ;;  %v3960_v29 = vadd.f32 %v3959_v35, %v3958_v31 }
 0x2b8   : > { %v4073_v62 = vld [vmem:[%s6558_s15 + $0x78] sm:$0xff] (%p5256_p6) }
 0x2b9   : > { %v3922_v18 = vadd.f32 %v3921_v45, %v3920_v16  ;;  %v3961_v49 = vrot.slane %v3960_v29, 2  ;;  %4074 = vst [vmem:[%s3984_s13 + $0xf0] sm:$0xff] (%p5256_p6), %v4073_v62 }
 0x2bb   : > { %v3923_v17 = vrot.slane %v3922_v18, 1  ;;  %v3962_v11 = vadd.f32 %v3961_v49, %v3960_v29 }
 0x2bd   : > { %v3924_v53 = vadd.f32 %v3923_v17, %v3922_v18  ;;  %v3963_v8 = vrot.slane %v3962_v11, 1 }
 0x2bf   : > { %v3925_v51 = vadd.f32 %v3924_v53, %v3903_v59  ;;  %v3964_v38 = vadd.f32 %v3963_v8, %v3962_v11  ;;  %3979 = sbr.rel (!%p5256_p6) target bundleno = 708 (0x2c4), region = 77 }
 0x2c1   : > { %3926 = vst [vmem:[%s6419_s6] sm:$0x1] %v3925_v51  ;;  %v3965_v42 = vadd.f32 %v3964_v38, %v3927_v15 }
 0x2c3   : > { %3966 = vst [vmem:[%s6424_s10] sm:$0x1] %v3965_v42 }
 0x2c4 PF: > { %s15_s19 = sadd.s32 1, %s5193_s19   ;;  %s6740_s15 = smov %s5181_s16 }
 0x2c5   : > { %p12_p12 = scmp.ge.s32.totalorder %s15_s19, 4   ;;  %s6741_s16 = smov %s5261_s25 }
 0x2c6   : > { %s6742_s17 = smov %s5189_s18  ;;  %s6743_s18 = smov %s6745_s20 }
 0x2c7   :  { %14 = sbr.rel (!%p12_p12) target bundleno = 3 (0x3), region = 173 }

// kernel: discriminator_forward.13
= control target key start
LH: loop header
LB: loop body
LE: loop exit
PB: predicated region body
PF: predicated region fallthrough
CT: control target
= control target key end

     0   :  { %s605_s12 = smov 0   ;;  %s607_s13 = smov 0   ;;  %s685_s0 = inlined_call_operand.vmem [shape: f32[32,512], index: 0, kind: input, shape index: {}]   ;;  %s686_s1 = inlined_call_operand.vmem [shape: f32[1,512], index: 1, kind: input, shape index: {}]   ;;  %s687_s2 = inlined_call_operand.vmem [shape: f32[1,512], index: 2, kind: input, shape index: {}]   ;;  %s688_s3 = inlined_call_operand.vmem [shape: bf16[32,512], index: 3, kind: output, shape index: {}]  }
   0x1   :  { %s609_s14 = smov 0   ;;  %s611_s15 = smov 0  }
   0x2   :  { %s613_s16 = smov 0  }
   0x3 LB: > { %s22_s17 = sadd.s32 1, %s579_s15  ;;  %s471_s18 = sadd.s32 4294967295, %s583_s16   ;;  %s583_s16 = sphi %s613_s16, %s13_s16   ;;  %s579_s15 = sphi %s611_s15, %s693_s15   ;;  %s575_s14 = sphi %s609_s14, %s692_s14   ;;  %s571_s13 = sphi %s607_s13, %s691_s13   ;;  %s567_s12 = sphi %s605_s12, %s690_s12  }
   0x4   : > { %p23_p0 = scmp.ge.s32.totalorder %s22_s17, 4  ;;  %p41_p1 = scmp.ne.s32.totalorder %s571_s13, %s567_s12 }
   0x5   : > { %p42_p2 = scmp.eq.s32.totalorder %s583_s16, 0  ;;  %p125_p4 = scmp.eq.s32.totalorder %s471_s18, 3 }
   0x6   : > { %s695_s17 = smov (%p23_p0, %s22_s17), 0  ;;  %s34_s20 = sadd.s32 1, %s571_s13 }
   0x7   : > { %p43_p3 = por %p42_p2, %p41_p1  ;;  %s30_s19 = ssub.s32 %s579_s15, %s695_s17 }
   0x8   : > { %p32_p5 = scmp.eq.s32.totalorder %s30_s19, 0  ;;  %p640_p6 = por %p125_p4, %p41_p1 }
   0x9   : > { %p474_p7 = scmp.ge.s32.totalorder %s583_s16, 4 }
   0xa   : > { %s645_s22 = scalar_select %p32_p5, %s571_s13, %s34_s20  }
   0xb   : > { %147 = sbr.rel (%p474_p7) target bundleno = 24 (0x18), region = 16 }
  0x10   : > { %150 = sbr.rel (!%p43_p3) target bundleno = 24 (0x18), region = 20  ;;  %s152_s23 = sand.u32 (%p43_p3), 1, %s571_s13  }
  0x11   : > { %s476_s24 = sshll.u32 (%p43_p3), %s579_s15, 3  ;;  %s475_s25 = sshll.u32 (%p43_p3), %s152_s23, 5 }
  0x12   : > { %s159_s28 = scalar_lea.vmem (%p43_p3), %s685_s0, %s476_s24  ;;  %s154_s29 = scalar_lea.vmem (%p43_p3), [#allocation2], %s475_s25 }
  0x13   : > { %v194_v0 = vld [vmem:[%s159_s28] sm:$0xff] (%p43_p3) }
  0x14   : > { %v196_v1 = vld [vmem:[%s159_s28 + $0x20] sm:$0xff] (%p43_p3)  ;;  %195 = vst [vmem:[%s154_s29] sm:$0xff] (%p43_p3), %v194_v0 }
  0x15   : > { %v198_v2 = vld [vmem:[%s159_s28 + $0x40] sm:$0xff]  ;;  %197 = vst [vmem:[%s154_s29 + $0x8] sm:$0xff] %v196_v1 }
  0x16   : > { %199 = vst [vmem:[%s154_s29 + $0x10] sm:$0xff] %v198_v2  ;;  %v200_v3 = vld [vmem:[%s159_s28 + $0x60] sm:$0xff] }
  0x17   : > { %201 = vst [vmem:[%s154_s29 + $0x18] sm:$0xff] %v200_v3 }
  0x18 PF: > { %p477_p8 = scmp.ge.s32.totalorder %s583_s16, 1  ;;  %p218_p9 = scmp.lt.s32.totalorder %s583_s16, 5 }
  0x1a   : > { %p219_p10 = pnand %p477_p8, %p218_p9 }
  0x1b   : > { %s225_s30 = sand.u32 (!%p219_p10), 1, %s567_s12   ;;  %p254_p11 = scmp.lt.s32.totalorder (!%p219_p10), %s575_s14, 3 }
  0x1c   : > { %222 = sbr.rel (%p219_p10) target bundleno = 57 (0x39), region = 66  ;;  %s478_s4 = sshll.u32 (!%p219_p10), %s225_s30, 5 }
  0x1d   : > { %s227_s6 = scalar_lea.vmem (!%p219_p10), [#allocation2], %s478_s4  ;;  %s479_s12 = sshll.u32 (!%p219_p10), %s225_s30, 4 }
  0x1e   : > { %s252_s19 = scalar_lea.vmem (!%p219_p10), [#allocation3], %s479_s12 }
  0x21   : > { %s255_s5 = scalar_select %p254_p11, %s575_s14, 3  ;;  %v261_v4 = vld [vmem:[%s227_s6] sm:$0xff]  ;;  %v262_v5 = vld [vmem:[%s227_s6 + $0x8] sm:$0xff]  ;;  %v263_v6 = vld [vmem:[%s227_s6 + $0x10] sm:$0xff] }
  0x22   : > { %v264_v7 = vld [vmem:[%s227_s6 + $0x18] sm:$0xff]  ;;  %s487_s20 = sshll.u32 (%p640_p6), %s575_s14, 2 }
  0x23   : > { %s256_s9 = scalar_lea.vmem %s686_s1, %s255_s5  ;;  %s259_s18 = scalar_lea.vmem %s687_s2, %s255_s5 }
  0x24   : > { %v480_v8 = vld [vmem:[%s256_s9] ss:$0 sm:$0xff]  ;;  %s330_s25 = scalar_lea.vmem (%p640_p6), %s688_s3, %s487_s20 }
  0x25   : > { %v481_v9 = vld [vmem:[%s259_s18] ss:$0 sm:$0xff]  ;;  %v272_v10 = vmul.f32 %v480_v8, %v261_v4  ;;  %v273_v11 = vmul.f32 %v480_v8, %v262_v5  ;;  %v274_v12 = vmul.f32 %v480_v8, %v263_v6  ;;  %v275_v13 = vmul.f32 %v480_v8, %v264_v7 }
  0x27   : > { %v283_v14 = vadd.f32 %v481_v9, %v272_v10  ;;  %v284_v15 = vadd.f32 %v481_v9, %v273_v11  ;;  %v285_v16 = vadd.f32 %v481_v9, %v274_v12  ;;  %v286_v17 = vadd.f32 %v481_v9, %v275_v13 }
  0x29   : > { %vm287_vm0 = vcmp.ge.f32.partialorder %v283_v14, 0.0  ;;  %vm288_vm1 = vcmp.ge.f32.partialorder %v284_v15, 0.0  ;;  %v291_v18 = vmul.f32 0.2, %v283_v14  ;;  %v292_v19 = vmul.f32 0.2, %v284_v15 }
  0x2a   : > { %vm289_vm2 = vcmp.ge.f32.partialorder %v285_v16, 0.0  ;;  %vm290_vm3 = vcmp.ge.f32.partialorder %v286_v17, 0.0  ;;  %v293_v20 = vmul.f32 0.2, %v285_v16  ;;  %v294_v21 = vmul.f32 0.2, %v286_v17 }
  0x2b   : > { %v295_v22 = vsel %vm287_vm0, %v283_v14, %v291_v18  ;;  %v296_v23 = vsel %vm288_vm1, %v284_v15, %v292_v19  ;;  %325 = sbr.rel (!%p640_p6) target bundleno = 57 (0x39), region = 74 }
  0x2c   : > { %v497_v24 = vpack.c.bf16 %v296_v23, %v295_v22  ;;  %v297_v25 = vsel %vm289_vm2, %v285_v16, %v293_v20  ;;  %v298_v26 = vsel %vm290_vm3, %v286_v17, %v294_v21 }
  0x2d   : > { %v502_v27 = vpack.c.bf16 %v298_v26, %v297_v25 }
  0x2e   : > { %498 = vst [vmem:[%s252_s19] sm:$0xff] %v497_v24  }
  0x2f   : > { %504 = vst [vmem:[%s252_s19 + $0x8] sm:$0xff] %v502_v27  }
  0x35   : > { %v347_v28 = vld [vmem:[%s252_s19] sm:$0xf]  ;;  %v349_v29 = vld [vmem:[%s252_s19 + $0x4] sm:$0xf] }
  0x36   : > { %v351_v30 = vld [vmem:[%s252_s19 + $0x8] sm:$0xf]  ;;  %v353_v31 = vld [vmem:[%s252_s19 + $0xc] sm:$0xf]  ;;  %348 = vst [vmem:[%s330_s25] sm:$0xf] %v347_v28 }
  0x37   : > { %350 = vst [vmem:[%s330_s25 + $0x10] sm:$0xf] %v349_v29  ;;  %352 = vst [vmem:[%s330_s25 + $0x20] sm:$0xf] %v351_v30 }
  0x38   : > { %354 = vst [vmem:[%s330_s25 + $0x30] sm:$0xf] %v353_v31 }
  0x39 PF: > { %s13_s16 = sadd.s32 1, %s583_s16   ;;  %s690_s12 = smov %s571_s13 }
  0x3a   : > { %p10_p12 = scmp.ge.s32.totalorder %s13_s16, 6   ;;  %s691_s13 = smov %s645_s22 }
  0x3b   : > { %s692_s14 = smov %s579_s15  ;;  %s693_s15 = smov %s695_s17 }
  0x3c   :  { %12 = sbr.rel (!%p10_p12) target bundleno = 3 (0x3), region = 152 }

// kernel: discriminator_forward.12
= control target key start
LH: loop header
LB: loop body
LE: loop exit
PB: predicated region body
PF: predicated region fallthrough
CT: control target
= control target key end

     0   :  { %s9011_s15 = smov 0   ;;  %s9013_s16 = smov 0   ;;  %s10831_s0 = inlined_call_operand.vmem [shape: bf16[32,4096], index: 0, kind: input, shape index: {}]   ;;  %s10832_s1 = inlined_call_operand.vmem [shape: bf16[4096,512], index: 1, kind: input, shape index: {}]   ;;  %s10833_s2 = inlined_call_operand.vmem [shape: f32[32,512], index: 2, kind: output, shape index: {0}]   ;;  %s10834_s3 = inlined_call_operand.vmem [shape: f32[1,512], index: 3, kind: output, shape index: {1}]   ;;  %s10835_s4 = inlined_call_operand.vmem [shape: f32[1,512], index: 4, kind: output, shape index: {2}]  }
   0x1   :  { %s9015_s17 = smov 0   ;;  %s9017_s18 = smov 0  }
   0x2   :  { %s9019_s19 = smov 0  }
   0x3 LB: > { %s27_s20 = sadd.s32 1, %s8979_s18  ;;  %s7866_s21 = sadd.s32 4294967295, %s8983_s19   ;;  %s8983_s19 = sphi %s9019_s19, %s15_s19   ;;  %s8979_s18 = sphi %s9017_s18, %s10870_s18   ;;  %s8975_s17 = sphi %s9015_s17, %s10869_s17   ;;  %s8971_s16 = sphi %s9013_s16, %s10868_s16   ;;  %s8967_s15 = sphi %s9011_s15, %s10867_s15  }
   0x4   : > { %p29_p0 = scmp.ge.s32.totalorder %s27_s20, 4  ;;  %p67_p1 = scmp.ne.s32.totalorder %s8971_s16, %s8967_s15 }
   0x5   : > { %p68_p2 = scmp.eq.s32.totalorder %s8983_s19, 0  ;;  %p99_p4 = scmp.eq.s32.totalorder %s7866_s21, 3 }
   0x6   : > { %s10872_s20 = smov (%p29_p0, %s27_s20), 0  ;;  %s60_s23 = sadd.s32 1, %s8971_s16 }
   0x7   : > { %p69_p3 = por %p68_p2, %p67_p1  ;;  %s57_s22 = ssub.s32 %s8979_s18, %s10872_s20 }
   0x8   : > { %p58_p5 = scmp.eq.s32.totalorder %s57_s22, 0  ;;  %p9046_p6 = por %p99_p4, %p67_p1 }
   0x9   : > { %p7870_p7 = scmp.ge.s32.totalorder %s8983_s19, 4 }
   0xa   : > { %s9051_s25 = scalar_select %p58_p5, %s8971_s16, %s60_s23  }
   0xb   : > { %183 = sbr.rel (%p7870_p7) target bundleno = 361 (0x169), region = 20 }
  0x10   : > { %186 = sbr.rel (!%p69_p3) target bundleno = 361 (0x169), region = 24  ;;  %s188_s26 = sand.u32 (%p69_p3), 1, %s8971_s16  }
  0x11   : > { %s7872_s27 = sshll.u32 (%p69_p3), %s8979_s18, 2  ;;  %s7871_s28 = sshll.u32 (%p69_p3), %s188_s26, 11 }
  0x12   : > { %s9059_s5 = scalar_lea.vmem (%p69_p3), %s10832_s1, %s7872_s27  ;;  %s9063_s6 = scalar_lea.vmem (%p69_p3), [#allocation2], %s7871_s28 }
  0x13   : > { %v209_v0 = vld [vmem:[%s9059_s5] sm:$0xf] (%p69_p3)  ;;  %v211_v1 = vld [vmem:[%s9059_s5 + $0x10] sm:$0xf] (%p69_p3) }
  0x14   : > { %210 = vst [vmem:[%s9063_s6] sm:$0xf] (%p69_p3), %v209_v0  ;;  %212 = vst [vmem:[%s9063_s6 + $0x4] sm:$0xf] (%p69_p3), %v211_v1  ;;  %v213_v2 = vld [vmem:[%s9059_s5 + $0x20] sm:$0xf] (%p69_p3) }
  0x15   : > { %v215_v3 = vld [vmem:[%s9059_s5 + $0x30] sm:$0xf]  ;;  %v217_v4 = vld [vmem:[%s9059_s5 + $0x40] sm:$0xf]  ;;  %214 = vst [vmem:[%s9063_s6 + $0x8] sm:$0xf] %v213_v2 }
  0x16   : > { %216 = vst [vmem:[%s9063_s6 + $0xc] sm:$0xf] %v215_v3  ;;  %218 = vst [vmem:[%s9063_s6 + $0x10] sm:$0xf] %v217_v4  ;;  %v219_v5 = vld [vmem:[%s9059_s5 + $0x50] sm:$0xf] }
  0x17   : > { %v221_v6 = vld [vmem:[%s9059_s5 + $0x60] sm:$0xf]  ;;  %v223_v7 = vld [vmem:[%s9059_s5 + $0x70] sm:$0xf]  ;;  %220 = vst [vmem:[%s9063_s6 + $0x14] sm:$0xf] %v219_v5 }
  0x18   : > { %222 = vst [vmem:[%s9063_s6 + $0x18] sm:$0xf] %v221_v6  ;;  %224 = vst [vmem:[%s9063_s6 + $0x1c] sm:$0xf] %v223_v7  ;;  %v225_v8 = vld [vmem:[%s9059_s5 + $0x80] sm:$0xf] }
  0x19   : > { %v227_v9 = vld [vmem:[%s9059_s5 + $0x90] sm:$0xf]  ;;  %v229_v10 = vld [vmem:[%s9059_s5 + $0xa0] sm:$0xf]  ;;  %226 = vst [vmem:[%s9063_s6 + $0x20] sm:$0xf] %v225_v8 }
  0x1a   : > { %228 = vst [vmem:[%s9063_s6 + $0x24] sm:$0xf] %v227_v9  ;;  %230 = vst [vmem:[%s9063_s6 + $0x28] sm:$0xf] %v229_v10  ;;  %v231_v11 = vld [vmem:[%s9059_s5 + $0xb0] sm:$0xf] }
  0x1b   : > { %v233_v12 = vld [vmem:[%s9059_s5 + $0xc0] sm:$0xf]  ;;  %v235_v13 = vld [vmem:[%s9059_s5 + $0xd0] sm:$0xf]  ;;  %232 = vst [vmem:[%s9063_s6 + $0x2c] sm:$0xf] %v231_v11 }
  0x1c   : > { %234 = vst [vmem:[%s9063_s6 + $0x30] sm:$0xf] %v233_v12  ;;  %236 = vst [vmem:[%s9063_s6 + $0x34] sm:$0xf] %v235_v13  ;;  %v237_v14 = vld [vmem:[%s9059_s5 + $0xe0] sm:$0xf] }
  0x1d   : > { %v239_v15 = vld [vmem:[%s9059_s5 + $0xf0] sm:$0xf]  ;;  %v241_v16 = vld [vmem:[%s9059_s5 + $0x100] sm:$0xf]  ;;  %238 = vst [vmem:[%s9063_s6 + $0x38] sm:$0xf] %v237_v14 }
  0x1e   : > { %240 = vst [vmem:[%s9063_s6 + $0x3c] sm:$0xf] %v239_v15  ;;  %242 = vst [vmem:[%s9063_s6 + $0x40] sm:$0xf] %v241_v16  ;;  %v243_v17 = vld [vmem:[%s9059_s5 + $0x110] sm:$0xf] }
  0x1f   : > { %v245_v18 = vld [vmem:[%s9059_s5 + $0x120] sm:$0xf]  ;;  %v247_v19 = vld [vmem:[%s9059_s5 + $0x130] sm:$0xf]  ;;  %244 = vst [vmem:[%s9063_s6 + $0x44] sm:$0xf] %v243_v17 }
  0x20   : > { %246 = vst [vmem:[%s9063_s6 + $0x48] sm:$0xf] %v245_v18  ;;  %248 = vst [vmem:[%s9063_s6 + $0x4c] sm:$0xf] %v247_v19  ;;  %v249_v20 = vld [vmem:[%s9059_s5 + $0x140] sm:$0xf] }
  0x21   : > { %v251_v21 = vld [vmem:[%s9059_s5 + $0x150] sm:$0xf]  ;;  %v253_v22 = vld [vmem:[%s9059_s5 + $0x160] sm:$0xf]  ;;  %250 = vst [vmem:[%s9063_s6 + $0x50] sm:$0xf] %v249_v20 }
  0x22   : > { %252 = vst [vmem:[%s9063_s6 + $0x54] sm:$0xf] %v251_v21  ;;  %254 = vst [vmem:[%s9063_s6 + $0x58] sm:$0xf] %v253_v22  ;;  %v255_v23 = vld [vmem:[%s9059_s5 + $0x170] sm:$0xf] }
  0x23   : > { %v257_v24 = vld [vmem:[%s9059_s5 + $0x180] sm:$0xf]  ;;  %v259_v25 = vld [vmem:[%s9059_s5 + $0x190] sm:$0xf]  ;;  %256 = vst [vmem:[%s9063_s6 + $0x5c] sm:$0xf] %v255_v23 }
  0x24   : > { %258 = vst [vmem:[%s9063_s6 + $0x60] sm:$0xf] %v257_v24  ;;  %260 = vst [vmem:[%s9063_s6 + $0x64] sm:$0xf] %v259_v25  ;;  %v261_v26 = vld [vmem:[%s9059_s5 + $0x1a0] sm:$0xf] }
  0x25   : > { %v263_v27 = vld [vmem:[%s9059_s5 + $0x1b0] sm:$0xf]  ;;  %v265_v28 = vld [vmem:[%s9059_s5 + $0x1c0] sm:$0xf]  ;;  %262 = vst [vmem:[%s9063_s6 + $0x68] sm:$0xf] %v261_v26 }
  0x26   : > { %264 = vst [vmem:[%s9063_s6 + $0x6c] sm:$0xf] %v263_v27  ;;  %266 = vst [vmem:[%s9063_s6 + $0x70] sm:$0xf] %v265_v28  ;;  %v267_v29 = vld [vmem:[%s9059_s5 + $0x1d0] sm:$0xf] }
  0x27   : > { %v269_v30 = vld [vmem:[%s9059_s5 + $0x1e0] sm:$0xf]  ;;  %v271_v31 = vld [vmem:[%s9059_s5 + $0x1f0] sm:$0xf]  ;;  %268 = vst [vmem:[%s9063_s6 + $0x74] sm:$0xf] %v267_v29 }
  0x28   : > { %270 = vst [vmem:[%s9063_s6 + $0x78] sm:$0xf] %v269_v30  ;;  %272 = vst [vmem:[%s9063_s6 + $0x7c] sm:$0xf] %v271_v31  ;;  %v273_v32 = vld [vmem:[%s9059_s5 + $0x200] sm:$0xf] }
  0x29   : > { %v275_v33 = vld [vmem:[%s9059_s5 + $0x210] sm:$0xf]  ;;  %v277_v34 = vld [vmem:[%s9059_s5 + $0x220] sm:$0xf]  ;;  %274 = vst [vmem:[%s9063_s6 + $0x80] sm:$0xf] %v273_v32 }
  0x2a   : > { %276 = vst [vmem:[%s9063_s6 + $0x84] sm:$0xf] %v275_v33  ;;  %278 = vst [vmem:[%s9063_s6 + $0x88] sm:$0xf] %v277_v34  ;;  %v279_v35 = vld [vmem:[%s9059_s5 + $0x230] sm:$0xf] }
  0x2b   : > { %v281_v36 = vld [vmem:[%s9059_s5 + $0x240] sm:$0xf]  ;;  %v283_v37 = vld [vmem:[%s9059_s5 + $0x250] sm:$0xf]  ;;  %280 = vst [vmem:[%s9063_s6 + $0x8c] sm:$0xf] %v279_v35 }
  0x2c   : > { %282 = vst [vmem:[%s9063_s6 + $0x90] sm:$0xf] %v281_v36  ;;  %284 = vst [vmem:[%s9063_s6 + $0x94] sm:$0xf] %v283_v37  ;;  %v285_v38 = vld [vmem:[%s9059_s5 + $0x260] sm:$0xf] }
  0x2d   : > { %v287_v39 = vld [vmem:[%s9059_s5 + $0x270] sm:$0xf]  ;;  %v289_v40 = vld [vmem:[%s9059_s5 + $0x280] sm:$0xf]  ;;  %286 = vst [vmem:[%s9063_s6 + $0x98] sm:$0xf] %v285_v38 }
  0x2e   : > { %288 = vst [vmem:[%s9063_s6 + $0x9c] sm:$0xf] %v287_v39  ;;  %290 = vst [vmem:[%s9063_s6 + $0xa0] sm:$0xf] %v289_v40  ;;  %v291_v41 = vld [vmem:[%s9059_s5 + $0x290] sm:$0xf] }
  0x2f   : > { %v293_v42 = vld [vmem:[%s9059_s5 + $0x2a0] sm:$0xf]  ;;  %v295_v43 = vld [vmem:[%s9059_s5 + $0x2b0] sm:$0xf]  ;;  %292 = vst [vmem:[%s9063_s6 + $0xa4] sm:$0xf] %v291_v41 }
  0x30   : > { %294 = vst [vmem:[%s9063_s6 + $0xa8] sm:$0xf] %v293_v42  ;;  %296 = vst [vmem:[%s9063_s6 + $0xac] sm:$0xf] %v295_v43  ;;  %v297_v44 = vld [vmem:[%s9059_s5 + $0x2c0] sm:$0xf] }
  0x31   : > { %v299_v45 = vld [vmem:[%s9059_s5 + $0x2d0] sm:$0xf]  ;;  %v301_v46 = vld [vmem:[%s9059_s5 + $0x2e0] sm:$0xf]  ;;  %298 = vst [vmem:[%s9063_s6 + $0xb0] sm:$0xf] %v297_v44 }
  0x32   : > { %300 = vst [vmem:[%s9063_s6 + $0xb4] sm:$0xf] %v299_v45  ;;  %302 = vst [vmem:[%s9063_s6 + $0xb8] sm:$0xf] %v301_v46  ;;  %v303_v47 = vld [vmem:[%s9059_s5 + $0x2f0] sm:$0xf] }
  0x33   : > { %v305_v48 = vld [vmem:[%s9059_s5 + $0x300] sm:$0xf]  ;;  %v307_v49 = vld [vmem:[%s9059_s5 + $0x310] sm:$0xf]  ;;  %304 = vst [vmem:[%s9063_s6 + $0xbc] sm:$0xf] %v303_v47 }
  0x34   : > { %306 = vst [vmem:[%s9063_s6 + $0xc0] sm:$0xf] %v305_v48  ;;  %308 = vst [vmem:[%s9063_s6 + $0xc4] sm:$0xf] %v307_v49  ;;  %v309_v50 = vld [vmem:[%s9059_s5 + $0x320] sm:$0xf] }
  0x35   : > { %v311_v51 = vld [vmem:[%s9059_s5 + $0x330] sm:$0xf]  ;;  %v313_v52 = vld [vmem:[%s9059_s5 + $0x340] sm:$0xf]  ;;  %310 = vst [vmem:[%s9063_s6 + $0xc8] sm:$0xf] %v309_v50 }
  0x36   : > { %312 = vst [vmem:[%s9063_s6 + $0xcc] sm:$0xf] %v311_v51  ;;  %314 = vst [vmem:[%s9063_s6 + $0xd0] sm:$0xf] %v313_v52  ;;  %v315_v53 = vld [vmem:[%s9059_s5 + $0x350] sm:$0xf] }
  0x37   : > { %v317_v54 = vld [vmem:[%s9059_s5 + $0x360] sm:$0xf]  ;;  %v319_v55 = vld [vmem:[%s9059_s5 + $0x370] sm:$0xf]  ;;  %316 = vst [vmem:[%s9063_s6 + $0xd4] sm:$0xf] %v315_v53 }
  0x38   : > { %318 = vst [vmem:[%s9063_s6 + $0xd8] sm:$0xf] %v317_v54  ;;  %320 = vst [vmem:[%s9063_s6 + $0xdc] sm:$0xf] %v319_v55  ;;  %v321_v56 = vld [vmem:[%s9059_s5 + $0x380] sm:$0xf] }
  0x39   : > { %v323_v57 = vld [vmem:[%s9059_s5 + $0x390] sm:$0xf]  ;;  %v325_v58 = vld [vmem:[%s9059_s5 + $0x3a0] sm:$0xf]  ;;  %322 = vst [vmem:[%s9063_s6 + $0xe0] sm:$0xf] %v321_v56 }
  0x3a   : > { %324 = vst [vmem:[%s9063_s6 + $0xe4] sm:$0xf] %v323_v57  ;;  %326 = vst [vmem:[%s9063_s6 + $0xe8] sm:$0xf] %v325_v58  ;;  %v327_v59 = vld [vmem:[%s9059_s5 + $0x3b0] sm:$0xf] }
  0x3b   : > { %v329_v60 = vld [vmem:[%s9059_s5 + $0x3c0] sm:$0xf]  ;;  %v331_v61 = vld [vmem:[%s9059_s5 + $0x3d0] sm:$0xf]  ;;  %328 = vst [vmem:[%s9063_s6 + $0xec] sm:$0xf] %v327_v59 }
  0x3c   : > { %330 = vst [vmem:[%s9063_s6 + $0xf0] sm:$0xf] %v329_v60  ;;  %332 = vst [vmem:[%s9063_s6 + $0xf4] sm:$0xf] %v331_v61  ;;  %v333_v62 = vld [vmem:[%s9059_s5 + $0x3e0] sm:$0xf] }
  0x3d   : > { %v335_v63 = vld [vmem:[%s9059_s5 + $0x3f0] sm:$0xf]  ;;  %v337_v0 = vld [vmem:[%s9059_s5 + $0x400] sm:$0xf]  ;;  %334 = vst [vmem:[%s9063_s6 + $0xf8] sm:$0xf] %v333_v62 }
  0x3e   : > { %336 = vst [vmem:[%s9063_s6 + $0xfc] sm:$0xf] %v335_v63  ;;  %338 = vst [vmem:[%s9063_s6 + $0x100] sm:$0xf] %v337_v0  ;;  %v339_v1 = vld [vmem:[%s9059_s5 + $0x410] sm:$0xf] }
  0x3f   : > { %v341_v2 = vld [vmem:[%s9059_s5 + $0x420] sm:$0xf]  ;;  %v343_v3 = vld [vmem:[%s9059_s5 + $0x430] sm:$0xf]  ;;  %340 = vst [vmem:[%s9063_s6 + $0x104] sm:$0xf] %v339_v1 }
  0x40   : > { %342 = vst [vmem:[%s9063_s6 + $0x108] sm:$0xf] %v341_v2  ;;  %344 = vst [vmem:[%s9063_s6 + $0x10c] sm:$0xf] %v343_v3  ;;  %v345_v4 = vld [vmem:[%s9059_s5 + $0x440] sm:$0xf] }
  0x41   : > { %v347_v5 = vld [vmem:[%s9059_s5 + $0x450] sm:$0xf]  ;;  %v349_v6 = vld [vmem:[%s9059_s5 + $0x460] sm:$0xf]  ;;  %346 = vst [vmem:[%s9063_s6 + $0x110] sm:$0xf] %v345_v4 }
  0x42   : > { %348 = vst [vmem:[%s9063_s6 + $0x114] sm:$0xf] %v347_v5  ;;  %350 = vst [vmem:[%s9063_s6 + $0x118] sm:$0xf] %v349_v6  ;;  %v351_v7 = vld [vmem:[%s9059_s5 + $0x470] sm:$0xf] }
  0x43   : > { %v353_v8 = vld [vmem:[%s9059_s5 + $0x480] sm:$0xf]  ;;  %v355_v9 = vld [vmem:[%s9059_s5 + $0x490] sm:$0xf]  ;;  %352 = vst [vmem:[%s9063_s6 + $0x11c] sm:$0xf] %v351_v7 }
  0x44   : > { %354 = vst [vmem:[%s9063_s6 + $0x120] sm:$0xf] %v353_v8  ;;  %356 = vst [vmem:[%s9063_s6 + $0x124] sm:$0xf] %v355_v9  ;;  %v357_v10 = vld [vmem:[%s9059_s5 + $0x4a0] sm:$0xf] }
  0x45   : > { %v359_v11 = vld [vmem:[%s9059_s5 + $0x4b0] sm:$0xf]  ;;  %v361_v12 = vld [vmem:[%s9059_s5 + $0x4c0] sm:$0xf]  ;;  %358 = vst [vmem:[%s9063_s6 + $0x128] sm:$0xf] %v357_v10 }
  0x46   : > { %360 = vst [vmem:[%s9063_s6 + $0x12c] sm:$0xf] %v359_v11  ;;  %362 = vst [vmem:[%s9063_s6 + $0x130] sm:$0xf] %v361_v12  ;;  %v363_v13 = vld [vmem:[%s9059_s5 + $0x4d0] sm:$0xf] }
  0x47   : > { %v365_v14 = vld [vmem:[%s9059_s5 + $0x4e0] sm:$0xf]  ;;  %v367_v15 = vld [vmem:[%s9059_s5 + $0x4f0] sm:$0xf]  ;;  %364 = vst [vmem:[%s9063_s6 + $0x134] sm:$0xf] %v363_v13 }
  0x48   : > { %366 = vst [vmem:[%s9063_s6 + $0x138] sm:$0xf] %v365_v14  ;;  %368 = vst [vmem:[%s9063_s6 + $0x13c] sm:$0xf] %v367_v15  ;;  %v369_v16 = vld [vmem:[%s9059_s5 + $0x500] sm:$0xf] }
  0x49   : > { %v371_v17 = vld [vmem:[%s9059_s5 + $0x510] sm:$0xf]  ;;  %v373_v18 = vld [vmem:[%s9059_s5 + $0x520] sm:$0xf]  ;;  %370 = vst [vmem:[%s9063_s6 + $0x140] sm:$0xf] %v369_v16 }
  0x4a   : > { %372 = vst [vmem:[%s9063_s6 + $0x144] sm:$0xf] %v371_v17  ;;  %374 = vst [vmem:[%s9063_s6 + $0x148] sm:$0xf] %v373_v18  ;;  %v375_v19 = vld [vmem:[%s9059_s5 + $0x530] sm:$0xf] }
  0x4b   : > { %v377_v20 = vld [vmem:[%s9059_s5 + $0x540] sm:$0xf]  ;;  %v379_v21 = vld [vmem:[%s9059_s5 + $0x550] sm:$0xf]  ;;  %376 = vst [vmem:[%s9063_s6 + $0x14c] sm:$0xf] %v375_v19 }
  0x4c   : > { %378 = vst [vmem:[%s9063_s6 + $0x150] sm:$0xf] %v377_v20  ;;  %380 = vst [vmem:[%s9063_s6 + $0x154] sm:$0xf] %v379_v21  ;;  %v381_v22 = vld [vmem:[%s9059_s5 + $0x560] sm:$0xf] }
  0x4d   : > { %v383_v23 = vld [vmem:[%s9059_s5 + $0x570] sm:$0xf]  ;;  %v385_v24 = vld [vmem:[%s9059_s5 + $0x580] sm:$0xf]  ;;  %382 = vst [vmem:[%s9063_s6 + $0x158] sm:$0xf] %v381_v22 }
  0x4e   : > { %384 = vst [vmem:[%s9063_s6 + $0x15c] sm:$0xf] %v383_v23  ;;  %386 = vst [vmem:[%s9063_s6 + $0x160] sm:$0xf] %v385_v24  ;;  %v387_v25 = vld [vmem:[%s9059_s5 + $0x590] sm:$0xf] }
  0x4f   : > { %v389_v26 = vld [vmem:[%s9059_s5 + $0x5a0] sm:$0xf]  ;;  %v391_v27 = vld [vmem:[%s9059_s5 + $0x5b0] sm:$0xf]  ;;  %388 = vst [vmem:[%s9063_s6 + $0x164] sm:$0xf] %v387_v25 }
  0x50   : > { %390 = vst [vmem:[%s9063_s6 + $0x168] sm:$0xf] %v389_v26  ;;  %392 = vst [vmem:[%s9063_s6 + $0x16c] sm:$0xf] %v391_v27  ;;  %v393_v28 = vld [vmem:[%s9059_s5 + $0x5c0] sm:$0xf] }
  0x51   : > { %v395_v29 = vld [vmem:[%s9059_s5 + $0x5d0] sm:$0xf]  ;;  %v397_v30 = vld [vmem:[%s9059_s5 + $0x5e0] sm:$0xf]  ;;  %394 = vst [vmem:[%s9063_s6 + $0x170] sm:$0xf] %v393_v28 }
  0x52   : > { %396 = vst [vmem:[%s9063_s6 + $0x174] sm:$0xf] %v395_v29  ;;  %398 = vst [vmem:[%s9063_s6 + $0x178] sm:$0xf] %v397_v30  ;;  %v399_v31 = vld [vmem:[%s9059_s5 + $0x5f0] sm:$0xf] }
  0x53   : > { %v401_v32 = vld [vmem:[%s9059_s5 + $0x600] sm:$0xf]  ;;  %v403_v33 = vld [vmem:[%s9059_s5 + $0x610] sm:$0xf]  ;;  %400 = vst [vmem:[%s9063_s6 + $0x17c] sm:$0xf] %v399_v31 }
  0x54   : > { %402 = vst [vmem:[%s9063_s6 + $0x180] sm:$0xf] %v401_v32  ;;  %404 = vst [vmem:[%s9063_s6 + $0x184] sm:$0xf] %v403_v33  ;;  %v405_v34 = vld [vmem:[%s9059_s5 + $0x620] sm:$0xf] }
  0x55   : > { %v407_v35 = vld [vmem:[%s9059_s5 + $0x630] sm:$0xf]  ;;  %v409_v36 = vld [vmem:[%s9059_s5 + $0x640] sm:$0xf]  ;;  %406 = vst [vmem:[%s9063_s6 + $0x188] sm:$0xf] %v405_v34 }
  0x56   : > { %408 = vst [vmem:[%s9063_s6 + $0x18c] sm:$0xf] %v407_v35  ;;  %410 = vst [vmem:[%s9063_s6 + $0x190] sm:$0xf] %v409_v36  ;;  %v411_v37 = vld [vmem:[%s9059_s5 + $0x650] sm:$0xf] }
  0x57   : > { %v413_v38 = vld [vmem:[%s9059_s5 + $0x660] sm:$0xf]  ;;  %v415_v39 = vld [vmem:[%s9059_s5 + $0x670] sm:$0xf]  ;;  %412 = vst [vmem:[%s9063_s6 + $0x194] sm:$0xf] %v411_v37 }
  0x58   : > { %414 = vst [vmem:[%s9063_s6 + $0x198] sm:$0xf] %v413_v38  ;;  %416 = vst [vmem:[%s9063_s6 + $0x19c] sm:$0xf] %v415_v39  ;;  %v417_v40 = vld [vmem:[%s9059_s5 + $0x680] sm:$0xf] }
  0x59   : > { %v419_v41 = vld [vmem:[%s9059_s5 + $0x690] sm:$0xf]  ;;  %v421_v42 = vld [vmem:[%s9059_s5 + $0x6a0] sm:$0xf]  ;;  %418 = vst [vmem:[%s9063_s6 + $0x1a0] sm:$0xf] %v417_v40 }
  0x5a   : > { %420 = vst [vmem:[%s9063_s6 + $0x1a4] sm:$0xf] %v419_v41  ;;  %422 = vst [vmem:[%s9063_s6 + $0x1a8] sm:$0xf] %v421_v42  ;;  %v423_v43 = vld [vmem:[%s9059_s5 + $0x6b0] sm:$0xf] }
  0x5b   : > { %v425_v44 = vld [vmem:[%s9059_s5 + $0x6c0] sm:$0xf]  ;;  %v427_v45 = vld [vmem:[%s9059_s5 + $0x6d0] sm:$0xf]  ;;  %424 = vst [vmem:[%s9063_s6 + $0x1ac] sm:$0xf] %v423_v43 }
  0x5c   : > { %426 = vst [vmem:[%s9063_s6 + $0x1b0] sm:$0xf] %v425_v44  ;;  %428 = vst [vmem:[%s9063_s6 + $0x1b4] sm:$0xf] %v427_v45  ;;  %v429_v46 = vld [vmem:[%s9059_s5 + $0x6e0] sm:$0xf] }
  0x5d   : > { %v431_v47 = vld [vmem:[%s9059_s5 + $0x6f0] sm:$0xf]  ;;  %v433_v48 = vld [vmem:[%s9059_s5 + $0x700] sm:$0xf]  ;;  %430 = vst [vmem:[%s9063_s6 + $0x1b8] sm:$0xf] %v429_v46 }
  0x5e   : > { %432 = vst [vmem:[%s9063_s6 + $0x1bc] sm:$0xf] %v431_v47  ;;  %434 = vst [vmem:[%s9063_s6 + $0x1c0] sm:$0xf] %v433_v48  ;;  %v435_v49 = vld [vmem:[%s9059_s5 + $0x710] sm:$0xf] }
  0x5f   : > { %v437_v50 = vld [vmem:[%s9059_s5 + $0x720] sm:$0xf]  ;;  %v439_v51 = vld [vmem:[%s9059_s5 + $0x730] sm:$0xf]  ;;  %436 = vst [vmem:[%s9063_s6 + $0x1c4] sm:$0xf] %v435_v49 }
  0x60   : > { %438 = vst [vmem:[%s9063_s6 + $0x1c8] sm:$0xf] %v437_v50  ;;  %440 = vst [vmem:[%s9063_s6 + $0x1cc] sm:$0xf] %v439_v51  ;;  %v441_v52 = vld [vmem:[%s9059_s5 + $0x740] sm:$0xf] }
  0x61   : > { %v443_v53 = vld [vmem:[%s9059_s5 + $0x750] sm:$0xf]  ;;  %v445_v54 = vld [vmem:[%s9059_s5 + $0x760] sm:$0xf]  ;;  %442 = vst [vmem:[%s9063_s6 + $0x1d0] sm:$0xf] %v441_v52 }
  0x62   : > { %444 = vst [vmem:[%s9063_s6 + $0x1d4] sm:$0xf] %v443_v53  ;;  %446 = vst [vmem:[%s9063_s6 + $0x1d8] sm:$0xf] %v445_v54  ;;  %v447_v55 = vld [vmem:[%s9059_s5 + $0x770] sm:$0xf] }
  0x63   : > { %v449_v56 = vld [vmem:[%s9059_s5 + $0x780] sm:$0xf]  ;;  %v451_v57 = vld [vmem:[%s9059_s5 + $0x790] sm:$0xf]  ;;  %448 = vst [vmem:[%s9063_s6 + $0x1dc] sm:$0xf] %v447_v55 }
  0x64   : > { %450 = vst [vmem:[%s9063_s6 + $0x1e0] sm:$0xf] %v449_v56  ;;  %452 = vst [vmem:[%s9063_s6 + $0x1e4] sm:$0xf] %v451_v57  ;;  %v453_v58 = vld [vmem:[%s9059_s5 + $0x7a0] sm:$0xf] }
  0x65   : > { %v455_v59 = vld [vmem:[%s9059_s5 + $0x7b0] sm:$0xf]  ;;  %v457_v60 = vld [vmem:[%s9059_s5 + $0x7c0] sm:$0xf]  ;;  %454 = vst [vmem:[%s9063_s6 + $0x1e8] sm:$0xf] %v453_v58 }
  0x66   : > { %456 = vst [vmem:[%s9063_s6 + $0x1ec] sm:$0xf] %v455_v59  ;;  %458 = vst [vmem:[%s9063_s6 + $0x1f0] sm:$0xf] %v457_v60  ;;  %v459_v61 = vld [vmem:[%s9059_s5 + $0x7d0] sm:$0xf] }
  0x67   : > { %v461_v62 = vld [vmem:[%s9059_s5 + $0x7e0] sm:$0xf]  ;;  %v463_v63 = vld [vmem:[%s9059_s5 + $0x7f0] sm:$0xf]  ;;  %460 = vst [vmem:[%s9063_s6 + $0x1f4] sm:$0xf] %v459_v61 }
  0x68   : > { %462 = vst [vmem:[%s9063_s6 + $0x1f8] sm:$0xf] %v461_v62  ;;  %464 = vst [vmem:[%s9063_s6 + $0x1fc] sm:$0xf] %v463_v63  ;;  %v465_v0 = vld [vmem:[%s9059_s5 + $0x800] sm:$0xf] }
  0x69   : > { %v467_v1 = vld [vmem:[%s9059_s5 + $0x810] sm:$0xf]  ;;  %v469_v2 = vld [vmem:[%s9059_s5 + $0x820] sm:$0xf]  ;;  %466 = vst [vmem:[%s9063_s6 + $0x200] sm:$0xf] %v465_v0 }
  0x6a   : > { %468 = vst [vmem:[%s9063_s6 + $0x204] sm:$0xf] %v467_v1  ;;  %470 = vst [vmem:[%s9063_s6 + $0x208] sm:$0xf] %v469_v2  ;;  %v471_v3 = vld [vmem:[%s9059_s5 + $0x830] sm:$0xf] }
  0x6b   : > { %v473_v4 = vld [vmem:[%s9059_s5 + $0x840] sm:$0xf]  ;;  %v475_v5 = vld [vmem:[%s9059_s5 + $0x850] sm:$0xf]  ;;  %472 = vst [vmem:[%s9063_s6 + $0x20c] sm:$0xf] %v471_v3 }
  0x6c   : > { %474 = vst [vmem:[%s9063_s6 + $0x210] sm:$0xf] %v473_v4  ;;  %476 = vst [vmem:[%s9063_s6 + $0x214] sm:$0xf] %v475_v5  ;;  %v477_v6 = vld [vmem:[%s9059_s5 + $0x860] sm:$0xf] }
  0x6d   : > { %v479_v7 = vld [vmem:[%s9059_s5 + $0x870] sm:$0xf]  ;;  %v481_v8 = vld [vmem:[%s9059_s5 + $0x880] sm:$0xf]  ;;  %478 = vst [vmem:[%s9063_s6 + $0x218] sm:$0xf] %v477_v6 }
  0x6e   : > { %480 = vst [vmem:[%s9063_s6 + $0x21c] sm:$0xf] %v479_v7  ;;  %482 = vst [vmem:[%s9063_s6 + $0x220] sm:$0xf] %v481_v8  ;;  %v483_v9 = vld [vmem:[%s9059_s5 + $0x890] sm:$0xf] }
  0x6f   : > { %v485_v10 = vld [vmem:[%s9059_s5 + $0x8a0] sm:$0xf]  ;;  %v487_v11 = vld [vmem:[%s9059_s5 + $0x8b0] sm:$0xf]  ;;  %484 = vst [vmem:[%s9063_s6 + $0x224] sm:$0xf] %v483_v9 }
  0x70   : > { %486 = vst [vmem:[%s9063_s6 + $0x228] sm:$0xf] %v485_v10  ;;  %488 = vst [vmem:[%s9063_s6 + $0x22c] sm:$0xf] %v487_v11  ;;  %v489_v12 = vld [vmem:[%s9059_s5 + $0x8c0] sm:$0xf] }
  0x71   : > { %v491_v13 = vld [vmem:[%s9059_s5 + $0x8d0] sm:$0xf]  ;;  %v493_v14 = vld [vmem:[%s9059_s5 + $0x8e0] sm:$0xf]  ;;  %490 = vst [vmem:[%s9063_s6 + $0x230] sm:$0xf] %v489_v12 }
  0x72   : > { %492 = vst [vmem:[%s9063_s6 + $0x234] sm:$0xf] %v491_v13  ;;  %494 = vst [vmem:[%s9063_s6 + $0x238] sm:$0xf] %v493_v14  ;;  %v495_v15 = vld [vmem:[%s9059_s5 + $0x8f0] sm:$0xf] }
  0x73   : > { %v497_v16 = vld [vmem:[%s9059_s5 + $0x900] sm:$0xf]  ;;  %v499_v17 = vld [vmem:[%s9059_s5 + $0x910] sm:$0xf]  ;;  %496 = vst [vmem:[%s9063_s6 + $0x23c] sm:$0xf] %v495_v15 }
  0x74   : > { %498 = vst [vmem:[%s9063_s6 + $0x240] sm:$0xf] %v497_v16  ;;  %500 = vst [vmem:[%s9063_s6 + $0x244] sm:$0xf] %v499_v17  ;;  %v501_v18 = vld [vmem:[%s9059_s5 + $0x920] sm:$0xf] }
  0x75   : > { %v503_v19 = vld [vmem:[%s9059_s5 + $0x930] sm:$0xf]  ;;  %v505_v20 = vld [vmem:[%s9059_s5 + $0x940] sm:$0xf]  ;;  %502 = vst [vmem:[%s9063_s6 + $0x248] sm:$0xf] %v501_v18 }
  0x76   : > { %504 = vst [vmem:[%s9063_s6 + $0x24c] sm:$0xf] %v503_v19  ;;  %506 = vst [vmem:[%s9063_s6 + $0x250] sm:$0xf] %v505_v20  ;;  %v507_v21 = vld [vmem:[%s9059_s5 + $0x950] sm:$0xf] }
  0x77   : > { %v509_v22 = vld [vmem:[%s9059_s5 + $0x960] sm:$0xf]  ;;  %v511_v23 = vld [vmem:[%s9059_s5 + $0x970] sm:$0xf]  ;;  %508 = vst [vmem:[%s9063_s6 + $0x254] sm:$0xf] %v507_v21 }
  0x78   : > { %510 = vst [vmem:[%s9063_s6 + $0x258] sm:$0xf] %v509_v22  ;;  %512 = vst [vmem:[%s9063_s6 + $0x25c] sm:$0xf] %v511_v23  ;;  %v513_v24 = vld [vmem:[%s9059_s5 + $0x980] sm:$0xf] }
  0x79   : > { %v515_v25 = vld [vmem:[%s9059_s5 + $0x990] sm:$0xf]  ;;  %v517_v26 = vld [vmem:[%s9059_s5 + $0x9a0] sm:$0xf]  ;;  %514 = vst [vmem:[%s9063_s6 + $0x260] sm:$0xf] %v513_v24 }
  0x7a   : > { %516 = vst [vmem:[%s9063_s6 + $0x264] sm:$0xf] %v515_v25  ;;  %518 = vst [vmem:[%s9063_s6 + $0x268] sm:$0xf] %v517_v26  ;;  %v519_v27 = vld [vmem:[%s9059_s5 + $0x9b0] sm:$0xf] }
  0x7b   : > { %v521_v28 = vld [vmem:[%s9059_s5 + $0x9c0] sm:$0xf]  ;;  %v523_v29 = vld [vmem:[%s9059_s5 + $0x9d0] sm:$0xf]  ;;  %520 = vst [vmem:[%s9063_s6 + $0x26c] sm:$0xf] %v519_v27 }
  0x7c   : > { %522 = vst [vmem:[%s9063_s6 + $0x270] sm:$0xf] %v521_v28  ;;  %524 = vst [vmem:[%s9063_s6 + $0x274] sm:$0xf] %v523_v29  ;;  %v525_v30 = vld [vmem:[%s9059_s5 + $0x9e0] sm:$0xf] }
  0x7d   : > { %v527_v31 = vld [vmem:[%s9059_s5 + $0x9f0] sm:$0xf]  ;;  %v529_v32 = vld [vmem:[%s9059_s5 + $0xa00] sm:$0xf]  ;;  %526 = vst [vmem:[%s9063_s6 + $0x278] sm:$0xf] %v525_v30 }
  0x7e   : > { %528 = vst [vmem:[%s9063_s6 + $0x27c] sm:$0xf] %v527_v31  ;;  %530 = vst [vmem:[%s9063_s6 + $0x280] sm:$0xf] %v529_v32  ;;  %v531_v33 = vld [vmem:[%s9059_s5 + $0xa10] sm:$0xf] }
  0x7f   : > { %v533_v34 = vld [vmem:[%s9059_s5 + $0xa20] sm:$0xf]  ;;  %v535_v35 = vld [vmem:[%s9059_s5 + $0xa30] sm:$0xf]  ;;  %532 = vst [vmem:[%s9063_s6 + $0x284] sm:$0xf] %v531_v33 }
  0x80   : > { %534 = vst [vmem:[%s9063_s6 + $0x288] sm:$0xf] %v533_v34  ;;  %536 = vst [vmem:[%s9063_s6 + $0x28c] sm:$0xf] %v535_v35  ;;  %v537_v36 = vld [vmem:[%s9059_s5 + $0xa40] sm:$0xf] }
  0x81   : > { %v539_v37 = vld [vmem:[%s9059_s5 + $0xa50] sm:$0xf]  ;;  %v541_v38 = vld [vmem:[%s9059_s5 + $0xa60] sm:$0xf]  ;;  %538 = vst [vmem:[%s9063_s6 + $0x290] sm:$0xf] %v537_v36 }
  0x82   : > { %540 = vst [vmem:[%s9063_s6 + $0x294] sm:$0xf] %v539_v37  ;;  %542 = vst [vmem:[%s9063_s6 + $0x298] sm:$0xf] %v541_v38  ;;  %v543_v39 = vld [vmem:[%s9059_s5 + $0xa70] sm:$0xf] }
  0x83   : > { %v545_v40 = vld [vmem:[%s9059_s5 + $0xa80] sm:$0xf]  ;;  %v547_v41 = vld [vmem:[%s9059_s5 + $0xa90] sm:$0xf]  ;;  %544 = vst [vmem:[%s9063_s6 + $0x29c] sm:$0xf] %v543_v39 }
  0x84   : > { %546 = vst [vmem:[%s9063_s6 + $0x2a0] sm:$0xf] %v545_v40  ;;  %548 = vst [vmem:[%s9063_s6 + $0x2a4] sm:$0xf] %v547_v41  ;;  %v549_v42 = vld [vmem:[%s9059_s5 + $0xaa0] sm:$0xf] }
  0x85   : > { %v551_v43 = vld [vmem:[%s9059_s5 + $0xab0] sm:$0xf]  ;;  %v553_v44 = vld [vmem:[%s9059_s5 + $0xac0] sm:$0xf]  ;;  %550 = vst [vmem:[%s9063_s6 + $0x2a8] sm:$0xf] %v549_v42 }
  0x86   : > { %552 = vst [vmem:[%s9063_s6 + $0x2ac] sm:$0xf] %v551_v43  ;;  %554 = vst [vmem:[%s9063_s6 + $0x2b0] sm:$0xf] %v553_v44  ;;  %v555_v45 = vld [vmem:[%s9059_s5 + $0xad0] sm:$0xf] }
  0x87   : > { %v557_v46 = vld [vmem:[%s9059_s5 + $0xae0] sm:$0xf]  ;;  %v559_v47 = vld [vmem:[%s9059_s5 + $0xaf0] sm:$0xf]  ;;  %556 = vst [vmem:[%s9063_s6 + $0x2b4] sm:$0xf] %v555_v45 }
  0x88   : > { %558 = vst [vmem:[%s9063_s6 + $0x2b8] sm:$0xf] %v557_v46  ;;  %560 = vst [vmem:[%s9063_s6 + $0x2bc] sm:$0xf] %v559_v47  ;;  %v561_v48 = vld [vmem:[%s9059_s5 + $0xb00] sm:$0xf] }
  0x89   : > { %v563_v49 = vld [vmem:[%s9059_s5 + $0xb10] sm:$0xf]  ;;  %v565_v50 = vld [vmem:[%s9059_s5 + $0xb20] sm:$0xf]  ;;  %562 = vst [vmem:[%s9063_s6 + $0x2c0] sm:$0xf] %v561_v48 }
  0x8a   : > { %564 = vst [vmem:[%s9063_s6 + $0x2c4] sm:$0xf] %v563_v49  ;;  %566 = vst [vmem:[%s9063_s6 + $0x2c8] sm:$0xf] %v565_v50  ;;  %v567_v51 = vld [vmem:[%s9059_s5 + $0xb30] sm:$0xf] }
  0x8b   : > { %v569_v52 = vld [vmem:[%s9059_s5 + $0xb40] sm:$0xf]  ;;  %v571_v53 = vld [vmem:[%s9059_s5 + $0xb50] sm:$0xf]  ;;  %568 = vst [vmem:[%s9063_s6 + $0x2cc] sm:$0xf] %v567_v51 }
  0x8c   : > { %570 = vst [vmem:[%s9063_s6 + $0x2d0] sm:$0xf] %v569_v52  ;;  %572 = vst [vmem:[%s9063_s6 + $0x2d4] sm:$0xf] %v571_v53  ;;  %v573_v54 = vld [vmem:[%s9059_s5 + $0xb60] sm:$0xf] }
  0x8d   : > { %v575_v55 = vld [vmem:[%s9059_s5 + $0xb70] sm:$0xf]  ;;  %v577_v56 = vld [vmem:[%s9059_s5 + $0xb80] sm:$0xf]  ;;  %574 = vst [vmem:[%s9063_s6 + $0x2d8] sm:$0xf] %v573_v54 }
  0x8e   : > { %576 = vst [vmem:[%s9063_s6 + $0x2dc] sm:$0xf] %v575_v55  ;;  %578 = vst [vmem:[%s9063_s6 + $0x2e0] sm:$0xf] %v577_v56  ;;  %v579_v57 = vld [vmem:[%s9059_s5 + $0xb90] sm:$0xf] }
  0x8f   : > { %v581_v58 = vld [vmem:[%s9059_s5 + $0xba0] sm:$0xf]  ;;  %v583_v59 = vld [vmem:[%s9059_s5 + $0xbb0] sm:$0xf]  ;;  %580 = vst [vmem:[%s9063_s6 + $0x2e4] sm:$0xf] %v579_v57 }
  0x90   : > { %582 = vst [vmem:[%s9063_s6 + $0x2e8] sm:$0xf] %v581_v58  ;;  %584 = vst [vmem:[%s9063_s6 + $0x2ec] sm:$0xf] %v583_v59  ;;  %v585_v60 = vld [vmem:[%s9059_s5 + $0xbc0] sm:$0xf] }
  0x91   : > { %v587_v61 = vld [vmem:[%s9059_s5 + $0xbd0] sm:$0xf]  ;;  %v589_v62 = vld [vmem:[%s9059_s5 + $0xbe0] sm:$0xf]  ;;  %586 = vst [vmem:[%s9063_s6 + $0x2f0] sm:$0xf] %v585_v60 }
  0x92   : > { %588 = vst [vmem:[%s9063_s6 + $0x2f4] sm:$0xf] %v587_v61  ;;  %590 = vst [vmem:[%s9063_s6 + $0x2f8] sm:$0xf] %v589_v62  ;;  %v591_v63 = vld [vmem:[%s9059_s5 + $0xbf0] sm:$0xf] }
  0x93   : > { %v593_v0 = vld [vmem:[%s9059_s5 + $0xc00] sm:$0xf]  ;;  %v595_v1 = vld [vmem:[%s9059_s5 + $0xc10] sm:$0xf]  ;;  %592 = vst [vmem:[%s9063_s6 + $0x2fc] sm:$0xf] %v591_v63 }
  0x94   : > { %594 = vst [vmem:[%s9063_s6 + $0x300] sm:$0xf] %v593_v0  ;;  %596 = vst [vmem:[%s9063_s6 + $0x304] sm:$0xf] %v595_v1  ;;  %v597_v2 = vld [vmem:[%s9059_s5 + $0xc20] sm:$0xf] }
  0x95   : > { %v599_v3 = vld [vmem:[%s9059_s5 + $0xc30] sm:$0xf]  ;;  %v601_v4 = vld [vmem:[%s9059_s5 + $0xc40] sm:$0xf]  ;;  %598 = vst [vmem:[%s9063_s6 + $0x308] sm:$0xf] %v597_v2 }
  0x96   : > { %600 = vst [vmem:[%s9063_s6 + $0x30c] sm:$0xf] %v599_v3  ;;  %602 = vst [vmem:[%s9063_s6 + $0x310] sm:$0xf] %v601_v4  ;;  %v603_v5 = vld [vmem:[%s9059_s5 + $0xc50] sm:$0xf] }
  0x97   : > { %v605_v6 = vld [vmem:[%s9059_s5 + $0xc60] sm:$0xf]  ;;  %v607_v7 = vld [vmem:[%s9059_s5 + $0xc70] sm:$0xf]  ;;  %604 = vst [vmem:[%s9063_s6 + $0x314] sm:$0xf] %v603_v5 }
  0x98   : > { %606 = vst [vmem:[%s9063_s6 + $0x318] sm:$0xf] %v605_v6  ;;  %608 = vst [vmem:[%s9063_s6 + $0x31c] sm:$0xf] %v607_v7  ;;  %v609_v8 = vld [vmem:[%s9059_s5 + $0xc80] sm:$0xf] }
  0x99   : > { %v611_v9 = vld [vmem:[%s9059_s5 + $0xc90] sm:$0xf]  ;;  %v613_v10 = vld [vmem:[%s9059_s5 + $0xca0] sm:$0xf]  ;;  %610 = vst [vmem:[%s9063_s6 + $0x320] sm:$0xf] %v609_v8 }
  0x9a   : > { %612 = vst [vmem:[%s9063_s6 + $0x324] sm:$0xf] %v611_v9  ;;  %614 = vst [vmem:[%s9063_s6 + $0x328] sm:$0xf] %v613_v10  ;;  %v615_v11 = vld [vmem:[%s9059_s5 + $0xcb0] sm:$0xf] }
  0x9b   : > { %v617_v12 = vld [vmem:[%s9059_s5 + $0xcc0] sm:$0xf]  ;;  %v619_v13 = vld [vmem:[%s9059_s5 + $0xcd0] sm:$0xf]  ;;  %616 = vst [vmem:[%s9063_s6 + $0x32c] sm:$0xf] %v615_v11 }
  0x9c   : > { %618 = vst [vmem:[%s9063_s6 + $0x330] sm:$0xf] %v617_v12  ;;  %620 = vst [vmem:[%s9063_s6 + $0x334] sm:$0xf] %v619_v13  ;;  %v621_v14 = vld [vmem:[%s9059_s5 + $0xce0] sm:$0xf] }
  0x9d   : > { %v623_v15 = vld [vmem:[%s9059_s5 + $0xcf0] sm:$0xf]  ;;  %v625_v16 = vld [vmem:[%s9059_s5 + $0xd00] sm:$0xf]  ;;  %622 = vst [vmem:[%s9063_s6 + $0x338] sm:$0xf] %v621_v14 }
  0x9e   : > { %624 = vst [vmem:[%s9063_s6 + $0x33c] sm:$0xf] %v623_v15  ;;  %626 = vst [vmem:[%s9063_s6 + $0x340] sm:$0xf] %v625_v16  ;;  %v627_v17 = vld [vmem:[%s9059_s5 + $0xd10] sm:$0xf] }
  0x9f   : > { %v629_v18 = vld [vmem:[%s9059_s5 + $0xd20] sm:$0xf]  ;;  %v631_v19 = vld [vmem:[%s9059_s5 + $0xd30] sm:$0xf]  ;;  %628 = vst [vmem:[%s9063_s6 + $0x344] sm:$0xf] %v627_v17 }
  0xa0   : > { %630 = vst [vmem:[%s9063_s6 + $0x348] sm:$0xf] %v629_v18  ;;  %632 = vst [vmem:[%s9063_s6 + $0x34c] sm:$0xf] %v631_v19  ;;  %v633_v20 = vld [vmem:[%s9059_s5 + $0xd40] sm:$0xf] }
  0xa1   : > { %v635_v21 = vld [vmem:[%s9059_s5 + $0xd50] sm:$0xf]  ;;  %v637_v22 = vld [vmem:[%s9059_s5 + $0xd60] sm:$0xf]  ;;  %634 = vst [vmem:[%s9063_s6 + $0x350] sm:$0xf] %v633_v20 }
  0xa2   : > { %636 = vst [vmem:[%s9063_s6 + $0x354] sm:$0xf] %v635_v21  ;;  %638 = vst [vmem:[%s9063_s6 + $0x358] sm:$0xf] %v637_v22  ;;  %v639_v23 = vld [vmem:[%s9059_s5 + $0xd70] sm:$0xf] }
  0xa3   : > { %v641_v24 = vld [vmem:[%s9059_s5 + $0xd80] sm:$0xf]  ;;  %v643_v25 = vld [vmem:[%s9059_s5 + $0xd90] sm:$0xf]  ;;  %640 = vst [vmem:[%s9063_s6 + $0x35c] sm:$0xf] %v639_v23 }
  0xa4   : > { %642 = vst [vmem:[%s9063_s6 + $0x360] sm:$0xf] %v641_v24  ;;  %644 = vst [vmem:[%s9063_s6 + $0x364] sm:$0xf] %v643_v25  ;;  %v645_v26 = vld [vmem:[%s9059_s5 + $0xda0] sm:$0xf] }
  0xa5   : > { %v647_v27 = vld [vmem:[%s9059_s5 + $0xdb0] sm:$0xf]  ;;  %v649_v28 = vld [vmem:[%s9059_s5 + $0xdc0] sm:$0xf]  ;;  %646 = vst [vmem:[%s9063_s6 + $0x368] sm:$0xf] %v645_v26 }
  0xa6   : > { %648 = vst [vmem:[%s9063_s6 + $0x36c] sm:$0xf] %v647_v27  ;;  %650 = vst [vmem:[%s9063_s6 + $0x370] sm:$0xf] %v649_v28  ;;  %v651_v29 = vld [vmem:[%s9059_s5 + $0xdd0] sm:$0xf] }
  0xa7   : > { %v653_v30 = vld [vmem:[%s9059_s5 + $0xde0] sm:$0xf]  ;;  %v655_v31 = vld [vmem:[%s9059_s5 + $0xdf0] sm:$0xf]  ;;  %652 = vst [vmem:[%s9063_s6 + $0x374] sm:$0xf] %v651_v29 }
  0xa8   : > { %654 = vst [vmem:[%s9063_s6 + $0x378] sm:$0xf] %v653_v30  ;;  %656 = vst [vmem:[%s9063_s6 + $0x37c] sm:$0xf] %v655_v31  ;;  %v657_v32 = vld [vmem:[%s9059_s5 + $0xe00] sm:$0xf] }
  0xa9   : > { %v659_v33 = vld [vmem:[%s9059_s5 + $0xe10] sm:$0xf]  ;;  %v661_v34 = vld [vmem:[%s9059_s5 + $0xe20] sm:$0xf]  ;;  %658 = vst [vmem:[%s9063_s6 + $0x380] sm:$0xf] %v657_v32 }
  0xaa   : > { %660 = vst [vmem:[%s9063_s6 + $0x384] sm:$0xf] %v659_v33  ;;  %662 = vst [vmem:[%s9063_s6 + $0x388] sm:$0xf] %v661_v34  ;;  %v663_v35 = vld [vmem:[%s9059_s5 + $0xe30] sm:$0xf] }
  0xab   : > { %v665_v36 = vld [vmem:[%s9059_s5 + $0xe40] sm:$0xf]  ;;  %v667_v37 = vld [vmem:[%s9059_s5 + $0xe50] sm:$0xf]  ;;  %664 = vst [vmem:[%s9063_s6 + $0x38c] sm:$0xf] %v663_v35 }
  0xac   : > { %666 = vst [vmem:[%s9063_s6 + $0x390] sm:$0xf] %v665_v36  ;;  %668 = vst [vmem:[%s9063_s6 + $0x394] sm:$0xf] %v667_v37  ;;  %v669_v38 = vld [vmem:[%s9059_s5 + $0xe60] sm:$0xf] }
  0xad   : > { %v671_v39 = vld [vmem:[%s9059_s5 + $0xe70] sm:$0xf]  ;;  %v673_v40 = vld [vmem:[%s9059_s5 + $0xe80] sm:$0xf]  ;;  %670 = vst [vmem:[%s9063_s6 + $0x398] sm:$0xf] %v669_v38 }
  0xae   : > { %672 = vst [vmem:[%s9063_s6 + $0x39c] sm:$0xf] %v671_v39  ;;  %674 = vst [vmem:[%s9063_s6 + $0x3a0] sm:$0xf] %v673_v40  ;;  %v675_v41 = vld [vmem:[%s9059_s5 + $0xe90] sm:$0xf] }
  0xaf   : > { %v677_v42 = vld [vmem:[%s9059_s5 + $0xea0] sm:$0xf]  ;;  %v679_v43 = vld [vmem:[%s9059_s5 + $0xeb0] sm:$0xf]  ;;  %676 = vst [vmem:[%s9063_s6 + $0x3a4] sm:$0xf] %v675_v41 }
  0xb0   : > { %678 = vst [vmem:[%s9063_s6 + $0x3a8] sm:$0xf] %v677_v42  ;;  %680 = vst [vmem:[%s9063_s6 + $0x3ac] sm:$0xf] %v679_v43  ;;  %v681_v44 = vld [vmem:[%s9059_s5 + $0xec0] sm:$0xf] }
  0xb1   : > { %v683_v45 = vld [vmem:[%s9059_s5 + $0xed0] sm:$0xf]  ;;  %v685_v46 = vld [vmem:[%s9059_s5 + $0xee0] sm:$0xf]  ;;  %682 = vst [vmem:[%s9063_s6 + $0x3b0] sm:$0xf] %v681_v44 }
  0xb2   : > { %684 = vst [vmem:[%s9063_s6 + $0x3b4] sm:$0xf] %v683_v45  ;;  %686 = vst [vmem:[%s9063_s6 + $0x3b8] sm:$0xf] %v685_v46  ;;  %v687_v47 = vld [vmem:[%s9059_s5 + $0xef0] sm:$0xf] }
  0xb3   : > { %v689_v48 = vld [vmem:[%s9059_s5 + $0xf00] sm:$0xf]  ;;  %v691_v49 = vld [vmem:[%s9059_s5 + $0xf10] sm:$0xf]  ;;  %688 = vst [vmem:[%s9063_s6 + $0x3bc] sm:$0xf] %v687_v47 }
  0xb4   : > { %690 = vst [vmem:[%s9063_s6 + $0x3c0] sm:$0xf] %v689_v48  ;;  %692 = vst [vmem:[%s9063_s6 + $0x3c4] sm:$0xf] %v691_v49  ;;  %v693_v50 = vld [vmem:[%s9059_s5 + $0xf20] sm:$0xf] }
  0xb5   : > { %v695_v51 = vld [vmem:[%s9059_s5 + $0xf30] sm:$0xf]  ;;  %v697_v52 = vld [vmem:[%s9059_s5 + $0xf40] sm:$0xf]  ;;  %694 = vst [vmem:[%s9063_s6 + $0x3c8] sm:$0xf] %v693_v50 }
  0xb6   : > { %696 = vst [vmem:[%s9063_s6 + $0x3cc] sm:$0xf] %v695_v51  ;;  %698 = vst [vmem:[%s9063_s6 + $0x3d0] sm:$0xf] %v697_v52  ;;  %v699_v53 = vld [vmem:[%s9059_s5 + $0xf50] sm:$0xf] }
  0xb7   : > { %v701_v54 = vld [vmem:[%s9059_s5 + $0xf60] sm:$0xf]  ;;  %v703_v55 = vld [vmem:[%s9059_s5 + $0xf70] sm:$0xf]  ;;  %700 = vst [vmem:[%s9063_s6 + $0x3d4] sm:$0xf] %v699_v53 }
  0xb8   : > { %702 = vst [vmem:[%s9063_s6 + $0x3d8] sm:$0xf] %v701_v54  ;;  %704 = vst [vmem:[%s9063_s6 + $0x3dc] sm:$0xf] %v703_v55  ;;  %v705_v56 = vld [vmem:[%s9059_s5 + $0xf80] sm:$0xf] }
  0xb9   : > { %v707_v57 = vld [vmem:[%s9059_s5 + $0xf90] sm:$0xf]  ;;  %v709_v58 = vld [vmem:[%s9059_s5 + $0xfa0] sm:$0xf]  ;;  %706 = vst [vmem:[%s9063_s6 + $0x3e0] sm:$0xf] %v705_v56 }
  0xba   : > { %708 = vst [vmem:[%s9063_s6 + $0x3e4] sm:$0xf] %v707_v57  ;;  %710 = vst [vmem:[%s9063_s6 + $0x3e8] sm:$0xf] %v709_v58  ;;  %v711_v59 = vld [vmem:[%s9059_s5 + $0xfb0] sm:$0xf] }
  0xbb   : > { %v713_v60 = vld [vmem:[%s9059_s5 + $0xfc0] sm:$0xf]  ;;  %v715_v61 = vld [vmem:[%s9059_s5 + $0xfd0] sm:$0xf]  ;;  %712 = vst [vmem:[%s9063_s6 + $0x3ec] sm:$0xf] %v711_v59 }
  0xbc   : > { %714 = vst [vmem:[%s9063_s6 + $0x3f0] sm:$0xf] %v713_v60  ;;  %716 = vst [vmem:[%s9063_s6 + $0x3f4] sm:$0xf] %v715_v61  ;;  %v717_v62 = vld [vmem:[%s9059_s5 + $0xfe0] sm:$0xf] }
  0xbd   : > { %v719_v63 = vld [vmem:[%s9059_s5 + $0xff0] sm:$0xf]  ;;  %v721_v0 = vld [vmem:[%s9059_s5 + $0x1000] sm:$0xf]  ;;  %718 = vst [vmem:[%s9063_s6 + $0x3f8] sm:$0xf] %v717_v62 }
  0xbe   : > { %720 = vst [vmem:[%s9063_s6 + $0x3fc] sm:$0xf] %v719_v63  ;;  %722 = vst [vmem:[%s9063_s6 + $0x400] sm:$0xf] %v721_v0  ;;  %v723_v1 = vld [vmem:[%s9059_s5 + $0x1010] sm:$0xf] }
  0xbf   : > { %v725_v2 = vld [vmem:[%s9059_s5 + $0x1020] sm:$0xf]  ;;  %v727_v3 = vld [vmem:[%s9059_s5 + $0x1030] sm:$0xf]  ;;  %724 = vst [vmem:[%s9063_s6 + $0x404] sm:$0xf] %v723_v1 }
  0xc0   : > { %726 = vst [vmem:[%s9063_s6 + $0x408] sm:$0xf] %v725_v2  ;;  %728 = vst [vmem:[%s9063_s6 + $0x40c] sm:$0xf] %v727_v3  ;;  %v729_v4 = vld [vmem:[%s9059_s5 + $0x1040] sm:$0xf] }
  0xc1   : > { %v731_v5 = vld [vmem:[%s9059_s5 + $0x1050] sm:$0xf]  ;;  %v733_v6 = vld [vmem:[%s9059_s5 + $0x1060] sm:$0xf]  ;;  %730 = vst [vmem:[%s9063_s6 + $0x410] sm:$0xf] %v729_v4 }
  0xc2   : > { %732 = vst [vmem:[%s9063_s6 + $0x414] sm:$0xf] %v731_v5  ;;  %734 = vst [vmem:[%s9063_s6 + $0x418] sm:$0xf] %v733_v6  ;;  %v735_v7 = vld [vmem:[%s9059_s5 + $0x1070] sm:$0xf] }
  0xc3   : > { %v737_v8 = vld [vmem:[%s9059_s5 + $0x1080] sm:$0xf]  ;;  %v739_v9 = vld [vmem:[%s9059_s5 + $0x1090] sm:$0xf]  ;;  %736 = vst [vmem:[%s9063_s6 + $0x41c] sm:$0xf] %v735_v7 }
  0xc4   : > { %738 = vst [vmem:[%s9063_s6 + $0x420] sm:$0xf] %v737_v8  ;;  %740 = vst [vmem:[%s9063_s6 + $0x424] sm:$0xf] %v739_v9  ;;  %v741_v10 = vld [vmem:[%s9059_s5 + $0x10a0] sm:$0xf] }
  0xc5   : > { %v743_v11 = vld [vmem:[%s9059_s5 + $0x10b0] sm:$0xf]  ;;  %v745_v12 = vld [vmem:[%s9059_s5 + $0x10c0] sm:$0xf]  ;;  %742 = vst [vmem:[%s9063_s6 + $0x428] sm:$0xf] %v741_v10 }
  0xc6   : > { %744 = vst [vmem:[%s9063_s6 + $0x42c] sm:$0xf] %v743_v11  ;;  %746 = vst [vmem:[%s9063_s6 + $0x430] sm:$0xf] %v745_v12  ;;  %v747_v13 = vld [vmem:[%s9059_s5 + $0x10d0] sm:$0xf] }
  0xc7   : > { %v749_v14 = vld [vmem:[%s9059_s5 + $0x10e0] sm:$0xf]  ;;  %v751_v15 = vld [vmem:[%s9059_s5 + $0x10f0] sm:$0xf]  ;;  %748 = vst [vmem:[%s9063_s6 + $0x434] sm:$0xf] %v747_v13 }
  0xc8   : > { %750 = vst [vmem:[%s9063_s6 + $0x438] sm:$0xf] %v749_v14  ;;  %752 = vst [vmem:[%s9063_s6 + $0x43c] sm:$0xf] %v751_v15  ;;  %v753_v16 = vld [vmem:[%s9059_s5 + $0x1100] sm:$0xf] }
  0xc9   : > { %v755_v17 = vld [vmem:[%s9059_s5 + $0x1110] sm:$0xf]  ;;  %v757_v18 = vld [vmem:[%s9059_s5 + $0x1120] sm:$0xf]  ;;  %754 = vst [vmem:[%s9063_s6 + $0x440] sm:$0xf] %v753_v16 }
  0xca   : > { %756 = vst [vmem:[%s9063_s6 + $0x444] sm:$0xf] %v755_v17  ;;  %758 = vst [vmem:[%s9063_s6 + $0x448] sm:$0xf] %v757_v18  ;;  %v759_v19 = vld [vmem:[%s9059_s5 + $0x1130] sm:$0xf] }
  0xcb   : > { %v761_v20 = vld [vmem:[%s9059_s5 + $0x1140] sm:$0xf]  ;;  %v763_v21 = vld [vmem:[%s9059_s5 + $0x1150] sm:$0xf]  ;;  %760 = vst [vmem:[%s9063_s6 + $0x44c] sm:$0xf] %v759_v19 }
  0xcc   : > { %762 = vst [vmem:[%s9063_s6 + $0x450] sm:$0xf] %v761_v20  ;;  %764 = vst [vmem:[%s9063_s6 + $0x454] sm:$0xf] %v763_v21  ;;  %v765_v22 = vld [vmem:[%s9059_s5 + $0x1160] sm:$0xf] }
  0xcd   : > { %v767_v23 = vld [vmem:[%s9059_s5 + $0x1170] sm:$0xf]  ;;  %v769_v24 = vld [vmem:[%s9059_s5 + $0x1180] sm:$0xf]  ;;  %766 = vst [vmem:[%s9063_s6 + $0x458] sm:$0xf] %v765_v22 }
  0xce   : > { %768 = vst [vmem:[%s9063_s6 + $0x45c] sm:$0xf] %v767_v23  ;;  %770 = vst [vmem:[%s9063_s6 + $0x460] sm:$0xf] %v769_v24  ;;  %v771_v25 = vld [vmem:[%s9059_s5 + $0x1190] sm:$0xf] }
  0xcf   : > { %v773_v26 = vld [vmem:[%s9059_s5 + $0x11a0] sm:$0xf]  ;;  %v775_v27 = vld [vmem:[%s9059_s5 + $0x11b0] sm:$0xf]  ;;  %772 = vst [vmem:[%s9063_s6 + $0x464] sm:$0xf] %v771_v25 }
  0xd0   : > { %774 = vst [vmem:[%s9063_s6 + $0x468] sm:$0xf] %v773_v26  ;;  %776 = vst [vmem:[%s9063_s6 + $0x46c] sm:$0xf] %v775_v27  ;;  %v777_v28 = vld [vmem:[%s9059_s5 + $0x11c0] sm:$0xf] }
  0xd1   : > { %v779_v29 = vld [vmem:[%s9059_s5 + $0x11d0] sm:$0xf]  ;;  %v781_v30 = vld [vmem:[%s9059_s5 + $0x11e0] sm:$0xf]  ;;  %778 = vst [vmem:[%s9063_s6 + $0x470] sm:$0xf] %v777_v28 }
  0xd2   : > { %780 = vst [vmem:[%s9063_s6 + $0x474] sm:$0xf] %v779_v29  ;;  %782 = vst [vmem:[%s9063_s6 + $0x478] sm:$0xf] %v781_v30  ;;  %v783_v31 = vld [vmem:[%s9059_s5 + $0x11f0] sm:$0xf] }
  0xd3   : > { %v785_v32 = vld [vmem:[%s9059_s5 + $0x1200] sm:$0xf]  ;;  %v787_v33 = vld [vmem:[%s9059_s5 + $0x1210] sm:$0xf]  ;;  %784 = vst [vmem:[%s9063_s6 + $0x47c] sm:$0xf] %v783_v31 }
  0xd4   : > { %786 = vst [vmem:[%s9063_s6 + $0x480] sm:$0xf] %v785_v32  ;;  %788 = vst [vmem:[%s9063_s6 + $0x484] sm:$0xf] %v787_v33  ;;  %v789_v34 = vld [vmem:[%s9059_s5 + $0x1220] sm:$0xf] }
  0xd5   : > { %v791_v35 = vld [vmem:[%s9059_s5 + $0x1230] sm:$0xf]  ;;  %v793_v36 = vld [vmem:[%s9059_s5 + $0x1240] sm:$0xf]  ;;  %790 = vst [vmem:[%s9063_s6 + $0x488] sm:$0xf] %v789_v34 }
  0xd6   : > { %792 = vst [vmem:[%s9063_s6 + $0x48c] sm:$0xf] %v791_v35  ;;  %794 = vst [vmem:[%s9063_s6 + $0x490] sm:$0xf] %v793_v36  ;;  %v795_v37 = vld [vmem:[%s9059_s5 + $0x1250] sm:$0xf] }
  0xd7   : > { %v797_v38 = vld [vmem:[%s9059_s5 + $0x1260] sm:$0xf]  ;;  %v799_v39 = vld [vmem:[%s9059_s5 + $0x1270] sm:$0xf]  ;;  %796 = vst [vmem:[%s9063_s6 + $0x494] sm:$0xf] %v795_v37 }
  0xd8   : > { %798 = vst [vmem:[%s9063_s6 + $0x498] sm:$0xf] %v797_v38  ;;  %800 = vst [vmem:[%s9063_s6 + $0x49c] sm:$0xf] %v799_v39  ;;  %v801_v40 = vld [vmem:[%s9059_s5 + $0x1280] sm:$0xf] }
  0xd9   : > { %v803_v41 = vld [vmem:[%s9059_s5 + $0x1290] sm:$0xf]  ;;  %v805_v42 = vld [vmem:[%s9059_s5 + $0x12a0] sm:$0xf]  ;;  %802 = vst [vmem:[%s9063_s6 + $0x4a0] sm:$0xf] %v801_v40 }
  0xda   : > { %804 = vst [vmem:[%s9063_s6 + $0x4a4] sm:$0xf] %v803_v41  ;;  %806 = vst [vmem:[%s9063_s6 + $0x4a8] sm:$0xf] %v805_v42  ;;  %v807_v43 = vld [vmem:[%s9059_s5 + $0x12b0] sm:$0xf] }
  0xdb   : > { %v809_v44 = vld [vmem:[%s9059_s5 + $0x12c0] sm:$0xf]  ;;  %v811_v45 = vld [vmem:[%s9059_s5 + $0x12d0] sm:$0xf]  ;;  %808 = vst [vmem:[%s9063_s6 + $0x4ac] sm:$0xf] %v807_v43 }
  0xdc   : > { %810 = vst [vmem:[%s9063_s6 + $0x4b0] sm:$0xf] %v809_v44  ;;  %812 = vst [vmem:[%s9063_s6 + $0x4b4] sm:$0xf] %v811_v45  ;;  %v813_v46 = vld [vmem:[%s9059_s5 + $0x12e0] sm:$0xf] }
  0xdd   : > { %v815_v47 = vld [vmem:[%s9059_s5 + $0x12f0] sm:$0xf]  ;;  %v817_v48 = vld [vmem:[%s9059_s5 + $0x1300] sm:$0xf]  ;;  %814 = vst [vmem:[%s9063_s6 + $0x4b8] sm:$0xf] %v813_v46 }
  0xde   : > { %816 = vst [vmem:[%s9063_s6 + $0x4bc] sm:$0xf] %v815_v47  ;;  %818 = vst [vmem:[%s9063_s6 + $0x4c0] sm:$0xf] %v817_v48  ;;  %v819_v49 = vld [vmem:[%s9059_s5 + $0x1310] sm:$0xf] }
  0xdf   : > { %v821_v50 = vld [vmem:[%s9059_s5 + $0x1320] sm:$0xf]  ;;  %v823_v51 = vld [vmem:[%s9059_s5 + $0x1330] sm:$0xf]  ;;  %820 = vst [vmem:[%s9063_s6 + $0x4c4] sm:$0xf] %v819_v49 }
  0xe0   : > { %822 = vst [vmem:[%s9063_s6 + $0x4c8] sm:$0xf] %v821_v50  ;;  %824 = vst [vmem:[%s9063_s6 + $0x4cc] sm:$0xf] %v823_v51  ;;  %v825_v52 = vld [vmem:[%s9059_s5 + $0x1340] sm:$0xf] }
  0xe1   : > { %v827_v53 = vld [vmem:[%s9059_s5 + $0x1350] sm:$0xf]  ;;  %v829_v54 = vld [vmem:[%s9059_s5 + $0x1360] sm:$0xf]  ;;  %826 = vst [vmem:[%s9063_s6 + $0x4d0] sm:$0xf] %v825_v52 }
  0xe2   : > { %828 = vst [vmem:[%s9063_s6 + $0x4d4] sm:$0xf] %v827_v53  ;;  %830 = vst [vmem:[%s9063_s6 + $0x4d8] sm:$0xf] %v829_v54  ;;  %v831_v55 = vld [vmem:[%s9059_s5 + $0x1370] sm:$0xf] }
  0xe3   : > { %v833_v56 = vld [vmem:[%s9059_s5 + $0x1380] sm:$0xf]  ;;  %v835_v57 = vld [vmem:[%s9059_s5 + $0x1390] sm:$0xf]  ;;  %832 = vst [vmem:[%s9063_s6 + $0x4dc] sm:$0xf] %v831_v55 }
  0xe4   : > { %834 = vst [vmem:[%s9063_s6 + $0x4e0] sm:$0xf] %v833_v56  ;;  %836 = vst [vmem:[%s9063_s6 + $0x4e4] sm:$0xf] %v835_v57  ;;  %v837_v58 = vld [vmem:[%s9059_s5 + $0x13a0] sm:$0xf] }
  0xe5   : > { %v839_v59 = vld [vmem:[%s9059_s5 + $0x13b0] sm:$0xf]  ;;  %v841_v60 = vld [vmem:[%s9059_s5 + $0x13c0] sm:$0xf]  ;;  %838 = vst [vmem:[%s9063_s6 + $0x4e8] sm:$0xf] %v837_v58 }
  0xe6   : > { %840 = vst [vmem:[%s9063_s6 + $0x4ec] sm:$0xf] %v839_v59  ;;  %842 = vst [vmem:[%s9063_s6 + $0x4f0] sm:$0xf] %v841_v60  ;;  %v843_v61 = vld [vmem:[%s9059_s5 + $0x13d0] sm:$0xf] }
  0xe7   : > { %v845_v62 = vld [vmem:[%s9059_s5 + $0x13e0] sm:$0xf]  ;;  %v847_v63 = vld [vmem:[%s9059_s5 + $0x13f0] sm:$0xf]  ;;  %844 = vst [vmem:[%s9063_s6 + $0x4f4] sm:$0xf] %v843_v61 }
  0xe8   : > { %846 = vst [vmem:[%s9063_s6 + $0x4f8] sm:$0xf] %v845_v62  ;;  %848 = vst [vmem:[%s9063_s6 + $0x4fc] sm:$0xf] %v847_v63  ;;  %v849_v0 = vld [vmem:[%s9059_s5 + $0x1400] sm:$0xf] }
  0xe9   : > { %v851_v1 = vld [vmem:[%s9059_s5 + $0x1410] sm:$0xf]  ;;  %v853_v2 = vld [vmem:[%s9059_s5 + $0x1420] sm:$0xf]  ;;  %850 = vst [vmem:[%s9063_s6 + $0x500] sm:$0xf] %v849_v0 }
  0xea   : > { %852 = vst [vmem:[%s9063_s6 + $0x504] sm:$0xf] %v851_v1  ;;  %854 = vst [vmem:[%s9063_s6 + $0x508] sm:$0xf] %v853_v2  ;;  %v855_v3 = vld [vmem:[%s9059_s5 + $0x1430] sm:$0xf] }
  0xeb   : > { %v857_v4 = vld [vmem:[%s9059_s5 + $0x1440] sm:$0xf]  ;;  %v859_v5 = vld [vmem:[%s9059_s5 + $0x1450] sm:$0xf]  ;;  %856 = vst [vmem:[%s9063_s6 + $0x50c] sm:$0xf] %v855_v3 }
  0xec   : > { %858 = vst [vmem:[%s9063_s6 + $0x510] sm:$0xf] %v857_v4  ;;  %860 = vst [vmem:[%s9063_s6 + $0x514] sm:$0xf] %v859_v5  ;;  %v861_v6 = vld [vmem:[%s9059_s5 + $0x1460] sm:$0xf] }
  0xed   : > { %v863_v7 = vld [vmem:[%s9059_s5 + $0x1470] sm:$0xf]  ;;  %v865_v8 = vld [vmem:[%s9059_s5 + $0x1480] sm:$0xf]  ;;  %862 = vst [vmem:[%s9063_s6 + $0x518] sm:$0xf] %v861_v6 }
  0xee   : > { %864 = vst [vmem:[%s9063_s6 + $0x51c] sm:$0xf] %v863_v7  ;;  %866 = vst [vmem:[%s9063_s6 + $0x520] sm:$0xf] %v865_v8  ;;  %v867_v9 = vld [vmem:[%s9059_s5 + $0x1490] sm:$0xf] }
  0xef   : > { %v869_v10 = vld [vmem:[%s9059_s5 + $0x14a0] sm:$0xf]  ;;  %v871_v11 = vld [vmem:[%s9059_s5 + $0x14b0] sm:$0xf]  ;;  %868 = vst [vmem:[%s9063_s6 + $0x524] sm:$0xf] %v867_v9 }
  0xf0   : > { %870 = vst [vmem:[%s9063_s6 + $0x528] sm:$0xf] %v869_v10  ;;  %872 = vst [vmem:[%s9063_s6 + $0x52c] sm:$0xf] %v871_v11  ;;  %v873_v12 = vld [vmem:[%s9059_s5 + $0x14c0] sm:$0xf] }
  0xf1   : > { %v875_v13 = vld [vmem:[%s9059_s5 + $0x14d0] sm:$0xf]  ;;  %v877_v14 = vld [vmem:[%s9059_s5 + $0x14e0] sm:$0xf]  ;;  %874 = vst [vmem:[%s9063_s6 + $0x530] sm:$0xf] %v873_v12 }
  0xf2   : > { %876 = vst [vmem:[%s9063_s6 + $0x534] sm:$0xf] %v875_v13  ;;  %878 = vst [vmem:[%s9063_s6 + $0x538] sm:$0xf] %v877_v14  ;;  %v879_v15 = vld [vmem:[%s9059_s5 + $0x14f0] sm:$0xf] }
  0xf3   : > { %v881_v16 = vld [vmem:[%s9059_s5 + $0x1500] sm:$0xf]  ;;  %v883_v17 = vld [vmem:[%s9059_s5 + $0x1510] sm:$0xf]  ;;  %880 = vst [vmem:[%s9063_s6 + $0x53c] sm:$0xf] %v879_v15 }
  0xf4   : > { %882 = vst [vmem:[%s9063_s6 + $0x540] sm:$0xf] %v881_v16  ;;  %884 = vst [vmem:[%s9063_s6 + $0x544] sm:$0xf] %v883_v17  ;;  %v885_v18 = vld [vmem:[%s9059_s5 + $0x1520] sm:$0xf] }
  0xf5   : > { %v887_v19 = vld [vmem:[%s9059_s5 + $0x1530] sm:$0xf]  ;;  %v889_v20 = vld [vmem:[%s9059_s5 + $0x1540] sm:$0xf]  ;;  %886 = vst [vmem:[%s9063_s6 + $0x548] sm:$0xf] %v885_v18 }
  0xf6   : > { %888 = vst [vmem:[%s9063_s6 + $0x54c] sm:$0xf] %v887_v19  ;;  %890 = vst [vmem:[%s9063_s6 + $0x550] sm:$0xf] %v889_v20  ;;  %v891_v21 = vld [vmem:[%s9059_s5 + $0x1550] sm:$0xf] }
  0xf7   : > { %v893_v22 = vld [vmem:[%s9059_s5 + $0x1560] sm:$0xf]  ;;  %v895_v23 = vld [vmem:[%s9059_s5 + $0x1570] sm:$0xf]  ;;  %892 = vst [vmem:[%s9063_s6 + $0x554] sm:$0xf] %v891_v21 }
  0xf8   : > { %894 = vst [vmem:[%s9063_s6 + $0x558] sm:$0xf] %v893_v22  ;;  %896 = vst [vmem:[%s9063_s6 + $0x55c] sm:$0xf] %v895_v23  ;;  %v897_v24 = vld [vmem:[%s9059_s5 + $0x1580] sm:$0xf] }
  0xf9   : > { %v899_v25 = vld [vmem:[%s9059_s5 + $0x1590] sm:$0xf]  ;;  %v901_v26 = vld [vmem:[%s9059_s5 + $0x15a0] sm:$0xf]  ;;  %898 = vst [vmem:[%s9063_s6 + $0x560] sm:$0xf] %v897_v24 }
  0xfa   : > { %900 = vst [vmem:[%s9063_s6 + $0x564] sm:$0xf] %v899_v25  ;;  %902 = vst [vmem:[%s9063_s6 + $0x568] sm:$0xf] %v901_v26  ;;  %v903_v27 = vld [vmem:[%s9059_s5 + $0x15b0] sm:$0xf] }
  0xfb   : > { %v905_v28 = vld [vmem:[%s9059_s5 + $0x15c0] sm:$0xf]  ;;  %v907_v29 = vld [vmem:[%s9059_s5 + $0x15d0] sm:$0xf]  ;;  %904 = vst [vmem:[%s9063_s6 + $0x56c] sm:$0xf] %v903_v27 }
  0xfc   : > { %906 = vst [vmem:[%s9063_s6 + $0x570] sm:$0xf] %v905_v28  ;;  %908 = vst [vmem:[%s9063_s6 + $0x574] sm:$0xf] %v907_v29  ;;  %v909_v30 = vld [vmem:[%s9059_s5 + $0x15e0] sm:$0xf] }
  0xfd   : > { %v911_v31 = vld [vmem:[%s9059_s5 + $0x15f0] sm:$0xf]  ;;  %v913_v32 = vld [vmem:[%s9059_s5 + $0x1600] sm:$0xf]  ;;  %910 = vst [vmem:[%s9063_s6 + $0x578] sm:$0xf] %v909_v30 }
  0xfe   : > { %912 = vst [vmem:[%s9063_s6 + $0x57c] sm:$0xf] %v911_v31  ;;  %914 = vst [vmem:[%s9063_s6 + $0x580] sm:$0xf] %v913_v32  ;;  %v915_v33 = vld [vmem:[%s9059_s5 + $0x1610] sm:$0xf] }
  0xff   : > { %v917_v34 = vld [vmem:[%s9059_s5 + $0x1620] sm:$0xf]  ;;  %v919_v35 = vld [vmem:[%s9059_s5 + $0x1630] sm:$0xf]  ;;  %916 = vst [vmem:[%s9063_s6 + $0x584] sm:$0xf] %v915_v33 }
 0x100   : > { %918 = vst [vmem:[%s9063_s6 + $0x588] sm:$0xf] %v917_v34  ;;  %920 = vst [vmem:[%s9063_s6 + $0x58c] sm:$0xf] %v919_v35  ;;  %v921_v36 = vld [vmem:[%s9059_s5 + $0x1640] sm:$0xf] }
 0x101   : > { %v923_v37 = vld [vmem:[%s9059_s5 + $0x1650] sm:$0xf]  ;;  %v925_v38 = vld [vmem:[%s9059_s5 + $0x1660] sm:$0xf]  ;;  %922 = vst [vmem:[%s9063_s6 + $0x590] sm:$0xf] %v921_v36 }
 0x102   : > { %924 = vst [vmem:[%s9063_s6 + $0x594] sm:$0xf] %v923_v37  ;;  %926 = vst [vmem:[%s9063_s6 + $0x598] sm:$0xf] %v925_v38  ;;  %v927_v39 = vld [vmem:[%s9059_s5 + $0x1670] sm:$0xf] }
 0x103   : > { %v929_v40 = vld [vmem:[%s9059_s5 + $0x1680] sm:$0xf]  ;;  %v931_v41 = vld [vmem:[%s9059_s5 + $0x1690] sm:$0xf]  ;;  %928 = vst [vmem:[%s9063_s6 + $0x59c] sm:$0xf] %v927_v39 }
 0x104   : > { %930 = vst [vmem:[%s9063_s6 + $0x5a0] sm:$0xf] %v929_v40  ;;  %932 = vst [vmem:[%s9063_s6 + $0x5a4] sm:$0xf] %v931_v41  ;;  %v933_v42 = vld [vmem:[%s9059_s5 + $0x16a0] sm:$0xf] }
 0x105   : > { %v935_v43 = vld [vmem:[%s9059_s5 + $0x16b0] sm:$0xf]  ;;  %v937_v44 = vld [vmem:[%s9059_s5 + $0x16c0] sm:$0xf]  ;;  %934 = vst [vmem:[%s9063_s6 + $0x5a8] sm:$0xf] %v933_v42 }
 0x106   : > { %936 = vst [vmem:[%s9063_s6 + $0x5ac] sm:$0xf] %v935_v43  ;;  %938 = vst [vmem:[%s9063_s6 + $0x5b0] sm:$0xf] %v937_v44  ;;  %v939_v45 = vld [vmem:[%s9059_s5 + $0x16d0] sm:$0xf] }
 0x107   : > { %v941_v46 = vld [vmem:[%s9059_s5 + $0x16e0] sm:$0xf]  ;;  %v943_v47 = vld [vmem:[%s9059_s5 + $0x16f0] sm:$0xf]  ;;  %940 = vst [vmem:[%s9063_s6 + $0x5b4] sm:$0xf] %v939_v45 }
 0x108   : > { %942 = vst [vmem:[%s9063_s6 + $0x5b8] sm:$0xf] %v941_v46  ;;  %944 = vst [vmem:[%s9063_s6 + $0x5bc] sm:$0xf] %v943_v47  ;;  %v945_v48 = vld [vmem:[%s9059_s5 + $0x1700] sm:$0xf] }
 0x109   : > { %v947_v49 = vld [vmem:[%s9059_s5 + $0x1710] sm:$0xf]  ;;  %v949_v50 = vld [vmem:[%s9059_s5 + $0x1720] sm:$0xf]  ;;  %946 = vst [vmem:[%s9063_s6 + $0x5c0] sm:$0xf] %v945_v48 }
 0x10a   : > { %948 = vst [vmem:[%s9063_s6 + $0x5c4] sm:$0xf] %v947_v49  ;;  %950 = vst [vmem:[%s9063_s6 + $0x5c8] sm:$0xf] %v949_v50  ;;  %v951_v51 = vld [vmem:[%s9059_s5 + $0x1730] sm:$0xf] }
 0x10b   : > { %v953_v52 = vld [vmem:[%s9059_s5 + $0x1740] sm:$0xf]  ;;  %v955_v53 = vld [vmem:[%s9059_s5 + $0x1750] sm:$0xf]  ;;  %952 = vst [vmem:[%s9063_s6 + $0x5cc] sm:$0xf] %v951_v51 }
 0x10c   : > { %954 = vst [vmem:[%s9063_s6 + $0x5d0] sm:$0xf] %v953_v52  ;;  %956 = vst [vmem:[%s9063_s6 + $0x5d4] sm:$0xf] %v955_v53  ;;  %v957_v54 = vld [vmem:[%s9059_s5 + $0x1760] sm:$0xf] }
 0x10d   : > { %v959_v55 = vld [vmem:[%s9059_s5 + $0x1770] sm:$0xf]  ;;  %v961_v56 = vld [vmem:[%s9059_s5 + $0x1780] sm:$0xf]  ;;  %958 = vst [vmem:[%s9063_s6 + $0x5d8] sm:$0xf] %v957_v54 }
 0x10e   : > { %960 = vst [vmem:[%s9063_s6 + $0x5dc] sm:$0xf] %v959_v55  ;;  %962 = vst [vmem:[%s9063_s6 + $0x5e0] sm:$0xf] %v961_v56  ;;  %v963_v57 = vld [vmem:[%s9059_s5 + $0x1790] sm:$0xf] }
 0x10f   : > { %v965_v58 = vld [vmem:[%s9059_s5 + $0x17a0] sm:$0xf]  ;;  %v967_v59 = vld [vmem:[%s9059_s5 + $0x17b0] sm:$0xf]  ;;  %964 = vst [vmem:[%s9063_s6 + $0x5e4] sm:$0xf] %v963_v57 }
 0x110   : > { %966 = vst [vmem:[%s9063_s6 + $0x5e8] sm:$0xf] %v965_v58  ;;  %968 = vst [vmem:[%s9063_s6 + $0x5ec] sm:$0xf] %v967_v59  ;;  %v969_v60 = vld [vmem:[%s9059_s5 + $0x17c0] sm:$0xf] }
 0x111   : > { %v971_v61 = vld [vmem:[%s9059_s5 + $0x17d0] sm:$0xf]  ;;  %v973_v62 = vld [vmem:[%s9059_s5 + $0x17e0] sm:$0xf]  ;;  %970 = vst [vmem:[%s9063_s6 + $0x5f0] sm:$0xf] %v969_v60 }
 0x112   : > { %972 = vst [vmem:[%s9063_s6 + $0x5f4] sm:$0xf] %v971_v61  ;;  %974 = vst [vmem:[%s9063_s6 + $0x5f8] sm:$0xf] %v973_v62  ;;  %v975_v63 = vld [vmem:[%s9059_s5 + $0x17f0] sm:$0xf] }
 0x113   : > { %v977_v0 = vld [vmem:[%s9059_s5 + $0x1800] sm:$0xf]  ;;  %v979_v1 = vld [vmem:[%s9059_s5 + $0x1810] sm:$0xf]  ;;  %976 = vst [vmem:[%s9063_s6 + $0x5fc] sm:$0xf] %v975_v63 }
 0x114   : > { %978 = vst [vmem:[%s9063_s6 + $0x600] sm:$0xf] %v977_v0  ;;  %980 = vst [vmem:[%s9063_s6 + $0x604] sm:$0xf] %v979_v1  ;;  %v981_v2 = vld [vmem:[%s9059_s5 + $0x1820] sm:$0xf] }
 0x115   : > { %v983_v3 = vld [vmem:[%s9059_s5 + $0x1830] sm:$0xf]  ;;  %v985_v4 = vld [vmem:[%s9059_s5 + $0x1840] sm:$0xf]  ;;  %982 = vst [vmem:[%s9063_s6 + $0x608] sm:$0xf] %v981_v2 }
 0x116   : > { %984 = vst [vmem:[%s9063_s6 + $0x60c] sm:$0xf] %v983_v3  ;;  %986 = vst [vmem:[%s9063_s6 + $0x610] sm:$0xf] %v985_v4  ;;  %v987_v5 = vld [vmem:[%s9059_s5 + $0x1850] sm:$0xf] }
 0x117   : > { %v989_v6 = vld [vmem:[%s9059_s5 + $0x1860] sm:$0xf]  ;;  %v991_v7 = vld [vmem:[%s9059_s5 + $0x1870] sm:$0xf]  ;;  %988 = vst [vmem:[%s9063_s6 + $0x614] sm:$0xf] %v987_v5 }
 0x118   : > { %990 = vst [vmem:[%s9063_s6 + $0x618] sm:$0xf] %v989_v6  ;;  %992 = vst [vmem:[%s9063_s6 + $0x61c] sm:$0xf] %v991_v7  ;;  %v993_v8 = vld [vmem:[%s9059_s5 + $0x1880] sm:$0xf] }
 0x119   : > { %v995_v9 = vld [vmem:[%s9059_s5 + $0x1890] sm:$0xf]  ;;  %v997_v10 = vld [vmem:[%s9059_s5 + $0x18a0] sm:$0xf]  ;;  %994 = vst [vmem:[%s9063_s6 + $0x620] sm:$0xf] %v993_v8 }
 0x11a   : > { %996 = vst [vmem:[%s9063_s6 + $0x624] sm:$0xf] %v995_v9  ;;  %998 = vst [vmem:[%s9063_s6 + $0x628] sm:$0xf] %v997_v10  ;;  %v999_v11 = vld [vmem:[%s9059_s5 + $0x18b0] sm:$0xf] }
 0x11b   : > { %v1001_v12 = vld [vmem:[%s9059_s5 + $0x18c0] sm:$0xf]  ;;  %v1003_v13 = vld [vmem:[%s9059_s5 + $0x18d0] sm:$0xf]  ;;  %1000 = vst [vmem:[%s9063_s6 + $0x62c] sm:$0xf] %v999_v11 }
 0x11c   : > { %1002 = vst [vmem:[%s9063_s6 + $0x630] sm:$0xf] %v1001_v12  ;;  %1004 = vst [vmem:[%s9063_s6 + $0x634] sm:$0xf] %v1003_v13  ;;  %v1005_v14 = vld [vmem:[%s9059_s5 + $0x18e0] sm:$0xf] }
 0x11d   : > { %v1007_v15 = vld [vmem:[%s9059_s5 + $0x18f0] sm:$0xf]  ;;  %v1009_v16 = vld [vmem:[%s9059_s5 + $0x1900] sm:$0xf]  ;;  %1006 = vst [vmem:[%s9063_s6 + $0x638] sm:$0xf] %v1005_v14 }
 0x11e   : > { %1008 = vst [vmem:[%s9063_s6 + $0x63c] sm:$0xf] %v1007_v15  ;;  %1010 = vst [vmem:[%s9063_s6 + $0x640] sm:$0xf] %v1009_v16  ;;  %v1011_v17 = vld [vmem:[%s9059_s5 + $0x1910] sm:$0xf] }
 0x11f   : > { %v1013_v18 = vld [vmem:[%s9059_s5 + $0x1920] sm:$0xf]  ;;  %v1015_v19 = vld [vmem:[%s9059_s5 + $0x1930] sm:$0xf]  ;;  %1012 = vst [vmem:[%s9063_s6 + $0x644] sm:$0xf] %v1011_v17 }
 0x120   : > { %1014 = vst [vmem:[%s9063_s6 + $0x648] sm:$0xf] %v1013_v18  ;;  %1016 = vst [vmem:[%s9063_s6 + $0x64c] sm:$0xf] %v1015_v19  ;;  %v1017_v20 = vld [vmem:[%s9059_s5 + $0x1940] sm:$0xf] }
 0x121   : > { %v1019_v21 = vld [vmem:[%s9059_s5 + $0x1950] sm:$0xf]  ;;  %v1021_v22 = vld [vmem:[%s9059_s5 + $0x1960] sm:$0xf]  ;;  %1018 = vst [vmem:[%s9063_s6 + $0x650] sm:$0xf] %v1017_v20 }
 0x122   : > { %1020 = vst [vmem:[%s9063_s6 + $0x654] sm:$0xf] %v1019_v21  ;;  %1022 = vst [vmem:[%s9063_s6 + $0x658] sm:$0xf] %v1021_v22  ;;  %v1023_v23 = vld [vmem:[%s9059_s5 + $0x1970] sm:$0xf] }
 0x123   : > { %v1025_v24 = vld [vmem:[%s9059_s5 + $0x1980] sm:$0xf]  ;;  %v1027_v25 = vld [vmem:[%s9059_s5 + $0x1990] sm:$0xf]  ;;  %1024 = vst [vmem:[%s9063_s6 + $0x65c] sm:$0xf] %v1023_v23 }
 0x124   : > { %1026 = vst [vmem:[%s9063_s6 + $0x660] sm:$0xf] %v1025_v24  ;;  %1028 = vst [vmem:[%s9063_s6 + $0x664] sm:$0xf] %v1027_v25  ;;  %v1029_v26 = vld [vmem:[%s9059_s5 + $0x19a0] sm:$0xf] }
 0x125   : > { %v1031_v27 = vld [vmem:[%s9059_s5 + $0x19b0] sm:$0xf]  ;;  %v1033_v28 = vld [vmem:[%s9059_s5 + $0x19c0] sm:$0xf]  ;;  %1030 = vst [vmem:[%s9063_s6 + $0x668] sm:$0xf] %v1029_v26 }
 0x126   : > { %1032 = vst [vmem:[%s9063_s6 + $0x66c] sm:$0xf] %v1031_v27  ;;  %1034 = vst [vmem:[%s9063_s6 + $0x670] sm:$0xf] %v1033_v28  ;;  %v1035_v29 = vld [vmem:[%s9059_s5 + $0x19d0] sm:$0xf] }
 0x127   : > { %v1037_v30 = vld [vmem:[%s9059_s5 + $0x19e0] sm:$0xf]  ;;  %v1039_v31 = vld [vmem:[%s9059_s5 + $0x19f0] sm:$0xf]  ;;  %1036 = vst [vmem:[%s9063_s6 + $0x674] sm:$0xf] %v1035_v29 }
 0x128   : > { %1038 = vst [vmem:[%s9063_s6 + $0x678] sm:$0xf] %v1037_v30  ;;  %1040 = vst [vmem:[%s9063_s6 + $0x67c] sm:$0xf] %v1039_v31  ;;  %v1041_v32 = vld [vmem:[%s9059_s5 + $0x1a00] sm:$0xf] }
 0x129   : > { %v1043_v33 = vld [vmem:[%s9059_s5 + $0x1a10] sm:$0xf]  ;;  %v1045_v34 = vld [vmem:[%s9059_s5 + $0x1a20] sm:$0xf]  ;;  %1042 = vst [vmem:[%s9063_s6 + $0x680] sm:$0xf] %v1041_v32 }
 0x12a   : > { %1044 = vst [vmem:[%s9063_s6 + $0x684] sm:$0xf] %v1043_v33  ;;  %1046 = vst [vmem:[%s9063_s6 + $0x688] sm:$0xf] %v1045_v34  ;;  %v1047_v35 = vld [vmem:[%s9059_s5 + $0x1a30] sm:$0xf] }
 0x12b   : > { %v1049_v36 = vld [vmem:[%s9059_s5 + $0x1a40] sm:$0xf]  ;;  %v1051_v37 = vld [vmem:[%s9059_s5 + $0x1a50] sm:$0xf]  ;;  %1048 = vst [vmem:[%s9063_s6 + $0x68c] sm:$0xf] %v1047_v35 }
 0x12c   : > { %1050 = vst [vmem:[%s9063_s6 + $0x690] sm:$0xf] %v1049_v36  ;;  %1052 = vst [vmem:[%s9063_s6 + $0x694] sm:$0xf] %v1051_v37  ;;  %v1053_v38 = vld [vmem:[%s9059_s5 + $0x1a60] sm:$0xf] }
 0x12d   : > { %v1055_v39 = vld [vmem:[%s9059_s5 + $0x1a70] sm:$0xf]  ;;  %v1057_v40 = vld [vmem:[%s9059_s5 + $0x1a80] sm:$0xf]  ;;  %1054 = vst [vmem:[%s9063_s6 + $0x698] sm:$0xf] %v1053_v38 }
 0x12e   : > { %1056 = vst [vmem:[%s9063_s6 + $0x69c] sm:$0xf] %v1055_v39  ;;  %1058 = vst [vmem:[%s9063_s6 + $0x6a0] sm:$0xf] %v1057_v40  ;;  %v1059_v41 = vld [vmem:[%s9059_s5 + $0x1a90] sm:$0xf] }
 0x12f   : > { %v1061_v42 = vld [vmem:[%s9059_s5 + $0x1aa0] sm:$0xf]  ;;  %v1063_v43 = vld [vmem:[%s9059_s5 + $0x1ab0] sm:$0xf]  ;;  %1060 = vst [vmem:[%s9063_s6 + $0x6a4] sm:$0xf] %v1059_v41 }
 0x130   : > { %1062 = vst [vmem:[%s9063_s6 + $0x6a8] sm:$0xf] %v1061_v42  ;;  %1064 = vst [vmem:[%s9063_s6 + $0x6ac] sm:$0xf] %v1063_v43  ;;  %v1065_v44 = vld [vmem:[%s9059_s5 + $0x1ac0] sm:$0xf] }
 0x131   : > { %v1067_v45 = vld [vmem:[%s9059_s5 + $0x1ad0] sm:$0xf]  ;;  %v1069_v46 = vld [vmem:[%s9059_s5 + $0x1ae0] sm:$0xf]  ;;  %1066 = vst [vmem:[%s9063_s6 + $0x6b0] sm:$0xf] %v1065_v44 }
 0x132   : > { %1068 = vst [vmem:[%s9063_s6 + $0x6b4] sm:$0xf] %v1067_v45  ;;  %1070 = vst [vmem:[%s9063_s6 + $0x6b8] sm:$0xf] %v1069_v46  ;;  %v1071_v47 = vld [vmem:[%s9059_s5 + $0x1af0] sm:$0xf] }
 0x133   : > { %v1073_v48 = vld [vmem:[%s9059_s5 + $0x1b00] sm:$0xf]  ;;  %v1075_v49 = vld [vmem:[%s9059_s5 + $0x1b10] sm:$0xf]  ;;  %1072 = vst [vmem:[%s9063_s6 + $0x6bc] sm:$0xf] %v1071_v47 }
 0x134   : > { %1074 = vst [vmem:[%s9063_s6 + $0x6c0] sm:$0xf] %v1073_v48  ;;  %1076 = vst [vmem:[%s9063_s6 + $0x6c4] sm:$0xf] %v1075_v49  ;;  %v1077_v50 = vld [vmem:[%s9059_s5 + $0x1b20] sm:$0xf] }
 0x135   : > { %v1079_v51 = vld [vmem:[%s9059_s5 + $0x1b30] sm:$0xf]  ;;  %v1081_v52 = vld [vmem:[%s9059_s5 + $0x1b40] sm:$0xf]  ;;  %1078 = vst [vmem:[%s9063_s6 + $0x6c8] sm:$0xf] %v1077_v50 }
 0x136   : > { %1080 = vst [vmem:[%s9063_s6 + $0x6cc] sm:$0xf] %v1079_v51  ;;  %1082 = vst [vmem:[%s9063_s6 + $0x6d0] sm:$0xf] %v1081_v52  ;;  %v1083_v53 = vld [vmem:[%s9059_s5 + $0x1b50] sm:$0xf] }
 0x137   : > { %v1085_v54 = vld [vmem:[%s9059_s5 + $0x1b60] sm:$0xf]  ;;  %v1087_v55 = vld [vmem:[%s9059_s5 + $0x1b70] sm:$0xf]  ;;  %1084 = vst [vmem:[%s9063_s6 + $0x6d4] sm:$0xf] %v1083_v53 }
 0x138   : > { %1086 = vst [vmem:[%s9063_s6 + $0x6d8] sm:$0xf] %v1085_v54  ;;  %1088 = vst [vmem:[%s9063_s6 + $0x6dc] sm:$0xf] %v1087_v55  ;;  %v1089_v56 = vld [vmem:[%s9059_s5 + $0x1b80] sm:$0xf] }
 0x139   : > { %v1091_v57 = vld [vmem:[%s9059_s5 + $0x1b90] sm:$0xf]  ;;  %v1093_v58 = vld [vmem:[%s9059_s5 + $0x1ba0] sm:$0xf]  ;;  %1090 = vst [vmem:[%s9063_s6 + $0x6e0] sm:$0xf] %v1089_v56 }
 0x13a   : > { %1092 = vst [vmem:[%s9063_s6 + $0x6e4] sm:$0xf] %v1091_v57  ;;  %1094 = vst [vmem:[%s9063_s6 + $0x6e8] sm:$0xf] %v1093_v58  ;;  %v1095_v59 = vld [vmem:[%s9059_s5 + $0x1bb0] sm:$0xf] }
 0x13b   : > { %v1097_v60 = vld [vmem:[%s9059_s5 + $0x1bc0] sm:$0xf]  ;;  %v1099_v61 = vld [vmem:[%s9059_s5 + $0x1bd0] sm:$0xf]  ;;  %1096 = vst [vmem:[%s9063_s6 + $0x6ec] sm:$0xf] %v1095_v59 }
 0x13c   : > { %1098 = vst [vmem:[%s9063_s6 + $0x6f0] sm:$0xf] %v1097_v60  ;;  %1100 = vst [vmem:[%s9063_s6 + $0x6f4] sm:$0xf] %v1099_v61  ;;  %v1101_v62 = vld [vmem:[%s9059_s5 + $0x1be0] sm:$0xf] }
 0x13d   : > { %v1103_v63 = vld [vmem:[%s9059_s5 + $0x1bf0] sm:$0xf]  ;;  %v1105_v0 = vld [vmem:[%s9059_s5 + $0x1c00] sm:$0xf]  ;;  %1102 = vst [vmem:[%s9063_s6 + $0x6f8] sm:$0xf] %v1101_v62 }
 0x13e   : > { %1104 = vst [vmem:[%s9063_s6 + $0x6fc] sm:$0xf] %v1103_v63  ;;  %1106 = vst [vmem:[%s9063_s6 + $0x700] sm:$0xf] %v1105_v0  ;;  %v1107_v1 = vld [vmem:[%s9059_s5 + $0x1c10] sm:$0xf] }
 0x13f   : > { %v1109_v2 = vld [vmem:[%s9059_s5 + $0x1c20] sm:$0xf]  ;;  %v1111_v3 = vld [vmem:[%s9059_s5 + $0x1c30] sm:$0xf]  ;;  %1108 = vst [vmem:[%s9063_s6 + $0x704] sm:$0xf] %v1107_v1 }
 0x140   : > { %1110 = vst [vmem:[%s9063_s6 + $0x708] sm:$0xf] %v1109_v2  ;;  %1112 = vst [vmem:[%s9063_s6 + $0x70c] sm:$0xf] %v1111_v3  ;;  %v1113_v4 = vld [vmem:[%s9059_s5 + $0x1c40] sm:$0xf] }
 0x141   : > { %v1115_v5 = vld [vmem:[%s9059_s5 + $0x1c50] sm:$0xf]  ;;  %v1117_v6 = vld [vmem:[%s9059_s5 + $0x1c60] sm:$0xf]  ;;  %1114 = vst [vmem:[%s9063_s6 + $0x710] sm:$0xf] %v1113_v4 }
 0x142   : > { %1116 = vst [vmem:[%s9063_s6 + $0x714] sm:$0xf] %v1115_v5  ;;  %1118 = vst [vmem:[%s9063_s6 + $0x718] sm:$0xf] %v1117_v6  ;;  %v1119_v7 = vld [vmem:[%s9059_s5 + $0x1c70] sm:$0xf] }
 0x143   : > { %v1121_v8 = vld [vmem:[%s9059_s5 + $0x1c80] sm:$0xf]  ;;  %v1123_v9 = vld [vmem:[%s9059_s5 + $0x1c90] sm:$0xf]  ;;  %1120 = vst [vmem:[%s9063_s6 + $0x71c] sm:$0xf] %v1119_v7 }
 0x144   : > { %1122 = vst [vmem:[%s9063_s6 + $0x720] sm:$0xf] %v1121_v8  ;;  %1124 = vst [vmem:[%s9063_s6 + $0x724] sm:$0xf] %v1123_v9  ;;  %v1125_v10 = vld [vmem:[%s9059_s5 + $0x1ca0] sm:$0xf] }
 0x145   : > { %v1127_v11 = vld [vmem:[%s9059_s5 + $0x1cb0] sm:$0xf]  ;;  %v1129_v12 = vld [vmem:[%s9059_s5 + $0x1cc0] sm:$0xf]  ;;  %1126 = vst [vmem:[%s9063_s6 + $0x728] sm:$0xf] %v1125_v10 }
 0x146   : > { %1128 = vst [vmem:[%s9063_s6 + $0x72c] sm:$0xf] %v1127_v11  ;;  %1130 = vst [vmem:[%s9063_s6 + $0x730] sm:$0xf] %v1129_v12  ;;  %v1131_v13 = vld [vmem:[%s9059_s5 + $0x1cd0] sm:$0xf] }
 0x147   : > { %v1133_v14 = vld [vmem:[%s9059_s5 + $0x1ce0] sm:$0xf]  ;;  %v1135_v15 = vld [vmem:[%s9059_s5 + $0x1cf0] sm:$0xf]  ;;  %1132 = vst [vmem:[%s9063_s6 + $0x734] sm:$0xf] %v1131_v13 }
 0x148   : > { %1134 = vst [vmem:[%s9063_s6 + $0x738] sm:$0xf] %v1133_v14  ;;  %1136 = vst [vmem:[%s9063_s6 + $0x73c] sm:$0xf] %v1135_v15  ;;  %v1137_v16 = vld [vmem:[%s9059_s5 + $0x1d00] sm:$0xf] }
 0x149   : > { %v1139_v17 = vld [vmem:[%s9059_s5 + $0x1d10] sm:$0xf]  ;;  %v1141_v18 = vld [vmem:[%s9059_s5 + $0x1d20] sm:$0xf]  ;;  %1138 = vst [vmem:[%s9063_s6 + $0x740] sm:$0xf] %v1137_v16 }
 0x14a   : > { %1140 = vst [vmem:[%s9063_s6 + $0x744] sm:$0xf] %v1139_v17  ;;  %1142 = vst [vmem:[%s9063_s6 + $0x748] sm:$0xf] %v1141_v18  ;;  %v1143_v19 = vld [vmem:[%s9059_s5 + $0x1d30] sm:$0xf] }
 0x14b   : > { %v1145_v20 = vld [vmem:[%s9059_s5 + $0x1d40] sm:$0xf]  ;;  %v1147_v21 = vld [vmem:[%s9059_s5 + $0x1d50] sm:$0xf]  ;;  %1144 = vst [vmem:[%s9063_s6 + $0x74c] sm:$0xf] %v1143_v19 }
 0x14c   : > { %1146 = vst [vmem:[%s9063_s6 + $0x750] sm:$0xf] %v1145_v20  ;;  %1148 = vst [vmem:[%s9063_s6 + $0x754] sm:$0xf] %v1147_v21  ;;  %v1149_v22 = vld [vmem:[%s9059_s5 + $0x1d60] sm:$0xf] }
 0x14d   : > { %v1151_v23 = vld [vmem:[%s9059_s5 + $0x1d70] sm:$0xf]  ;;  %v1153_v24 = vld [vmem:[%s9059_s5 + $0x1d80] sm:$0xf]  ;;  %1150 = vst [vmem:[%s9063_s6 + $0x758] sm:$0xf] %v1149_v22 }
 0x14e   : > { %1152 = vst [vmem:[%s9063_s6 + $0x75c] sm:$0xf] %v1151_v23  ;;  %1154 = vst [vmem:[%s9063_s6 + $0x760] sm:$0xf] %v1153_v24  ;;  %v1155_v25 = vld [vmem:[%s9059_s5 + $0x1d90] sm:$0xf] }
 0x14f   : > { %v1157_v26 = vld [vmem:[%s9059_s5 + $0x1da0] sm:$0xf]  ;;  %v1159_v27 = vld [vmem:[%s9059_s5 + $0x1db0] sm:$0xf]  ;;  %1156 = vst [vmem:[%s9063_s6 + $0x764] sm:$0xf] %v1155_v25 }
 0x150   : > { %1158 = vst [vmem:[%s9063_s6 + $0x768] sm:$0xf] %v1157_v26  ;;  %1160 = vst [vmem:[%s9063_s6 + $0x76c] sm:$0xf] %v1159_v27  ;;  %v1161_v28 = vld [vmem:[%s9059_s5 + $0x1dc0] sm:$0xf] }
 0x151   : > { %v1163_v29 = vld [vmem:[%s9059_s5 + $0x1dd0] sm:$0xf]  ;;  %v1165_v30 = vld [vmem:[%s9059_s5 + $0x1de0] sm:$0xf]  ;;  %1162 = vst [vmem:[%s9063_s6 + $0x770] sm:$0xf] %v1161_v28 }
 0x152   : > { %1164 = vst [vmem:[%s9063_s6 + $0x774] sm:$0xf] %v1163_v29  ;;  %1166 = vst [vmem:[%s9063_s6 + $0x778] sm:$0xf] %v1165_v30  ;;  %v1167_v31 = vld [vmem:[%s9059_s5 + $0x1df0] sm:$0xf] }
 0x153   : > { %v1169_v32 = vld [vmem:[%s9059_s5 + $0x1e00] sm:$0xf]  ;;  %v1171_v33 = vld [vmem:[%s9059_s5 + $0x1e10] sm:$0xf]  ;;  %1168 = vst [vmem:[%s9063_s6 + $0x77c] sm:$0xf] %v1167_v31 }
 0x154   : > { %1170 = vst [vmem:[%s9063_s6 + $0x780] sm:$0xf] %v1169_v32  ;;  %1172 = vst [vmem:[%s9063_s6 + $0x784] sm:$0xf] %v1171_v33  ;;  %v1173_v34 = vld [vmem:[%s9059_s5 + $0x1e20] sm:$0xf] }
 0x155   : > { %v1175_v35 = vld [vmem:[%s9059_s5 + $0x1e30] sm:$0xf]  ;;  %v1177_v36 = vld [vmem:[%s9059_s5 + $0x1e40] sm:$0xf]  ;;  %1174 = vst [vmem:[%s9063_s6 + $0x788] sm:$0xf] %v1173_v34 }
 0x156   : > { %1176 = vst [vmem:[%s9063_s6 + $0x78c] sm:$0xf] %v1175_v35  ;;  %1178 = vst [vmem:[%s9063_s6 + $0x790] sm:$0xf] %v1177_v36  ;;  %v1179_v37 = vld [vmem:[%s9059_s5 + $0x1e50] sm:$0xf] }
 0x157   : > { %v1181_v38 = vld [vmem:[%s9059_s5 + $0x1e60] sm:$0xf]  ;;  %v1183_v39 = vld [vmem:[%s9059_s5 + $0x1e70] sm:$0xf]  ;;  %1180 = vst [vmem:[%s9063_s6 + $0x794] sm:$0xf] %v1179_v37 }
 0x158   : > { %1182 = vst [vmem:[%s9063_s6 + $0x798] sm:$0xf] %v1181_v38  ;;  %1184 = vst [vmem:[%s9063_s6 + $0x79c] sm:$0xf] %v1183_v39  ;;  %v1185_v40 = vld [vmem:[%s9059_s5 + $0x1e80] sm:$0xf] }
 0x159   : > { %v1187_v41 = vld [vmem:[%s9059_s5 + $0x1e90] sm:$0xf]  ;;  %v1189_v42 = vld [vmem:[%s9059_s5 + $0x1ea0] sm:$0xf]  ;;  %1186 = vst [vmem:[%s9063_s6 + $0x7a0] sm:$0xf] %v1185_v40 }
 0x15a   : > { %1188 = vst [vmem:[%s9063_s6 + $0x7a4] sm:$0xf] %v1187_v41  ;;  %1190 = vst [vmem:[%s9063_s6 + $0x7a8] sm:$0xf] %v1189_v42  ;;  %v1191_v43 = vld [vmem:[%s9059_s5 + $0x1eb0] sm:$0xf] }
 0x15b   : > { %v1193_v44 = vld [vmem:[%s9059_s5 + $0x1ec0] sm:$0xf]  ;;  %v1195_v45 = vld [vmem:[%s9059_s5 + $0x1ed0] sm:$0xf]  ;;  %1192 = vst [vmem:[%s9063_s6 + $0x7ac] sm:$0xf] %v1191_v43 }
 0x15c   : > { %1194 = vst [vmem:[%s9063_s6 + $0x7b0] sm:$0xf] %v1193_v44  ;;  %1196 = vst [vmem:[%s9063_s6 + $0x7b4] sm:$0xf] %v1195_v45  ;;  %v1197_v46 = vld [vmem:[%s9059_s5 + $0x1ee0] sm:$0xf] }
 0x15d   : > { %v1199_v47 = vld [vmem:[%s9059_s5 + $0x1ef0] sm:$0xf]  ;;  %v1201_v48 = vld [vmem:[%s9059_s5 + $0x1f00] sm:$0xf]  ;;  %1198 = vst [vmem:[%s9063_s6 + $0x7b8] sm:$0xf] %v1197_v46 }
 0x15e   : > { %1200 = vst [vmem:[%s9063_s6 + $0x7bc] sm:$0xf] %v1199_v47  ;;  %1202 = vst [vmem:[%s9063_s6 + $0x7c0] sm:$0xf] %v1201_v48  ;;  %v1203_v49 = vld [vmem:[%s9059_s5 + $0x1f10] sm:$0xf] }
 0x15f   : > { %v1205_v50 = vld [vmem:[%s9059_s5 + $0x1f20] sm:$0xf]  ;;  %v1207_v51 = vld [vmem:[%s9059_s5 + $0x1f30] sm:$0xf]  ;;  %1204 = vst [vmem:[%s9063_s6 + $0x7c4] sm:$0xf] %v1203_v49 }
 0x160   : > { %1206 = vst [vmem:[%s9063_s6 + $0x7c8] sm:$0xf] %v1205_v50  ;;  %1208 = vst [vmem:[%s9063_s6 + $0x7cc] sm:$0xf] %v1207_v51  ;;  %v1209_v52 = vld [vmem:[%s9059_s5 + $0x1f40] sm:$0xf] }
 0x161   : > { %v1211_v53 = vld [vmem:[%s9059_s5 + $0x1f50] sm:$0xf]  ;;  %v1213_v54 = vld [vmem:[%s9059_s5 + $0x1f60] sm:$0xf]  ;;  %1210 = vst [vmem:[%s9063_s6 + $0x7d0] sm:$0xf] %v1209_v52 }
 0x162   : > { %1212 = vst [vmem:[%s9063_s6 + $0x7d4] sm:$0xf] %v1211_v53  ;;  %1214 = vst [vmem:[%s9063_s6 + $0x7d8] sm:$0xf] %v1213_v54  ;;  %v1215_v55 = vld [vmem:[%s9059_s5 + $0x1f70] sm:$0xf] }
 0x163   : > { %v1217_v56 = vld [vmem:[%s9059_s5 + $0x1f80] sm:$0xf]  ;;  %v1219_v57 = vld [vmem:[%s9059_s5 + $0x1f90] sm:$0xf]  ;;  %1216 = vst [vmem:[%s9063_s6 + $0x7dc] sm:$0xf] %v1215_v55 }
 0x164   : > { %1218 = vst [vmem:[%s9063_s6 + $0x7e0] sm:$0xf] %v1217_v56  ;;  %1220 = vst [vmem:[%s9063_s6 + $0x7e4] sm:$0xf] %v1219_v57  ;;  %v1221_v58 = vld [vmem:[%s9059_s5 + $0x1fa0] sm:$0xf] }
 0x165   : > { %v1223_v59 = vld [vmem:[%s9059_s5 + $0x1fb0] sm:$0xf]  ;;  %v1225_v60 = vld [vmem:[%s9059_s5 + $0x1fc0] sm:$0xf]  ;;  %1222 = vst [vmem:[%s9063_s6 + $0x7e8] sm:$0xf] %v1221_v58 }
 0x166   : > { %1224 = vst [vmem:[%s9063_s6 + $0x7ec] sm:$0xf] %v1223_v59  ;;  %1226 = vst [vmem:[%s9063_s6 + $0x7f0] sm:$0xf] %v1225_v60  ;;  %v1227_v61 = vld [vmem:[%s9059_s5 + $0x1fd0] sm:$0xf] }
 0x167   : > { %v1229_v62 = vld [vmem:[%s9059_s5 + $0x1fe0] sm:$0xf]  ;;  %v1231_v63 = vld [vmem:[%s9059_s5 + $0x1ff0] sm:$0xf]  ;;  %1228 = vst [vmem:[%s9063_s6 + $0x7f4] sm:$0xf] %v1227_v61 }
 0x168   : > { %1230 = vst [vmem:[%s9063_s6 + $0x7f8] sm:$0xf] %v1229_v62  ;;  %1232 = vst [vmem:[%s9063_s6 + $0x7fc] sm:$0xf] %v1231_v63 }
 0x169 PF: > { %p7873_p8 = scmp.ge.s32.totalorder %s8983_s19, 1  ;;  %p4357_p9 = scmp.lt.s32.totalorder %s8983_s19, 5 }
 0x16b   : > { %p4358_p10 = pnand %p7873_p8, %p4357_p9 }
 0x16d   : > { %4361 = sbr.rel (%p4358_p10) target bundleno = 874 (0x36a), region = 76 }
 0x172   : > { %s4364_s7 = sand.u32 1, %s8967_s15   ;;  %v10093_v0 = vld [vmem:[%s10831_s0] sm:$0xff]  ;;  %v10103_v2 = vld [vmem:[%s10831_s0 + $0x8] sm:$0xff]  ;;  %p4408_p11 = scmp.lt.s32.totalorder %s8975_s17, 3 }
 0x173   : > { %v10098_v1 = vld [vmem:[%s10831_s0 + $0x80] sm:$0xff]  ;;  %s7874_s14 = sshll.u32 %s4364_s7, 11  ;;  %v10112_v4 = vld [vmem:[%s10831_s0 + $0x88] sm:$0xff]  ;;  %s7875_s21 = sshll.u32 %s4364_s7, 5 }
 0x174   : > { %v7877_v3 = vcombine.high %v10093_v0, %v10098_v1  ;;  %v7879_v5 = vcombine.high %v10103_v2, %v10112_v4  ;;  %s10116_s23 = scalar_lea.vmem [#allocation2], %s7874_s14  ;;  %v4447_v35 = vld [vmem:[%s10831_s0 + $0x100] sm:$0xff]  ;;  %v4448_v38 = vld [vmem:[%s10831_s0 + $0x108] sm:$0xff]  ;;  %v7876_v42 = vcombine.low %v10093_v0, %v10098_v1  ;;  %v7878_v43 = vcombine.low %v10103_v2, %v10112_v4  ;;  %s10796_s15 = scalar_lea.vmem [#allocation3], %s7875_s21 }
 0x175   : > { %v8689_v6 = vld [vmem:[%s10116_s23 + $0x78] sm:$0xff]   ;;  %v8693_v10 = vld [vmem:[%s10116_s23 + $0x70] sm:$0xff]   ;;  %v8697_v14 = vld [vmem:[%s10116_s23 + $0x68] sm:$0xff]   ;;  %s4409_s8 = scalar_select %p4408_p11, %s8975_s17, 3 }
 0x176   : > { %6879 = vmatprep.mubr.bf16.mxu0 %v7877_v3  ;;  %v8690_v7 = vld [vmem:[%s10116_s23 + $0xf8] sm:$0xff]   ;;  %6928 = vmatprep.mubr.bf16.mxu1 %v7879_v5  ;;  %v8694_v11 = vld [vmem:[%s10116_s23 + $0xf0] sm:$0xff]   ;;  %v8698_v15 = vld [vmem:[%s10116_s23 + $0xe8] sm:$0xff]   ;;  %s8197_s7 = sshll.u32 (%p9046_p6), %s8975_s17, 3 }
 0x177   : > { %8200 = vmatprep.subr.bf16.mxu0 %v8689_v6  ;;  %v8691_v8 = vld [vmem:[%s10116_s23 + $0x38] sm:$0xff]   ;;  %8228 = vmatprep.subr.bf16.mxu1 %v8690_v7  ;;  %v8695_v12 = vld [vmem:[%s10116_s23 + $0x30] sm:$0xff]   ;;  %v8699_v16 = vld [vmem:[%s10116_s23 + $0x28] sm:$0xff]   ;;  %s10627_s11 = scalar_lea.vmem %s10834_s3, %s4409_s8  ;;  %s10632_s14 = scalar_lea.vmem %s10835_s4, %s4409_s8 }
 0x178   : > { %v8692_v9 = vld [vmem:[%s10116_s23 + $0xb8] sm:$0xff]   ;;  %8201 = vmatpush3.bf16.msra.mxu0 %v8691_v8  ;;  %v8696_v13 = vld [vmem:[%s10116_s23 + $0xb0] sm:$0xff]   ;;  %v8700_v17 = vld [vmem:[%s10116_s23 + $0xa8] sm:$0xff]   ;;  %s7686_s26 = scalar_lea.vmem (%p9046_p6), %s10833_s2, %s8197_s7 }
 0x179   : > { %8229 = vmatpush3.bf16.msra.mxu1 %v8692_v9  ;;  %8202 = vmatprep.subr.bf16.mxu0 %v8693_v10  ;;  %v8701_v18 = vld [vmem:[%s10116_s23 + $0x60] sm:$0xff]   ;;  %v8705_v22 = vld [vmem:[%s10116_s23 + $0x58] sm:$0xff]   ;;  %v8709_v26 = vld [vmem:[%s10116_s23 + $0x50] sm:$0xff]  }
 0x17a   : > { %8230 = vmatprep.subr.bf16.mxu1 %v8694_v11  ;;  %v8702_v19 = vld [vmem:[%s10116_s23 + $0xe0] sm:$0xff]   ;;  %v8706_v23 = vld [vmem:[%s10116_s23 + $0xd8] sm:$0xff]   ;;  %v8710_v27 = vld [vmem:[%s10116_s23 + $0xd0] sm:$0xff]  }
 0x17b   : > { %v8703_v20 = vld [vmem:[%s10116_s23 + $0x20] sm:$0xff]   ;;  %v8707_v24 = vld [vmem:[%s10116_s23 + $0x18] sm:$0xff]   ;;  %v8711_v28 = vld [vmem:[%s10116_s23 + $0x10] sm:$0xff]  }
 0x17c   : > { %8203 = vmatpush3.bf16.msra.mxu0 %v8695_v12  ;;  %v8704_v21 = vld [vmem:[%s10116_s23 + $0xa0] sm:$0xff]   ;;  %v8708_v25 = vld [vmem:[%s10116_s23 + $0x98] sm:$0xff]   ;;  %v8712_v29 = vld [vmem:[%s10116_s23 + $0x90] sm:$0xff]  }
 0x17d   : > { %8231 = vmatpush3.bf16.msra.mxu1 %v8696_v13  ;;  %8204 = vmatprep.subr.bf16.mxu0 %v8697_v14  ;;  %v8713_v30 = vld [vmem:[%s10116_s23 + $0x48] sm:$0xff]   ;;  %v8717_v34 = vld [vmem:[%s10116_s23 + $0x40] sm:$0xff]   ;;  %v8721_v44 = vld [vmem:[%s10116_s23 + $0x178] sm:$0xff]  }
 0x17e   : > { %8232 = vmatprep.subr.bf16.mxu1 %v8698_v15  ;;  %v8714_v31 = vld [vmem:[%s10116_s23 + $0xc8] sm:$0xff]   ;;  %v4463_v36 = vld [vmem:[%s10831_s0 + $0x180] sm:$0xff]  ;;  %v8722_v45 = vld [vmem:[%s10116_s23 + $0x1f8] sm:$0xff]  }
 0x17f   : > { %v8715_v32 = vld [vmem:[%s10116_s23 + $0x8] sm:$0xff]   ;;  %v8718_v37 = vld [vmem:[%s10116_s23 + $0xc0] sm:$0xff]   ;;  %v7909_v46 = vcombine.high %v4447_v35, %v4463_v36  ;;  %v8723_v47 = vld [vmem:[%s10116_s23 + $0x138] sm:$0xff]   ;;  %v7908_v54 = vcombine.low %v4447_v35, %v4463_v36 }
 0x180   : > { %8205 = vmatpush3.bf16.msra.mxu0 %v8699_v16  ;;  %v8716_v33 = vld [vmem:[%s10116_s23 + $0x88] sm:$0xff]   ;;  %v8719_v40 = vld [vmem:[%s10116_s23] sm:$0xff]   ;;  %v8724_v49 = vld [vmem:[%s10116_s23 + $0x1b8] sm:$0xff]  }
 0x181   : > { %8233 = vmatpush3.bf16.msra.mxu1 %v8700_v17  ;;  %8206 = vmatprep.subr.bf16.mxu0 %v8701_v18  ;;  %v4464_v39 = vld [vmem:[%s10831_s0 + $0x188] sm:$0xff]  ;;  %v8720_v41 = vld [vmem:[%s10116_s23 + $0x80] sm:$0xff]   ;;  %v8725_v50 = vld [vmem:[%s10116_s23 + $0x170] sm:$0xff]  }
 0x182   : > { %8234 = vmatprep.subr.bf16.mxu1 %v8702_v19  ;;  %v7911_v48 = vcombine.high %v4448_v38, %v4464_v39  ;;  %v8726_v51 = vld [vmem:[%s10116_s23 + $0x1f0] sm:$0xff]   ;;  %v8729_v55 = vld [vmem:[%s10116_s23 + $0x168] sm:$0xff]   ;;  %v7910_v56 = vcombine.low %v4448_v38, %v4464_v39  ;;  %v8733_v60 = vld [vmem:[%s10116_s23 + $0x160] sm:$0xff]  }
 0x183   : > { %v8727_v52 = vld [vmem:[%s10116_s23 + $0x130] sm:$0xff]   ;;  %v8730_v57 = vld [vmem:[%s10116_s23 + $0x1e8] sm:$0xff]   ;;  %v8734_v61 = vld [vmem:[%s10116_s23 + $0x1e0] sm:$0xff]  }
 0x184   : > { %8207 = vmatpush3.bf16.msra.mxu0 %v8703_v20  ;;  %v8728_v53 = vld [vmem:[%s10116_s23 + $0x1b0] sm:$0xff]   ;;  %v8731_v58 = vld [vmem:[%s10116_s23 + $0x128] sm:$0xff]   ;;  %v8735_v62 = vld [vmem:[%s10116_s23 + $0x120] sm:$0xff]  }
 0x185   : > { %8235 = vmatpush3.bf16.msra.mxu1 %v8704_v21  ;;  %8208 = vmatprep.subr.bf16.mxu0 %v8705_v22  ;;  %v8732_v59 = vld [vmem:[%s10116_s23 + $0x1a8] sm:$0xff]   ;;  %v8736_v63 = vld [vmem:[%s10116_s23 + $0x1a0] sm:$0xff]   ;;  %v8737_v0 = vld [vmem:[%s10116_s23 + $0x158] sm:$0xff]  }
 0x186   : > { %8236 = vmatprep.subr.bf16.mxu1 %v8706_v23  ;;  %v8738_v1 = vld [vmem:[%s10116_s23 + $0x1d8] sm:$0xff]   ;;  %v8741_v4 = vld [vmem:[%s10116_s23 + $0x150] sm:$0xff]   ;;  %v8745_v8 = vld [vmem:[%s10116_s23 + $0x148] sm:$0xff]  }
 0x187   : > { %v8739_v2 = vld [vmem:[%s10116_s23 + $0x118] sm:$0xff]   ;;  %v8742_v5 = vld [vmem:[%s10116_s23 + $0x1d0] sm:$0xff]   ;;  %v8746_v9 = vld [vmem:[%s10116_s23 + $0x1c8] sm:$0xff]  }
 0x188   : > { %8209 = vmatpush3.bf16.msra.mxu0 %v8707_v24  ;;  %v8740_v3 = vld [vmem:[%s10116_s23 + $0x198] sm:$0xff]   ;;  %v8743_v6 = vld [vmem:[%s10116_s23 + $0x110] sm:$0xff]   ;;  %v8747_v10 = vld [vmem:[%s10116_s23 + $0x108] sm:$0xff]  }
 0x189   : > { %8237 = vmatpush3.bf16.msra.mxu1 %v8708_v25  ;;  %8210 = vmatprep.subr.bf16.mxu0 %v8709_v26  ;;  %v8744_v7 = vld [vmem:[%s10116_s23 + $0x190] sm:$0xff]   ;;  %v8748_v11 = vld [vmem:[%s10116_s23 + $0x188] sm:$0xff]   ;;  %v8749_v12 = vld [vmem:[%s10116_s23 + $0x140] sm:$0xff]  }
 0x18a   : > { %8238 = vmatprep.subr.bf16.mxu1 %v8710_v27  ;;  %v4417_v13 = vld [vmem:[%s10831_s0 + $0x10] sm:$0xff]  ;;  %v8750_v14 = vld [vmem:[%s10116_s23 + $0x1c0] sm:$0xff]   ;;  %v4418_v18 = vld [vmem:[%s10831_s0 + $0x18] sm:$0xff] }
 0x18b   : > { %v8751_v15 = vld [vmem:[%s10116_s23 + $0x100] sm:$0xff]   ;;  %v4433_v17 = vld [vmem:[%s10831_s0 + $0x90] sm:$0xff]  ;;  %v4434_v19 = vld [vmem:[%s10831_s0 + $0x98] sm:$0xff] }
 0x18c   : > { %8211 = vmatpush3.bf16.msra.mxu0 %v8711_v28  ;;  %v8752_v16 = vld [vmem:[%s10116_s23 + $0x180] sm:$0xff]   ;;  %v7880_v20 = vcombine.low %v4417_v13, %v4433_v17  ;;  %v7881_v21 = vcombine.high %v4417_v13, %v4433_v17  ;;  %v7882_v22 = vcombine.low %v4418_v18, %v4434_v19  ;;  %v7883_v23 = vcombine.high %v4418_v18, %v4434_v19  ;;  %v8753_v24 = vld [vmem:[%s10116_s23 + $0x278] sm:$0xff]   ;;  %v8757_v28 = vld [vmem:[%s10116_s23 + $0x270] sm:$0xff]  }
 0x18d   : > { %8239 = vmatpush3.bf16.msra.mxu1 %v8712_v29  ;;  %8212 = vmatprep.subr.bf16.mxu0 %v8713_v30  ;;  %v8754_v25 = vld [vmem:[%s10116_s23 + $0x2f8] sm:$0xff]   ;;  %v8758_v29 = vld [vmem:[%s10116_s23 + $0x2f0] sm:$0xff]   ;;  %v8761_v36 = vld [vmem:[%s10116_s23 + $0x268] sm:$0xff]  }
 0x18e   : > { %8240 = vmatprep.subr.bf16.mxu1 %v8714_v31  ;;  %v8755_v26 = vld [vmem:[%s10116_s23 + $0x238] sm:$0xff]   ;;  %v8759_v30 = vld [vmem:[%s10116_s23 + $0x230] sm:$0xff]   ;;  %v4467_v17 = vld [vmem:[%s10831_s0 + $0x1a0] sm:$0xff] }
 0x18f   : > { %v8756_v27 = vld [vmem:[%s10116_s23 + $0x2b8] sm:$0xff]   ;;  %v8760_v31 = vld [vmem:[%s10116_s23 + $0x2b0] sm:$0xff]  }
 0x190   : > { %8213 = vmatpush3.bf16.msra.mxu0 %v8715_v32  ;;  %v4449_v32 = vld [vmem:[%s10831_s0 + $0x110] sm:$0xff]  ;;  %v4450_v38 = vld [vmem:[%s10831_s0 + $0x118] sm:$0xff] }
 0x191   : > { %8241 = vmatpush3.bf16.msra.mxu1 %v8716_v33  ;;  %8214 = vmatprep.subr.bf16.mxu0 %v8717_v34  ;;  %v4465_v33 = vld [vmem:[%s10831_s0 + $0x190] sm:$0xff]  ;;  %v4466_v39 = vld [vmem:[%s10831_s0 + $0x198] sm:$0xff] }
 0x192   : > { %8242 = vmatprep.subr.bf16.mxu1 %v8718_v37  ;;  %v7913_v34 = vcombine.high %v4449_v32, %v4465_v33  ;;  %v7912_v35 = vcombine.low %v4449_v32, %v4465_v33  ;;  %v8762_v37 = vld [vmem:[%s10116_s23 + $0x2e8] sm:$0xff]   ;;  %v8790_v13 = vld [vmem:[%s10116_s23 + $0x3f0] sm:$0xff]   ;;  %v8801_v32 = vld [vmem:[%s10116_s23 + $0x358] sm:$0xff]  }
 0x193   : > { %v8802_v33 = vld [vmem:[%s10116_s23 + $0x3d8] sm:$0xff]  }
 0x194   : > { %8215 = vmatpush3.bf16.msra.mxu0 %v8719_v40  ;;  %v7915_v40 = vcombine.high %v4450_v38, %v4466_v39 }
 0x195   : > { %8243 = vmatpush3.bf16.msra.mxu1 %v8720_v41  ;;  %8256 = vmatprep.subr.bf16.mxu0 %v8721_v44  ;;  %v8763_v41 = vld [vmem:[%s10116_s23 + $0x228] sm:$0xff]   ;;  %v8765_v44 = vld [vmem:[%s10116_s23 + $0x260] sm:$0xff]  }
 0x196   : > { %8284 = vmatprep.subr.bf16.mxu1 %v8722_v45  ;;  %v8766_v45 = vld [vmem:[%s10116_s23 + $0x2e0] sm:$0xff]  }
 0x197   : > { %6880 = vmatmul.mubr.bf16.vlgmr.msra.gmra.mxu0 %v7876_v42  ;;  %v7914_v42 = vcombine.low %v4450_v38, %v4466_v39  ;;  %v8807_v38 = vld [vmem:[%s10116_s23 + $0x310] sm:$0xff]  }
 0x198   : > { %6929 = vmatmul.mubr.bf16.vlgmr.msra.gmra.mxu1 %v7878_v43  ;;  %8257 = vmatpush3.bf16.msra.mxu0 %v8723_v47  ;;  %v8764_v43 = vld [vmem:[%s10116_s23 + $0x2a8] sm:$0xff]   ;;  %v8768_v47 = vld [vmem:[%s10116_s23 + $0x2a0] sm:$0xff]   ;;  %v8808_v39 = vld [vmem:[%s10116_s23 + $0x390] sm:$0xff]  }
 0x199   : > { %8285 = vmatpush3.bf16.msra.mxu1 %v8724_v49  ;;  %6887 = vmatprep.mubr.bf16.mxu0 %v7909_v46  ;;  %v8767_v46 = vld [vmem:[%s10116_s23 + $0x220] sm:$0xff]   ;;  %v8770_v49 = vld [vmem:[%s10116_s23 + $0x2d8] sm:$0xff]  }
 0x19a   : > { %8258 = vmatprep.subr.bf16.mxu0 %v8725_v50  ;;  %6936 = vmatprep.mubr.bf16.mxu1 %v7911_v48  ;;  %v8769_v48 = vld [vmem:[%s10116_s23 + $0x258] sm:$0xff]  }
 0x19b   : > { %8286 = vmatprep.subr.bf16.mxu1 %v8726_v51  ;;  %v8771_v50 = vld [vmem:[%s10116_s23 + $0x218] sm:$0xff]  }
 0x19c   : > { %8259 = vmatpush3.bf16.msra.mxu0 %v8727_v52  ;;  %v8772_v51 = vld [vmem:[%s10116_s23 + $0x298] sm:$0xff]   ;;  %v8773_v52 = vld [vmem:[%s10116_s23 + $0x250] sm:$0xff]  }
 0x19d   : > { %8287 = vmatpush3.bf16.msra.mxu1 %v8728_v53  ;;  %8260 = vmatprep.subr.bf16.mxu0 %v8729_v55  ;;  %v8774_v53 = vld [vmem:[%s10116_s23 + $0x2d0] sm:$0xff]  }
 0x19e   : > { %8288 = vmatprep.subr.bf16.mxu1 %v8730_v57  ;;  %v8776_v55 = vld [vmem:[%s10116_s23 + $0x290] sm:$0xff]   ;;  %v8778_v57 = vld [vmem:[%s10116_s23 + $0x2c8] sm:$0xff]  }
 0x19f   : > { %6888 = vmatmul.mubr.bf16.gmra.mxu0 %v7908_v54  ;;  %v8775_v54 = vld [vmem:[%s10116_s23 + $0x210] sm:$0xff]  }
 0x1a0   : > { %8261 = vmatpush3.bf16.msra.mxu0 %v8731_v58  ;;  %6937 = vmatmul.mubr.bf16.gmra.mxu1 %v7910_v56  ;;  %v8777_v56 = vld [vmem:[%s10116_s23 + $0x248] sm:$0xff]  }
 0x1a1   : > { %8289 = vmatpush3.bf16.msra.mxu1 %v8732_v59  ;;  %8262 = vmatprep.subr.bf16.mxu0 %v8733_v60  ;;  %v8779_v58 = vld [vmem:[%s10116_s23 + $0x208] sm:$0xff]   ;;  %v8781_v60 = vld [vmem:[%s10116_s23 + $0x240] sm:$0xff]  }
 0x1a2   : > { %8290 = vmatprep.subr.bf16.mxu1 %v8734_v61  ;;  %6977 = vmatprep.mubr.bf16.mxu0 %v7881_v21  ;;  %v8780_v59 = vld [vmem:[%s10116_s23 + $0x288] sm:$0xff]   ;;  %v8782_v61 = vld [vmem:[%s10116_s23 + $0x2c0] sm:$0xff]  }
 0x1a3   : > { %7026 = vmatprep.mubr.bf16.mxu1 %v7883_v23  ;;  %v8794_v21 = vld [vmem:[%s10116_s23 + $0x3e8] sm:$0xff]  }
 0x1a4   : > { %8263 = vmatpush3.bf16.msra.mxu0 %v8735_v62  ;;  %v8783_v62 = vld [vmem:[%s10116_s23 + $0x200] sm:$0xff]   ;;  %v4468_v23 = vld [vmem:[%s10831_s0 + $0x1a8] sm:$0xff] }
 0x1a5   : > { %8291 = vmatpush3.bf16.msra.mxu1 %v8736_v63  ;;  %8264 = vmatprep.subr.bf16.mxu0 %v8737_v0  ;;  %v8784_v63 = vld [vmem:[%s10116_s23 + $0x280] sm:$0xff]  }
 0x1a6   : > { %8292 = vmatprep.subr.bf16.mxu1 %v8738_v1  ;;  %v4419_v0 = vld [vmem:[%s10831_s0 + $0x20] sm:$0xff] }
 0x1a7   : > { %v4435_v1 = vld [vmem:[%s10831_s0 + $0xa0] sm:$0xff] }
 0x1a8   : > { %8265 = vmatpush3.bf16.msra.mxu0 %v8739_v2  ;;  %v7884_v2 = vcombine.low %v4419_v0, %v4435_v1 }
 0x1a9   : > { %8293 = vmatpush3.bf16.msra.mxu1 %v8740_v3  ;;  %8266 = vmatprep.subr.bf16.mxu0 %v8741_v4  ;;  %v7885_v3 = vcombine.high %v4419_v0, %v4435_v1  ;;  %v4420_v4 = vld [vmem:[%s10831_s0 + $0x28] sm:$0xff]  ;;  %v4453_v0 = vld [vmem:[%s10831_s0 + $0x130] sm:$0xff] }
 0x1aa   : > { %8294 = vmatprep.subr.bf16.mxu1 %v8742_v5  ;;  %v4436_v5 = vld [vmem:[%s10831_s0 + $0xa8] sm:$0xff]  ;;  %v4469_v1 = vld [vmem:[%s10831_s0 + $0x1b0] sm:$0xff] }
 0x1ac   : > { %8267 = vmatpush3.bf16.msra.mxu0 %v8743_v6  ;;  %v7886_v6 = vcombine.low %v4420_v4, %v4436_v5 }
 0x1ad   : > { %8295 = vmatpush3.bf16.msra.mxu1 %v8744_v7  ;;  %8268 = vmatprep.subr.bf16.mxu0 %v8745_v8  ;;  %v7887_v7 = vcombine.high %v4420_v4, %v4436_v5  ;;  %v8785_v8 = vld [vmem:[%s10116_s23 + $0x378] sm:$0xff]   ;;  %v8825_v4 = vld [vmem:[%s10116_s23 + $0x468] sm:$0xff]  }
 0x1ae   : > { %8296 = vmatprep.subr.bf16.mxu1 %v8746_v9  ;;  %v8786_v9 = vld [vmem:[%s10116_s23 + $0x3f8] sm:$0xff]   ;;  %v8826_v5 = vld [vmem:[%s10116_s23 + $0x4e8] sm:$0xff]  }
 0x1b0   : > { %8269 = vmatpush3.bf16.msra.mxu0 %v8747_v10  ;;  %v8787_v10 = vld [vmem:[%s10116_s23 + $0x338] sm:$0xff]  }
 0x1b1   : > { %8297 = vmatpush3.bf16.msra.mxu1 %v8748_v11  ;;  %8270 = vmatprep.subr.bf16.mxu0 %v8749_v12  ;;  %v8788_v11 = vld [vmem:[%s10116_s23 + $0x3b8] sm:$0xff]   ;;  %v8789_v12 = vld [vmem:[%s10116_s23 + $0x370] sm:$0xff]  }
 0x1b2   : > { %8298 = vmatprep.subr.bf16.mxu1 %v8750_v14  ;;  %v8791_v14 = vld [vmem:[%s10116_s23 + $0x330] sm:$0xff]  }
 0x1b4   : > { %8271 = vmatpush3.bf16.msra.mxu0 %v8751_v15  ;;  %v8792_v15 = vld [vmem:[%s10116_s23 + $0x3b0] sm:$0xff]  }
 0x1b5   : > { %8299 = vmatpush3.bf16.msra.mxu1 %v8752_v16  ;;  %8312 = vmatprep.subr.bf16.mxu0 %v8753_v24  ;;  %v4451_v16 = vld [vmem:[%s10831_s0 + $0x120] sm:$0xff] }
 0x1b6   : > { %8340 = vmatprep.subr.bf16.mxu1 %v8754_v25  ;;  %v7917_v18 = vcombine.high %v4451_v16, %v4467_v17  ;;  %v7916_v19 = vcombine.low %v4451_v16, %v4467_v17  ;;  %v8795_v25 = vld [vmem:[%s10116_s23 + $0x328] sm:$0xff]   ;;  %v8833_v16 = vld [vmem:[%s10116_s23 + $0x458] sm:$0xff]  }
 0x1b7   : > { %6978 = vmatmul.mubr.bf16.vlgmr.msra.gmra.mxu0 %v7880_v20  ;;  %v8793_v20 = vld [vmem:[%s10116_s23 + $0x368] sm:$0xff]   ;;  %v8834_v17 = vld [vmem:[%s10116_s23 + $0x4d8] sm:$0xff]  }
 0x1b8   : > { %7027 = vmatmul.mubr.bf16.vlgmr.msra.gmra.mxu1 %v7882_v22  ;;  %8313 = vmatpush3.bf16.msra.mxu0 %v8755_v26  ;;  %v4452_v22 = vld [vmem:[%s10831_s0 + $0x128] sm:$0xff] }
 0x1b9   : > { %8341 = vmatpush3.bf16.msra.mxu1 %v8756_v27  ;;  %8314 = vmatprep.subr.bf16.mxu0 %v8757_v28  ;;  %v7919_v24 = vcombine.high %v4452_v22, %v4468_v23  ;;  %v7918_v26 = vcombine.low %v4452_v22, %v4468_v23  ;;  %v8796_v27 = vld [vmem:[%s10116_s23 + $0x3a8] sm:$0xff]   ;;  %v8797_v28 = vld [vmem:[%s10116_s23 + $0x360] sm:$0xff]   ;;  %v8839_v22 = vld [vmem:[%s10116_s23 + $0x410] sm:$0xff]  }
 0x1ba   : > { %8342 = vmatprep.subr.bf16.mxu1 %v8758_v29  ;;  %6985 = vmatprep.mubr.bf16.mxu0 %v7913_v34  ;;  %v8798_v29 = vld [vmem:[%s10116_s23 + $0x3e0] sm:$0xff]   ;;  %v8803_v34 = vld [vmem:[%s10116_s23 + $0x318] sm:$0xff]   ;;  %v8840_v23 = vld [vmem:[%s10116_s23 + $0x490] sm:$0xff]  }
 0x1bb   : > { %7034 = vmatprep.mubr.bf16.mxu1 %v7915_v40  ;;  %v8809_v40 = vld [vmem:[%s10116_s23 + $0x348] sm:$0xff]  }
 0x1bc   : > { %8315 = vmatpush3.bf16.msra.mxu0 %v8759_v30  ;;  %v8799_v30 = vld [vmem:[%s10116_s23 + $0x320] sm:$0xff]  }
 0x1bd   : > { %8343 = vmatpush3.bf16.msra.mxu1 %v8760_v31  ;;  %8316 = vmatprep.subr.bf16.mxu0 %v8761_v36  ;;  %v8800_v31 = vld [vmem:[%s10116_s23 + $0x3a0] sm:$0xff]   ;;  %v8805_v36 = vld [vmem:[%s10116_s23 + $0x350] sm:$0xff]  }
 0x1be   : > { %8344 = vmatprep.subr.bf16.mxu1 %v8762_v37  ;;  %v8806_v37 = vld [vmem:[%s10116_s23 + $0x3d0] sm:$0xff]  }
 0x1bf   : > { %6986 = vmatmul.mubr.bf16.gmra.mxu0 %v7912_v35  ;;  %v8804_v35 = vld [vmem:[%s10116_s23 + $0x398] sm:$0xff]  }
 0x1c0   : > { %8317 = vmatpush3.bf16.msra.mxu0 %v8763_v41  ;;  %7035 = vmatmul.mubr.bf16.gmra.mxu1 %v7914_v42  ;;  %v8810_v41 = vld [vmem:[%s10116_s23 + $0x3c8] sm:$0xff]  }
 0x1c1   : > { %8345 = vmatpush3.bf16.msra.mxu1 %v8764_v43  ;;  %8318 = vmatprep.subr.bf16.mxu0 %v8765_v44  ;;  %v8811_v42 = vld [vmem:[%s10116_s23 + $0x308] sm:$0xff]   ;;  %v8813_v44 = vld [vmem:[%s10116_s23 + $0x340] sm:$0xff]  }
 0x1c2   : > { %8346 = vmatprep.subr.bf16.mxu1 %v8766_v45  ;;  %7075 = vmatprep.mubr.bf16.mxu0 %v7885_v3  ;;  %v8812_v43 = vld [vmem:[%s10116_s23 + $0x388] sm:$0xff]   ;;  %v8814_v45 = vld [vmem:[%s10116_s23 + $0x3c0] sm:$0xff]   ;;  %v7920_v3 = vcombine.low %v4453_v0, %v4469_v1 }
 0x1c3   : > { %7124 = vmatprep.mubr.bf16.mxu1 %v7887_v7  ;;  %v4470_v7 = vld [vmem:[%s10831_s0 + $0x1b8] sm:$0xff] }
 0x1c4   : > { %8319 = vmatpush3.bf16.msra.mxu0 %v8767_v46  ;;  %v8815_v46 = vld [vmem:[%s10116_s23 + $0x300] sm:$0xff]  }
 0x1c5   : > { %8347 = vmatpush3.bf16.msra.mxu1 %v8768_v47  ;;  %8320 = vmatprep.subr.bf16.mxu0 %v8769_v48  ;;  %v8816_v47 = vld [vmem:[%s10116_s23 + $0x380] sm:$0xff]   ;;  %v4421_v48 = vld [vmem:[%s10831_s0 + $0x30] sm:$0xff] }
 0x1c6   : > { %8348 = vmatprep.subr.bf16.mxu1 %v8770_v49  ;;  %v4437_v49 = vld [vmem:[%s10831_s0 + $0xb0] sm:$0xff] }
 0x1c8   : > { %8321 = vmatpush3.bf16.msra.mxu0 %v8771_v50  ;;  %v4422_v50 = vld [vmem:[%s10831_s0 + $0x38] sm:$0xff] }
 0x1c9   : > { %8349 = vmatpush3.bf16.msra.mxu1 %v8772_v51  ;;  %8322 = vmatprep.subr.bf16.mxu0 %v8773_v52  ;;  %v7888_v51 = vcombine.low %v4421_v48, %v4437_v49  ;;  %v7889_v52 = vcombine.high %v4421_v48, %v4437_v49  ;;  %v4455_v48 = vld [vmem:[%s10831_s0 + $0x140] sm:$0xff] }
 0x1ca   : > { %8350 = vmatprep.subr.bf16.mxu1 %v8774_v53  ;;  %v4438_v53 = vld [vmem:[%s10831_s0 + $0xb8] sm:$0xff]  ;;  %v4471_v49 = vld [vmem:[%s10831_s0 + $0x1c0] sm:$0xff] }
 0x1cc   : > { %8323 = vmatpush3.bf16.msra.mxu0 %v8775_v54  ;;  %v7890_v54 = vcombine.low %v4422_v50, %v4438_v53 }
 0x1cd   : > { %8351 = vmatpush3.bf16.msra.mxu1 %v8776_v55  ;;  %8324 = vmatprep.subr.bf16.mxu0 %v8777_v56  ;;  %v7891_v55 = vcombine.high %v4422_v50, %v4438_v53  ;;  %v8817_v56 = vld [vmem:[%s10116_s23 + $0x478] sm:$0xff]   ;;  %v7925_v50 = vcombine.high %v4455_v48, %v4471_v49  ;;  %v8858_v53 = vld [vmem:[%s10116_s23 + $0x5e8] sm:$0xff]  }
 0x1ce   : > { %8352 = vmatprep.subr.bf16.mxu1 %v8778_v57  ;;  %v8818_v57 = vld [vmem:[%s10116_s23 + $0x4f8] sm:$0xff]  }
 0x1d0   : > { %8325 = vmatpush3.bf16.msra.mxu0 %v8779_v58  ;;  %v8819_v58 = vld [vmem:[%s10116_s23 + $0x438] sm:$0xff]  }
 0x1d1   : > { %8353 = vmatpush3.bf16.msra.mxu1 %v8780_v59  ;;  %8326 = vmatprep.subr.bf16.mxu0 %v8781_v60  ;;  %v8820_v59 = vld [vmem:[%s10116_s23 + $0x4b8] sm:$0xff]   ;;  %v8821_v60 = vld [vmem:[%s10116_s23 + $0x470] sm:$0xff]  }
 0x1d2   : > { %8354 = vmatprep.subr.bf16.mxu1 %v8782_v61  ;;  %v8822_v61 = vld [vmem:[%s10116_s23 + $0x4f0] sm:$0xff]  }
 0x1d4   : > { %8327 = vmatpush3.bf16.msra.mxu0 %v8783_v62  ;;  %v8823_v62 = vld [vmem:[%s10116_s23 + $0x430] sm:$0xff]  }
 0x1d5   : > { %8355 = vmatpush3.bf16.msra.mxu1 %v8784_v63  ;;  %8368 = vmatprep.subr.bf16.mxu0 %v8785_v8  ;;  %v8824_v63 = vld [vmem:[%s10116_s23 + $0x4b0] sm:$0xff]  }
 0x1d6   : > { %8396 = vmatprep.subr.bf16.mxu1 %v8786_v9  ;;  %v8827_v9 = vld [vmem:[%s10116_s23 + $0x428] sm:$0xff]  }
 0x1d7   : > { %7076 = vmatmul.mubr.bf16.vlgmr.msra.gmra.mxu0 %v7884_v2  ;;  %v7921_v2 = vcombine.high %v4453_v0, %v4469_v1  ;;  %v8865_v0 = vld [vmem:[%s10116_s23 + $0x558] sm:$0xff]  }
 0x1d8   : > { %7125 = vmatmul.mubr.bf16.vlgmr.msra.gmra.mxu1 %v7886_v6  ;;  %8369 = vmatpush3.bf16.msra.mxu0 %v8787_v10  ;;  %v4454_v6 = vld [vmem:[%s10831_s0 + $0x138] sm:$0xff] }
 0x1d9   : > { %8397 = vmatpush3.bf16.msra.mxu1 %v8788_v11  ;;  %8370 = vmatprep.subr.bf16.mxu0 %v8789_v12  ;;  %v7923_v8 = vcombine.high %v4454_v6, %v4470_v7  ;;  %v7922_v10 = vcombine.low %v4454_v6, %v4470_v7  ;;  %v8828_v11 = vld [vmem:[%s10116_s23 + $0x4a8] sm:$0xff]   ;;  %v8829_v12 = vld [vmem:[%s10116_s23 + $0x460] sm:$0xff]   ;;  %v8866_v1 = vld [vmem:[%s10116_s23 + $0x5d8] sm:$0xff]  }
 0x1da   : > { %8398 = vmatprep.subr.bf16.mxu1 %v8790_v13  ;;  %7083 = vmatprep.mubr.bf16.mxu0 %v7917_v18  ;;  %v8830_v13 = vld [vmem:[%s10116_s23 + $0x4e0] sm:$0xff]   ;;  %v8835_v18 = vld [vmem:[%s10116_s23 + $0x418] sm:$0xff]   ;;  %v8871_v6 = vld [vmem:[%s10116_s23 + $0x510] sm:$0xff]  }
 0x1db   : > { %7132 = vmatprep.mubr.bf16.mxu1 %v7919_v24  ;;  %v8841_v24 = vld [vmem:[%s10116_s23 + $0x448] sm:$0xff]   ;;  %v8872_v7 = vld [vmem:[%s10116_s23 + $0x590] sm:$0xff]  }
 0x1dc   : > { %8371 = vmatpush3.bf16.msra.mxu0 %v8791_v14  ;;  %v8831_v14 = vld [vmem:[%s10116_s23 + $0x420] sm:$0xff]  }
 0x1dd   : > { %8399 = vmatpush3.bf16.msra.mxu1 %v8792_v15  ;;  %8372 = vmatprep.subr.bf16.mxu0 %v8793_v20  ;;  %v8832_v15 = vld [vmem:[%s10116_s23 + $0x4a0] sm:$0xff]   ;;  %v8837_v20 = vld [vmem:[%s10116_s23 + $0x450] sm:$0xff]  }
 0x1de   : > { %8400 = vmatprep.subr.bf16.mxu1 %v8794_v21  ;;  %v8838_v21 = vld [vmem:[%s10116_s23 + $0x4d0] sm:$0xff]  }
 0x1df   : > { %7084 = vmatmul.mubr.bf16.gmra.mxu0 %v7916_v19  ;;  %v8836_v19 = vld [vmem:[%s10116_s23 + $0x498] sm:$0xff]  }
 0x1e0   : > { %8373 = vmatpush3.bf16.msra.mxu0 %v8795_v25  ;;  %7133 = vmatmul.mubr.bf16.gmra.mxu1 %v7918_v26  ;;  %v8842_v25 = vld [vmem:[%s10116_s23 + $0x4c8] sm:$0xff]  }
 0x1e1   : > { %8401 = vmatpush3.bf16.msra.mxu1 %v8796_v27  ;;  %8374 = vmatprep.subr.bf16.mxu0 %v8797_v28  ;;  %v8843_v26 = vld [vmem:[%s10116_s23 + $0x408] sm:$0xff]   ;;  %v8845_v28 = vld [vmem:[%s10116_s23 + $0x440] sm:$0xff]  }
 0x1e2   : > { %8402 = vmatprep.subr.bf16.mxu1 %v8798_v29  ;;  %7173 = vmatprep.mubr.bf16.mxu0 %v7889_v52  ;;  %v8844_v27 = vld [vmem:[%s10116_s23 + $0x488] sm:$0xff]   ;;  %v8846_v29 = vld [vmem:[%s10116_s23 + $0x4c0] sm:$0xff]  }
 0x1e3   : > { %7222 = vmatprep.mubr.bf16.mxu1 %v7891_v55  ;;  %v8857_v52 = vld [vmem:[%s10116_s23 + $0x568] sm:$0xff]  }
 0x1e4   : > { %8375 = vmatpush3.bf16.msra.mxu0 %v8799_v30  ;;  %v8847_v30 = vld [vmem:[%s10116_s23 + $0x400] sm:$0xff]   ;;  %v4472_v55 = vld [vmem:[%s10831_s0 + $0x1c8] sm:$0xff] }
 0x1e5   : > { %8403 = vmatpush3.bf16.msra.mxu1 %v8800_v31  ;;  %8376 = vmatprep.subr.bf16.mxu0 %v8801_v32  ;;  %v8848_v31 = vld [vmem:[%s10116_s23 + $0x480] sm:$0xff]  }
 0x1e6   : > { %8404 = vmatprep.subr.bf16.mxu1 %v8802_v33  ;;  %v4423_v32 = vld [vmem:[%s10831_s0 + $0x40] sm:$0xff] }
 0x1e7   : > { %v4439_v33 = vld [vmem:[%s10831_s0 + $0xc0] sm:$0xff] }
 0x1e8   : > { %8377 = vmatpush3.bf16.msra.mxu0 %v8803_v34  ;;  %v4424_v34 = vld [vmem:[%s10831_s0 + $0x48] sm:$0xff] }
 0x1e9   : > { %8405 = vmatpush3.bf16.msra.mxu1 %v8804_v35  ;;  %8378 = vmatprep.subr.bf16.mxu0 %v8805_v36  ;;  %v4440_v35 = vld [vmem:[%s10831_s0 + $0xc8] sm:$0xff]  ;;  %v7892_v36 = vcombine.low %v4423_v32, %v4439_v33 }
 0x1ea   : > { %8406 = vmatprep.subr.bf16.mxu1 %v8806_v37  ;;  %v7893_v37 = vcombine.high %v4423_v32, %v4439_v33  ;;  %v4457_v32 = vld [vmem:[%s10831_s0 + $0x150] sm:$0xff] }
 0x1eb   : > { %v4473_v33 = vld [vmem:[%s10831_s0 + $0x1d0] sm:$0xff] }
 0x1ec   : > { %8379 = vmatpush3.bf16.msra.mxu0 %v8807_v38  ;;  %v7894_v38 = vcombine.low %v4424_v34, %v4440_v35 }
 0x1ed   : > { %8407 = vmatpush3.bf16.msra.mxu1 %v8808_v39  ;;  %8380 = vmatprep.subr.bf16.mxu0 %v8809_v40  ;;  %v7895_v39 = vcombine.high %v4424_v34, %v4440_v35  ;;  %v8849_v40 = vld [vmem:[%s10116_s23 + $0x578] sm:$0xff]   ;;  %v7929_v34 = vcombine.high %v4457_v32, %v4473_v33  ;;  %v7928_v35 = vcombine.low %v4457_v32, %v4473_v33 }
 0x1ee   : > { %8408 = vmatprep.subr.bf16.mxu1 %v8810_v41  ;;  %v8850_v41 = vld [vmem:[%s10116_s23 + $0x5f8] sm:$0xff]  }
 0x1ef   : > { %v8915_v32 = vld [vmem:[%s10116_s23 + $0x738] sm:$0xff]  }
 0x1f0   : > { %8381 = vmatpush3.bf16.msra.mxu0 %v8811_v42  ;;  %v8851_v42 = vld [vmem:[%s10116_s23 + $0x538] sm:$0xff]  }
 0x1f1   : > { %8409 = vmatpush3.bf16.msra.mxu1 %v8812_v43  ;;  %8382 = vmatprep.subr.bf16.mxu0 %v8813_v44  ;;  %v8852_v43 = vld [vmem:[%s10116_s23 + $0x5b8] sm:$0xff]   ;;  %v8853_v44 = vld [vmem:[%s10116_s23 + $0x570] sm:$0xff]  }
 0x1f2   : > { %8410 = vmatprep.subr.bf16.mxu1 %v8814_v45  ;;  %v8854_v45 = vld [vmem:[%s10116_s23 + $0x5f0] sm:$0xff]  }
 0x1f4   : > { %8383 = vmatpush3.bf16.msra.mxu0 %v8815_v46  ;;  %v8855_v46 = vld [vmem:[%s10116_s23 + $0x530] sm:$0xff]  }
 0x1f5   : > { %8411 = vmatpush3.bf16.msra.mxu1 %v8816_v47  ;;  %8424 = vmatprep.subr.bf16.mxu0 %v8817_v56  ;;  %v8856_v47 = vld [vmem:[%s10116_s23 + $0x5b0] sm:$0xff]  }
 0x1f6   : > { %8452 = vmatprep.subr.bf16.mxu1 %v8818_v57  ;;  %v8859_v57 = vld [vmem:[%s10116_s23 + $0x528] sm:$0xff]  }
 0x1f7   : > { %7174 = vmatmul.mubr.bf16.vlgmr.msra.gmra.mxu0 %v7888_v51  ;;  %v7924_v51 = vcombine.low %v4455_v48, %v4471_v49  ;;  %v8897_v48 = vld [vmem:[%s10116_s23 + $0x658] sm:$0xff]  }
 0x1f8   : > { %7223 = vmatmul.mubr.bf16.vlgmr.msra.gmra.mxu1 %v7890_v54  ;;  %8425 = vmatpush3.bf16.msra.mxu0 %v8819_v58  ;;  %v4456_v54 = vld [vmem:[%s10831_s0 + $0x148] sm:$0xff]  ;;  %v8898_v49 = vld [vmem:[%s10116_s23 + $0x6d8] sm:$0xff]  }
 0x1f9   : > { %8453 = vmatpush3.bf16.msra.mxu1 %v8820_v59  ;;  %8426 = vmatprep.subr.bf16.mxu0 %v8821_v60  ;;  %v7927_v56 = vcombine.high %v4456_v54, %v4472_v55  ;;  %v7926_v58 = vcombine.low %v4456_v54, %v4472_v55  ;;  %v8860_v59 = vld [vmem:[%s10116_s23 + $0x5a8] sm:$0xff]   ;;  %v8861_v60 = vld [vmem:[%s10116_s23 + $0x560] sm:$0xff]   ;;  %v8903_v54 = vld [vmem:[%s10116_s23 + $0x610] sm:$0xff]  }
 0x1fa   : > { %8454 = vmatprep.subr.bf16.mxu1 %v8822_v61  ;;  %7181 = vmatprep.mubr.bf16.mxu0 %v7921_v2  ;;  %v8862_v61 = vld [vmem:[%s10116_s23 + $0x5e0] sm:$0xff]   ;;  %v8867_v2 = vld [vmem:[%s10116_s23 + $0x518] sm:$0xff]  }
 0x1fb   : > { %7230 = vmatprep.mubr.bf16.mxu1 %v7923_v8  ;;  %v8873_v8 = vld [vmem:[%s10116_s23 + $0x548] sm:$0xff]  }
 0x1fc   : > { %8427 = vmatpush3.bf16.msra.mxu0 %v8823_v62  ;;  %v8863_v62 = vld [vmem:[%s10116_s23 + $0x520] sm:$0xff]  }
 0x1fd   : > { %8455 = vmatpush3.bf16.msra.mxu1 %v8824_v63  ;;  %8428 = vmatprep.subr.bf16.mxu0 %v8825_v4  ;;  %v8864_v63 = vld [vmem:[%s10116_s23 + $0x5a0] sm:$0xff]   ;;  %v8869_v4 = vld [vmem:[%s10116_s23 + $0x550] sm:$0xff]  }
 0x1fe   : > { %8456 = vmatprep.subr.bf16.mxu1 %v8826_v5  ;;  %v8870_v5 = vld [vmem:[%s10116_s23 + $0x5d0] sm:$0xff]  }
 0x1ff   : > { %7182 = vmatmul.mubr.bf16.gmra.mxu0 %v7920_v3  ;;  %v8868_v3 = vld [vmem:[%s10116_s23 + $0x598] sm:$0xff]  }
 0x200   : > { %8429 = vmatpush3.bf16.msra.mxu0 %v8827_v9  ;;  %7231 = vmatmul.mubr.bf16.gmra.mxu1 %v7922_v10  ;;  %v8874_v9 = vld [vmem:[%s10116_s23 + $0x5c8] sm:$0xff]  }
 0x201   : > { %8457 = vmatpush3.bf16.msra.mxu1 %v8828_v11  ;;  %8430 = vmatprep.subr.bf16.mxu0 %v8829_v12  ;;  %v8875_v10 = vld [vmem:[%s10116_s23 + $0x508] sm:$0xff]   ;;  %v8877_v12 = vld [vmem:[%s10116_s23 + $0x540] sm:$0xff]  }
 0x202   : > { %8458 = vmatprep.subr.bf16.mxu1 %v8830_v13  ;;  %7271 = vmatprep.mubr.bf16.mxu0 %v7893_v37  ;;  %v8876_v11 = vld [vmem:[%s10116_s23 + $0x588] sm:$0xff]   ;;  %v8878_v13 = vld [vmem:[%s10116_s23 + $0x5c0] sm:$0xff]  }
 0x203   : > { %7320 = vmatprep.mubr.bf16.mxu1 %v7895_v39  ;;  %v8890_v37 = vld [vmem:[%s10116_s23 + $0x6e8] sm:$0xff]   ;;  %v4474_v39 = vld [vmem:[%s10831_s0 + $0x1d8] sm:$0xff] }
 0x204   : > { %8431 = vmatpush3.bf16.msra.mxu0 %v8831_v14  ;;  %v8879_v14 = vld [vmem:[%s10116_s23 + $0x500] sm:$0xff]  }
 0x205   : > { %8459 = vmatpush3.bf16.msra.mxu1 %v8832_v15  ;;  %8432 = vmatprep.subr.bf16.mxu0 %v8833_v16  ;;  %v8880_v15 = vld [vmem:[%s10116_s23 + $0x580] sm:$0xff]   ;;  %v4425_v16 = vld [vmem:[%s10831_s0 + $0x50] sm:$0xff] }
 0x206   : > { %8460 = vmatprep.subr.bf16.mxu1 %v8834_v17  ;;  %v4441_v17 = vld [vmem:[%s10831_s0 + $0xd0] sm:$0xff] }
 0x208   : > { %8433 = vmatpush3.bf16.msra.mxu0 %v8835_v18  ;;  %v7896_v18 = vcombine.low %v4425_v16, %v4441_v17 }
 0x209   : > { %8461 = vmatpush3.bf16.msra.mxu1 %v8836_v19  ;;  %8434 = vmatprep.subr.bf16.mxu0 %v8837_v20  ;;  %v7897_v19 = vcombine.high %v4425_v16, %v4441_v17  ;;  %v4426_v20 = vld [vmem:[%s10831_s0 + $0x58] sm:$0xff]  ;;  %v4443_v16 = vld [vmem:[%s10831_s0 + $0xe0] sm:$0xff]  ;;  %v4428_v17 = vld [vmem:[%s10831_s0 + $0x68] sm:$0xff] }
 0x20a   : > { %8462 = vmatprep.subr.bf16.mxu1 %v8838_v21  ;;  %v4442_v21 = vld [vmem:[%s10831_s0 + $0xd8] sm:$0xff] }
 0x20c   : > { %8435 = vmatpush3.bf16.msra.mxu0 %v8839_v22  ;;  %v7898_v22 = vcombine.low %v4426_v20, %v4442_v21 }
 0x20d   : > { %8463 = vmatpush3.bf16.msra.mxu1 %v8840_v23  ;;  %8436 = vmatprep.subr.bf16.mxu0 %v8841_v24  ;;  %v7899_v23 = vcombine.high %v4426_v20, %v4442_v21  ;;  %v8881_v24 = vld [vmem:[%s10116_s23 + $0x678] sm:$0xff]  }
 0x20e   : > { %8464 = vmatprep.subr.bf16.mxu1 %v8842_v25  ;;  %v8882_v25 = vld [vmem:[%s10116_s23 + $0x6f8] sm:$0xff]  }
 0x210   : > { %8437 = vmatpush3.bf16.msra.mxu0 %v8843_v26  ;;  %v8883_v26 = vld [vmem:[%s10116_s23 + $0x638] sm:$0xff]  }
 0x211   : > { %8465 = vmatpush3.bf16.msra.mxu1 %v8844_v27  ;;  %8438 = vmatprep.subr.bf16.mxu0 %v8845_v28  ;;  %v8884_v27 = vld [vmem:[%s10116_s23 + $0x6b8] sm:$0xff]   ;;  %v8885_v28 = vld [vmem:[%s10116_s23 + $0x670] sm:$0xff]  }
 0x212   : > { %8466 = vmatprep.subr.bf16.mxu1 %v8846_v29  ;;  %v8886_v29 = vld [vmem:[%s10116_s23 + $0x6f0] sm:$0xff]  }
 0x214   : > { %8439 = vmatpush3.bf16.msra.mxu0 %v8847_v30  ;;  %v8887_v30 = vld [vmem:[%s10116_s23 + $0x630] sm:$0xff]  }
 0x215   : > { %8467 = vmatpush3.bf16.msra.mxu1 %v8848_v31  ;;  %8480 = vmatprep.subr.bf16.mxu0 %v8849_v40  ;;  %v8888_v31 = vld [vmem:[%s10116_s23 + $0x6b0] sm:$0xff]  }
 0x216   : > { %8508 = vmatprep.subr.bf16.mxu1 %v8850_v41  ;;  %v8891_v41 = vld [vmem:[%s10116_s23 + $0x628] sm:$0xff]  }
 0x217   : > { %7272 = vmatmul.mubr.bf16.vlgmr.msra.gmra.mxu0 %v7892_v36  ;;  %v8889_v36 = vld [vmem:[%s10116_s23 + $0x668] sm:$0xff]  }
 0x218   : > { %7321 = vmatmul.mubr.bf16.vlgmr.msra.gmra.mxu1 %v7894_v38  ;;  %8481 = vmatpush3.bf16.msra.mxu0 %v8851_v42  ;;  %v4458_v38 = vld [vmem:[%s10831_s0 + $0x158] sm:$0xff] }
 0x219   : > { %8509 = vmatpush3.bf16.msra.mxu1 %v8852_v43  ;;  %8482 = vmatprep.subr.bf16.mxu0 %v8853_v44  ;;  %v7931_v40 = vcombine.high %v4458_v38, %v4474_v39  ;;  %v7930_v42 = vcombine.low %v4458_v38, %v4474_v39  ;;  %v8892_v43 = vld [vmem:[%s10116_s23 + $0x6a8] sm:$0xff]   ;;  %v8893_v44 = vld [vmem:[%s10116_s23 + $0x660] sm:$0xff]   ;;  %v8917_v38 = vld [vmem:[%s10116_s23 + $0x770] sm:$0xff]  }
 0x21a   : > { %8510 = vmatprep.subr.bf16.mxu1 %v8854_v45  ;;  %7279 = vmatprep.mubr.bf16.mxu0 %v7925_v50  ;;  %v8894_v45 = vld [vmem:[%s10116_s23 + $0x6e0] sm:$0xff]   ;;  %v8899_v50 = vld [vmem:[%s10116_s23 + $0x618] sm:$0xff]  }
 0x21b   : > { %7328 = vmatprep.mubr.bf16.mxu1 %v7927_v56  ;;  %v8904_v56 = vld [vmem:[%s10116_s23 + $0x690] sm:$0xff]  }
 0x21c   : > { %8483 = vmatpush3.bf16.msra.mxu0 %v8855_v46  ;;  %v8895_v46 = vld [vmem:[%s10116_s23 + $0x620] sm:$0xff]  }
 0x21d   : > { %8511 = vmatpush3.bf16.msra.mxu1 %v8856_v47  ;;  %8484 = vmatprep.subr.bf16.mxu0 %v8857_v52  ;;  %v8896_v47 = vld [vmem:[%s10116_s23 + $0x6a0] sm:$0xff]   ;;  %v8901_v52 = vld [vmem:[%s10116_s23 + $0x650] sm:$0xff]  }
 0x21e   : > { %8512 = vmatprep.subr.bf16.mxu1 %v8858_v53  ;;  %v8902_v53 = vld [vmem:[%s10116_s23 + $0x6d0] sm:$0xff]  }
 0x21f   : > { %7280 = vmatmul.mubr.bf16.gmra.mxu0 %v7924_v51  ;;  %v8900_v51 = vld [vmem:[%s10116_s23 + $0x698] sm:$0xff]  }
 0x220   : > { %8485 = vmatpush3.bf16.msra.mxu0 %v8859_v57  ;;  %7329 = vmatmul.mubr.bf16.gmra.mxu1 %v7926_v58  ;;  %v8905_v58 = vld [vmem:[%s10116_s23 + $0x648] sm:$0xff]  }
 0x221   : > { %8513 = vmatpush3.bf16.msra.mxu1 %v8860_v59  ;;  %8486 = vmatprep.subr.bf16.mxu0 %v8861_v60  ;;  %v8906_v60 = vld [vmem:[%s10116_s23 + $0x6c8] sm:$0xff]  }
 0x222   : > { %8514 = vmatprep.subr.bf16.mxu1 %v8862_v61  ;;  %7369 = vmatprep.mubr.bf16.mxu0 %v7897_v19 }
 0x223   : > { %7418 = vmatprep.mubr.bf16.mxu1 %v7899_v23 }
 0x224   : > { %8487 = vmatpush3.bf16.msra.mxu0 %v8863_v62 }
 0x225   : > { %8515 = vmatpush3.bf16.msra.mxu1 %v8864_v63  ;;  %8488 = vmatprep.subr.bf16.mxu0 %v8865_v0  ;;  %v8907_v63 = vld [vmem:[%s10116_s23 + $0x608] sm:$0xff]  }
 0x226   : > { %8516 = vmatprep.subr.bf16.mxu1 %v8866_v1 }
 0x228   : > { %8489 = vmatpush3.bf16.msra.mxu0 %v8867_v2  ;;  %v8908_v2 = vld [vmem:[%s10116_s23 + $0x688] sm:$0xff]  }
 0x229   : > { %8517 = vmatpush3.bf16.msra.mxu1 %v8868_v3  ;;  %8490 = vmatprep.subr.bf16.mxu0 %v8869_v4  ;;  %v8909_v4 = vld [vmem:[%s10116_s23 + $0x640] sm:$0xff]  }
 0x22a   : > { %8518 = vmatprep.subr.bf16.mxu1 %v8870_v5 }
 0x22c   : > { %8491 = vmatpush3.bf16.msra.mxu0 %v8871_v6 }
 0x22d   : > { %8519 = vmatpush3.bf16.msra.mxu1 %v8872_v7  ;;  %8492 = vmatprep.subr.bf16.mxu0 %v8873_v8  ;;  %v8910_v7 = vld [vmem:[%s10116_s23 + $0x6c0] sm:$0xff]  }
 0x22e   : > { %8520 = vmatprep.subr.bf16.mxu1 %v8874_v9 }
 0x230   : > { %8493 = vmatpush3.bf16.msra.mxu0 %v8875_v10  ;;  %v8911_v10 = vld [vmem:[%s10116_s23 + $0x600] sm:$0xff]  }
 0x231   : > { %8521 = vmatpush3.bf16.msra.mxu1 %v8876_v11  ;;  %8494 = vmatprep.subr.bf16.mxu0 %v8877_v12 }
 0x232   : > { %8522 = vmatprep.subr.bf16.mxu1 %v8878_v13  ;;  %v8912_v13 = vld [vmem:[%s10116_s23 + $0x680] sm:$0xff]  }
 0x234   : > { %8495 = vmatpush3.bf16.msra.mxu0 %v8879_v14 }
 0x235   : > { %8523 = vmatpush3.bf16.msra.mxu1 %v8880_v15  ;;  %8536 = vmatprep.subr.bf16.mxu0 %v8881_v24  ;;  %v4427_v15 = vld [vmem:[%s10831_s0 + $0x60] sm:$0xff] }
 0x236   : > { %8564 = vmatprep.subr.bf16.mxu1 %v8882_v25  ;;  %v7900_v20 = vcombine.low %v4427_v15, %v4443_v16  ;;  %v7901_v21 = vcombine.high %v4427_v15, %v4443_v16  ;;  %v8939_v16 = vld [vmem:[%s10116_s23 + $0x708] sm:$0xff]  }
 0x237   : > { %7370 = vmatmul.mubr.bf16.vlgmr.msra.gmra.mxu0 %v7896_v18 }
 0x238   : > { %7419 = vmatmul.mubr.bf16.vlgmr.msra.gmra.mxu1 %v7898_v22  ;;  %8537 = vmatpush3.bf16.msra.mxu0 %v8883_v26  ;;  %v4444_v22 = vld [vmem:[%s10831_s0 + $0xe8] sm:$0xff] }
 0x239   : > { %8565 = vmatpush3.bf16.msra.mxu1 %v8884_v27  ;;  %8538 = vmatprep.subr.bf16.mxu0 %v8885_v28  ;;  %v7902_v25 = vcombine.low %v4428_v17, %v4444_v22  ;;  %v7903_v26 = vcombine.high %v4428_v17, %v4444_v22  ;;  %v8913_v27 = vld [vmem:[%s10116_s23 + $0x778] sm:$0xff]  }
 0x23a   : > { %8566 = vmatprep.subr.bf16.mxu1 %v8886_v29  ;;  %7377 = vmatprep.mubr.bf16.mxu0 %v7929_v34 }
 0x23b   : > { %7426 = vmatprep.mubr.bf16.mxu1 %v7931_v40  ;;  %v8918_v40 = vld [vmem:[%s10116_s23 + $0x7f0] sm:$0xff]  }
 0x23c   : > { %8539 = vmatpush3.bf16.msra.mxu0 %v8887_v30  ;;  %v8914_v30 = vld [vmem:[%s10116_s23 + $0x7f8] sm:$0xff]  }
 0x23d   : > { %8567 = vmatpush3.bf16.msra.mxu1 %v8888_v31  ;;  %8540 = vmatprep.subr.bf16.mxu0 %v8889_v36 }
 0x23e   : > { %8568 = vmatprep.subr.bf16.mxu1 %v8890_v37 }
 0x23f   : > { %7378 = vmatmul.mubr.bf16.gmra.mxu0 %v7928_v35  ;;  %v8916_v35 = vld [vmem:[%s10116_s23 + $0x7b8] sm:$0xff]  }
 0x240   : > { %8541 = vmatpush3.bf16.msra.mxu0 %v8891_v41  ;;  %7427 = vmatmul.mubr.bf16.gmra.mxu1 %v7930_v42  ;;  %v8919_v41 = vld [vmem:[%s10116_s23 + $0x730] sm:$0xff]  }
 0x241   : > { %8569 = vmatpush3.bf16.msra.mxu1 %v8892_v43  ;;  %8542 = vmatprep.subr.bf16.mxu0 %v8893_v44  ;;  %v8920_v43 = vld [vmem:[%s10116_s23 + $0x7b0] sm:$0xff]   ;;  %v4459_v44 = vld [vmem:[%s10831_s0 + $0x160] sm:$0xff] }
 0x242   : > { %8570 = vmatprep.subr.bf16.mxu1 %v8894_v45  ;;  %7467 = vmatprep.mubr.bf16.mxu0 %v7901_v21  ;;  %v4475_v45 = vld [vmem:[%s10831_s0 + $0x1e0] sm:$0xff] }
 0x243   : > { %7516 = vmatprep.mubr.bf16.mxu1 %v7903_v26 }
 0x244   : > { %8543 = vmatpush3.bf16.msra.mxu0 %v8895_v46  ;;  %v7933_v46 = vcombine.high %v4459_v44, %v4475_v45 }
 0x245   : > { %8571 = vmatpush3.bf16.msra.mxu1 %v8896_v47  ;;  %8544 = vmatprep.subr.bf16.mxu0 %v8897_v48  ;;  %v7932_v47 = vcombine.low %v4459_v44, %v4475_v45  ;;  %v8921_v48 = vld [vmem:[%s10116_s23 + $0x768] sm:$0xff]  }
 0x246   : > { %8572 = vmatprep.subr.bf16.mxu1 %v8898_v49  ;;  %v8922_v49 = vld [vmem:[%s10116_s23 + $0x7e8] sm:$0xff]  }
 0x248   : > { %8545 = vmatpush3.bf16.msra.mxu0 %v8899_v50  ;;  %v4460_v50 = vld [vmem:[%s10831_s0 + $0x168] sm:$0xff] }
 0x249   : > { %8573 = vmatpush3.bf16.msra.mxu1 %v8900_v51  ;;  %8546 = vmatprep.subr.bf16.mxu0 %v8901_v52  ;;  %v4476_v51 = vld [vmem:[%s10831_s0 + $0x1e8] sm:$0xff] }
 0x24a   : > { %8574 = vmatprep.subr.bf16.mxu1 %v8902_v53  ;;  %v7935_v52 = vcombine.high %v4460_v50, %v4476_v51  ;;  %v8923_v53 = vld [vmem:[%s10116_s23 + $0x728] sm:$0xff]  }
 0x24c   : > { %8547 = vmatpush3.bf16.msra.mxu0 %v8903_v54  ;;  %v7934_v54 = vcombine.low %v4460_v50, %v4476_v51 }
 0x24d   : > { %8575 = vmatpush3.bf16.msra.mxu1 %v8904_v56  ;;  %8548 = vmatprep.subr.bf16.mxu0 %v8905_v58  ;;  %v8925_v56 = vld [vmem:[%s10116_s23 + $0x760] sm:$0xff]  }
 0x24e   : > { %8576 = vmatprep.subr.bf16.mxu1 %v8906_v60  ;;  %v8927_v58 = vld [vmem:[%s10116_s23 + $0x720] sm:$0xff]   ;;  %v8929_v60 = vld [vmem:[%s10116_s23 + $0x758] sm:$0xff]  }
 0x250   : > { %8549 = vmatpush3.bf16.msra.mxu0 %v8907_v63  ;;  %v8932_v63 = vld [vmem:[%s10116_s23 + $0x798] sm:$0xff]  }
 0x251   : > { %8577 = vmatpush3.bf16.msra.mxu1 %v8908_v2  ;;  %8550 = vmatprep.subr.bf16.mxu0 %v8909_v4  ;;  %v8935_v4 = vld [vmem:[%s10116_s23 + $0x710] sm:$0xff]  }
 0x252   : > { %8578 = vmatprep.subr.bf16.mxu1 %v8910_v7 }
 0x254   : > { %8551 = vmatpush3.bf16.msra.mxu0 %v8911_v10 }
 0x255   : > { %8579 = vmatpush3.bf16.msra.mxu1 %v8912_v13  ;;  %8592 = vmatprep.subr.bf16.mxu0 %v8913_v27 }
 0x256   : > { %8620 = vmatprep.subr.bf16.mxu1 %v8914_v30 }
 0x257   : > { %v8216_v55 = vpop.f32.mrf.mxu0  ;;  %7468 = vmatmul.mubr.bf16.vlgmr.msra.gmra.mxu0 %v7900_v20  ;;  %v8940_v20 = vld [vmem:[%s10116_s23 + $0x788] sm:$0xff]  }
 0x258   : > { %v8244_v57 = vpop.f32.mrf.mxu1  ;;  %7517 = vmatmul.mubr.bf16.vlgmr.msra.gmra.mxu1 %v7902_v25  ;;  %8593 = vmatpush3.bf16.msra.mxu0 %v8915_v32  ;;  %v8942_v25 = vld [vmem:[%s10116_s23 + $0x7c0] sm:$0xff]   ;;  %v4445_v32 = vld [vmem:[%s10831_s0 + $0xf0] sm:$0xff] }
 0x259   : > { %v8217_v59 = vpop.f32.mrf.mxu0  ;;  %8621 = vmatpush3.bf16.msra.mxu1 %v8916_v35  ;;  %8594 = vmatprep.subr.bf16.mxu0 %v8917_v38 }
 0x25a   : > { %v8218_v61 = vadd.f32 %v8217_v59, %v8216_v55  ;;  %v8245_v62 = vpop.f32.mrf.mxu1  ;;  %8622 = vmatprep.subr.bf16.mxu1 %v8918_v40  ;;  %7475 = vmatprep.mubr.bf16.mxu0 %v7933_v46  ;;  %v8924_v55 = vld [vmem:[%s10116_s23 + $0x7a8] sm:$0xff]   ;;  %v8928_v59 = vld [vmem:[%s10116_s23 + $0x7a0] sm:$0xff]   ;;  %v4461_v40 = vld [vmem:[%s10831_s0 + $0x170] sm:$0xff] }
 0x25b   : > { %v8246_v0 = vadd.f32 %v8245_v62, %v8244_v57  ;;  %v8219_v1 = vpop.f32.mrf.mxu0  ;;  %7524 = vmatprep.mubr.bf16.mxu1 %v7935_v52  ;;  %v8926_v57 = vld [vmem:[%s10116_s23 + $0x7e0] sm:$0xff]   ;;  %v8931_v62 = vld [vmem:[%s10116_s23 + $0x718] sm:$0xff]  }
 0x25c   : > { %v8247_v3 = vpop.f32.mrf.mxu1  ;;  %8595 = vmatpush3.bf16.msra.mxu0 %v8919_v41  ;;  %v4477_v41 = vld [vmem:[%s10831_s0 + $0x1f0] sm:$0xff] }
 0x25d   : > { %v10475_v5 = vadd.f32 %v8246_v0, %v8218_v61  ;;  %v8220_v6 = vpop.f32.mrf.mxu0  ;;  %8623 = vmatpush3.bf16.msra.mxu1 %v8920_v43  ;;  %8596 = vmatprep.subr.bf16.mxu0 %v8921_v48  ;;  %v8930_v61 = vld [vmem:[%s10116_s23 + $0x7d8] sm:$0xff]   ;;  %v8933_v0 = vld [vmem:[%s10116_s23 + $0x750] sm:$0xff]   ;;  %v7937_v46 = vcombine.high %v4461_v40, %v4477_v41 }
 0x25e   : > { %v8221_v8 = vadd.f32 %v8220_v6, %v8219_v1  ;;  %v8248_v9 = vpop.f32.mrf.mxu1  ;;  %8624 = vmatprep.subr.bf16.mxu1 %v8922_v49  ;;  %v4462_v43 = vld [vmem:[%s10831_s0 + $0x178] sm:$0xff] }
 0x25f   : > { %v8249_v11 = vadd.f32 %v8248_v9, %v8247_v3  ;;  %v8222_v12 = vpop.f32.mrf.mxu0  ;;  %7476 = vmatmul.mubr.bf16.gmra.mxu0 %v7932_v47  ;;  %v8934_v3 = vld [vmem:[%s10116_s23 + $0x7d0] sm:$0xff]   ;;  %v4478_v47 = vld [vmem:[%s10831_s0 + $0x1f8] sm:$0xff] }
 0x260   : > { %v8250_v14 = vpop.f32.mrf.mxu1  ;;  %8597 = vmatpush3.bf16.msra.mxu0 %v8923_v53  ;;  %7525 = vmatmul.mubr.bf16.gmra.mxu1 %v7934_v54  ;;  %v7939_v49 = vcombine.high %v4462_v43, %v4478_v47 }
 0x261   : > { %v10489_v18 = vadd.f32 %v8249_v11, %v8221_v8  ;;  %v8223_v19 = vpop.f32.mrf.mxu0  ;;  %8625 = vmatpush3.bf16.msra.mxu1 %v8924_v55  ;;  %8598 = vmatprep.subr.bf16.mxu0 %v8925_v56  ;;  %v8936_v8 = vld [vmem:[%s10116_s23 + $0x790] sm:$0xff]   ;;  %v8937_v11 = vld [vmem:[%s10116_s23 + $0x748] sm:$0xff]  }
 0x262   : > { %v8224_v23 = vadd.f32 %v8223_v19, %v8222_v12  ;;  %v8251_v24 = vpop.f32.mrf.mxu1  ;;  %8626 = vmatprep.subr.bf16.mxu1 %v8926_v57 }
 0x263   : > { %v8252_v28 = vadd.f32 %v8251_v24, %v8250_v14  ;;  %v8225_v29 = vpop.f32.mrf.mxu0  ;;  %v8938_v14 = vld [vmem:[%s10116_s23 + $0x7c8] sm:$0xff]   ;;  %v8941_v24 = vld [vmem:[%s10116_s23 + $0x740] sm:$0xff]  }
 0x264   : > { %v8253_v31 = vpop.f32.mrf.mxu1  ;;  %8599 = vmatpush3.bf16.msra.mxu0 %v8927_v58  ;;  %v7936_v58 = vcombine.low %v4461_v40, %v4477_v41 }
 0x265   : > { %v10497_v33 = vadd.f32 %v8252_v28, %v8224_v23  ;;  %v8226_v34 = vpop.f32.mrf.mxu0  ;;  %8627 = vmatpush3.bf16.msra.mxu1 %v8928_v59  ;;  %8600 = vmatprep.subr.bf16.mxu0 %v8929_v60  ;;  %v8944_v28 = vld [vmem:[%s10116_s23 + $0x780] sm:$0xff]   ;;  %v7938_v59 = vcombine.low %v4462_v43, %v4478_v47 }
 0x266   : > { %v8227_v36 = vadd.f32 %v8226_v34, %v8225_v29  ;;  %v8254_v37 = vpop.f32.mrf.mxu1  ;;  %8628 = vmatprep.subr.bf16.mxu1 %v8930_v61  ;;  %v4429_v29 = vld [vmem:[%s10831_s0 + $0x70] sm:$0xff]  ;;  %v4446_v34 = vld [vmem:[%s10831_s0 + $0xf8] sm:$0xff] }
 0x267   : > { %v8255_v39 = vadd.f32 %v8254_v37, %v8253_v31  ;;  %v7905_v37 = vcombine.high %v4429_v29, %v4445_v32 }
 0x268   : > { %8601 = vmatpush3.bf16.msra.mxu0 %v8931_v62 }
 0x269   : > { %v10503_v42 = vadd.f32 %v8255_v39, %v8227_v36  ;;  %8629 = vmatpush3.bf16.msra.mxu1 %v8932_v63  ;;  %8602 = vmatprep.subr.bf16.mxu0 %v8933_v0  ;;  %v7904_v36 = vcombine.low %v4429_v29, %v4445_v32 }
 0x26a   : > { %8630 = vmatprep.subr.bf16.mxu1 %v8934_v3  ;;  %7565 = vmatprep.mubr.bf16.mxu0 %v7905_v37 }
 0x26c   : > { %8603 = vmatpush3.bf16.msra.mxu0 %v8935_v4 }
 0x26d   : > { %8631 = vmatpush3.bf16.msra.mxu1 %v8936_v8  ;;  %8604 = vmatprep.subr.bf16.mxu0 %v8937_v11 }
 0x26e   : > { %8632 = vmatprep.subr.bf16.mxu1 %v8938_v14 }
 0x270   : > { %8605 = vmatpush3.bf16.msra.mxu0 %v8939_v16 }
 0x271   : > { %8633 = vmatpush3.bf16.msra.mxu1 %v8940_v20  ;;  %8606 = vmatprep.subr.bf16.mxu0 %v8941_v24 }
 0x272   : > { %8634 = vmatprep.subr.bf16.mxu1 %v8942_v25 }
 0x275   : > { %8635 = vmatpush3.bf16.msra.mxu1 %v8944_v28 }
 0x277   : > { %v8272_v1 = vpop.f32.mrf.mxu0 }
 0x278   : > { %v8300_v2 = vpop.f32.mrf.mxu1 }
 0x279   : > { %v8273_v6 = vpop.f32.mrf.mxu0 }
 0x27a   : > { %v8301_v7 = vpop.f32.mrf.mxu1  ;;  %v8274_v9 = vadd.f32 %v8273_v6, %v8272_v1 }
 0x27b   : > { %v8302_v10 = vadd.f32 %v8301_v7, %v8300_v2  ;;  %v8275_v12 = vpop.f32.mrf.mxu0 }
 0x27c   : > { %v8303_v13 = vpop.f32.mrf.mxu1  ;;  %v6980_v15 = vadd.f32 %v8274_v9, %v10475_v5  ;;  %v8943_v5 = vld [vmem:[%s10116_s23 + $0x700] sm:$0xff]  }
 0x27d   : > { %v8276_v17 = vpop.f32.mrf.mxu0  ;;  %8607 = vmatpush3.bf16.msra.mxu0 %v8943_v5 }
 0x27e   : > { %v8304_v19 = vpop.f32.mrf.mxu1  ;;  %v10539_v21 = vadd.f32 %v8302_v10, %v6980_v15  ;;  %v8277_v22 = vadd.f32 %v8276_v17, %v8275_v12 }
 0x27f   : > { %v8305_v23 = vadd.f32 %v8304_v19, %v8303_v13  ;;  %v8278_v27 = vpop.f32.mrf.mxu0 }
 0x280   : > { %v6983_v26 = vadd.f32 %v8277_v22, %v10489_v18  ;;  %v4430_v18 = vld [vmem:[%s10831_s0 + $0x78] sm:$0xff]  ;;  %v8306_v44 = vpop.f32.mrf.mxu1  ;;  %7566 = vmatmul.mubr.bf16.vlgmr.msra.gmra.mxu0 %v7904_v36 }
 0x281   : > { %v8279_v31 = vpop.f32.mrf.mxu0  ;;  %v7906_v38 = vcombine.low %v4430_v18, %v4446_v34  ;;  %v7907_v39 = vcombine.high %v4430_v18, %v4446_v34  ;;  %7573 = vmatprep.mubr.bf16.mxu0 %v7937_v46 }
 0x282   : > { %v10549_v30 = vadd.f32 %v8305_v23, %v6983_v26  ;;  %v8280_v35 = vadd.f32 %v8279_v31, %v8278_v27  ;;  %v8307_v50 = vpop.f32.mrf.mxu1  ;;  %v8985_v23 = vmov 0.0  }
 0x283   : > { %v8281_v45 = vpop.f32.mrf.mxu0  ;;  %7614 = vmatprep.mubr.bf16.mxu1 %v7907_v39  ;;  %v8308_v52 = vadd.f32 %v8307_v50, %v8306_v44  ;;  %7639 = vst [vmem:[%s10627_s11] sm:$0x1] %v8985_v23  ;;  %7640 = vst [vmem:[%s10632_s14] sm:$0x1] %v8985_v23 }
 0x284   : > { %v6988_v48 = vadd.f32 %v8280_v35, %v10497_v33  ;;  %7615 = vmatmul.mubr.bf16.vlgmr.msra.gmra.mxu1 %v7906_v38  ;;  %v8309_v54 = vpop.f32.mrf.mxu1 }
 0x285   : > { %v8282_v51 = vpop.f32.mrf.mxu0  ;;  %7622 = vmatprep.mubr.bf16.mxu1 %v7939_v49 }
 0x286   : > { %v8283_v53 = vadd.f32 %v8282_v51, %v8281_v45  ;;  %v10573_v55 = vadd.f32 %v8308_v52, %v6988_v48  ;;  %v8310_v57 = vpop.f32.mrf.mxu1 }
 0x287   : > { %v8311_v33 = vadd.f32 %v8310_v57, %v8309_v54 }
 0x288   : > { %v6991_v56 = vadd.f32 %v8283_v53, %v10503_v42  ;;  %7574 = vmatmul.mubr.bf16.gmra.mxu0 %v7936_v58 }
 0x28a   : > { %v10576_v60 = vadd.f32 %v8311_v33, %v6991_v56 }
 0x28c   : > { %7623 = vmatmul.mubr.bf16.gmra.mxu1 %v7938_v59 }
 0x297   : > { %v10578_v61 = vpop.f32.mrf.mxu0 }
 0x298   : > { %v10584_v0 = vpop.f32.mrf.mxu1 }
 0x299   : > { %v10580_v62 = vpop.f32.mrf.mxu0 }
 0x29a   : > { %v10588_v42 = vpop.f32.mrf.mxu1 }
 0x29b   : > { %v10582_v63 = vpop.f32.mrf.mxu0 }
 0x29c   : > { %v10592_v3 = vpop.f32.mrf.mxu1 }
 0x29d   : > { %v10586_v1 = vpop.f32.mrf.mxu0 }
 0x29e   : > { %v10596_v6 = vpop.f32.mrf.mxu1 }
 0x29f   : > { %v10590_v2 = vpop.f32.mrf.mxu0 }
 0x2a0   : > { %v10598_v7 = vpop.f32.mrf.mxu1 }
 0x2a1   : > { %v10594_v4 = vpop.f32.mrf.mxu0 }
 0x2a2   : > { %v10602_v9 = vpop.f32.mrf.mxu1 }
 0x2a3   : > { %v10600_v8 = vpop.f32.mrf.mxu0 }
 0x2a4   : > { %v10608_v12 = vpop.f32.mrf.mxu1 }
 0x2a5   : > { %v10604_v10 = vpop.f32.mrf.mxu0 }
 0x2a6   : > { %v10612_v14 = vpop.f32.mrf.mxu1 }
 0x2b7   : > { %v10606_v11 = vpop.f32.mrf.mxu0 }
 0x2b8   : > { %v10614_v15 = vpop.f32.mrf.mxu1 }
 0x2b9   : > { %v10610_v13 = vpop.f32.mrf.mxu0 }
 0x2ba   : > { %v10619_v17 = vpop.f32.mrf.mxu1 }
 0x2bb   : > { %v10616_v16 = vpop.f32.mrf.mxu0 }
 0x2bc   : > { %v10634_v20 = vpop.f32.mrf.mxu1 }
 0x2bd   : > { %v10621_v19 = vpop.f32.mrf.mxu0 }
 0x2be   : > { %v10640_v24 = vpop.f32.mrf.mxu1 }
 0x2bf   : > { %v10636_v22 = vpop.f32.mrf.mxu0 }
 0x2c0   : > { %v10644_v26 = vpop.f32.mrf.mxu1 }
 0x2c1   : > { %v10642_v25 = vpop.f32.mrf.mxu0 }
 0x2c2   : > { %v10648_v5 = vpop.f32.mrf.mxu1 }
 0x2c3   : > { %v10646_v27 = vpop.f32.mrf.mxu0 }
 0x2c4   : > { %v10652_v29 = vpop.f32.mrf.mxu1 }
 0x2c5   : > { %v10650_v28 = vpop.f32.mrf.mxu0 }
 0x2c6   : > { %v10654_v32 = vpop.f32.mrf.mxu1 }
 0x2d7   : > { %v8440_v31 = vpop.f32.mrf.mxu0 }
 0x2d8   : > { %v10656_v34 = vpop.f32.mrf.mxu1 }
 0x2d9   : > { %v8441_v18 = vpop.f32.mrf.mxu0 }
 0x2da   : > { %v10660_v36 = vpop.f32.mrf.mxu1 }
 0x2db   : > { %v10658_v35 = vpop.f32.mrf.mxu0 }
 0x2dc   : > { %v10664_v38 = vpop.f32.mrf.mxu1 }
 0x2dd   : > { %v10662_v37 = vpop.f32.mrf.mxu0 }
 0x2de   : > { %v10668_v40 = vpop.f32.mrf.mxu1 }
 0x2df   : > { %v10666_v39 = vpop.f32.mrf.mxu0 }
 0x2e0   : > { %v10672_v43 = vpop.f32.mrf.mxu1 }
 0x2e1   : > { %v10670_v41 = vpop.f32.mrf.mxu0 }
 0x2e2   : > { %v10676_v45 = vpop.f32.mrf.mxu1 }
 0x2e3   : > { %v10674_v44 = vpop.f32.mrf.mxu0  ;;  %10838 = vst [vmem:[#allocation5_spill] sm:$0xff] %v10676_v45 }
 0x2e4   : > { %10837 = vst [vmem:[#allocation4_spill] sm:$0xff] %v10674_v44  ;;  %v10680_v47 = vpop.f32.mrf.mxu1 }
 0x2e5   : > { %v10678_v46 = vpop.f32.mrf.mxu0  ;;  %10840 = vst [vmem:[#allocation7_spill] sm:$0xff] %v10680_v47 }
 0x2e6   : > { %10839 = vst [vmem:[#allocation6_spill] sm:$0xff] %v10678_v46  ;;  %v10682_v49 = vpop.f32.mrf.mxu1 }
 0x2e7   : > { %10841 = vst [vmem:[#allocation8_spill] sm:$0xff] %v10682_v49 }
 0x2f7   : > { %v8496_v48 = vpop.f32.mrf.mxu0 }
 0x2f8   : > { %v10684_v50 = vpop.f32.mrf.mxu1 }
 0x2f9   : > { %v8497_v51 = vpop.f32.mrf.mxu0 }
 0x2fa   : > { %v10686_v52 = vpop.f32.mrf.mxu1 }
 0x2fb   : > { %v10688_v53 = vpop.f32.mrf.mxu0 }
 0x2fc   : > { %v10690_v54 = vpop.f32.mrf.mxu1 }
 0x2fd   : > { %10842 = vst [vmem:[#allocation9_spill] sm:$0xff] %v10690_v54  ;;  %v10692_v56 = vpop.f32.mrf.mxu0 }
 0x2fe   : > { %v10694_v57 = vpop.f32.mrf.mxu1 }
 0x2ff   : > { %10843 = vst [vmem:[#allocation10_spill] sm:$0xff] %v10694_v57  ;;  %v10696_v58 = vpop.f32.mrf.mxu0  ;;  %v8330_v57 = vadd.f32 %v10580_v62, %v10578_v61 }
 0x300   : > { %10844 = vst [vmem:[#allocation11_spill] sm:$0xff] %v10696_v58  ;;  %v10698_v59 = vpop.f32.mrf.mxu1 }
 0x301   : > { %10845 = vst [vmem:[#allocation12_spill] sm:$0xff] %v10698_v59  ;;  %v10700_v33 = vpop.f32.mrf.mxu0  ;;  %v7078_v59 = vadd.f32 %v8330_v57, %v10539_v21 }
 0x302   : > { %v10702_v23 = vpop.f32.mrf.mxu1 }
 0x303   : > { %10846 = vst [vmem:[#allocation13_spill] sm:$0xff] %v10702_v23  ;;  %v10704_v49 = vpop.f32.mrf.mxu0  ;;  %v8358_v23 = vadd.f32 %v10588_v42, %v10584_v0  ;;  %v8361_v0 = vadd.f32 %v10596_v6, %v10592_v3  ;;  %v8392_v3 = vadd.f32 %v10642_v25, %v10636_v22  ;;  %v8445_v22 = vadd.f32 %v10662_v37, %v10658_v35 }
 0x304   : > { %10847 = vst [vmem:[#allocation14_spill] sm:$0xff] %v10704_v49  ;;  %v10706_v47 = vpop.f32.mrf.mxu1  ;;  %v8333_v49 = vadd.f32 %v10586_v1, %v10582_v63  ;;  %v8414_v63 = vadd.f32 %v10619_v17, %v10614_v15  ;;  %v8389_v1 = vadd.f32 %v10621_v19, %v10616_v16  ;;  %v8470_v19 = vadd.f32 %v10660_v36, %v10656_v34 }
 0x305   : > { %10848 = vst [vmem:[#allocation15_spill] sm:$0xff] %v10706_v47  ;;  %v10708_v46 = vpop.f32.mrf.mxu0  ;;  %v7127_v62 = vadd.f32 %v8358_v23, %v7078_v59  ;;  %v8423_v35 = vadd.f32 %v10654_v32, %v10652_v29 }
 0x306   : > { %10849 = vst [vmem:[#allocation16_spill] sm:$0xff] %v10708_v46  ;;  %v10710_v44 = vpop.f32.mrf.mxu1  ;;  %v8336_v46 = vadd.f32 %v10594_v4, %v10590_v2  ;;  %v8364_v2 = vadd.f32 %v10602_v9, %v10598_v7 }
 0x307   : > { %10850 = vst [vmem:[#allocation17_spill] sm:$0xff] %v10710_v44  ;;  %v8386_v44 = vadd.f32 %v10610_v13, %v10606_v11 }
 0x308   : > { %v7086_v11 = vadd.f32 %v8336_v46, %v10573_v55  ;;  %v8367_v55 = vadd.f32 %v10612_v14, %v10608_v12  ;;  %v8395_v12 = vadd.f32 %v10650_v28, %v10646_v27  ;;  %v8526_v27 = vadd.f32 %v10686_v52, %v10684_v50 }
 0x309   : > { %v7176_v42 = vadd.f32 %v8386_v44, %v7127_v62  ;;  %v8501_v28 = vadd.f32 %v10692_v56, %v10688_v53  ;;  %v10856_v53 = vld [vmem:[#allocation7_spill] sm:$0xff]  ;;  %v10857_v56 = vld [vmem:[#allocation8_spill] sm:$0xff] }
 0x30a   : > { %v7135_v44 = vadd.f32 %v8364_v2, %v7086_v11  ;;  %v10858_v2 = vld [vmem:[#allocation9_spill] sm:$0xff] }
 0x30b   : > { %v7225_v15 = vadd.f32 %v8414_v63, %v7176_v42 }
 0x30c   : > { %v7184_v25 = vadd.f32 %v8392_v3, %v7135_v44 }
 0x317   : > { %v8552_v54 = vpop.f32.mrf.mxu0 }
 0x318   : > { %v10714_v45 = vpop.f32.mrf.mxu1 }
 0x319   : > { %10851 = vst [vmem:[#allocation18_spill] sm:$0xff] %v10714_v45  ;;  %v8553_v58 = vpop.f32.mrf.mxu0  ;;  %v7081_v45 = vadd.f32 %v8333_v49, %v10549_v30  ;;  %v8339_v30 = vadd.f32 %v10604_v10, %v10600_v8  ;;  %v8442_v49 = vadd.f32 %v8441_v18, %v8440_v31  ;;  %v8417_v8 = vadd.f32 %v10640_v24, %v10634_v20 }
 0x31a   : > { %v10721_v47 = vpop.f32.mrf.mxu1  ;;  %v8498_v31 = vadd.f32 %v8497_v51, %v8496_v48  ;;  %v8448_v20 = vadd.f32 %v10670_v41, %v10666_v39  ;;  %v10852_v39 = vld [vmem:[#allocation5_spill] sm:$0xff]  ;;  %v10853_v48 = vld [vmem:[#allocation4_spill] sm:$0xff]  ;;  %v10854_v51 = vld [vmem:[#allocation6_spill] sm:$0xff]  ;;  %v8554_v32 = vadd.f32 %v8553_v58, %v8552_v54 }
 0x31b   : > { %v10727_v61 = vpop.f32.mrf.mxu0  ;;  %v7130_v13 = vadd.f32 %v8361_v0, %v7081_v45  ;;  %v7089_v16 = vadd.f32 %v8339_v30, %v10576_v60  ;;  %v7274_v10 = vadd.f32 %v8442_v49, %v7225_v15  ;;  %v8420_v60 = vadd.f32 %v10648_v5, %v10644_v26  ;;  %v10859_v30 = vld [vmem:[#allocation10_spill] sm:$0xff]  ;;  %v10861_v15 = vld [vmem:[#allocation12_spill] sm:$0xff] }
 0x31c   : > { %v10730_v21 = vpop.f32.mrf.mxu1  ;;  %v8473_v26 = vadd.f32 %v10668_v40, %v10664_v38  ;;  %v8476_v41 = vadd.f32 %v10852_v39, %v10672_v43  ;;  %v8451_v59 = vadd.f32 %v10854_v51, %v10853_v48  ;;  %v10855_v38 = vld [vmem:[#allocation11_spill] sm:$0xff] }
 0x31d   : > { %v8556_v4 = vpop.f32.mrf.mxu0  ;;  %v7179_v17 = vadd.f32 %v8389_v1, %v7130_v13  ;;  %v7138_v18 = vadd.f32 %v8367_v55, %v7089_v16  ;;  %v7323_v46 = vadd.f32 %v8470_v19, %v7274_v10  ;;  %v7233_v36 = vadd.f32 %v8420_v60, %v7184_v25  ;;  %v10863_v16 = vld [vmem:[#allocation14_spill] sm:$0xff]  ;;  %v10864_v55 = vld [vmem:[#allocation16_spill] sm:$0xff] }
 0x31e   : > { %v10745_v6 = vpop.f32.mrf.mxu1  ;;  %v8504_v40 = vadd.f32 %v10700_v33, %v10855_v38  ;;  %v8479_v1 = vadd.f32 %v10857_v56, %v10856_v53  ;;  %v8529_v13 = vadd.f32 %v10859_v30, %v10858_v2  ;;  %v8557_v58 = vadd.f32 %v8556_v4, %v10727_v61 }
 0x31f   : > { %v8558_v7 = vpop.f32.mrf.mxu0  ;;  %v7228_v14 = vadd.f32 %v8417_v8, %v7179_v17  ;;  %v7187_v57 = vadd.f32 %v8395_v12, %v7138_v18  ;;  %v7372_v5 = vadd.f32 %v8498_v31, %v7323_v46  ;;  %v7282_v37 = vadd.f32 %v8448_v20, %v7233_v36  ;;  %v10862_v17 = vld [vmem:[#allocation13_spill] sm:$0xff] }
 0x320   : > { %v10750_v9 = vpop.f32.mrf.mxu1  ;;  %v10860_v3 = vld [vmem:[#allocation18_spill] sm:$0xff]  ;;  %v8532_v44 = vadd.f32 %v10862_v17, %v10861_v15  ;;  %v8507_v8 = vadd.f32 %v10864_v55, %v10863_v16  ;;  %v10866_v36 = vld [vmem:[#allocation17_spill] sm:$0xff] }
 0x321   : > { %v8559_v24 = vpop.f32.mrf.mxu0  ;;  %v7277_v34 = vadd.f32 %v8445_v22, %v7228_v14  ;;  %v7236_v0 = vadd.f32 %v8423_v35, %v7187_v57  ;;  %v7421_v42 = vadd.f32 %v8526_v27, %v7372_v5  ;;  %v7331_v52 = vadd.f32 %v8476_v41, %v7282_v37 }
 0x322   : > { %v8587_v45 = vpop.f32.mrf.mxu1  ;;  %v8582_v54 = vadd.f32 %v10721_v47, %v10860_v3  ;;  %v8560_v60 = vadd.f32 %v8559_v24, %v8558_v7  ;;  %v8585_v35 = vadd.f32 %v10745_v6, %v10730_v21 }
 0x323   : > { %v8561_v23 = vpop.f32.mrf.mxu0  ;;  %v7326_v29 = vadd.f32 %v8473_v26, %v7277_v34  ;;  %v7285_v63 = vadd.f32 %v8451_v59, %v7236_v0  ;;  %v7470_v49 = vadd.f32 %v8554_v32, %v7421_v42  ;;  %v7380_v33 = vadd.f32 %v8504_v40, %v7331_v52  ;;  %v10865_v34 = vld [vmem:[#allocation15_spill] sm:$0xff] }
 0x324   : > { %v8589_v62 = vpop.f32.mrf.mxu1  ;;  %v8535_v57 = vadd.f32 %v10866_v36, %v10865_v34  ;;  %v8588_v24 = vadd.f32 %v8587_v45, %v10750_v9 }
 0x325   : > { %v7375_v50 = vadd.f32 %v8501_v28, %v7326_v29  ;;  %v8562_v11 = vpop.f32.mrf.mxu0  ;;  %v7334_v25 = vadd.f32 %v8479_v1, %v7285_v63  ;;  %v7519_v31 = vadd.f32 %v8582_v54, %v7470_v49  ;;  %v7429_v47 = vadd.f32 %v8532_v44, %v7380_v33 }
 0x326   : > { %v8590_v43 = vpop.f32.mrf.mxu1  ;;  %v8563_v39 = vadd.f32 %v8562_v11, %v8561_v23 }
 0x327   : > { %v7424_v22 = vadd.f32 %v8529_v13, %v7375_v50  ;;  %v7383_v61 = vadd.f32 %v8507_v8, %v7334_v25  ;;  %v7478_v7 = vadd.f32 %v8560_v60, %v7429_v47  ;;  %v8591_v45 = vadd.f32 %v8590_v43, %v8589_v62  ;;  %v7653_v47 = vld [vmem:[%s10632_s14] sm:$0x1] }
 0x329   : > { %v7473_v18 = vadd.f32 %v8557_v58, %v7424_v22  ;;  %v7432_v29 = vadd.f32 %v8535_v57, %v7383_v61  ;;  %v7527_v32 = vadd.f32 %v8588_v24, %v7478_v7 }
 0x32b   : > { %v7522_v37 = vadd.f32 %v8585_v35, %v7473_v18  ;;  %v7481_v9 = vadd.f32 %v8563_v39, %v7432_v29 }
 0x32d   : > { %v7530_v30 = vadd.f32 %v8591_v45, %v7481_v9 }
 0x340   : > { %v8608_v10 = vpop.f32.mrf.mxu0 }
 0x342   : > { %v8609_v12 = vpop.f32.mrf.mxu0 }
 0x343   : > { %v8610_v20 = vadd.f32 %v8609_v12, %v8608_v10 }
 0x344   : > { %v8636_v19 = vpop.f32.mrf.mxu1  ;;  %v8611_v4 = vpop.f32.mrf.mxu0 }
 0x345   : > { %v7568_v26 = vadd.f32 %v8610_v20, %v7519_v31  ;;  %v7641_v31 = vld [vmem:[%s10627_s11] sm:$0x1] }
 0x346   : > { %v8637_v14 = vpop.f32.mrf.mxu1  ;;  %v8612_v27 = vpop.f32.mrf.mxu0 }
 0x347   : > { %v8638_v5 = vadd.f32 %v8637_v14, %v8636_v19  ;;  %v8613_v48 = vadd.f32 %v8612_v27, %v8611_v4 }
 0x348   : > { %v8639_v46 = vpop.f32.mrf.mxu1  ;;  %v8614_v51 = vpop.f32.mrf.mxu0 }
 0x349   : > { %v7617_v41 = vadd.f32 %v8638_v5, %v7568_v26  ;;  %v7571_v21 = vadd.f32 %v8613_v48, %v7522_v37 }
 0x34a   : > { %v8640_v28 = vpop.f32.mrf.mxu1  ;;  %v8615_v0 = vpop.f32.mrf.mxu0 }
 0x34b   : > { %7631 = vst [vmem:[%s10796_s15] sm:$0xff] %v7617_v41  ;;  %v8641_v6 = vadd.f32 %v8640_v28, %v8639_v46  ;;  %v8616_v23 = vadd.f32 %v8615_v0, %v8614_v51  ;;  %v7654_v42 = vmul.f32 %v7617_v41, %v7617_v41 }
 0x34c   : > { %v8642_v59 = vpop.f32.mrf.mxu1  ;;  %v8617_v50 = vpop.f32.mrf.mxu0 }
 0x34d   : > { %v7620_v40 = vadd.f32 %v8641_v6, %v7571_v21  ;;  %v7576_v56 = vadd.f32 %v8616_v23, %v7527_v32 }
 0x34e   : > { %v8643_v38 = vpop.f32.mrf.mxu1  ;;  %v8618_v11 = vpop.f32.mrf.mxu0 }
 0x34f   : > { %7632 = vst [vmem:[%s10796_s15 + $0x8] sm:$0xff] %v7620_v40  ;;  %v7642_v63 = vadd.f32 %v7620_v40, %v7617_v41  ;;  %v7655_v53 = vmul.f32 %v7620_v40, %v7620_v40  ;;  %v8644_v1 = vadd.f32 %v8643_v38, %v8642_v59  ;;  %v8619_v3 = vadd.f32 %v8618_v11, %v8617_v50 }
 0x350   : > { %v8645_v52 = vpop.f32.mrf.mxu1 }
 0x351   : > { %v7658_v13 = vadd.f32 %v7655_v53, %v7654_v42  ;;  %v7625_v49 = vadd.f32 %v8644_v1, %v7576_v56  ;;  %v7579_v54 = vadd.f32 %v8619_v3, %v7530_v30 }
 0x352   : > { %v8646_v2 = vpop.f32.mrf.mxu1  ;;  %v7721_v34 = vld [vmem:[%s10796_s15] sm:$0xff] (%p9046_p6) }
 0x353   : > { %7633 = vst [vmem:[%s10796_s15 + $0x10] sm:$0xff] %v7625_v49  ;;  %v7643_v62 = vadd.f32 %v7642_v63, %v7625_v49  ;;  %v7656_v43 = vmul.f32 %v7625_v49, %v7625_v49  ;;  %v8647_v58 = vadd.f32 %v8646_v2, %v8645_v52  ;;  %7722 = vst [vmem:[%s7686_s26] sm:$0xff] (%p9046_p6), %v7721_v34 }
 0x355   : > { %v7659_v33 = vadd.f32 %v7658_v13, %v7656_v43  ;;  %v7628_v15 = vadd.f32 %v8647_v58, %v7579_v54 }
 0x356   : > { %v7723_v36 = vld [vmem:[%s10796_s15 + $0x8] sm:$0xff] (%p9046_p6) }
 0x357   : > { %7634 = vst [vmem:[%s10796_s15 + $0x18] sm:$0xff] %v7628_v15  ;;  %v7644_v17 = vadd.f32 %v7643_v62, %v7628_v15  ;;  %v7657_v44 = vmul.f32 %v7628_v15, %v7628_v15  ;;  %7724 = vst [vmem:[%s7686_s26 + $0x20] sm:$0xff] (%p9046_p6), %v7723_v36 }
 0x359   : > { %v7645_v16 = vrot.slane %v7644_v17, 4  ;;  %v7660_v55 = vadd.f32 %v7659_v33, %v7657_v44 }
 0x35a   : > { %v7725_v57 = vld [vmem:[%s10796_s15 + $0x10] sm:$0xff] (%p9046_p6) }
 0x35b   : > { %v7646_v8 = vadd.f32 %v7645_v16, %v7644_v17  ;;  %v7661_v10 = vrot.slane %v7660_v55, 4  ;;  %7726 = vst [vmem:[%s7686_s26 + $0x40] sm:$0xff] (%p9046_p6), %v7725_v57 }
 0x35d   : > { %v7647_v19 = vrot.slane %v7646_v8, 2  ;;  %v7662_v22 = vadd.f32 %v7661_v10, %v7660_v55 }
 0x35e   : > { %v7727_v35 = vld [vmem:[%s10796_s15 + $0x18] sm:$0xff] (%p9046_p6) }
 0x35f   : > { %v7648_v25 = vadd.f32 %v7647_v19, %v7646_v8  ;;  %v7663_v60 = vrot.slane %v7662_v22, 2  ;;  %7728 = vst [vmem:[%s7686_s26 + $0x60] sm:$0xff] (%p9046_p6), %v7727_v35 }
 0x361   : > { %v7649_v12 = vrot.slane %v7648_v25, 1  ;;  %v7664_v14 = vadd.f32 %v7663_v60, %v7662_v22 }
 0x363   : > { %v7650_v18 = vadd.f32 %v7649_v12, %v7648_v25  ;;  %v7665_v20 = vrot.slane %v7664_v14, 1 }
 0x365   : > { %v7651_v61 = vadd.f32 %v7650_v18, %v7641_v31  ;;  %v7666_v4 = vadd.f32 %v7665_v20, %v7664_v14  ;;  %7681 = sbr.rel (!%p9046_p6) target bundleno = 874 (0x36a), region = 88 }
 0x367   : > { %7652 = vst [vmem:[%s10627_s11] sm:$0x1] %v7651_v61  ;;  %v7667_v46 = vadd.f32 %v7666_v4, %v7653_v47 }
 0x369   : > { %7668 = vst [vmem:[%s10632_s14] sm:$0x1] %v7667_v46 }
 0x36a PF: > { %s15_s19 = sadd.s32 1, %s8983_s19   ;;  %s10867_s15 = smov %s8971_s16 }
 0x36b   : > { %p12_p12 = scmp.ge.s32.totalorder %s15_s19, 6   ;;  %s10868_s16 = smov %s9051_s25 }
 0x36c   : > { %s10869_s17 = smov %s8979_s18  ;;  %s10870_s18 = smov %s10872_s20 }
 0x36d   :  { %14 = sbr.rel (!%p12_p12) target bundleno = 3 (0x3), region = 188 }

</bundles_post_ra>
